<compile_context>
chip_gen: v6e
topology: v6e:2x2x1
jax: 0.10.0
libtpu: 0.0.40
codegen_flags: <defaults>
</compile_context>

<pallas_src>
import numpy as np
import jax
import jax.numpy as jnp
from jax.experimental import pallas as pl
from jax.experimental.pallas import tpu as pltpu


# ---------------------------------------------------------------------------
# Constant 0/1 selection matrices: tsel[d, t2, q, p] == 1 iff conv2 tap
# d=(kh,kw) at pool2-tap t2=(dh,dw), pool2-position q=(qh,qw) reads pooled-1
# row p = ih*14+iw  (zero rows implement the conv2 zero padding).
# ---------------------------------------------------------------------------
def _build_pool2_selectors():
    t = np.zeros((9, 4, 49, 196), np.float32)
    for d in range(9):
        kh, kw = d // 3, d % 3
        for t2 in range(4):
            dh, dw = t2 // 2, t2 % 2
            for q in range(49):
                qh, qw = q // 7, q % 7
                ih, iw = 2 * qh + dh + kh - 1, 2 * qw + dw + kw - 1
                if 0 <= ih < 14 and 0 <= iw < 14:
                    t[d, t2, q, ih * 14 + iw] = 1.0
    return t


_TSEL_NP = _build_pool2_selectors()   # (9, 4, 49, 196), ~1.4 MB, VMEM resident


# ---------------------------------------------------------------------------
# Pallas kernels
# ---------------------------------------------------------------------------
def _conv_stage_kernel(p1_ref, w1_ref, b1_ref, tsel_ref, w2_ref, b2_ref, o_ref):
    # p1_ref : (1, 4, 196, 9)   conv1 patches, grouped by pool1 tap
    # w1_ref : (9, 32)          conv1 weights (kh,kw,cin=1 -> cout)
    # b1_ref : (1, 32)
    # tsel   : (9, 4, 49, 196)  conv2 shift/pad selection (constants)
    # w2_ref : (9, 32, 64)      conv2 weights per tap
    # b2_ref : (1, 64)
    # o_ref  : (1, 49, 64)      pooled conv2 output (q = qh*7+qw, channel)
    w1 = w1_ref[...]

    # conv1 (per pool tap) -> max over taps -> +bias -> ReLU   == pool(relu(conv1))
    m = jnp.dot(p1_ref[0, 0], w1, preferred_element_type=jnp.float32)
    for t in range(1, 4):
        m = jnp.maximum(m, jnp.dot(p1_ref[0, t], w1,
                                   preferred_element_type=jnp.float32))
    pooled1 = jnp.maximum(m + b1_ref[...], 0.0)                      # (196, 32)

    # conv2: 9 taps.  y_d = pooled1 @ W2_d, then constant selection matmuls
    # shift/zero-pad the rows and group them by pool2 tap — all in VMEM.
    accs = [jnp.zeros((49, 64), jnp.float32) for _ in range(4)]
    for d in range(9):
        y_d = jnp.dot(pooled1, w2_ref[d], preferred_element_type=jnp.float32)  # (196,64)
        for t2 in range(4):
            accs[t2] = accs[t2] + jnp.dot(tsel_ref[d, t2], y_d,
                                          preferred_element_type=jnp.float32)
    m2 = jnp.maximum(jnp.maximum(accs[0], accs[1]),
                     jnp.maximum(accs[2], accs[3]))
    o_ref[0] = jnp.maximum(m2 + b2_ref[...], 0.0)                    # (49, 64)


def _mlp_kernel(x_ref, w1_ref, b1_ref, w2_ref, b2_ref, o_ref):
    # x_ref: (1, 1, 3136), w1: (3136, 128), w2: (128, 10)
    h = jnp.dot(x_ref[0], w1_ref[...], preferred_element_type=jnp.float32)
    h = jnp.maximum(h + b1_ref[...], 0.0)
    o = jnp.dot(h, w2_ref[...], preferred_element_type=jnp.float32)
    o_ref[0] = o + b2_ref[...]


# ---------------------------------------------------------------------------
# Wrappers
# ---------------------------------------------------------------------------
def conv_stage(x_nchw, conv1_w, conv1_b, conv2_w, conv2_b):
    """Fused conv1+ReLU+pool1+conv2+ReLU+pool2.  Returns (B, 49, 64)."""
    B = x_nchw.shape[0]
    xi = x_nchw[:, 0]                                     # (B, 28, 28), Cin=1
    xp = jnp.pad(xi, ((0, 0), (1, 1), (1, 1)))            # (B, 30, 30)

    # conv1 im2col on the tiny input (9 taps), rows grouped by pool1 tap.
    cols = [xp[:, kh:kh + 28, kw:kw + 28] for kh in range(3) for kw in range(3)]
    s = jnp.stack(cols, axis=-1)                          # (B, 28, 28, 9)
    p1 = (s.reshape(B, 14, 2, 14, 2, 9)
           .transpose(0, 2, 4, 1, 3, 5)
           .reshape(B, 4, 196, 9))                        # [b, pool-tap, ph*14+pw, d]

    # Trace-time weight reshapes (match (kh, kw, cin) patch ordering).
    w1 = jnp.transpose(conv1_w, (2, 3, 1, 0)).reshape(9, 32)
    w2 = jnp.transpose(conv2_w, (2, 3, 1, 0)).reshape(9, 32, 64)
    b1 = conv1_b.reshape(1, 32)
    b2 = conv2_b.reshape(1, 64)
    tsel = jnp.asarray(_TSEL_NP)

    return pl.pallas_call(
        _conv_stage_kernel,
        out_shape=jax.ShapeDtypeStruct((B, 49, 64), jnp.float32),
        grid=(B,),
        in_specs=[
            pl.BlockSpec((1, 4, 196, 9), lambda b: (b, 0, 0, 0)),
            pl.BlockSpec((9, 32), lambda b: (0, 0)),
            pl.BlockSpec((1, 32), lambda b: (0, 0)),
            pl.BlockSpec((9, 4, 49, 196), lambda b: (0, 0, 0, 0)),
            pl.BlockSpec((9, 32, 64), lambda b: (0, 0, 0)),
            pl.BlockSpec((1, 64), lambda b: (0, 0)),
        ],
        out_specs=pl.BlockSpec((1, 49, 64), lambda b: (b, 0, 0)),
        compiler_params=pltpu.CompilerParams(dimension_semantics=("parallel",)),
    )(p1, w1, b1, tsel, w2, b2)


def mlp(x_flat, fc1_w, fc1_b, fc2_w, fc2_b):
    """fc1 + ReLU + fc2.  x_flat is (B, 3136) in (spatial q, channel c) order."""
    B = x_flat.shape[0]
    # Permute fc1 weight columns at trace time so NO activation transpose is
    # needed: PyTorch flatten index c*49+q  ->  our index q*64+c.
    w1p = jnp.transpose(fc1_w.reshape(128, 64, 49), (2, 1, 0)).reshape(3136, 128)
    w2 = fc2_w.T                                          # (128, 10)
    x3 = x_flat.reshape(B, 1, 3136)

    out = pl.pallas_call(
        _mlp_kernel,
        out_shape=jax.ShapeDtypeStruct((B, 1, 10), jnp.float32),
        grid=(B,),
        in_specs=[
            pl.BlockSpec((1, 1, 3136), lambda b: (b, 0, 0)),
            pl.BlockSpec((3136, 128), lambda b: (0, 0)),
            pl.BlockSpec((1, 128), lambda b: (0, 0)),
            pl.BlockSpec((128, 10), lambda b: (0, 0)),
            pl.BlockSpec((1, 10), lambda b: (0, 0)),
        ],
        out_specs=pl.BlockSpec((1, 1, 10), lambda b: (b, 0, 0)),
        compiler_params=pltpu.CompilerParams(dimension_semantics=("parallel",)),
    )(x3, w1p, fc1_b.reshape(1, 128), w2, fc2_b.reshape(1, 10))
    return out.reshape(B, 10)


def cnn_forward(x_nchw, p):
    B = x_nchw.shape[0]
    pooled2 = conv_stage(x_nchw, p["conv1_w"], p["conv1_b"],
                         p["conv2_w"], p["conv2_b"])      # (B, 49, 64)
    x_flat = pooled2.reshape(B, 49 * 64)                  # free bitcast reshape
    return mlp(x_flat, p["fc1_w"], p["fc1_b"], p["fc2_w"], p["fc2_b"])


# ---------------------------------------------------------------------------
# Pure-JAX reference for numerical verification
# ---------------------------------------------------------------------------
def reference_forward(x_nchw, p):
    def conv(x, w, b):
        dn = jax.lax.conv_dimension_numbers(x.shape, w.shape, ("NCHW", "OIHW", "NCHW"))
        y = jax.lax.conv_general_dilated(x, w, (1, 1), ((1, 1), (1, 1)),
                                         dimension_numbers=dn)
        return jax.nn.relu(y + b[None, :, None, None])

    def pool(x):
        return jax.lax.reduce_window(x, -jnp.inf, jax.lax.max,
                                     (1, 1, 2, 2), (1, 1, 2, 2), "VALID")

    x = pool(conv(x_nchw, p["conv1_w"], p["conv1_b"]))
    x = pool(conv(x, p["conv2_w"], p["conv2_b"]))
    x = x.reshape(x.shape[0], -1)
    x = jax.nn.relu(x @ p["fc1_w"].T + p["fc1_b"])
    return x @ p["fc2_w"].T + p["fc2_b"]


# ---------------------------------------------------------------------------
def init_params(key):
    def uinit(k, shape, fan_in):
        bound = 1.0 / jnp.sqrt(fan_in)
        return jax.random.uniform(k, shape, jnp.float32, -bound, bound)

    ks = jax.random.split(key, 8)
    return {
        "conv1_w": uinit(ks[0], (32, 1, 3, 3), 1 * 3 * 3),
        "conv1_b": uinit(ks[1], (32,), 1 * 3 * 3),
        "conv2_w": uinit(ks[2], (64, 32, 3, 3), 32 * 3 * 3),
        "conv2_b": uinit(ks[3], (64,), 32 * 3 * 3),
        "fc1_w": uinit(ks[4], (128, 64 * 7 * 7), 64 * 7 * 7),
        "fc1_b": uinit(ks[5], (128,), 64 * 7 * 7),
        "fc2_w": uinit(ks[6], (10, 128), 128),
        "fc2_b": uinit(ks[7], (10,), 128),
    }


if __name__ == "__main__":
    key = jax.random.PRNGKey(0)
    k_x, k_p = jax.random.split(key)
    # fc1 = Linear(64*7*7, 128) implies 28x28 single-channel inputs (MNIST-style).
    x = jax.random.normal(k_x, (2, 1, 28, 28), jnp.float32)
    params = init_params(k_p)

    out = jax.block_until_ready(jax.jit(cnn_forward)(x, params))
    assert out.shape == (2, 10), out.shape

    ref = jax.block_until_ready(reference_forward(x, params))
    assert jnp.allclose(out, ref, rtol=1e-4, atol=1e-4), (
        float(jnp.max(jnp.abs(out - ref))))

    print("KERNEL_OK")
</pallas_src>

<mosaic_0001>
module attributes {stable_mosaic.version = 11 : i64} {
  func.func @_conv_stage_kernel(%arg0: i32, %arg1: memref<1x4x196x9xf32, #tpu.memory_space<vmem>>, %arg2: memref<9x32xf32, #tpu.memory_space<vmem>>, %arg3: memref<1x32xf32, #tpu.memory_space<vmem>>, %arg4: memref<9x4x49x196xf32, #tpu.memory_space<vmem>>, %arg5: memref<9x32x64xf32, #tpu.memory_space<vmem>>, %arg6: memref<1x64xf32, #tpu.memory_space<vmem>>, %arg7: memref<1x49x64xf32, #tpu.memory_space<vmem>>) attributes {dimension_semantics = [#tpu.dimension_semantics<parallel>], iteration_bounds = array<i64: 2>, scalar_prefetch = 0 : i64, scratch_operands = 0 : i64, tpu.core_type = #tpu.core_type<tc>, window_params = [{transform_indices = @transform_0, window_bounds = array<i64: 1, 4, 196, 9>}, {pipeline_mode = #tpu.pipeline_mode<synchronous>, transform_indices = @transform_1, window_bounds = array<i64: 9, 32>}, {pipeline_mode = #tpu.pipeline_mode<synchronous>, transform_indices = @transform_2, window_bounds = array<i64: 1, 32>}, {pipeline_mode = #tpu.pipeline_mode<synchronous>, transform_indices = @transform_3, window_bounds = array<i64: 9, 4, 49, 196>}, {pipeline_mode = #tpu.pipeline_mode<synchronous>, transform_indices = @transform_4, window_bounds = array<i64: 9, 32, 64>}, {pipeline_mode = #tpu.pipeline_mode<synchronous>, transform_indices = @transform_5, window_bounds = array<i64: 1, 64>}, {transform_indices = @transform_6, window_bounds = array<i64: 1, 49, 64>}]} {
    %c0 = arith.constant 0 : index
    %c0_0 = arith.constant 0 : index
    %0 = vector.load %arg2[%c0, %c0_0] : memref<9x32xf32, #tpu.memory_space<vmem>>, vector<9x32xf32>
    %c0_1 = arith.constant 0 : index
    %c0_2 = arith.constant 0 : index
    %c0_3 = arith.constant 0 : index
    %c0_4 = arith.constant 0 : index
    %1 = vector.load %arg1[%c0_1, %c0_2, %c0_3, %c0_4] : memref<1x4x196x9xf32, #tpu.memory_space<vmem>>, vector<1x1x196x9xf32>
    %2 = vector.shape_cast %1 : vector<1x1x196x9xf32> to vector<196x9xf32>
    %cst = arith.constant dense<0.000000e+00> : vector<196x32xf32>
    %3 = tpu.matmul %2, %0, %cst {dimension_numbers = #tpu.dot_dimension_numbers<[1], [0], [0], [1], [0, 0, 1, 1], [], []>} : vector<196x9xf32>, vector<9x32xf32>, vector<196x32xf32> -> vector<196x32xf32>
    %c0_5 = arith.constant 0 : index
    %c1 = arith.constant 1 : index
    %c0_6 = arith.constant 0 : index
    %c0_7 = arith.constant 0 : index
    %4 = vector.load %arg1[%c0_5, %c1, %c0_6, %c0_7] : memref<1x4x196x9xf32, #tpu.memory_space<vmem>>, vector<1x1x196x9xf32>
    %5 = vector.shape_cast %4 : vector<1x1x196x9xf32> to vector<196x9xf32>
    %cst_8 = arith.constant dense<0.000000e+00> : vector<196x32xf32>
    %6 = tpu.matmul %5, %0, %cst_8 {dimension_numbers = #tpu.dot_dimension_numbers<[1], [0], [0], [1], [0, 0, 1, 1], [], []>} : vector<196x9xf32>, vector<9x32xf32>, vector<196x32xf32> -> vector<196x32xf32>
    %7 = arith.maximumf %3, %6 : vector<196x32xf32>
    %c0_9 = arith.constant 0 : index
    %c2 = arith.constant 2 : index
    %c0_10 = arith.constant 0 : index
    %c0_11 = arith.constant 0 : index
    %8 = vector.load %arg1[%c0_9, %c2, %c0_10, %c0_11] : memref<1x4x196x9xf32, #tpu.memory_space<vmem>>, vector<1x1x196x9xf32>
    %9 = vector.shape_cast %8 : vector<1x1x196x9xf32> to vector<196x9xf32>
    %cst_12 = arith.constant dense<0.000000e+00> : vector<196x32xf32>
    %10 = tpu.matmul %9, %0, %cst_12 {dimension_numbers = #tpu.dot_dimension_numbers<[1], [0], [0], [1], [0, 0, 1, 1], [], []>} : vector<196x9xf32>, vector<9x32xf32>, vector<196x32xf32> -> vector<196x32xf32>
    %11 = arith.maximumf %7, %10 : vector<196x32xf32>
    %c0_13 = arith.constant 0 : index
    %c3 = arith.constant 3 : index
    %c0_14 = arith.constant 0 : index
    %c0_15 = arith.constant 0 : index
    %12 = vector.load %arg1[%c0_13, %c3, %c0_14, %c0_15] : memref<1x4x196x9xf32, #tpu.memory_space<vmem>>, vector<1x1x196x9xf32>
    %13 = vector.shape_cast %12 : vector<1x1x196x9xf32> to vector<196x9xf32>
    %cst_16 = arith.constant dense<0.000000e+00> : vector<196x32xf32>
    %14 = tpu.matmul %13, %0, %cst_16 {dimension_numbers = #tpu.dot_dimension_numbers<[1], [0], [0], [1], [0, 0, 1, 1], [], []>} : vector<196x9xf32>, vector<9x32xf32>, vector<196x32xf32> -> vector<196x32xf32>
    %15 = arith.maximumf %11, %14 : vector<196x32xf32>
    %c0_17 = arith.constant 0 : index
    %c0_18 = arith.constant 0 : index
    %16 = vector.load %arg3[%c0_17, %c0_18] : memref<1x32xf32, #tpu.memory_space<vmem>>, vector<1x32xf32>
    %17 = vector.broadcast %16 : vector<1x32xf32> to vector<196x32xf32>
    %18 = arith.addf %15, %17 : vector<196x32xf32>
    %cst_19 = arith.constant 0.000000e+00 : f32
    %19 = vector.broadcast %cst_19 : f32 to vector<196x32xf32>
    %20 = arith.maximumf %18, %19 : vector<196x32xf32>
    %cst_20 = arith.constant 0.000000e+00 : f32
    %21 = vector.broadcast %cst_20 : f32 to vector<49x64xf32>
    %cst_21 = arith.constant 0.000000e+00 : f32
    %22 = vector.broadcast %cst_21 : f32 to vector<49x64xf32>
    %cst_22 = arith.constant 0.000000e+00 : f32
    %23 = vector.broadcast %cst_22 : f32 to vector<49x64xf32>
    %cst_23 = arith.constant 0.000000e+00 : f32
    %24 = vector.broadcast %cst_23 : f32 to vector<49x64xf32>
    %c0_24 = arith.constant 0 : index
    %c0_25 = arith.constant 0 : index
    %c0_26 = arith.constant 0 : index
    %25 = vector.load %arg5[%c0_24, %c0_25, %c0_26] : memref<9x32x64xf32, #tpu.memory_space<vmem>>, vector<1x32x64xf32>
    %26 = vector.shape_cast %25 : vector<1x32x64xf32> to vector<32x64xf32>
    %cst_27 = arith.constant dense<0.000000e+00> : vector<196x64xf32>
    %27 = tpu.matmul %20, %26, %cst_27 {dimension_numbers = #tpu.dot_dimension_numbers<[1], [0], [0], [1], [0, 0, 1, 1], [], []>} : vector<196x32xf32>, vector<32x64xf32>, vector<196x64xf32> -> vector<196x64xf32>
    %c0_28 = arith.constant 0 : index
    %c0_29 = arith.constant 0 : index
    %c0_30 = arith.constant 0 : index
    %c0_31 = arith.constant 0 : index
    %28 = vector.load %arg4[%c0_28, %c0_29, %c0_30, %c0_31] : memref<9x4x49x196xf32, #tpu.memory_space<vmem>>, vector<1x1x49x196xf32>
    %29 = vector.shape_cast %28 : vector<1x1x49x196xf32> to vector<49x196xf32>
    %cst_32 = arith.constant dense<0.000000e+00> : vector<49x64xf32>
    %30 = tpu.matmul %29, %27, %cst_32 {dimension_numbers = #tpu.dot_dimension_numbers<[1], [0], [0], [1], [0, 0, 1, 1], [], []>} : vector<49x196xf32>, vector<196x64xf32>, vector<49x64xf32> -> vector<49x64xf32>
    %31 = arith.addf %21, %30 : vector<49x64xf32>
    %c0_33 = arith.constant 0 : index
    %c1_34 = arith.constant 1 : index
    %c0_35 = arith.constant 0 : index
    %c0_36 = arith.constant 0 : index
    %32 = vector.load %arg4[%c0_33, %c1_34, %c0_35, %c0_36] : memref<9x4x49x196xf32, #tpu.memory_space<vmem>>, vector<1x1x49x196xf32>
    %33 = vector.shape_cast %32 : vector<1x1x49x196xf32> to vector<49x196xf32>
    %cst_37 = arith.constant dense<0.000000e+00> : vector<49x64xf32>
    %34 = tpu.matmul %33, %27, %cst_37 {dimension_numbers = #tpu.dot_dimension_numbers<[1], [0], [0], [1], [0, 0, 1, 1], [], []>} : vector<49x196xf32>, vector<196x64xf32>, vector<49x64xf32> -> vector<49x64xf32>
    %35 = arith.addf %22, %34 : vector<49x64xf32>
    %c0_38 = arith.constant 0 : index
    %c2_39 = arith.constant 2 : index
    %c0_40 = arith.constant 0 : index
    %c0_41 = arith.constant 0 : index
    %36 = vector.load %arg4[%c0_38, %c2_39, %c0_40, %c0_41] : memref<9x4x49x196xf32, #tpu.memory_space<vmem>>, vector<1x1x49x196xf32>
    %37 = vector.shape_cast %36 : vector<1x1x49x196xf32> to vector<49x196xf32>
    %cst_42 = arith.constant dense<0.000000e+00> : vector<49x64xf32>
    %38 = tpu.matmul %37, %27, %cst_42 {dimension_numbers = #tpu.dot_dimension_numbers<[1], [0], [0], [1], [0, 0, 1, 1], [], []>} : vector<49x196xf32>, vector<196x64xf32>, vector<49x64xf32> -> vector<49x64xf32>
    %39 = arith.addf %23, %38 : vector<49x64xf32>
    %c0_43 = arith.constant 0 : index
    %c3_44 = arith.constant 3 : index
    %c0_45 = arith.constant 0 : index
    %c0_46 = arith.constant 0 : index
    %40 = vector.load %arg4[%c0_43, %c3_44, %c0_45, %c0_46] : memref<9x4x49x196xf32, #tpu.memory_space<vmem>>, vector<1x1x49x196xf32>
    %41 = vector.shape_cast %40 : vector<1x1x49x196xf32> to vector<49x196xf32>
    %cst_47 = arith.constant dense<0.000000e+00> : vector<49x64xf32>
    %42 = tpu.matmul %41, %27, %cst_47 {dimension_numbers = #tpu.dot_dimension_numbers<[1], [0], [0], [1], [0, 0, 1, 1], [], []>} : vector<49x196xf32>, vector<196x64xf32>, vector<49x64xf32> -> vector<49x64xf32>
    %43 = arith.addf %24, %42 : vector<49x64xf32>
    %c1_48 = arith.constant 1 : index
    %c0_49 = arith.constant 0 : index
    %c0_50 = arith.constant 0 : index
    %44 = vector.load %arg5[%c1_48, %c0_49, %c0_50] : memref<9x32x64xf32, #tpu.memory_space<vmem>>, vector<1x32x64xf32>
    %45 = vector.shape_cast %44 : vector<1x32x64xf32> to vector<32x64xf32>
    %cst_51 = arith.constant dense<0.000000e+00> : vector<196x64xf32>
    %46 = tpu.matmul %20, %45, %cst_51 {dimension_numbers = #tpu.dot_dimension_numbers<[1], [0], [0], [1], [0, 0, 1, 1], [], []>} : vector<196x32xf32>, vector<32x64xf32>, vector<196x64xf32> -> vector<196x64xf32>
    %c1_52 = arith.constant 1 : index
    %c0_53 = arith.constant 0 : index
    %c0_54 = arith.constant 0 : index
    %c0_55 = arith.constant 0 : index
    %47 = vector.load %arg4[%c1_52, %c0_53, %c0_54, %c0_55] : memref<9x4x49x196xf32, #tpu.memory_space<vmem>>, vector<1x1x49x196xf32>
    %48 = vector.shape_cast %47 : vector<1x1x49x196xf32> to vector<49x196xf32>
    %cst_56 = arith.constant dense<0.000000e+00> : vector<49x64xf32>
    %49 = tpu.matmul %48, %46, %cst_56 {dimension_numbers = #tpu.dot_dimension_numbers<[1], [0], [0], [1], [0, 0, 1, 1], [], []>} : vector<49x196xf32>, vector<196x64xf32>, vector<49x64xf32> -> vector<49x64xf32>
    %50 = arith.addf %31, %49 : vector<49x64xf32>
    %c1_57 = arith.constant 1 : index
    %c1_58 = arith.constant 1 : index
    %c0_59 = arith.constant 0 : index
    %c0_60 = arith.constant 0 : index
    %51 = vector.load %arg4[%c1_57, %c1_58, %c0_59, %c0_60] : memref<9x4x49x196xf32, #tpu.memory_space<vmem>>, vector<1x1x49x196xf32>
    %52 = vector.shape_cast %51 : vector<1x1x49x196xf32> to vector<49x196xf32>
    %cst_61 = arith.constant dense<0.000000e+00> : vector<49x64xf32>
    %53 = tpu.matmul %52, %46, %cst_61 {dimension_numbers = #tpu.dot_dimension_numbers<[1], [0], [0], [1], [0, 0, 1, 1], [], []>} : vector<49x196xf32>, vector<196x64xf32>, vector<49x64xf32> -> vector<49x64xf32>
    %54 = arith.addf %35, %53 : vector<49x64xf32>
    %c1_62 = arith.constant 1 : index
    %c2_63 = arith.constant 2 : index
    %c0_64 = arith.constant 0 : index
    %c0_65 = arith.constant 0 : index
    %55 = vector.load %arg4[%c1_62, %c2_63, %c0_64, %c0_65] : memref<9x4x49x196xf32, #tpu.memory_space<vmem>>, vector<1x1x49x196xf32>
    %56 = vector.shape_cast %55 : vector<1x1x49x196xf32> to vector<49x196xf32>
    %cst_66 = arith.constant dense<0.000000e+00> : vector<49x64xf32>
    %57 = tpu.matmul %56, %46, %cst_66 {dimension_numbers = #tpu.dot_dimension_numbers<[1], [0], [0], [1], [0, 0, 1, 1], [], []>} : vector<49x196xf32>, vector<196x64xf32>, vector<49x64xf32> -> vector<49x64xf32>
    %58 = arith.addf %39, %57 : vector<49x64xf32>
    %c1_67 = arith.constant 1 : index
    %c3_68 = arith.constant 3 : index
    %c0_69 = arith.constant 0 : index
    %c0_70 = arith.constant 0 : index
    %59 = vector.load %arg4[%c1_67, %c3_68, %c0_69, %c0_70] : memref<9x4x49x196xf32, #tpu.memory_space<vmem>>, vector<1x1x49x196xf32>
    %60 = vector.shape_cast %59 : vector<1x1x49x196xf32> to vector<49x196xf32>
    %cst_71 = arith.constant dense<0.000000e+00> : vector<49x64xf32>
    %61 = tpu.matmul %60, %46, %cst_71 {dimension_numbers = #tpu.dot_dimension_numbers<[1], [0], [0], [1], [0, 0, 1, 1], [], []>} : vector<49x196xf32>, vector<196x64xf32>, vector<49x64xf32> -> vector<49x64xf32>
    %62 = arith.addf %43, %61 : vector<49x64xf32>
    %c2_72 = arith.constant 2 : index
    %c0_73 = arith.constant 0 : index
    %c0_74 = arith.constant 0 : index
    %63 = vector.load %arg5[%c2_72, %c0_73, %c0_74] : memref<9x32x64xf32, #tpu.memory_space<vmem>>, vector<1x32x64xf32>
    %64 = vector.shape_cast %63 : vector<1x32x64xf32> to vector<32x64xf32>
    %cst_75 = arith.constant dense<0.000000e+00> : vector<196x64xf32>
    %65 = tpu.matmul %20, %64, %cst_75 {dimension_numbers = #tpu.dot_dimension_numbers<[1], [0], [0], [1], [0, 0, 1, 1], [], []>} : vector<196x32xf32>, vector<32x64xf32>, vector<196x64xf32> -> vector<196x64xf32>
    %c2_76 = arith.constant 2 : index
    %c0_77 = arith.constant 0 : index
    %c0_78 = arith.constant 0 : index
    %c0_79 = arith.constant 0 : index
    %66 = vector.load %arg4[%c2_76, %c0_77, %c0_78, %c0_79] : memref<9x4x49x196xf32, #tpu.memory_space<vmem>>, vector<1x1x49x196xf32>
    %67 = vector.shape_cast %66 : vector<1x1x49x196xf32> to vector<49x196xf32>
    %cst_80 = arith.constant dense<0.000000e+00> : vector<49x64xf32>
    %68 = tpu.matmul %67, %65, %cst_80 {dimension_numbers = #tpu.dot_dimension_numbers<[1], [0], [0], [1], [0, 0, 1, 1], [], []>} : vector<49x196xf32>, vector<196x64xf32>, vector<49x64xf32> -> vector<49x64xf32>
    %69 = arith.addf %50, %68 : vector<49x64xf32>
    %c2_81 = arith.constant 2 : index
    %c1_82 = arith.constant 1 : index
    %c0_83 = arith.constant 0 : index
    %c0_84 = arith.constant 0 : index
    %70 = vector.load %arg4[%c2_81, %c1_82, %c0_83, %c0_84] : memref<9x4x49x196xf32, #tpu.memory_space<vmem>>, vector<1x1x49x196xf32>
    %71 = vector.shape_cast %70 : vector<1x1x49x196xf32> to vector<49x196xf32>
    %cst_85 = arith.constant dense<0.000000e+00> : vector<49x64xf32>
    %72 = tpu.matmul %71, %65, %cst_85 {dimension_numbers = #tpu.dot_dimension_numbers<[1], [0], [0], [1], [0, 0, 1, 1], [], []>} : vector<49x196xf32>, vector<196x64xf32>, vector<49x64xf32> -> vector<49x64xf32>
    %73 = arith.addf %54, %72 : vector<49x64xf32>
    %c2_86 = arith.constant 2 : index
    %c2_87 = arith.constant 2 : index
    %c0_88 = arith.constant 0 : index
    %c0_89 = arith.constant 0 : index
    %74 = vector.load %arg4[%c2_86, %c2_87, %c0_88, %c0_89] : memref<9x4x49x196xf32, #tpu.memory_space<vmem>>, vector<1x1x49x196xf32>
    %75 = vector.shape_cast %74 : vector<1x1x49x196xf32> to vector<49x196xf32>
    %cst_90 = arith.constant dense<0.000000e+00> : vector<49x64xf32>
    %76 = tpu.matmul %75, %65, %cst_90 {dimension_numbers = #tpu.dot_dimension_numbers<[1], [0], [0], [1], [0, 0, 1, 1], [], []>} : vector<49x196xf32>, vector<196x64xf32>, vector<49x64xf32> -> vector<49x64xf32>
    %77 = arith.addf %58, %76 : vector<49x64xf32>
    %c2_91 = arith.constant 2 : index
    %c3_92 = arith.constant 3 : index
    %c0_93 = arith.constant 0 : index
    %c0_94 = arith.constant 0 : index
    %78 = vector.load %arg4[%c2_91, %c3_92, %c0_93, %c0_94] : memref<9x4x49x196xf32, #tpu.memory_space<vmem>>, vector<1x1x49x196xf32>
    %79 = vector.shape_cast %78 : vector<1x1x49x196xf32> to vector<49x196xf32>
    %cst_95 = arith.constant dense<0.000000e+00> : vector<49x64xf32>
    %80 = tpu.matmul %79, %65, %cst_95 {dimension_numbers = #tpu.dot_dimension_numbers<[1], [0], [0], [1], [0, 0, 1, 1], [], []>} : vector<49x196xf32>, vector<196x64xf32>, vector<49x64xf32> -> vector<49x64xf32>
    %81 = arith.addf %62, %80 : vector<49x64xf32>
    %c3_96 = arith.constant 3 : index
    %c0_97 = arith.constant 0 : index
    %c0_98 = arith.constant 0 : index
    %82 = vector.load %arg5[%c3_96, %c0_97, %c0_98] : memref<9x32x64xf32, #tpu.memory_space<vmem>>, vector<1x32x64xf32>
    %83 = vector.shape_cast %82 : vector<1x32x64xf32> to vector<32x64xf32>
    %cst_99 = arith.constant dense<0.000000e+00> : vector<196x64xf32>
    %84 = tpu.matmul %20, %83, %cst_99 {dimension_numbers = #tpu.dot_dimension_numbers<[1], [0], [0], [1], [0, 0, 1, 1], [], []>} : vector<196x32xf32>, vector<32x64xf32>, vector<196x64xf32> -> vector<196x64xf32>
    %c3_100 = arith.constant 3 : index
    %c0_101 = arith.constant 0 : index
    %c0_102 = arith.constant 0 : index
    %c0_103 = arith.constant 0 : index
    %85 = vector.load %arg4[%c3_100, %c0_101, %c0_102, %c0_103] : memref<9x4x49x196xf32, #tpu.memory_space<vmem>>, vector<1x1x49x196xf32>
    %86 = vector.shape_cast %85 : vector<1x1x49x196xf32> to vector<49x196xf32>
    %cst_104 = arith.constant dense<0.000000e+00> : vector<49x64xf32>
    %87 = tpu.matmul %86, %84, %cst_104 {dimension_numbers = #tpu.dot_dimension_numbers<[1], [0], [0], [1], [0, 0, 1, 1], [], []>} : vector<49x196xf32>, vector<196x64xf32>, vector<49x64xf32> -> vector<49x64xf32>
    %88 = arith.addf %69, %87 : vector<49x64xf32>
    %c3_105 = arith.constant 3 : index
    %c1_106 = arith.constant 1 : index
    %c0_107 = arith.constant 0 : index
    %c0_108 = arith.constant 0 : index
    %89 = vector.load %arg4[%c3_105, %c1_106, %c0_107, %c0_108] : memref<9x4x49x196xf32, #tpu.memory_space<vmem>>, vector<1x1x49x196xf32>
    %90 = vector.shape_cast %89 : vector<1x1x49x196xf32> to vector<49x196xf32>
    %cst_109 = arith.constant dense<0.000000e+00> : vector<49x64xf32>
    %91 = tpu.matmul %90, %84, %cst_109 {dimension_numbers = #tpu.dot_dimension_numbers<[1], [0], [0], [1], [0, 0, 1, 1], [], []>} : vector<49x196xf32>, vector<196x64xf32>, vector<49x64xf32> -> vector<49x64xf32>
    %92 = arith.addf %73, %91 : vector<49x64xf32>
    %c3_110 = arith.constant 3 : index
    %c2_111 = arith.constant 2 : index
    %c0_112 = arith.constant 0 : index
    %c0_113 = arith.constant 0 : index
    %93 = vector.load %arg4[%c3_110, %c2_111, %c0_112, %c0_113] : memref<9x4x49x196xf32, #tpu.memory_space<vmem>>, vector<1x1x49x196xf32>
    %94 = vector.shape_cast %93 : vector<1x1x49x196xf32> to vector<49x196xf32>
    %cst_114 = arith.constant dense<0.000000e+00> : vector<49x64xf32>
    %95 = tpu.matmul %94, %84, %cst_114 {dimension_numbers = #tpu.dot_dimension_numbers<[1], [0], [0], [1], [0, 0, 1, 1], [], []>} : vector<49x196xf32>, vector<196x64xf32>, vector<49x64xf32> -> vector<49x64xf32>
    %96 = arith.addf %77, %95 : vector<49x64xf32>
    %c3_115 = arith.constant 3 : index
    %c3_116 = arith.constant 3 : index
    %c0_117 = arith.constant 0 : index
    %c0_118 = arith.constant 0 : index
    %97 = vector.load %arg4[%c3_115, %c3_116, %c0_117, %c0_118] : memref<9x4x49x196xf32, #tpu.memory_space<vmem>>, vector<1x1x49x196xf32>
    %98 = vector.shape_cast %97 : vector<1x1x49x196xf32> to vector<49x196xf32>
    %cst_119 = arith.constant dense<0.000000e+00> : vector<49x64xf32>
    %99 = tpu.matmul %98, %84, %cst_119 {dimension_numbers = #tpu.dot_dimension_numbers<[1], [0], [0], [1], [0, 0, 1, 1], [], []>} : vector<49x196xf32>, vector<196x64xf32>, vector<49x64xf32> -> vector<49x64xf32>
    %100 = arith.addf %81, %99 : vector<49x64xf32>
    %c4 = arith.constant 4 : index
    %c0_120 = arith.constant 0 : index
    %c0_121 = arith.constant 0 : index
    %101 = vector.load %arg5[%c4, %c0_120, %c0_121] : memref<9x32x64xf32, #tpu.memory_space<vmem>>, vector<1x32x64xf32>
    %102 = vector.shape_cast %101 : vector<1x32x64xf32> to vector<32x64xf32>
    %cst_122 = arith.constant dense<0.000000e+00> : vector<196x64xf32>
    %103 = tpu.matmul %20, %102, %cst_122 {dimension_numbers = #tpu.dot_dimension_numbers<[1], [0], [0], [1], [0, 0, 1, 1], [], []>} : vector<196x32xf32>, vector<32x64xf32>, vector<196x64xf32> -> vector<196x64xf32>
    %c4_123 = arith.constant 4 : index
    %c0_124 = arith.constant 0 : index
    %c0_125 = arith.constant 0 : index
    %c0_126 = arith.constant 0 : index
    %104 = vector.load %arg4[%c4_123, %c0_124, %c0_125, %c0_126] : memref<9x4x49x196xf32, #tpu.memory_space<vmem>>, vector<1x1x49x196xf32>
    %105 = vector.shape_cast %104 : vector<1x1x49x196xf32> to vector<49x196xf32>
    %cst_127 = arith.constant dense<0.000000e+00> : vector<49x64xf32>
    %106 = tpu.matmul %105, %103, %cst_127 {dimension_numbers = #tpu.dot_dimension_numbers<[1], [0], [0], [1], [0, 0, 1, 1], [], []>} : vector<49x196xf32>, vector<196x64xf32>, vector<49x64xf32> -> vector<49x64xf32>
    %107 = arith.addf %88, %106 : vector<49x64xf32>
    %c4_128 = arith.constant 4 : index
    %c1_129 = arith.constant 1 : index
    %c0_130 = arith.constant 0 : index
    %c0_131 = arith.constant 0 : index
    %108 = vector.load %arg4[%c4_128, %c1_129, %c0_130, %c0_131] : memref<9x4x49x196xf32, #tpu.memory_space<vmem>>, vector<1x1x49x196xf32>
    %109 = vector.shape_cast %108 : vector<1x1x49x196xf32> to vector<49x196xf32>
    %cst_132 = arith.constant dense<0.000000e+00> : vector<49x64xf32>
    %110 = tpu.matmul %109, %103, %cst_132 {dimension_numbers = #tpu.dot_dimension_numbers<[1], [0], [0], [1], [0, 0, 1, 1], [], []>} : vector<49x196xf32>, vector<196x64xf32>, vector<49x64xf32> -> vector<49x64xf32>
    %111 = arith.addf %92, %110 : vector<49x64xf32>
    %c4_133 = arith.constant 4 : index
    %c2_134 = arith.constant 2 : index
    %c0_135 = arith.constant 0 : index
    %c0_136 = arith.constant 0 : index
    %112 = vector.load %arg4[%c4_133, %c2_134, %c0_135, %c0_136] : memref<9x4x49x196xf32, #tpu.memory_space<vmem>>, vector<1x1x49x196xf32>
    %113 = vector.shape_cast %112 : vector<1x1x49x196xf32> to vector<49x196xf32>
    %cst_137 = arith.constant dense<0.000000e+00> : vector<49x64xf32>
    %114 = tpu.matmul %113, %103, %cst_137 {dimension_numbers = #tpu.dot_dimension_numbers<[1], [0], [0], [1], [0, 0, 1, 1], [], []>} : vector<49x196xf32>, vector<196x64xf32>, vector<49x64xf32> -> vector<49x64xf32>
    %115 = arith.addf %96, %114 : vector<49x64xf32>
    %c4_138 = arith.constant 4 : index
    %c3_139 = arith.constant 3 : index
    %c0_140 = arith.constant 0 : index
    %c0_141 = arith.constant 0 : index
    %116 = vector.load %arg4[%c4_138, %c3_139, %c0_140, %c0_141] : memref<9x4x49x196xf32, #tpu.memory_space<vmem>>, vector<1x1x49x196xf32>
    %117 = vector.shape_cast %116 : vector<1x1x49x196xf32> to vector<49x196xf32>
    %cst_142 = arith.constant dense<0.000000e+00> : vector<49x64xf32>
    %118 = tpu.matmul %117, %103, %cst_142 {dimension_numbers = #tpu.dot_dimension_numbers<[1], [0], [0], [1], [0, 0, 1, 1], [], []>} : vector<49x196xf32>, vector<196x64xf32>, vector<49x64xf32> -> vector<49x64xf32>
    %119 = arith.addf %100, %118 : vector<49x64xf32>
    %c5 = arith.constant 5 : index
    %c0_143 = arith.constant 0 : index
    %c0_144 = arith.constant 0 : index
    %120 = vector.load %arg5[%c5, %c0_143, %c0_144] : memref<9x32x64xf32, #tpu.memory_space<vmem>>, vector<1x32x64xf32>
    %121 = vector.shape_cast %120 : vector<1x32x64xf32> to vector<32x64xf32>
    %cst_145 = arith.constant dense<0.000000e+00> : vector<196x64xf32>
    %122 = tpu.matmul %20, %121, %cst_145 {dimension_numbers = #tpu.dot_dimension_numbers<[1], [0], [0], [1], [0, 0, 1, 1], [], []>} : vector<196x32xf32>, vector<32x64xf32>, vector<196x64xf32> -> vector<196x64xf32>
    %c5_146 = arith.constant 5 : index
    %c0_147 = arith.constant 0 : index
    %c0_148 = arith.constant 0 : index
    %c0_149 = arith.constant 0 : index
    %123 = vector.load %arg4[%c5_146, %c0_147, %c0_148, %c0_149] : memref<9x4x49x196xf32, #tpu.memory_space<vmem>>, vector<1x1x49x196xf32>
    %124 = vector.shape_cast %123 : vector<1x1x49x196xf32> to vector<49x196xf32>
    %cst_150 = arith.constant dense<0.000000e+00> : vector<49x64xf32>
    %125 = tpu.matmul %124, %122, %cst_150 {dimension_numbers = #tpu.dot_dimension_numbers<[1], [0], [0], [1], [0, 0, 1, 1], [], []>} : vector<49x196xf32>, vector<196x64xf32>, vector<49x64xf32> -> vector<49x64xf32>
    %126 = arith.addf %107, %125 : vector<49x64xf32>
    %c5_151 = arith.constant 5 : index
    %c1_152 = arith.constant 1 : index
    %c0_153 = arith.constant 0 : index
    %c0_154 = arith.constant 0 : index
    %127 = vector.load %arg4[%c5_151, %c1_152, %c0_153, %c0_154] : memref<9x4x49x196xf32, #tpu.memory_space<vmem>>, vector<1x1x49x196xf32>
    %128 = vector.shape_cast %127 : vector<1x1x49x196xf32> to vector<49x196xf32>
    %cst_155 = arith.constant dense<0.000000e+00> : vector<49x64xf32>
    %129 = tpu.matmul %128, %122, %cst_155 {dimension_numbers = #tpu.dot_dimension_numbers<[1], [0], [0], [1], [0, 0, 1, 1], [], []>} : vector<49x196xf32>, vector<196x64xf32>, vector<49x64xf32> -> vector<49x64xf32>
    %130 = arith.addf %111, %129 : vector<49x64xf32>
    %c5_156 = arith.constant 5 : index
    %c2_157 = arith.constant 2 : index
    %c0_158 = arith.constant 0 : index
    %c0_159 = arith.constant 0 : index
    %131 = vector.load %arg4[%c5_156, %c2_157, %c0_158, %c0_159] : memref<9x4x49x196xf32, #tpu.memory_space<vmem>>, vector<1x1x49x196xf32>
    %132 = vector.shape_cast %131 : vector<1x1x49x196xf32> to vector<49x196xf32>
    %cst_160 = arith.constant dense<0.000000e+00> : vector<49x64xf32>
    %133 = tpu.matmul %132, %122, %cst_160 {dimension_numbers = #tpu.dot_dimension_numbers<[1], [0], [0], [1], [0, 0, 1, 1], [], []>} : vector<49x196xf32>, vector<196x64xf32>, vector<49x64xf32> -> vector<49x64xf32>
    %134 = arith.addf %115, %133 : vector<49x64xf32>
    %c5_161 = arith.constant 5 : index
    %c3_162 = arith.constant 3 : index
    %c0_163 = arith.constant 0 : index
    %c0_164 = arith.constant 0 : index
    %135 = vector.load %arg4[%c5_161, %c3_162, %c0_163, %c0_164] : memref<9x4x49x196xf32, #tpu.memory_space<vmem>>, vector<1x1x49x196xf32>
    %136 = vector.shape_cast %135 : vector<1x1x49x196xf32> to vector<49x196xf32>
    %cst_165 = arith.constant dense<0.000000e+00> : vector<49x64xf32>
    %137 = tpu.matmul %136, %122, %cst_165 {dimension_numbers = #tpu.dot_dimension_numbers<[1], [0], [0], [1], [0, 0, 1, 1], [], []>} : vector<49x196xf32>, vector<196x64xf32>, vector<49x64xf32> -> vector<49x64xf32>
    %138 = arith.addf %119, %137 : vector<49x64xf32>
    %c6 = arith.constant 6 : index
    %c0_166 = arith.constant 0 : index
    %c0_167 = arith.constant 0 : index
    %139 = vector.load %arg5[%c6, %c0_166, %c0_167] : memref<9x32x64xf32, #tpu.memory_space<vmem>>, vector<1x32x64xf32>
    %140 = vector.shape_cast %139 : vector<1x32x64xf32> to vector<32x64xf32>
    %cst_168 = arith.constant dense<0.000000e+00> : vector<196x64xf32>
    %141 = tpu.matmul %20, %140, %cst_168 {dimension_numbers = #tpu.dot_dimension_numbers<[1], [0], [0], [1], [0, 0, 1, 1], [], []>} : vector<196x32xf32>, vector<32x64xf32>, vector<196x64xf32> -> vector<196x64xf32>
    %c6_169 = arith.constant 6 : index
    %c0_170 = arith.constant 0 : index
    %c0_171 = arith.constant 0 : index
    %c0_172 = arith.constant 0 : index
    %142 = vector.load %arg4[%c6_169, %c0_170, %c0_171, %c0_172] : memref<9x4x49x196xf32, #tpu.memory_space<vmem>>, vector<1x1x49x196xf32>
    %143 = vector.shape_cast %142 : vector<1x1x49x196xf32> to vector<49x196xf32>
    %cst_173 = arith.constant dense<0.000000e+00> : vector<49x64xf32>
    %144 = tpu.matmul %143, %141, %cst_173 {dimension_numbers = #tpu.dot_dimension_numbers<[1], [0], [0], [1], [0, 0, 1, 1], [], []>} : vector<49x196xf32>, vector<196x64xf32>, vector<49x64xf32> -> vector<49x64xf32>
    %145 = arith.addf %126, %144 : vector<49x64xf32>
    %c6_174 = arith.constant 6 : index
    %c1_175 = arith.constant 1 : index
    %c0_176 = arith.constant 0 : index
    %c0_177 = arith.constant 0 : index
    %146 = vector.load %arg4[%c6_174, %c1_175, %c0_176, %c0_177] : memref<9x4x49x196xf32, #tpu.memory_space<vmem>>, vector<1x1x49x196xf32>
    %147 = vector.shape_cast %146 : vector<1x1x49x196xf32> to vector<49x196xf32>
    %cst_178 = arith.constant dense<0.000000e+00> : vector<49x64xf32>
    %148 = tpu.matmul %147, %141, %cst_178 {dimension_numbers = #tpu.dot_dimension_numbers<[1], [0], [0], [1], [0, 0, 1, 1], [], []>} : vector<49x196xf32>, vector<196x64xf32>, vector<49x64xf32> -> vector<49x64xf32>
    %149 = arith.addf %130, %148 : vector<49x64xf32>
    %c6_179 = arith.constant 6 : index
    %c2_180 = arith.constant 2 : index
    %c0_181 = arith.constant 0 : index
    %c0_182 = arith.constant 0 : index
    %150 = vector.load %arg4[%c6_179, %c2_180, %c0_181, %c0_182] : memref<9x4x49x196xf32, #tpu.memory_space<vmem>>, vector<1x1x49x196xf32>
    %151 = vector.shape_cast %150 : vector<1x1x49x196xf32> to vector<49x196xf32>
    %cst_183 = arith.constant dense<0.000000e+00> : vector<49x64xf32>
    %152 = tpu.matmul %151, %141, %cst_183 {dimension_numbers = #tpu.dot_dimension_numbers<[1], [0], [0], [1], [0, 0, 1, 1], [], []>} : vector<49x196xf32>, vector<196x64xf32>, vector<49x64xf32> -> vector<49x64xf32>
    %153 = arith.addf %134, %152 : vector<49x64xf32>
    %c6_184 = arith.constant 6 : index
    %c3_185 = arith.constant 3 : index
    %c0_186 = arith.constant 0 : index
    %c0_187 = arith.constant 0 : index
    %154 = vector.load %arg4[%c6_184, %c3_185, %c0_186, %c0_187] : memref<9x4x49x196xf32, #tpu.memory_space<vmem>>, vector<1x1x49x196xf32>
    %155 = vector.shape_cast %154 : vector<1x1x49x196xf32> to vector<49x196xf32>
    %cst_188 = arith.constant dense<0.000000e+00> : vector<49x64xf32>
    %156 = tpu.matmul %155, %141, %cst_188 {dimension_numbers = #tpu.dot_dimension_numbers<[1], [0], [0], [1], [0, 0, 1, 1], [], []>} : vector<49x196xf32>, vector<196x64xf32>, vector<49x64xf32> -> vector<49x64xf32>
    %157 = arith.addf %138, %156 : vector<49x64xf32>
    %c7 = arith.constant 7 : index
    %c0_189 = arith.constant 0 : index
    %c0_190 = arith.constant 0 : index
    %158 = vector.load %arg5[%c7, %c0_189, %c0_190] : memref<9x32x64xf32, #tpu.memory_space<vmem>>, vector<1x32x64xf32>
    %159 = vector.shape_cast %158 : vector<1x32x64xf32> to vector<32x64xf32>
    %cst_191 = arith.constant dense<0.000000e+00> : vector<196x64xf32>
    %160 = tpu.matmul %20, %159, %cst_191 {dimension_numbers = #tpu.dot_dimension_numbers<[1], [0], [0], [1], [0, 0, 1, 1], [], []>} : vector<196x32xf32>, vector<32x64xf32>, vector<196x64xf32> -> vector<196x64xf32>
    %c7_192 = arith.constant 7 : index
    %c0_193 = arith.constant 0 : index
    %c0_194 = arith.constant 0 : index
    %c0_195 = arith.constant 0 : index
    %161 = vector.load %arg4[%c7_192, %c0_193, %c0_194, %c0_195] : memref<9x4x49x196xf32, #tpu.memory_space<vmem>>, vector<1x1x49x196xf32>
    %162 = vector.shape_cast %161 : vector<1x1x49x196xf32> to vector<49x196xf32>
    %cst_196 = arith.constant dense<0.000000e+00> : vector<49x64xf32>
    %163 = tpu.matmul %162, %160, %cst_196 {dimension_numbers = #tpu.dot_dimension_numbers<[1], [0], [0], [1], [0, 0, 1, 1], [], []>} : vector<49x196xf32>, vector<196x64xf32>, vector<49x64xf32> -> vector<49x64xf32>
    %164 = arith.addf %145, %163 : vector<49x64xf32>
    %c7_197 = arith.constant 7 : index
    %c1_198 = arith.constant 1 : index
    %c0_199 = arith.constant 0 : index
    %c0_200 = arith.constant 0 : index
    %165 = vector.load %arg4[%c7_197, %c1_198, %c0_199, %c0_200] : memref<9x4x49x196xf32, #tpu.memory_space<vmem>>, vector<1x1x49x196xf32>
    %166 = vector.shape_cast %165 : vector<1x1x49x196xf32> to vector<49x196xf32>
    %cst_201 = arith.constant dense<0.000000e+00> : vector<49x64xf32>
    %167 = tpu.matmul %166, %160, %cst_201 {dimension_numbers = #tpu.dot_dimension_numbers<[1], [0], [0], [1], [0, 0, 1, 1], [], []>} : vector<49x196xf32>, vector<196x64xf32>, vector<49x64xf32> -> vector<49x64xf32>
    %168 = arith.addf %149, %167 : vector<49x64xf32>
    %c7_202 = arith.constant 7 : index
    %c2_203 = arith.constant 2 : index
    %c0_204 = arith.constant 0 : index
    %c0_205 = arith.constant 0 : index
    %169 = vector.load %arg4[%c7_202, %c2_203, %c0_204, %c0_205] : memref<9x4x49x196xf32, #tpu.memory_space<vmem>>, vector<1x1x49x196xf32>
    %170 = vector.shape_cast %169 : vector<1x1x49x196xf32> to vector<49x196xf32>
    %cst_206 = arith.constant dense<0.000000e+00> : vector<49x64xf32>
    %171 = tpu.matmul %170, %160, %cst_206 {dimension_numbers = #tpu.dot_dimension_numbers<[1], [0], [0], [1], [0, 0, 1, 1], [], []>} : vector<49x196xf32>, vector<196x64xf32>, vector<49x64xf32> -> vector<49x64xf32>
    %172 = arith.addf %153, %171 : vector<49x64xf32>
    %c7_207 = arith.constant 7 : index
    %c3_208 = arith.constant 3 : index
    %c0_209 = arith.constant 0 : index
    %c0_210 = arith.constant 0 : index
    %173 = vector.load %arg4[%c7_207, %c3_208, %c0_209, %c0_210] : memref<9x4x49x196xf32, #tpu.memory_space<vmem>>, vector<1x1x49x196xf32>
    %174 = vector.shape_cast %173 : vector<1x1x49x196xf32> to vector<49x196xf32>
    %cst_211 = arith.constant dense<0.000000e+00> : vector<49x64xf32>
    %175 = tpu.matmul %174, %160, %cst_211 {dimension_numbers = #tpu.dot_dimension_numbers<[1], [0], [0], [1], [0, 0, 1, 1], [], []>} : vector<49x196xf32>, vector<196x64xf32>, vector<49x64xf32> -> vector<49x64xf32>
    %176 = arith.addf %157, %175 : vector<49x64xf32>
    %c8 = arith.constant 8 : index
    %c0_212 = arith.constant 0 : index
    %c0_213 = arith.constant 0 : index
    %177 = vector.load %arg5[%c8, %c0_212, %c0_213] : memref<9x32x64xf32, #tpu.memory_space<vmem>>, vector<1x32x64xf32>
    %178 = vector.shape_cast %177 : vector<1x32x64xf32> to vector<32x64xf32>
    %cst_214 = arith.constant dense<0.000000e+00> : vector<196x64xf32>
    %179 = tpu.matmul %20, %178, %cst_214 {dimension_numbers = #tpu.dot_dimension_numbers<[1], [0], [0], [1], [0, 0, 1, 1], [], []>} : vector<196x32xf32>, vector<32x64xf32>, vector<196x64xf32> -> vector<196x64xf32>
    %c8_215 = arith.constant 8 : index
    %c0_216 = arith.constant 0 : index
    %c0_217 = arith.constant 0 : index
    %c0_218 = arith.constant 0 : index
    %180 = vector.load %arg4[%c8_215, %c0_216, %c0_217, %c0_218] : memref<9x4x49x196xf32, #tpu.memory_space<vmem>>, vector<1x1x49x196xf32>
    %181 = vector.shape_cast %180 : vector<1x1x49x196xf32> to vector<49x196xf32>
    %cst_219 = arith.constant dense<0.000000e+00> : vector<49x64xf32>
    %182 = tpu.matmul %181, %179, %cst_219 {dimension_numbers = #tpu.dot_dimension_numbers<[1], [0], [0], [1], [0, 0, 1, 1], [], []>} : vector<49x196xf32>, vector<196x64xf32>, vector<49x64xf32> -> vector<49x64xf32>
    %183 = arith.addf %164, %182 : vector<49x64xf32>
    %c8_220 = arith.constant 8 : index
    %c1_221 = arith.constant 1 : index
    %c0_222 = arith.constant 0 : index
    %c0_223 = arith.constant 0 : index
    %184 = vector.load %arg4[%c8_220, %c1_221, %c0_222, %c0_223] : memref<9x4x49x196xf32, #tpu.memory_space<vmem>>, vector<1x1x49x196xf32>
    %185 = vector.shape_cast %184 : vector<1x1x49x196xf32> to vector<49x196xf32>
    %cst_224 = arith.constant dense<0.000000e+00> : vector<49x64xf32>
    %186 = tpu.matmul %185, %179, %cst_224 {dimension_numbers = #tpu.dot_dimension_numbers<[1], [0], [0], [1], [0, 0, 1, 1], [], []>} : vector<49x196xf32>, vector<196x64xf32>, vector<49x64xf32> -> vector<49x64xf32>
    %187 = arith.addf %168, %186 : vector<49x64xf32>
    %c8_225 = arith.constant 8 : index
    %c2_226 = arith.constant 2 : index
    %c0_227 = arith.constant 0 : index
    %c0_228 = arith.constant 0 : index
    %188 = vector.load %arg4[%c8_225, %c2_226, %c0_227, %c0_228] : memref<9x4x49x196xf32, #tpu.memory_space<vmem>>, vector<1x1x49x196xf32>
    %189 = vector.shape_cast %188 : vector<1x1x49x196xf32> to vector<49x196xf32>
    %cst_229 = arith.constant dense<0.000000e+00> : vector<49x64xf32>
    %190 = tpu.matmul %189, %179, %cst_229 {dimension_numbers = #tpu.dot_dimension_numbers<[1], [0], [0], [1], [0, 0, 1, 1], [], []>} : vector<49x196xf32>, vector<196x64xf32>, vector<49x64xf32> -> vector<49x64xf32>
    %191 = arith.addf %172, %190 : vector<49x64xf32>
    %c8_230 = arith.constant 8 : index
    %c3_231 = arith.constant 3 : index
    %c0_232 = arith.constant 0 : index
    %c0_233 = arith.constant 0 : index
    %192 = vector.load %arg4[%c8_230, %c3_231, %c0_232, %c0_233] : memref<9x4x49x196xf32, #tpu.memory_space<vmem>>, vector<1x1x49x196xf32>
    %193 = vector.shape_cast %192 : vector<1x1x49x196xf32> to vector<49x196xf32>
    %cst_234 = arith.constant dense<0.000000e+00> : vector<49x64xf32>
    %194 = tpu.matmul %193, %179, %cst_234 {dimension_numbers = #tpu.dot_dimension_numbers<[1], [0], [0], [1], [0, 0, 1, 1], [], []>} : vector<49x196xf32>, vector<196x64xf32>, vector<49x64xf32> -> vector<49x64xf32>
    %195 = arith.addf %176, %194 : vector<49x64xf32>
    %196 = arith.maximumf %183, %187 : vector<49x64xf32>
    %197 = arith.maximumf %191, %195 : vector<49x64xf32>
    %198 = arith.maximumf %196, %197 : vector<49x64xf32>
    %c0_235 = arith.constant 0 : index
    %c0_236 = arith.constant 0 : index
    %199 = vector.load %arg6[%c0_235, %c0_236] : memref<1x64xf32, #tpu.memory_space<vmem>>, vector<1x64xf32>
    %200 = vector.broadcast %199 : vector<1x64xf32> to vector<49x64xf32>
    %201 = arith.addf %198, %200 : vector<49x64xf32>
    %cst_237 = arith.constant 0.000000e+00 : f32
    %202 = vector.broadcast %cst_237 : f32 to vector<49x64xf32>
    %203 = arith.maximumf %201, %202 : vector<49x64xf32>
    %c0_238 = arith.constant 0 : index
    %c0_239 = arith.constant 0 : index
    %c0_240 = arith.constant 0 : index
    %204 = vector.load %arg7[%c0_238, %c0_239, %c0_240] : memref<1x49x64xf32, #tpu.memory_space<vmem>>, vector<1x49x64xf32>
    %205 = vector.shape_cast %204 : vector<1x49x64xf32> to vector<49x64xf32>
    %206 = vector.shape_cast %203 : vector<49x64xf32> to vector<1x49x64xf32>
    tpu.vector_store %arg7[%c0_238, %c0_239, %c0_240], %206 {strides = array<i32>} : memref<1x49x64xf32, #tpu.memory_space<vmem>>, vector<1x49x64xf32>,
    return
  }
  func.func @transform_0(%arg0: i32) -> (i32, i32, i32, i32) {
    %c0_i32 = arith.constant 0 : i32
    %c0_i32_0 = arith.constant 0 : i32
    %c0_i32_1 = arith.constant 0 : i32
    %c0_i32_2 = arith.constant 0 : i32
    return %arg0, %c0_i32, %c0_i32_0, %c0_i32_1 : i32, i32, i32, i32
  }
  func.func @transform_1(%arg0: i32) -> (i32, i32) {
    %c0_i32 = arith.constant 0 : i32
    %c0_i32_0 = arith.constant 0 : i32
    %c0_i32_1 = arith.constant 0 : i32
    return %c0_i32, %c0_i32_0 : i32, i32
  }
  func.func @transform_2(%arg0: i32) -> (i32, i32) {
    %c0_i32 = arith.constant 0 : i32
    %c0_i32_0 = arith.constant 0 : i32
    %c0_i32_1 = arith.constant 0 : i32
    return %c0_i32, %c0_i32_0 : i32, i32
  }
  func.func @transform_3(%arg0: i32) -> (i32, i32, i32, i32) {
    %c0_i32 = arith.constant 0 : i32
    %c0_i32_0 = arith.constant 0 : i32
    %c0_i32_1 = arith.constant 0 : i32
    %c0_i32_2 = arith.constant 0 : i32
    %c0_i32_3 = arith.constant 0 : i32
    return %c0_i32, %c0_i32_0, %c0_i32_1, %c0_i32_2 : i32, i32, i32, i32
  }
  func.func @transform_4(%arg0: i32) -> (i32, i32, i32) {
    %c0_i32 = arith.constant 0 : i32
    %c0_i32_0 = arith.constant 0 : i32
    %c0_i32_1 = arith.constant 0 : i32
    %c0_i32_2 = arith.constant 0 : i32
    return %c0_i32, %c0_i32_0, %c0_i32_1 : i32, i32, i32
  }
  func.func @transform_5(%arg0: i32) -> (i32, i32) {
    %c0_i32 = arith.constant 0 : i32
    %c0_i32_0 = arith.constant 0 : i32
    %c0_i32_1 = arith.constant 0 : i32
    return %c0_i32, %c0_i32_0 : i32, i32
  }
  func.func @transform_6(%arg0: i32) -> (i32, i32, i32) {
    %c0_i32 = arith.constant 0 : i32
    %c0_i32_0 = arith.constant 0 : i32
    %c0_i32_1 = arith.constant 0 : i32
    return %arg0, %c0_i32, %c0_i32_0 : i32, i32, i32
  }
}

module attributes {stable_mosaic.version = 11 : i64} {
  func.func @_mlp_kernel(%arg0: i32, %arg1: memref<1x1x3136xf32, #tpu.memory_space<vmem>>, %arg2: memref<3136x128xf32, #tpu.memory_space<vmem>>, %arg3: memref<1x128xf32, #tpu.memory_space<vmem>>, %arg4: memref<128x10xf32, #tpu.memory_space<vmem>>, %arg5: memref<1x10xf32, #tpu.memory_space<vmem>>, %arg6: memref<1x1x10xf32, #tpu.memory_space<vmem>>) attributes {dimension_semantics = [#tpu.dimension_semantics<parallel>], iteration_bounds = array<i64: 2>, scalar_prefetch = 0 : i64, scratch_operands = 0 : i64, tpu.core_type = #tpu.core_type<tc>, window_params = [{transform_indices = @transform_0, window_bounds = array<i64: 1, 1, 3136>}, {pipeline_mode = #tpu.pipeline_mode<synchronous>, transform_indices = @transform_1, window_bounds = array<i64: 3136, 128>}, {pipeline_mode = #tpu.pipeline_mode<synchronous>, transform_indices = @transform_2, window_bounds = array<i64: 1, 128>}, {pipeline_mode = #tpu.pipeline_mode<synchronous>, transform_indices = @transform_3, window_bounds = array<i64: 128, 10>}, {pipeline_mode = #tpu.pipeline_mode<synchronous>, transform_indices = @transform_4, window_bounds = array<i64: 1, 10>}, {transform_indices = @transform_5, window_bounds = array<i64: 1, 1, 10>}]} {
    %c0 = arith.constant 0 : index
    %c0_0 = arith.constant 0 : index
    %c0_1 = arith.constant 0 : index
    %0 = vector.load %arg1[%c0, %c0_0, %c0_1] : memref<1x1x3136xf32, #tpu.memory_space<vmem>>, vector<1x1x3136xf32>
    %1 = vector.shape_cast %0 : vector<1x1x3136xf32> to vector<1x3136xf32>
    %c0_2 = arith.constant 0 : index
    %c0_3 = arith.constant 0 : index
    %2 = vector.load %arg2[%c0_2, %c0_3] : memref<3136x128xf32, #tpu.memory_space<vmem>>, vector<3136x128xf32>
    %cst = arith.constant dense<0.000000e+00> : vector<1x128xf32>
    %3 = tpu.matmul %1, %2, %cst {dimension_numbers = #tpu.dot_dimension_numbers<[1], [0], [0], [1], [0, 0, 1, 1], [], []>} : vector<1x3136xf32>, vector<3136x128xf32>, vector<1x128xf32> -> vector<1x128xf32>
    %c0_4 = arith.constant 0 : index
    %c0_5 = arith.constant 0 : index
    %4 = vector.load %arg3[%c0_4, %c0_5] : memref<1x128xf32, #tpu.memory_space<vmem>>, vector<1x128xf32>
    %5 = arith.addf %3, %4 : vector<1x128xf32>
    %cst_6 = arith.constant 0.000000e+00 : f32
    %6 = vector.broadcast %cst_6 : f32 to vector<1x128xf32>
    %7 = arith.maximumf %5, %6 : vector<1x128xf32>
    %c0_7 = arith.constant 0 : index
    %c0_8 = arith.constant 0 : index
    %8 = vector.load %arg4[%c0_7, %c0_8] : memref<128x10xf32, #tpu.memory_space<vmem>>, vector<128x10xf32>
    %cst_9 = arith.constant dense<0.000000e+00> : vector<1x10xf32>
    %9 = tpu.matmul %7, %8, %cst_9 {dimension_numbers = #tpu.dot_dimension_numbers<[1], [0], [0], [1], [0, 0, 1, 1], [], []>} : vector<1x128xf32>, vector<128x10xf32>, vector<1x10xf32> -> vector<1x10xf32>
    %c0_10 = arith.constant 0 : index
    %c0_11 = arith.constant 0 : index
    %10 = vector.load %arg5[%c0_10, %c0_11] : memref<1x10xf32, #tpu.memory_space<vmem>>, vector<1x10xf32>
    %11 = arith.addf %9, %10 : vector<1x10xf32>
    %c0_12 = arith.constant 0 : index
    %c0_13 = arith.constant 0 : index
    %c0_14 = arith.constant 0 : index
    %12 = vector.load %arg6[%c0_12, %c0_13, %c0_14] : memref<1x1x10xf32, #tpu.memory_space<vmem>>, vector<1x1x10xf32>
    %13 = vector.shape_cast %12 : vector<1x1x10xf32> to vector<1x10xf32>
    %14 = vector.shape_cast %11 : vector<1x10xf32> to vector<1x1x10xf32>
    tpu.vector_store %arg6[%c0_12, %c0_13, %c0_14], %14 {strides = array<i32>} : memref<1x1x10xf32, #tpu.memory_space<vmem>>, vector<1x1x10xf32>,
    return
  }
  func.func @transform_0(%arg0: i32) -> (i32, i32, i32) {
    %c0_i32 = arith.constant 0 : i32
    %c0_i32_0 = arith.constant 0 : i32
    %c0_i32_1 = arith.constant 0 : i32
    return %arg0, %c0_i32, %c0_i32_0 : i32, i32, i32
  }
  func.func @transform_1(%arg0: i32) -> (i32, i32) {
    %c0_i32 = arith.constant 0 : i32
    %c0_i32_0 = arith.constant 0 : i32
    %c0_i32_1 = arith.constant 0 : i32
    return %c0_i32, %c0_i32_0 : i32, i32
  }
  func.func @transform_2(%arg0: i32) -> (i32, i32) {
    %c0_i32 = arith.constant 0 : i32
    %c0_i32_0 = arith.constant 0 : i32
    %c0_i32_1 = arith.constant 0 : i32
    return %c0_i32, %c0_i32_0 : i32, i32
  }
  func.func @transform_3(%arg0: i32) -> (i32, i32) {
    %c0_i32 = arith.constant 0 : i32
    %c0_i32_0 = arith.constant 0 : i32
    %c0_i32_1 = arith.constant 0 : i32
    return %c0_i32, %c0_i32_0 : i32, i32
  }
  func.func @transform_4(%arg0: i32) -> (i32, i32) {
    %c0_i32 = arith.constant 0 : i32
    %c0_i32_0 = arith.constant 0 : i32
    %c0_i32_1 = arith.constant 0 : i32
    return %c0_i32, %c0_i32_0 : i32, i32
  }
  func.func @transform_5(%arg0: i32) -> (i32, i32, i32) {
    %c0_i32 = arith.constant 0 : i32
    %c0_i32_0 = arith.constant 0 : i32
    %c0_i32_1 = arith.constant 0 : i32
    return %arg0, %c0_i32, %c0_i32_0 : i32, i32, i32
  }
}

</mosaic_0001>

<bundles_post_ra>
// kernel: cnn_forward.3
= control target key start
LH: loop header
LB: loop body
LE: loop exit
PB: predicated region body
PF: predicated region fallthrough
CT: control target
= control target key end

     0   :  { %10 = vsyncpa [#allocation3], 0  ;;  %s3901_s0 = inlined_call_operand.vmem [shape: f32[2,1,3136], index: 0, kind: input, shape index: {}]   ;;  %s3902_s1 = inlined_call_operand.vmem [shape: f32[3136,128], index: 1, kind: input, shape index: {}]   ;;  %s3903_s2 = inlined_call_operand.vmem [shape: f32[1,128], index: 2, kind: input, shape index: {}]   ;;  %s3904_s3 = inlined_call_operand.vmem [shape: f32[128,10], index: 3, kind: input, shape index: {}]   ;;  %s3905_s4 = inlined_call_operand.vmem [shape: f32[1,10], index: 4, kind: input, shape index: {}]   ;;  %s3906_s5 = inlined_call_operand.hbm [shape: f32[2,1,10], index: 5, kind: output, shape index: {}]  }
   0x1   :  { %12 = vsyncpa [#allocation3 + $0x1], 0  ;;  %s2461_s18 = smov 0   ;;  %s2463_s19 = smov 0  }
   0x2   :  { %s2465_s20 = smov 0   ;;  %s2467_s21 = smov 0  }
   0x3 LB: > { %s2482_s22 = sadd.s32 4294967295, %s2426_s21   ;;  %s1815_s23 = sadd.s32 4294967294, %s2426_s21   ;;  %s2426_s21 = sphi %s2467_s21, %s3912_s21   ;;  %s2422_s20 = sphi %s2465_s20, %s3911_s20   ;;  %s2418_s19 = sphi %s2463_s19, %s3910_s19   ;;  %s2414_s18 = sphi %s2461_s18, %s3909_s18  }
   0x4   : > { %s2486_s24 = sadd.s32 1, %s2426_s21   ;;  %s135_s25 = sadd.s32 1, %s2422_s20 }
   0x5   : > { %s132_s26 = ssub.s32 %s2426_s21, %s2486_s24  ;;  %p145_p0 = scmp.ne.s32.totalorder %s2422_s20, %s2418_s19 }
   0x6   : > { %p133_p1 = scmp.eq.s32.totalorder %s132_s26, 0  ;;  %p146_p2 = scmp.eq.s32.totalorder %s2482_s22, 1 }
   0x7   : > { %p151_p3 = scmp.ne.s32.totalorder %s2418_s19, %s2414_s18  ;;  %p152_p4 = scmp.eq.s32.totalorder %s1815_s23, 1 }
   0x8   : > { %s2497_s27 = scalar_select %p133_p1, %s2422_s20, %s135_s25  }
   0x9   : > { %p2499_p5 = por %p146_p2, %p145_p0  ;;  %p2503_p6 = por %p152_p4, %p151_p3 }
   0xa   : > { %p1818_p7 = scmp.ge.s32.totalorder %s2426_s21, 1  ;;  %p189_p8 = scmp.lt.s32.totalorder %s2426_s21, 3 }
   0xc   : > { %p190_p9 = pnand %p1818_p7, %p189_p8 }
   0xd   : > { %p215_p10 = scmp.lt.s32.totalorder (!%p190_p9), %s2482_s22, 1  ;;  %s213_s12 = sand.u32 (!%p190_p9), 1, %s2418_s19  }
   0xe   : > { %193 = sbr.rel (%p190_p9) target bundleno = 645 (0x285), region = 40  ;;  %s1821_s14 = sshll.u32 (!%p190_p9), %s2482_s22, 4 }
   0xf   : > { %s3866_s17 = scalar_lea.hbm (!%p190_p9), %s3906_s5, %s1821_s14  ;;  %s1748_s23 = scalar_lea.sflag (!%p190_p9), [#allocation3], %s213_s12 }
  0x13   : > { %v254_v0 = vld [vmem:[%s3902_s1 + $0xf8] sm:$0xff]  ;;  %v253_v2 = vld [vmem:[%s3902_s1 + $0xf0] sm:$0xff]  ;;  %v252_v6 = vld [vmem:[%s3902_s1 + $0xe8] sm:$0xff]  ;;  %s2606_s25 = scalar_select %p215_p10, %s2482_s22, 1  ;;  %v620_v35 = vlaneseq  ;;  %vm2429_vm0 = vmmov 0   ;;  %vm744_vm1 = vcmask 523264  }
  0x14   : > { %v238_v1 = vld [vmem:[%s3902_s1 + $0x78] sm:$0xff]  ;;  %1824 = vmatprep.subr.mxu0 %v254_v0  ;;  %v237_v4 = vld [vmem:[%s3902_s1 + $0x70] sm:$0xff]  ;;  %v236_v8 = vld [vmem:[%s3902_s1 + $0x68] sm:$0xff]  ;;  %vm1745_vm2 = vcmask 73728   ;;  %s2430_s22 = smov [#allocation2]  }
  0x15   : > { %v286_v3 = vld [vmem:[%s3902_s1 + $0x1f8] sm:$0xff]  ;;  %1825 = vmatpush3.msra.mxu0 %v238_v1  ;;  %v285_v7 = vld [vmem:[%s3902_s1 + $0x1f0] sm:$0xff]  ;;  %v284_v10 = vld [vmem:[%s3902_s1 + $0x1e8] sm:$0xff]  ;;  %s2324_s30 = smul.u32 25, %s2606_s25  ;;  %v2645_v44 = vshrl.u32 %v620_v35, 7  ;;  %s2370_s6 = sshll.u32 %s2430_s22, 4  ;;  %s2371_s6 = int_to_ptr.vmem [resolvable:$false] %s2370_s6 }
  0x16   : > { %v270_v5 = vld [vmem:[%s3902_s1 + $0x178] sm:$0xff]  ;;  %1859 = vmatprep.subr.mxu1 %v286_v3  ;;  %1826 = vmatprep.subr.mxu0 %v253_v2  ;;  %v269_v9 = vld [vmem:[%s3902_s1 + $0x170] sm:$0xff]  ;;  %v251_v11 = vld [vmem:[%s3902_s1 + $0xe0] sm:$0xff]  ;;  %s2372_s7 = scalar_lea.vmem %s2371_s6, 32 }
  0x17   : > { %1860 = vmatpush3.msra.mxu1 %v270_v5  ;;  %1827 = vmatpush3.msra.mxu0 %v237_v4  ;;  %v268_v12 = vld [vmem:[%s3902_s1 + $0x168] sm:$0xff]  ;;  %v235_v13 = vld [vmem:[%s3902_s1 + $0x60] sm:$0xff]  ;;  %v250_v15 = vld [vmem:[%s3902_s1 + $0xd8] sm:$0xff]  ;;  %s2662_s9 = scalar_lea.vmem %s3901_s0, %s2324_s30  ;;  %v2677_v53 = vsub.s32 1, %v2645_v44  ;;  %v2695_v59 = vsub.s32 0, %v2645_v44  ;;  %v2712_v1 = vsub.s32 3, %v2645_v44 }
  0x18   : > { %1861 = vmatprep.subr.mxu1 %v285_v7  ;;  %1828 = vmatprep.subr.mxu0 %v252_v6  ;;  %v283_v14 = vld [vmem:[%s3902_s1 + $0x1e0] sm:$0xff]  ;;  %v234_v17 = vld [vmem:[%s3902_s1 + $0x58] sm:$0xff]  ;;  %v249_v19 = vld [vmem:[%s3902_s1 + $0xd0] sm:$0xff]  ;;  %v2718_v3 = vsub.s32 2, %v2645_v44 }
  0x19   : > { %1862 = vmatpush3.msra.mxu1 %v269_v9  ;;  %1829 = vmatpush3.msra.mxu0 %v236_v8  ;;  %v267_v16 = vld [vmem:[%s3902_s1 + $0x160] sm:$0xff]  ;;  %v282_v18 = vld [vmem:[%s3902_s1 + $0x1d8] sm:$0xff]  ;;  %v233_v21 = vld [vmem:[%s3902_s1 + $0x50] sm:$0xff] }
  0x1a   : > { %1863 = vmatprep.subr.mxu1 %v284_v10  ;;  %1830 = vmatprep.subr.mxu0 %v251_v11  ;;  %v266_v20 = vld [vmem:[%s3902_s1 + $0x158] sm:$0xff]  ;;  %v281_v22 = vld [vmem:[%s3902_s1 + $0x1d0] sm:$0xff]  ;;  %v248_v23 = vld [vmem:[%s3902_s1 + $0xc8] sm:$0xff] }
  0x1b   : > { %1864 = vmatpush3.msra.mxu1 %v268_v12  ;;  %1831 = vmatpush3.msra.mxu0 %v235_v13  ;;  %v265_v24 = vld [vmem:[%s3902_s1 + $0x150] sm:$0xff]  ;;  %v232_v25 = vld [vmem:[%s3902_s1 + $0x48] sm:$0xff]  ;;  %v247_v27 = vld [vmem:[%s3902_s1 + $0xc0] sm:$0xff] }
  0x1c   : > { %1865 = vmatprep.subr.mxu1 %v283_v14  ;;  %1832 = vmatprep.subr.mxu0 %v250_v15  ;;  %v280_v26 = vld [vmem:[%s3902_s1 + $0x1c8] sm:$0xff]  ;;  %v231_v29 = vld [vmem:[%s3902_s1 + $0x40] sm:$0xff]  ;;  %v246_v31 = vld [vmem:[%s3902_s1 + $0xb8] sm:$0xff] }
  0x1d   : > { %1866 = vmatpush3.msra.mxu1 %v267_v16  ;;  %1833 = vmatpush3.msra.mxu0 %v234_v17  ;;  %v264_v28 = vld [vmem:[%s3902_s1 + $0x148] sm:$0xff]  ;;  %v279_v30 = vld [vmem:[%s3902_s1 + $0x1c0] sm:$0xff]  ;;  %v230_v33 = vld [vmem:[%s3902_s1 + $0x38] sm:$0xff] }
  0x1e   : > { %1867 = vmatprep.subr.mxu1 %v282_v18  ;;  %1834 = vmatprep.subr.mxu0 %v249_v19  ;;  %v263_v32 = vld [vmem:[%s3902_s1 + $0x140] sm:$0xff]  ;;  %v278_v34 = vld [vmem:[%s3902_s1 + $0x1b8] sm:$0xff]  ;;  %v245_v36 = vld [vmem:[%s3902_s1 + $0xb0] sm:$0xff] }
  0x1f   : > { %1868 = vmatpush3.msra.mxu1 %v266_v20  ;;  %1835 = vmatpush3.msra.mxu0 %v233_v21  ;;  %v262_v37 = vld [vmem:[%s3902_s1 + $0x138] sm:$0xff]  ;;  %v229_v38 = vld [vmem:[%s3902_s1 + $0x30] sm:$0xff]  ;;  %v244_v40 = vld [vmem:[%s3902_s1 + $0xa8] sm:$0xff] }
  0x20   : > { %1869 = vmatprep.subr.mxu1 %v281_v22  ;;  %1836 = vmatprep.subr.mxu0 %v248_v23  ;;  %v277_v39 = vld [vmem:[%s3902_s1 + $0x1b0] sm:$0xff]  ;;  %v228_v42 = vld [vmem:[%s3902_s1 + $0x28] sm:$0xff]  ;;  %v243_v45 = vld [vmem:[%s3902_s1 + $0xa0] sm:$0xff] }
  0x21   : > { %1870 = vmatpush3.msra.mxu1 %v265_v24  ;;  %1837 = vmatpush3.msra.mxu0 %v232_v25  ;;  %v261_v41 = vld [vmem:[%s3902_s1 + $0x130] sm:$0xff]  ;;  %v276_v43 = vld [vmem:[%s3902_s1 + $0x1a8] sm:$0xff]  ;;  %v227_v47 = vld [vmem:[%s3902_s1 + $0x20] sm:$0xff] }
  0x22   : > { %1871 = vmatprep.subr.mxu1 %v280_v26  ;;  %1838 = vmatprep.subr.mxu0 %v247_v27  ;;  %v260_v46 = vld [vmem:[%s3902_s1 + $0x128] sm:$0xff]  ;;  %v275_v48 = vld [vmem:[%s3902_s1 + $0x1a0] sm:$0xff]  ;;  %v242_v49 = vld [vmem:[%s3902_s1 + $0x98] sm:$0xff] }
  0x23   : > { %1872 = vmatpush3.msra.mxu1 %v264_v28  ;;  %1839 = vmatpush3.msra.mxu0 %v231_v29  ;;  %v259_v50 = vld [vmem:[%s3902_s1 + $0x120] sm:$0xff]  ;;  %v226_v51 = vld [vmem:[%s3902_s1 + $0x18] sm:$0xff]  ;;  %v241_v54 = vld [vmem:[%s3902_s1 + $0x90] sm:$0xff] }
  0x24   : > { %1873 = vmatprep.subr.mxu1 %v279_v30  ;;  %1840 = vmatprep.subr.mxu0 %v246_v31  ;;  %v274_v52 = vld [vmem:[%s3902_s1 + $0x198] sm:$0xff]  ;;  %v2686_v56 = vld [vmem:[%s2662_s9] sm:$0xff]  ;;  %v225_v57 = vld [vmem:[%s3902_s1 + $0x10] sm:$0xff] }
  0x25   : > { %1874 = vmatpush3.msra.mxu1 %v263_v32  ;;  %1841 = vmatpush3.msra.mxu0 %v230_v33  ;;  %v258_v55 = vld [vmem:[%s3902_s1 + $0x118] sm:$0xff]  ;;  %v273_v58 = vld [vmem:[%s3902_s1 + $0x190] sm:$0xff]  ;;  %v240_v60 = vld [vmem:[%s3902_s1 + $0x88] sm:$0xff]  ;;  %v627_v0 = vrot.slane %v2686_v56, %v2677_v53  ;;  %v623_v6 = vrot.slane %v2686_v56, %v2695_v59  ;;  %v635_v10 = vrot.slane %v2686_v56, %v2712_v1 }
  0x26   : > { %1875 = vmatprep.subr.mxu1 %v278_v34  ;;  %1842 = vmatprep.subr.mxu0 %v245_v36  ;;  %v257_v61 = vld [vmem:[%s3902_s1 + $0x110] sm:$0xff]  ;;  %v224_v62 = vld [vmem:[%s3902_s1 + $0x8] sm:$0xff]  ;;  %v239_v2 = vld [vmem:[%s3902_s1 + $0x80] sm:$0xff]  ;;  %v631_v12 = vrot.slane %v2686_v56, %v2718_v3 }
  0x27   : > { %1876 = vmatpush3.msra.mxu1 %v262_v37  ;;  %1843 = vmatpush3.msra.mxu0 %v229_v38  ;;  %v272_v63 = vld [vmem:[%s3902_s1 + $0x188] sm:$0xff]  ;;  %v223_v4 = vld [vmem:[%s3902_s1] sm:$0xff]  ;;  %v318_v8 = vld [vmem:[%s3902_s1 + $0x2f8] sm:$0xff] }
  0x28   : > { %1877 = vmatprep.subr.mxu1 %v277_v39  ;;  %1844 = vmatprep.subr.mxu0 %v244_v40  ;;  %v256_v5 = vld [vmem:[%s3902_s1 + $0x108] sm:$0xff]  ;;  %v271_v7 = vld [vmem:[%s3902_s1 + $0x180] sm:$0xff]  ;;  %v302_v11 = vld [vmem:[%s3902_s1 + $0x278] sm:$0xff] }
  0x29   : > { %1878 = vmatpush3.msra.mxu1 %v261_v41  ;;  %1845 = vmatpush3.msra.mxu0 %v228_v42  ;;  %v255_v9 = vld [vmem:[%s3902_s1 + $0x100] sm:$0xff]  ;;  %v317_v13 = vld [vmem:[%s3902_s1 + $0x2f0] sm:$0xff]  ;;  %v350_v14 = vld [vmem:[%s3902_s1 + $0x3f8] sm:$0xff] }
  0x2a   : > { %1879 = vmatprep.subr.mxu1 %v276_v43  ;;  %1846 = vmatprep.subr.mxu0 %v243_v45  ;;  %v301_v15 = vld [vmem:[%s3902_s1 + $0x270] sm:$0xff]  ;;  %v334_v16 = vld [vmem:[%s3902_s1 + $0x378] sm:$0xff]  ;;  %v316_v17 = vld [vmem:[%s3902_s1 + $0x2e8] sm:$0xff] }
  0x2b   : > { %1880 = vmatpush3.msra.mxu1 %v260_v46  ;;  %1847 = vmatpush3.msra.mxu0 %v227_v47  ;;  %v349_v18 = vld [vmem:[%s3902_s1 + $0x3f0] sm:$0xff]  ;;  %v300_v19 = vld [vmem:[%s3902_s1 + $0x268] sm:$0xff]  ;;  %v315_v21 = vld [vmem:[%s3902_s1 + $0x2e0] sm:$0xff] }
  0x2c   : > { %1881 = vmatprep.subr.mxu1 %v275_v48  ;;  %1848 = vmatprep.subr.mxu0 %v242_v49  ;;  %v333_v20 = vld [vmem:[%s3902_s1 + $0x370] sm:$0xff]  ;;  %v348_v22 = vld [vmem:[%s3902_s1 + $0x3e8] sm:$0xff]  ;;  %v299_v23 = vld [vmem:[%s3902_s1 + $0x260] sm:$0xff] }
  0x2d   : > { %1882 = vmatpush3.msra.mxu1 %v259_v50  ;;  %1849 = vmatpush3.msra.mxu0 %v226_v51  ;;  %v332_v24 = vld [vmem:[%s3902_s1 + $0x368] sm:$0xff]  ;;  %v314_v25 = vld [vmem:[%s3902_s1 + $0x2d8] sm:$0xff]  ;;  %v347_v26 = vld [vmem:[%s3902_s1 + $0x3e0] sm:$0xff] }
  0x2e   : > { %1883 = vmatprep.subr.mxu1 %v274_v52  ;;  %1850 = vmatprep.subr.mxu0 %v241_v54  ;;  %v298_v27 = vld [vmem:[%s3902_s1 + $0x258] sm:$0xff]  ;;  %v331_v28 = vld [vmem:[%s3902_s1 + $0x360] sm:$0xff]  ;;  %v313_v29 = vld [vmem:[%s3902_s1 + $0x2d0] sm:$0xff] }
  0x2f   : > { %1884 = vmatpush3.msra.mxu1 %v258_v55  ;;  %1851 = vmatpush3.msra.mxu0 %v225_v57  ;;  %v346_v30 = vld [vmem:[%s3902_s1 + $0x3d8] sm:$0xff]  ;;  %v297_v31 = vld [vmem:[%s3902_s1 + $0x250] sm:$0xff]  ;;  %v312_v33 = vld [vmem:[%s3902_s1 + $0x2c8] sm:$0xff] }
  0x30   : > { %1885 = vmatprep.subr.mxu1 %v273_v58  ;;  %1852 = vmatprep.subr.mxu0 %v240_v60  ;;  %v330_v32 = vld [vmem:[%s3902_s1 + $0x358] sm:$0xff]  ;;  %v345_v34 = vld [vmem:[%s3902_s1 + $0x3d0] sm:$0xff]  ;;  %v296_v35 = vld [vmem:[%s3902_s1 + $0x248] sm:$0xff] }
  0x31   : > { %1886 = vmatpush3.msra.mxu1 %v257_v61  ;;  %1853 = vmatpush3.msra.mxu0 %v224_v62  ;;  %v329_v36 = vld [vmem:[%s3902_s1 + $0x350] sm:$0xff]  ;;  %v311_v37 = vld [vmem:[%s3902_s1 + $0x2c0] sm:$0xff]  ;;  %v344_v38 = vld [vmem:[%s3902_s1 + $0x3c8] sm:$0xff] }
  0x32   : > { %1887 = vmatprep.subr.mxu1 %v272_v63  ;;  %1854 = vmatprep.subr.mxu0 %v239_v2  ;;  %v295_v39 = vld [vmem:[%s3902_s1 + $0x240] sm:$0xff]  ;;  %v328_v40 = vld [vmem:[%s3902_s1 + $0x348] sm:$0xff]  ;;  %v310_v41 = vld [vmem:[%s3902_s1 + $0x2b8] sm:$0xff] }
  0x33   : > { %811 = vmatprep.mubr.f32.mxu0 %v627_v0  ;;  %1855 = vmatpush3.msra.mxu0 %v223_v4  ;;  %v343_v42 = vld [vmem:[%s3902_s1 + $0x3c0] sm:$0xff]  ;;  %v294_v43 = vld [vmem:[%s3902_s1 + $0x238] sm:$0xff]  ;;  %v309_v46 = vld [vmem:[%s3902_s1 + $0x2b0] sm:$0xff] }
  0x34   : > { %1888 = vmatpush3.msra.mxu1 %v256_v5  ;;  %812 = vmatmul.mubr.f32.vlgmr.msra.gmra.mxu0 %v623_v6  ;;  %v327_v45 = vld [vmem:[%s3902_s1 + $0x340] sm:$0xff]  ;;  %v342_v47 = vld [vmem:[%s3902_s1 + $0x3b8] sm:$0xff]  ;;  %v293_v48 = vld [vmem:[%s3902_s1 + $0x230] sm:$0xff]  ;;  %v2898_v6 = vsub.s32 5, %v2645_v44 }
  0x35   : > { %1889 = vmatprep.subr.mxu1 %v271_v7  ;;  %1894 = vmatprep.subr.mxu0 %v318_v8  ;;  %v326_v49 = vld [vmem:[%s3902_s1 + $0x338] sm:$0xff]  ;;  %v308_v50 = vld [vmem:[%s3902_s1 + $0x2a8] sm:$0xff]  ;;  %v341_v51 = vld [vmem:[%s3902_s1 + $0x3b0] sm:$0xff] }
  0x36   : > { %1890 = vmatpush3.msra.mxu1 %v255_v9  ;;  %881 = vmatprep.mubr.f32.mxu1 %v635_v10  ;;  %v292_v52 = vld [vmem:[%s3902_s1 + $0x228] sm:$0xff]  ;;  %v325_v54 = vld [vmem:[%s3902_s1 + $0x330] sm:$0xff]  ;;  %v307_v55 = vld [vmem:[%s3902_s1 + $0x2a0] sm:$0xff]  ;;  %v2907_v9 = vsub.s32 4, %v2645_v44 }
  0x37   : > { %1895 = vmatpush3.msra.mxu0 %v302_v11  ;;  %882 = vmatmul.mubr.f32.vlgmr.msra.gmra.mxu1 %v631_v12  ;;  %v340_v57 = vld [vmem:[%s3902_s1 + $0x3a8] sm:$0xff]  ;;  %v291_v58 = vld [vmem:[%s3902_s1 + $0x220] sm:$0xff]  ;;  %v306_v61 = vld [vmem:[%s3902_s1 + $0x298] sm:$0xff] }
  0x38   : > { %1896 = vmatprep.subr.mxu0 %v317_v13  ;;  %1929 = vmatprep.subr.mxu1 %v350_v14  ;;  %v324_v60 = vld [vmem:[%s3902_s1 + $0x328] sm:$0xff]  ;;  %v339_v62 = vld [vmem:[%s3902_s1 + $0x3a0] sm:$0xff]  ;;  %v290_v63 = vld [vmem:[%s3902_s1 + $0x218] sm:$0xff]  ;;  %v2922_v14 = vsub.s32 7, %v2645_v44 }
  0x39   : > { %1897 = vmatpush3.msra.mxu0 %v301_v15  ;;  %1930 = vmatpush3.msra.mxu1 %v334_v16  ;;  %v323_v0 = vld [vmem:[%s3902_s1 + $0x320] sm:$0xff]  ;;  %v305_v2 = vld [vmem:[%s3902_s1 + $0x290] sm:$0xff]  ;;  %v338_v4 = vld [vmem:[%s3902_s1 + $0x398] sm:$0xff] }
  0x3a   : > { %1898 = vmatprep.subr.mxu0 %v316_v17  ;;  %1931 = vmatprep.subr.mxu1 %v349_v18  ;;  %v289_v5 = vld [vmem:[%s3902_s1 + $0x210] sm:$0xff]  ;;  %v322_v7 = vld [vmem:[%s3902_s1 + $0x318] sm:$0xff]  ;;  %v304_v8 = vld [vmem:[%s3902_s1 + $0x288] sm:$0xff]  ;;  %v643_v17 = vrot.slane %v2686_v56, %v2898_v6  ;;  %v2933_v18 = vsub.s32 6, %v2645_v44 }
  0x3b   : > { %1899 = vmatpush3.msra.mxu0 %v300_v19  ;;  %1932 = vmatpush3.msra.mxu1 %v333_v20  ;;  %v337_v10 = vld [vmem:[%s3902_s1 + $0x390] sm:$0xff]  ;;  %v288_v11 = vld [vmem:[%s3902_s1 + $0x208] sm:$0xff]  ;;  %v303_v13 = vld [vmem:[%s3902_s1 + $0x280] sm:$0xff]  ;;  %v639_v20 = vrot.slane %v2686_v56, %v2907_v9 }
  0x3c   : > { %1900 = vmatprep.subr.mxu0 %v315_v21  ;;  %1933 = vmatprep.subr.mxu1 %v348_v22  ;;  %v321_v12 = vld [vmem:[%s3902_s1 + $0x310] sm:$0xff]  ;;  %v336_v15 = vld [vmem:[%s3902_s1 + $0x388] sm:$0xff]  ;;  %v287_v16 = vld [vmem:[%s3902_s1 + $0x200] sm:$0xff] }
  0x3d   : > { %1901 = vmatpush3.msra.mxu0 %v299_v23  ;;  %1934 = vmatpush3.msra.mxu1 %v332_v24  ;;  %v320_v19 = vld [vmem:[%s3902_s1 + $0x308] sm:$0xff]  ;;  %v335_v21 = vld [vmem:[%s3902_s1 + $0x380] sm:$0xff]  ;;  %v382_v44 = vld [vmem:[%s3902_s1 + $0x4f8] sm:$0xff]  ;;  %v651_v23 = vrot.slane %v2686_v56, %v2922_v14 }
  0x3e   : > { %1902 = vmatprep.subr.mxu0 %v314_v25  ;;  %1935 = vmatprep.subr.mxu1 %v347_v26  ;;  %v319_v22 = vld [vmem:[%s3902_s1 + $0x300] sm:$0xff]  ;;  %v366_v24 = vld [vmem:[%s3902_s1 + $0x478] sm:$0xff]  ;;  %v647_v25 = vrot.slane %v2686_v56, %v2933_v18  ;;  %v381_v26 = vld [vmem:[%s3902_s1 + $0x4f0] sm:$0xff] }
  0x3f   : > { %1903 = vmatpush3.msra.mxu0 %v298_v27  ;;  %1936 = vmatpush3.msra.mxu1 %v331_v28  ;;  %v414_v27 = vld [vmem:[%s3902_s1 + $0x5f8] sm:$0xff]  ;;  %v365_v28 = vld [vmem:[%s3902_s1 + $0x470] sm:$0xff] }
  0x40   : > { %1904 = vmatprep.subr.mxu0 %v313_v29  ;;  %1937 = vmatprep.subr.mxu1 %v346_v30  ;;  %v398_v56 = vld [vmem:[%s3902_s1 + $0x578] sm:$0xff]  ;;  %v380_v29 = vld [vmem:[%s3902_s1 + $0x4e8] sm:$0xff]  ;;  %v413_v30 = vld [vmem:[%s3902_s1 + $0x5f0] sm:$0xff] }
  0x41   : > { %1905 = vmatpush3.msra.mxu0 %v297_v31  ;;  %1938 = vmatpush3.msra.mxu1 %v330_v32  ;;  %v364_v31 = vld [vmem:[%s3902_s1 + $0x468] sm:$0xff]  ;;  %v397_v32 = vld [vmem:[%s3902_s1 + $0x570] sm:$0xff] }
  0x42   : > { %1906 = vmatprep.subr.mxu0 %v312_v33  ;;  %1939 = vmatprep.subr.mxu1 %v345_v34  ;;  %v379_v33 = vld [vmem:[%s3902_s1 + $0x4e0] sm:$0xff]  ;;  %v412_v34 = vld [vmem:[%s3902_s1 + $0x5e8] sm:$0xff] }
  0x43   : > { %1907 = vmatpush3.msra.mxu0 %v296_v35  ;;  %1940 = vmatpush3.msra.mxu1 %v329_v36  ;;  %v363_v35 = vld [vmem:[%s3902_s1 + $0x460] sm:$0xff]  ;;  %v396_v36 = vld [vmem:[%s3902_s1 + $0x568] sm:$0xff] }
  0x44   : > { %1908 = vmatprep.subr.mxu0 %v311_v37  ;;  %1941 = vmatprep.subr.mxu1 %v344_v38  ;;  %v378_v37 = vld [vmem:[%s3902_s1 + $0x4d8] sm:$0xff]  ;;  %v411_v38 = vld [vmem:[%s3902_s1 + $0x5e0] sm:$0xff] }
  0x45   : > { %1909 = vmatpush3.msra.mxu0 %v295_v39  ;;  %1942 = vmatpush3.msra.mxu1 %v328_v40  ;;  %v362_v39 = vld [vmem:[%s3902_s1 + $0x458] sm:$0xff]  ;;  %v395_v40 = vld [vmem:[%s3902_s1 + $0x560] sm:$0xff] }
  0x46   : > { %1910 = vmatprep.subr.mxu0 %v310_v41  ;;  %1943 = vmatprep.subr.mxu1 %v343_v42  ;;  %v377_v41 = vld [vmem:[%s3902_s1 + $0x4d0] sm:$0xff]  ;;  %v410_v42 = vld [vmem:[%s3902_s1 + $0x5d8] sm:$0xff] }
  0x47   : > { %1911 = vmatpush3.msra.mxu0 %v294_v43  ;;  %1944 = vmatpush3.msra.mxu1 %v327_v45  ;;  %v361_v43 = vld [vmem:[%s3902_s1 + $0x450] sm:$0xff]  ;;  %v394_v45 = vld [vmem:[%s3902_s1 + $0x558] sm:$0xff] }
  0x48   : > { %1912 = vmatprep.subr.mxu0 %v309_v46  ;;  %1945 = vmatprep.subr.mxu1 %v342_v47  ;;  %v376_v46 = vld [vmem:[%s3902_s1 + $0x4c8] sm:$0xff]  ;;  %v409_v47 = vld [vmem:[%s3902_s1 + $0x5d0] sm:$0xff] }
  0x49   : > { %1913 = vmatpush3.msra.mxu0 %v293_v48  ;;  %1946 = vmatpush3.msra.mxu1 %v326_v49  ;;  %v360_v48 = vld [vmem:[%s3902_s1 + $0x448] sm:$0xff]  ;;  %v393_v49 = vld [vmem:[%s3902_s1 + $0x550] sm:$0xff] }
  0x4a   : > { %1914 = vmatprep.subr.mxu0 %v308_v50  ;;  %1947 = vmatprep.subr.mxu1 %v341_v51  ;;  %v375_v50 = vld [vmem:[%s3902_s1 + $0x4c0] sm:$0xff]  ;;  %v408_v51 = vld [vmem:[%s3902_s1 + $0x5c8] sm:$0xff] }
  0x4b   : > { %1915 = vmatpush3.msra.mxu0 %v292_v52  ;;  %1948 = vmatpush3.msra.mxu1 %v325_v54  ;;  %v359_v52 = vld [vmem:[%s3902_s1 + $0x440] sm:$0xff]  ;;  %v392_v54 = vld [vmem:[%s3902_s1 + $0x548] sm:$0xff] }
  0x4c   : > { %1916 = vmatprep.subr.mxu0 %v307_v55  ;;  %1949 = vmatprep.subr.mxu1 %v340_v57  ;;  %v374_v55 = vld [vmem:[%s3902_s1 + $0x4b8] sm:$0xff]  ;;  %v407_v57 = vld [vmem:[%s3902_s1 + $0x5c0] sm:$0xff] }
  0x4d   : > { %1917 = vmatpush3.msra.mxu0 %v291_v58  ;;  %1950 = vmatpush3.msra.mxu1 %v324_v60  ;;  %v358_v58 = vld [vmem:[%s3902_s1 + $0x438] sm:$0xff]  ;;  %v391_v60 = vld [vmem:[%s3902_s1 + $0x540] sm:$0xff] }
  0x4e   : > { %1918 = vmatprep.subr.mxu0 %v306_v61  ;;  %1951 = vmatprep.subr.mxu1 %v339_v62  ;;  %v373_v61 = vld [vmem:[%s3902_s1 + $0x4b0] sm:$0xff]  ;;  %v406_v62 = vld [vmem:[%s3902_s1 + $0x5b8] sm:$0xff] }
  0x4f   : > { %1919 = vmatpush3.msra.mxu0 %v290_v63  ;;  %1952 = vmatpush3.msra.mxu1 %v323_v0  ;;  %v357_v63 = vld [vmem:[%s3902_s1 + $0x430] sm:$0xff]  ;;  %v390_v0 = vld [vmem:[%s3902_s1 + $0x538] sm:$0xff] }
  0x50   : > { %1920 = vmatprep.subr.mxu0 %v305_v2  ;;  %1953 = vmatprep.subr.mxu1 %v338_v4  ;;  %v372_v2 = vld [vmem:[%s3902_s1 + $0x4a8] sm:$0xff]  ;;  %v405_v4 = vld [vmem:[%s3902_s1 + $0x5b0] sm:$0xff] }
  0x51   : > { %1921 = vmatpush3.msra.mxu0 %v289_v5  ;;  %1954 = vmatpush3.msra.mxu1 %v322_v7  ;;  %v356_v5 = vld [vmem:[%s3902_s1 + $0x428] sm:$0xff]  ;;  %v389_v7 = vld [vmem:[%s3902_s1 + $0x530] sm:$0xff] }
  0x52   : > { %1922 = vmatprep.subr.mxu0 %v304_v8  ;;  %1955 = vmatprep.subr.mxu1 %v337_v10  ;;  %v371_v8 = vld [vmem:[%s3902_s1 + $0x4a0] sm:$0xff]  ;;  %v404_v10 = vld [vmem:[%s3902_s1 + $0x5a8] sm:$0xff] }
  0x53   : > { %1923 = vmatpush3.msra.mxu0 %v288_v11  ;;  %1956 = vmatpush3.msra.mxu1 %v321_v12  ;;  %v355_v11 = vld [vmem:[%s3902_s1 + $0x420] sm:$0xff]  ;;  %v388_v12 = vld [vmem:[%s3902_s1 + $0x528] sm:$0xff] }
  0x54   : > { %1924 = vmatprep.subr.mxu0 %v303_v13  ;;  %1957 = vmatprep.subr.mxu1 %v336_v15  ;;  %v370_v13 = vld [vmem:[%s3902_s1 + $0x498] sm:$0xff]  ;;  %v403_v15 = vld [vmem:[%s3902_s1 + $0x5a0] sm:$0xff] }
  0x55   : > { %1925 = vmatpush3.msra.mxu0 %v287_v16  ;;  %951 = vmatprep.mubr.f32.mxu0 %v643_v17  ;;  %v354_v16 = vld [vmem:[%s3902_s1 + $0x418] sm:$0xff]  ;;  %v387_v17 = vld [vmem:[%s3902_s1 + $0x520] sm:$0xff] }
  0x56   : > { %1958 = vmatpush3.msra.mxu1 %v320_v19  ;;  %952 = vmatmul.mubr.f32.vlgmr.msra.gmra.mxu0 %v639_v20  ;;  %v369_v19 = vld [vmem:[%s3902_s1 + $0x490] sm:$0xff]  ;;  %v402_v20 = vld [vmem:[%s3902_s1 + $0x598] sm:$0xff] }
  0x57   : > { %1959 = vmatprep.subr.mxu1 %v335_v21  ;;  %1964 = vmatprep.subr.mxu0 %v382_v44  ;;  %v353_v21 = vld [vmem:[%s3902_s1 + $0x410] sm:$0xff]  ;;  %v386_v44 = vld [vmem:[%s3902_s1 + $0x518] sm:$0xff] }
  0x58   : > { %1960 = vmatpush3.msra.mxu1 %v319_v22  ;;  %1021 = vmatprep.mubr.f32.mxu1 %v651_v23  ;;  %v368_v22 = vld [vmem:[%s3902_s1 + $0x488] sm:$0xff] }
  0x59   : > { %1965 = vmatpush3.msra.mxu0 %v366_v24  ;;  %1022 = vmatmul.mubr.f32.vlgmr.msra.gmra.mxu1 %v647_v25  ;;  %v3116_v23 = vld [vmem:[%s2662_s9 + $0x8] sm:$0xff]  ;;  %v401_v24 = vld [vmem:[%s3902_s1 + $0x590] sm:$0xff] }
  0x5a   : > { %1966 = vmatprep.subr.mxu0 %v381_v26  ;;  %1999 = vmatprep.subr.mxu1 %v414_v27  ;;  %v352_v25 = vld [vmem:[%s3902_s1 + $0x408] sm:$0xff]  ;;  %v385_v26 = vld [vmem:[%s3902_s1 + $0x510] sm:$0xff]  ;;  %v367_v27 = vld [vmem:[%s3902_s1 + $0x480] sm:$0xff] }
  0x5b   : > { %1967 = vmatpush3.msra.mxu0 %v365_v28  ;;  %2000 = vmatpush3.msra.mxu1 %v398_v56  ;;  %v400_v28 = vld [vmem:[%s3902_s1 + $0x588] sm:$0xff]  ;;  %v351_v56 = vld [vmem:[%s3902_s1 + $0x400] sm:$0xff] }
  0x5c   : > { %1968 = vmatprep.subr.mxu0 %v380_v29  ;;  %2001 = vmatprep.subr.mxu1 %v413_v30  ;;  %v659_v29 = vrot.slane %v3116_v23, %v2677_v53  ;;  %v384_v30 = vld [vmem:[%s3902_s1 + $0x508] sm:$0xff] }
  0x5d   : > { %1969 = vmatpush3.msra.mxu0 %v364_v31  ;;  %2002 = vmatpush3.msra.mxu1 %v397_v32  ;;  %v655_v31 = vrot.slane %v3116_v23, %v2695_v59  ;;  %v399_v32 = vld [vmem:[%s3902_s1 + $0x580] sm:$0xff] }
  0x5e   : > { %1970 = vmatprep.subr.mxu0 %v379_v33  ;;  %2003 = vmatprep.subr.mxu1 %v412_v34  ;;  %v446_v33 = vld [vmem:[%s3902_s1 + $0x6f8] sm:$0xff]  ;;  %v383_v34 = vld [vmem:[%s3902_s1 + $0x500] sm:$0xff] }
  0x5f   : > { %1971 = vmatpush3.msra.mxu0 %v363_v35  ;;  %2004 = vmatpush3.msra.mxu1 %v396_v36  ;;  %v667_v35 = vrot.slane %v3116_v23, %v2712_v1  ;;  %v430_v36 = vld [vmem:[%s3902_s1 + $0x678] sm:$0xff] }
  0x60   : > { %1972 = vmatprep.subr.mxu0 %v378_v37  ;;  %2005 = vmatprep.subr.mxu1 %v411_v38  ;;  %v663_v37 = vrot.slane %v3116_v23, %v2718_v3  ;;  %v445_v38 = vld [vmem:[%s3902_s1 + $0x6f0] sm:$0xff] }
  0x61   : > { %1973 = vmatpush3.msra.mxu0 %v362_v39  ;;  %2006 = vmatpush3.msra.mxu1 %v395_v40  ;;  %v478_v39 = vld [vmem:[%s3902_s1 + $0x7f8] sm:$0xff]  ;;  %v429_v40 = vld [vmem:[%s3902_s1 + $0x670] sm:$0xff] }
  0x62   : > { %1974 = vmatprep.subr.mxu0 %v377_v41  ;;  %2007 = vmatprep.subr.mxu1 %v410_v42  ;;  %v462_v41 = vld [vmem:[%s3902_s1 + $0x778] sm:$0xff]  ;;  %v444_v42 = vld [vmem:[%s3902_s1 + $0x6e8] sm:$0xff] }
  0x63   : > { %1975 = vmatpush3.msra.mxu0 %v361_v43  ;;  %2008 = vmatpush3.msra.mxu1 %v394_v45  ;;  %v477_v43 = vld [vmem:[%s3902_s1 + $0x7f0] sm:$0xff]  ;;  %v428_v45 = vld [vmem:[%s3902_s1 + $0x668] sm:$0xff] }
  0x64   : > { %1976 = vmatprep.subr.mxu0 %v376_v46  ;;  %2009 = vmatprep.subr.mxu1 %v409_v47  ;;  %v461_v46 = vld [vmem:[%s3902_s1 + $0x770] sm:$0xff]  ;;  %v443_v47 = vld [vmem:[%s3902_s1 + $0x6e0] sm:$0xff] }
  0x65   : > { %1977 = vmatpush3.msra.mxu0 %v360_v48  ;;  %2010 = vmatpush3.msra.mxu1 %v393_v49  ;;  %v476_v48 = vld [vmem:[%s3902_s1 + $0x7e8] sm:$0xff]  ;;  %v427_v49 = vld [vmem:[%s3902_s1 + $0x660] sm:$0xff] }
  0x66   : > { %1978 = vmatprep.subr.mxu0 %v375_v50  ;;  %2011 = vmatprep.subr.mxu1 %v408_v51  ;;  %v460_v50 = vld [vmem:[%s3902_s1 + $0x768] sm:$0xff]  ;;  %v442_v51 = vld [vmem:[%s3902_s1 + $0x6d8] sm:$0xff] }
  0x67   : > { %1979 = vmatpush3.msra.mxu0 %v359_v52  ;;  %2012 = vmatpush3.msra.mxu1 %v392_v54  ;;  %v475_v52 = vld [vmem:[%s3902_s1 + $0x7e0] sm:$0xff]  ;;  %v426_v54 = vld [vmem:[%s3902_s1 + $0x658] sm:$0xff] }
  0x68   : > { %1980 = vmatprep.subr.mxu0 %v374_v55  ;;  %2013 = vmatprep.subr.mxu1 %v407_v57  ;;  %v459_v55 = vld [vmem:[%s3902_s1 + $0x760] sm:$0xff]  ;;  %v441_v57 = vld [vmem:[%s3902_s1 + $0x6d0] sm:$0xff] }
  0x69   : > { %1981 = vmatpush3.msra.mxu0 %v358_v58  ;;  %2014 = vmatpush3.msra.mxu1 %v391_v60  ;;  %v474_v58 = vld [vmem:[%s3902_s1 + $0x7d8] sm:$0xff]  ;;  %v425_v60 = vld [vmem:[%s3902_s1 + $0x650] sm:$0xff] }
  0x6a   : > { %1982 = vmatprep.subr.mxu0 %v373_v61  ;;  %2015 = vmatprep.subr.mxu1 %v406_v62  ;;  %v458_v61 = vld [vmem:[%s3902_s1 + $0x758] sm:$0xff]  ;;  %v440_v62 = vld [vmem:[%s3902_s1 + $0x6c8] sm:$0xff] }
  0x6b   : > { %1983 = vmatpush3.msra.mxu0 %v357_v63  ;;  %2016 = vmatpush3.msra.mxu1 %v390_v0  ;;  %v473_v63 = vld [vmem:[%s3902_s1 + $0x7d0] sm:$0xff]  ;;  %v424_v0 = vld [vmem:[%s3902_s1 + $0x648] sm:$0xff] }
  0x6c   : > { %1984 = vmatprep.subr.mxu0 %v372_v2  ;;  %2017 = vmatprep.subr.mxu1 %v405_v4  ;;  %v457_v2 = vld [vmem:[%s3902_s1 + $0x750] sm:$0xff]  ;;  %v439_v4 = vld [vmem:[%s3902_s1 + $0x6c0] sm:$0xff] }
  0x6d   : > { %1985 = vmatpush3.msra.mxu0 %v356_v5  ;;  %2018 = vmatpush3.msra.mxu1 %v389_v7  ;;  %v472_v5 = vld [vmem:[%s3902_s1 + $0x7c8] sm:$0xff]  ;;  %v423_v7 = vld [vmem:[%s3902_s1 + $0x640] sm:$0xff] }
  0x6e   : > { %1986 = vmatprep.subr.mxu0 %v371_v8  ;;  %2019 = vmatprep.subr.mxu1 %v404_v10  ;;  %v456_v8 = vld [vmem:[%s3902_s1 + $0x748] sm:$0xff]  ;;  %v438_v10 = vld [vmem:[%s3902_s1 + $0x6b8] sm:$0xff] }
  0x6f   : > { %1987 = vmatpush3.msra.mxu0 %v355_v11  ;;  %2020 = vmatpush3.msra.mxu1 %v388_v12  ;;  %v471_v11 = vld [vmem:[%s3902_s1 + $0x7c0] sm:$0xff]  ;;  %v422_v12 = vld [vmem:[%s3902_s1 + $0x638] sm:$0xff] }
  0x70   : > { %1988 = vmatprep.subr.mxu0 %v370_v13  ;;  %2021 = vmatprep.subr.mxu1 %v403_v15  ;;  %v455_v13 = vld [vmem:[%s3902_s1 + $0x740] sm:$0xff]  ;;  %v437_v15 = vld [vmem:[%s3902_s1 + $0x6b0] sm:$0xff] }
  0x71   : > { %1989 = vmatpush3.msra.mxu0 %v354_v16  ;;  %2022 = vmatpush3.msra.mxu1 %v387_v17  ;;  %v470_v16 = vld [vmem:[%s3902_s1 + $0x7b8] sm:$0xff]  ;;  %v421_v17 = vld [vmem:[%s3902_s1 + $0x630] sm:$0xff] }
  0x72   : > { %1990 = vmatprep.subr.mxu0 %v369_v19  ;;  %2023 = vmatprep.subr.mxu1 %v402_v20  ;;  %v454_v19 = vld [vmem:[%s3902_s1 + $0x738] sm:$0xff]  ;;  %v436_v20 = vld [vmem:[%s3902_s1 + $0x6a8] sm:$0xff] }
  0x73   : > { %1991 = vmatpush3.msra.mxu0 %v353_v21  ;;  %2024 = vmatpush3.msra.mxu1 %v386_v44  ;;  %v469_v21 = vld [vmem:[%s3902_s1 + $0x7b0] sm:$0xff]  ;;  %v420_v44 = vld [vmem:[%s3902_s1 + $0x628] sm:$0xff] }
  0x74   : > { %1992 = vmatprep.subr.mxu0 %v368_v22  ;;  %2025 = vmatprep.subr.mxu1 %v401_v24  ;;  %v453_v22 = vld [vmem:[%s3902_s1 + $0x730] sm:$0xff]  ;;  %v435_v24 = vld [vmem:[%s3902_s1 + $0x6a0] sm:$0xff] }
  0x75   : > { %1993 = vmatpush3.msra.mxu0 %v352_v25  ;;  %2026 = vmatpush3.msra.mxu1 %v385_v26  ;;  %v468_v25 = vld [vmem:[%s3902_s1 + $0x7a8] sm:$0xff]  ;;  %v419_v26 = vld [vmem:[%s3902_s1 + $0x620] sm:$0xff] }
  0x76   : > { %1994 = vmatprep.subr.mxu0 %v367_v27  ;;  %2027 = vmatprep.subr.mxu1 %v400_v28  ;;  %v452_v27 = vld [vmem:[%s3902_s1 + $0x728] sm:$0xff]  ;;  %v434_v28 = vld [vmem:[%s3902_s1 + $0x698] sm:$0xff] }
  0x77   : > { %1995 = vmatpush3.msra.mxu0 %v351_v56  ;;  %1091 = vmatprep.mubr.f32.mxu0 %v659_v29  ;;  %v467_v56 = vld [vmem:[%s3902_s1 + $0x7a0] sm:$0xff]  ;;  %v418_v29 = vld [vmem:[%s3902_s1 + $0x618] sm:$0xff] }
  0x78   : > { %2028 = vmatpush3.msra.mxu1 %v384_v30  ;;  %1092 = vmatmul.mubr.f32.vlgmr.msra.gmra.mxu0 %v655_v31  ;;  %v451_v30 = vld [vmem:[%s3902_s1 + $0x720] sm:$0xff]  ;;  %v433_v31 = vld [vmem:[%s3902_s1 + $0x690] sm:$0xff] }
  0x79   : > { %2029 = vmatprep.subr.mxu1 %v399_v32  ;;  %2034 = vmatprep.subr.mxu0 %v446_v33  ;;  %v466_v32 = vld [vmem:[%s3902_s1 + $0x798] sm:$0xff]  ;;  %v417_v33 = vld [vmem:[%s3902_s1 + $0x610] sm:$0xff] }
  0x7a   : > { %2030 = vmatpush3.msra.mxu1 %v383_v34  ;;  %1161 = vmatprep.mubr.f32.mxu1 %v667_v35  ;;  %v450_v34 = vld [vmem:[%s3902_s1 + $0x718] sm:$0xff]  ;;  %v432_v35 = vld [vmem:[%s3902_s1 + $0x688] sm:$0xff] }
  0x7b   : > { %2035 = vmatpush3.msra.mxu0 %v430_v36  ;;  %1162 = vmatmul.mubr.f32.vlgmr.msra.gmra.mxu1 %v663_v37  ;;  %v465_v36 = vld [vmem:[%s3902_s1 + $0x790] sm:$0xff]  ;;  %v416_v37 = vld [vmem:[%s3902_s1 + $0x608] sm:$0xff] }
  0x7c   : > { %2036 = vmatprep.subr.mxu0 %v445_v38  ;;  %2069 = vmatprep.subr.mxu1 %v478_v39  ;;  %v449_v38 = vld [vmem:[%s3902_s1 + $0x710] sm:$0xff]  ;;  %v431_v39 = vld [vmem:[%s3902_s1 + $0x680] sm:$0xff] }
  0x7d   : > { %2037 = vmatpush3.msra.mxu0 %v429_v40  ;;  %2070 = vmatpush3.msra.mxu1 %v462_v41  ;;  %v464_v40 = vld [vmem:[%s3902_s1 + $0x788] sm:$0xff]  ;;  %v415_v41 = vld [vmem:[%s3902_s1 + $0x600] sm:$0xff] }
  0x7e   : > { %2038 = vmatprep.subr.mxu0 %v444_v42  ;;  %2071 = vmatprep.subr.mxu1 %v477_v43  ;;  %v675_v42 = vrot.slane %v3116_v23, %v2898_v6  ;;  %v448_v43 = vld [vmem:[%s3902_s1 + $0x708] sm:$0xff] }
  0x7f   : > { %2039 = vmatpush3.msra.mxu0 %v428_v45  ;;  %2072 = vmatpush3.msra.mxu1 %v461_v46  ;;  %v671_v45 = vrot.slane %v3116_v23, %v2907_v9  ;;  %v463_v46 = vld [vmem:[%s3902_s1 + $0x780] sm:$0xff] }
  0x80   : > { %2040 = vmatprep.subr.mxu0 %v443_v47  ;;  %2073 = vmatprep.subr.mxu1 %v476_v48  ;;  %v510_v47 = vld [vmem:[%s3902_s1 + $0x8f8] sm:$0xff]  ;;  %v447_v48 = vld [vmem:[%s3902_s1 + $0x700] sm:$0xff] }
  0x81   : > { %2041 = vmatpush3.msra.mxu0 %v427_v49  ;;  %2074 = vmatpush3.msra.mxu1 %v460_v50  ;;  %v683_v49 = vrot.slane %v3116_v23, %v2922_v14  ;;  %v494_v50 = vld [vmem:[%s3902_s1 + $0x878] sm:$0xff] }
  0x82   : > { %2042 = vmatprep.subr.mxu0 %v442_v51  ;;  %2075 = vmatprep.subr.mxu1 %v475_v52  ;;  %v679_v51 = vrot.slane %v3116_v23, %v2933_v18  ;;  %v509_v52 = vld [vmem:[%s3902_s1 + $0x8f0] sm:$0xff]  ;;  %v526_v23 = vld [vmem:[%s3902_s1 + $0x978] sm:$0xff] }
  0x83   : > { %2043 = vmatpush3.msra.mxu0 %v426_v54  ;;  %2076 = vmatpush3.msra.mxu1 %v459_v55  ;;  %v542_v54 = vld [vmem:[%s3902_s1 + $0x9f8] sm:$0xff]  ;;  %v493_v55 = vld [vmem:[%s3902_s1 + $0x870] sm:$0xff] }
  0x84   : > { %2044 = vmatprep.subr.mxu0 %v441_v57  ;;  %2077 = vmatprep.subr.mxu1 %v474_v58  ;;  %v508_v57 = vld [vmem:[%s3902_s1 + $0x8e8] sm:$0xff]  ;;  %v541_v58 = vld [vmem:[%s3902_s1 + $0x9f0] sm:$0xff] }
  0x85   : > { %2045 = vmatpush3.msra.mxu0 %v425_v60  ;;  %2078 = vmatpush3.msra.mxu1 %v458_v61  ;;  %v492_v60 = vld [vmem:[%s3902_s1 + $0x868] sm:$0xff]  ;;  %v525_v61 = vld [vmem:[%s3902_s1 + $0x970] sm:$0xff] }
  0x86   : > { %2046 = vmatprep.subr.mxu0 %v440_v62  ;;  %2079 = vmatprep.subr.mxu1 %v473_v63  ;;  %v507_v62 = vld [vmem:[%s3902_s1 + $0x8e0] sm:$0xff]  ;;  %v540_v63 = vld [vmem:[%s3902_s1 + $0x9e8] sm:$0xff] }
  0x87   : > { %2047 = vmatpush3.msra.mxu0 %v424_v0  ;;  %2080 = vmatpush3.msra.mxu1 %v457_v2  ;;  %v491_v0 = vld [vmem:[%s3902_s1 + $0x860] sm:$0xff]  ;;  %v524_v2 = vld [vmem:[%s3902_s1 + $0x968] sm:$0xff] }
  0x88   : > { %2048 = vmatprep.subr.mxu0 %v439_v4  ;;  %2081 = vmatprep.subr.mxu1 %v472_v5  ;;  %v506_v4 = vld [vmem:[%s3902_s1 + $0x8d8] sm:$0xff]  ;;  %v539_v5 = vld [vmem:[%s3902_s1 + $0x9e0] sm:$0xff] }
  0x89   : > { %2049 = vmatpush3.msra.mxu0 %v423_v7  ;;  %2082 = vmatpush3.msra.mxu1 %v456_v8  ;;  %v490_v7 = vld [vmem:[%s3902_s1 + $0x858] sm:$0xff]  ;;  %v523_v8 = vld [vmem:[%s3902_s1 + $0x960] sm:$0xff] }
  0x8a   : > { %2050 = vmatprep.subr.mxu0 %v438_v10  ;;  %2083 = vmatprep.subr.mxu1 %v471_v11  ;;  %v505_v10 = vld [vmem:[%s3902_s1 + $0x8d0] sm:$0xff]  ;;  %v538_v11 = vld [vmem:[%s3902_s1 + $0x9d8] sm:$0xff] }
  0x8b   : > { %2051 = vmatpush3.msra.mxu0 %v422_v12  ;;  %2084 = vmatpush3.msra.mxu1 %v455_v13  ;;  %v489_v12 = vld [vmem:[%s3902_s1 + $0x850] sm:$0xff]  ;;  %v522_v13 = vld [vmem:[%s3902_s1 + $0x958] sm:$0xff] }
  0x8c   : > { %2052 = vmatprep.subr.mxu0 %v437_v15  ;;  %2085 = vmatprep.subr.mxu1 %v470_v16  ;;  %v504_v15 = vld [vmem:[%s3902_s1 + $0x8c8] sm:$0xff]  ;;  %v537_v16 = vld [vmem:[%s3902_s1 + $0x9d0] sm:$0xff] }
  0x8d   : > { %2053 = vmatpush3.msra.mxu0 %v421_v17  ;;  %2086 = vmatpush3.msra.mxu1 %v454_v19  ;;  %v488_v17 = vld [vmem:[%s3902_s1 + $0x848] sm:$0xff]  ;;  %v521_v19 = vld [vmem:[%s3902_s1 + $0x950] sm:$0xff] }
  0x8e   : > { %2054 = vmatprep.subr.mxu0 %v436_v20  ;;  %2087 = vmatprep.subr.mxu1 %v469_v21  ;;  %v503_v20 = vld [vmem:[%s3902_s1 + $0x8c0] sm:$0xff]  ;;  %v536_v21 = vld [vmem:[%s3902_s1 + $0x9c8] sm:$0xff] }
  0x8f   : > { %2055 = vmatpush3.msra.mxu0 %v420_v44  ;;  %2088 = vmatpush3.msra.mxu1 %v453_v22  ;;  %v487_v44 = vld [vmem:[%s3902_s1 + $0x840] sm:$0xff]  ;;  %v520_v22 = vld [vmem:[%s3902_s1 + $0x948] sm:$0xff] }
  0x90   : > { %2056 = vmatprep.subr.mxu0 %v435_v24  ;;  %2089 = vmatprep.subr.mxu1 %v468_v25  ;;  %v502_v24 = vld [vmem:[%s3902_s1 + $0x8b8] sm:$0xff]  ;;  %v535_v25 = vld [vmem:[%s3902_s1 + $0x9c0] sm:$0xff] }
  0x91   : > { %2057 = vmatpush3.msra.mxu0 %v419_v26  ;;  %2090 = vmatpush3.msra.mxu1 %v452_v27  ;;  %v486_v26 = vld [vmem:[%s3902_s1 + $0x838] sm:$0xff]  ;;  %v519_v27 = vld [vmem:[%s3902_s1 + $0x940] sm:$0xff] }
  0x92   : > { %2058 = vmatprep.subr.mxu0 %v434_v28  ;;  %2091 = vmatprep.subr.mxu1 %v467_v56  ;;  %v501_v28 = vld [vmem:[%s3902_s1 + $0x8b0] sm:$0xff]  ;;  %v534_v56 = vld [vmem:[%s3902_s1 + $0x9b8] sm:$0xff] }
  0x93   : > { %2059 = vmatpush3.msra.mxu0 %v418_v29  ;;  %2092 = vmatpush3.msra.mxu1 %v451_v30  ;;  %v485_v29 = vld [vmem:[%s3902_s1 + $0x830] sm:$0xff]  ;;  %v518_v30 = vld [vmem:[%s3902_s1 + $0x938] sm:$0xff] }
  0x94   : > { %2060 = vmatprep.subr.mxu0 %v433_v31  ;;  %2093 = vmatprep.subr.mxu1 %v466_v32  ;;  %v500_v31 = vld [vmem:[%s3902_s1 + $0x8a8] sm:$0xff]  ;;  %v533_v32 = vld [vmem:[%s3902_s1 + $0x9b0] sm:$0xff] }
  0x95   : > { %2061 = vmatpush3.msra.mxu0 %v417_v33  ;;  %2094 = vmatpush3.msra.mxu1 %v450_v34  ;;  %v484_v33 = vld [vmem:[%s3902_s1 + $0x828] sm:$0xff]  ;;  %v517_v34 = vld [vmem:[%s3902_s1 + $0x930] sm:$0xff] }
  0x96   : > { %2062 = vmatprep.subr.mxu0 %v432_v35  ;;  %2095 = vmatprep.subr.mxu1 %v465_v36  ;;  %v499_v35 = vld [vmem:[%s3902_s1 + $0x8a0] sm:$0xff]  ;;  %v532_v36 = vld [vmem:[%s3902_s1 + $0x9a8] sm:$0xff] }
  0x97   : > { %2063 = vmatpush3.msra.mxu0 %v416_v37  ;;  %2096 = vmatpush3.msra.mxu1 %v449_v38  ;;  %v483_v37 = vld [vmem:[%s3902_s1 + $0x820] sm:$0xff]  ;;  %v516_v38 = vld [vmem:[%s3902_s1 + $0x928] sm:$0xff] }
  0x98   : > { %2064 = vmatprep.subr.mxu0 %v431_v39  ;;  %2097 = vmatprep.subr.mxu1 %v464_v40  ;;  %v498_v39 = vld [vmem:[%s3902_s1 + $0x898] sm:$0xff]  ;;  %v531_v40 = vld [vmem:[%s3902_s1 + $0x9a0] sm:$0xff] }
  0x99   : > { %2065 = vmatpush3.msra.mxu0 %v415_v41  ;;  %1231 = vmatprep.mubr.f32.mxu0 %v675_v42  ;;  %v482_v41 = vld [vmem:[%s3902_s1 + $0x818] sm:$0xff]  ;;  %v515_v42 = vld [vmem:[%s3902_s1 + $0x920] sm:$0xff] }
  0x9a   : > { %2098 = vmatpush3.msra.mxu1 %v448_v43  ;;  %1232 = vmatmul.mubr.f32.vlgmr.msra.gmra.mxu0 %v671_v45  ;;  %v497_v43 = vld [vmem:[%s3902_s1 + $0x890] sm:$0xff]  ;;  %v530_v45 = vld [vmem:[%s3902_s1 + $0x998] sm:$0xff] }
  0x9b   : > { %2099 = vmatprep.subr.mxu1 %v463_v46  ;;  %2104 = vmatprep.subr.mxu0 %v510_v47  ;;  %v481_v46 = vld [vmem:[%s3902_s1 + $0x810] sm:$0xff]  ;;  %v514_v47 = vld [vmem:[%s3902_s1 + $0x918] sm:$0xff] }
  0x9c   : > { %2100 = vmatpush3.msra.mxu1 %v447_v48  ;;  %1301 = vmatprep.mubr.f32.mxu1 %v683_v49  ;;  %v496_v48 = vld [vmem:[%s3902_s1 + $0x888] sm:$0xff]  ;;  %v3519_v49 = vld [vmem:[%s2662_s9 + $0x10] sm:$0xff] }
  0x9d   : > { %2105 = vmatpush3.msra.mxu0 %v494_v50  ;;  %1302 = vmatmul.mubr.f32.vlgmr.msra.gmra.mxu1 %v679_v51  ;;  %v529_v50 = vld [vmem:[%s3902_s1 + $0x990] sm:$0xff]  ;;  %v480_v51 = vld [vmem:[%s3902_s1 + $0x808] sm:$0xff] }
  0x9e   : > { %2106 = vmatprep.subr.mxu0 %v509_v52  ;;  %2139 = vmatprep.subr.mxu1 %v542_v54  ;;  %v513_v52 = vld [vmem:[%s3902_s1 + $0x910] sm:$0xff]  ;;  %v495_v54 = vld [vmem:[%s3902_s1 + $0x880] sm:$0xff] }
  0x9f   : > { %2107 = vmatpush3.msra.mxu0 %v493_v55  ;;  %2140 = vmatpush3.msra.mxu1 %v526_v23  ;;  %v528_v55 = vld [vmem:[%s3902_s1 + $0x988] sm:$0xff]  ;;  %v479_v23 = vld [vmem:[%s3902_s1 + $0x800] sm:$0xff] }
  0xa0   : > { %2108 = vmatprep.subr.mxu0 %v508_v57  ;;  %2141 = vmatprep.subr.mxu1 %v541_v58  ;;  %v691_v57 = vrot.slane %v3519_v49, %v2677_v53  ;;  %v512_v58 = vld [vmem:[%s3902_s1 + $0x908] sm:$0xff]  ;;  %v574_v53 = vld [vmem:[%s3902_s1 + $0xaf8] sm:$0xff] }
  0xa1   : > { %2109 = vmatpush3.msra.mxu0 %v492_v60  ;;  %2142 = vmatpush3.msra.mxu1 %v525_v61  ;;  %v687_v60 = vrot.slane %v3519_v49, %v2695_v59  ;;  %v527_v61 = vld [vmem:[%s3902_s1 + $0x980] sm:$0xff]  ;;  %v558_v59 = vld [vmem:[%s3902_s1 + $0xa78] sm:$0xff] }
  0xa2   : > { %2110 = vmatprep.subr.mxu0 %v507_v62  ;;  %2143 = vmatprep.subr.mxu1 %v540_v63  ;;  %v511_v62 = vld [vmem:[%s3902_s1 + $0x900] sm:$0xff]  ;;  %v699_v63 = vrot.slane %v3519_v49, %v2712_v1  ;;  %v606_v1 = vld [vmem:[%s3902_s1 + $0xbf8] sm:$0xff] }
  0xa3   : > { %2111 = vmatpush3.msra.mxu0 %v491_v0  ;;  %2144 = vmatpush3.msra.mxu1 %v524_v2  ;;  %v695_v0 = vrot.slane %v3519_v49, %v2718_v3  ;;  %v573_v2 = vld [vmem:[%s3902_s1 + $0xaf0] sm:$0xff]  ;;  %v590_v3 = vld [vmem:[%s3902_s1 + $0xb78] sm:$0xff] }
  0xa4   : > { %2112 = vmatprep.subr.mxu0 %v506_v4  ;;  %2145 = vmatprep.subr.mxu1 %v539_v5  ;;  %v557_v4 = vld [vmem:[%s3902_s1 + $0xa70] sm:$0xff]  ;;  %v572_v5 = vld [vmem:[%s3902_s1 + $0xae8] sm:$0xff] }
  0xa5   : > { %2113 = vmatpush3.msra.mxu0 %v490_v7  ;;  %2146 = vmatpush3.msra.mxu1 %v523_v8  ;;  %v605_v7 = vld [vmem:[%s3902_s1 + $0xbf0] sm:$0xff]  ;;  %v556_v8 = vld [vmem:[%s3902_s1 + $0xa68] sm:$0xff] }
  0xa6   : > { %2114 = vmatprep.subr.mxu0 %v505_v10  ;;  %2147 = vmatprep.subr.mxu1 %v538_v11  ;;  %v589_v10 = vld [vmem:[%s3902_s1 + $0xb70] sm:$0xff]  ;;  %v571_v11 = vld [vmem:[%s3902_s1 + $0xae0] sm:$0xff] }
  0xa7   : > { %2115 = vmatpush3.msra.mxu0 %v489_v12  ;;  %2148 = vmatpush3.msra.mxu1 %v522_v13  ;;  %v604_v12 = vld [vmem:[%s3902_s1 + $0xbe8] sm:$0xff]  ;;  %v555_v13 = vld [vmem:[%s3902_s1 + $0xa60] sm:$0xff] }
  0xa8   : > { %2116 = vmatprep.subr.mxu0 %v504_v15  ;;  %2149 = vmatprep.subr.mxu1 %v537_v16  ;;  %v588_v15 = vld [vmem:[%s3902_s1 + $0xb68] sm:$0xff]  ;;  %v570_v16 = vld [vmem:[%s3902_s1 + $0xad8] sm:$0xff] }
  0xa9   : > { %2117 = vmatpush3.msra.mxu0 %v488_v17  ;;  %2150 = vmatpush3.msra.mxu1 %v521_v19  ;;  %v603_v17 = vld [vmem:[%s3902_s1 + $0xbe0] sm:$0xff]  ;;  %v554_v19 = vld [vmem:[%s3902_s1 + $0xa58] sm:$0xff] }
  0xaa   : > { %2118 = vmatprep.subr.mxu0 %v503_v20  ;;  %2151 = vmatprep.subr.mxu1 %v536_v21  ;;  %v587_v20 = vld [vmem:[%s3902_s1 + $0xb60] sm:$0xff]  ;;  %v569_v21 = vld [vmem:[%s3902_s1 + $0xad0] sm:$0xff] }
  0xab   : > { %2119 = vmatpush3.msra.mxu0 %v487_v44  ;;  %2152 = vmatpush3.msra.mxu1 %v520_v22  ;;  %v602_v44 = vld [vmem:[%s3902_s1 + $0xbd8] sm:$0xff]  ;;  %v553_v22 = vld [vmem:[%s3902_s1 + $0xa50] sm:$0xff] }
  0xac   : > { %2120 = vmatprep.subr.mxu0 %v502_v24  ;;  %2153 = vmatprep.subr.mxu1 %v535_v25  ;;  %v586_v24 = vld [vmem:[%s3902_s1 + $0xb58] sm:$0xff]  ;;  %v568_v25 = vld [vmem:[%s3902_s1 + $0xac8] sm:$0xff] }
  0xad   : > { %2121 = vmatpush3.msra.mxu0 %v486_v26  ;;  %2154 = vmatpush3.msra.mxu1 %v519_v27  ;;  %v601_v26 = vld [vmem:[%s3902_s1 + $0xbd0] sm:$0xff]  ;;  %v552_v27 = vld [vmem:[%s3902_s1 + $0xa48] sm:$0xff] }
  0xae   : > { %2122 = vmatprep.subr.mxu0 %v501_v28  ;;  %2155 = vmatprep.subr.mxu1 %v534_v56  ;;  %v585_v28 = vld [vmem:[%s3902_s1 + $0xb50] sm:$0xff]  ;;  %v567_v56 = vld [vmem:[%s3902_s1 + $0xac0] sm:$0xff] }
  0xaf   : > { %2123 = vmatpush3.msra.mxu0 %v485_v29  ;;  %2156 = vmatpush3.msra.mxu1 %v518_v30  ;;  %v600_v29 = vld [vmem:[%s3902_s1 + $0xbc8] sm:$0xff]  ;;  %v551_v30 = vld [vmem:[%s3902_s1 + $0xa40] sm:$0xff] }
  0xb0   : > { %2124 = vmatprep.subr.mxu0 %v500_v31  ;;  %2157 = vmatprep.subr.mxu1 %v533_v32  ;;  %v584_v31 = vld [vmem:[%s3902_s1 + $0xb48] sm:$0xff]  ;;  %v566_v32 = vld [vmem:[%s3902_s1 + $0xab8] sm:$0xff] }
  0xb1   : > { %2125 = vmatpush3.msra.mxu0 %v484_v33  ;;  %2158 = vmatpush3.msra.mxu1 %v517_v34  ;;  %v599_v33 = vld [vmem:[%s3902_s1 + $0xbc0] sm:$0xff]  ;;  %v550_v34 = vld [vmem:[%s3902_s1 + $0xa38] sm:$0xff] }
  0xb2   : > { %2126 = vmatprep.subr.mxu0 %v499_v35  ;;  %2159 = vmatprep.subr.mxu1 %v532_v36  ;;  %v583_v35 = vld [vmem:[%s3902_s1 + $0xb40] sm:$0xff]  ;;  %v565_v36 = vld [vmem:[%s3902_s1 + $0xab0] sm:$0xff] }
  0xb3   : > { %2127 = vmatpush3.msra.mxu0 %v483_v37  ;;  %2160 = vmatpush3.msra.mxu1 %v516_v38  ;;  %v598_v37 = vld [vmem:[%s3902_s1 + $0xbb8] sm:$0xff]  ;;  %v549_v38 = vld [vmem:[%s3902_s1 + $0xa30] sm:$0xff] }
  0xb4   : > { %2128 = vmatprep.subr.mxu0 %v498_v39  ;;  %2161 = vmatprep.subr.mxu1 %v531_v40  ;;  %v582_v39 = vld [vmem:[%s3902_s1 + $0xb38] sm:$0xff]  ;;  %v564_v40 = vld [vmem:[%s3902_s1 + $0xaa8] sm:$0xff] }
  0xb5   : > { %2129 = vmatpush3.msra.mxu0 %v482_v41  ;;  %2162 = vmatpush3.msra.mxu1 %v515_v42  ;;  %v597_v41 = vld [vmem:[%s3902_s1 + $0xbb0] sm:$0xff]  ;;  %v548_v42 = vld [vmem:[%s3902_s1 + $0xa28] sm:$0xff] }
  0xb6   : > { %2130 = vmatprep.subr.mxu0 %v497_v43  ;;  %2163 = vmatprep.subr.mxu1 %v530_v45  ;;  %v581_v43 = vld [vmem:[%s3902_s1 + $0xb30] sm:$0xff]  ;;  %v563_v45 = vld [vmem:[%s3902_s1 + $0xaa0] sm:$0xff] }
  0xb7   : > { %2131 = vmatpush3.msra.mxu0 %v481_v46  ;;  %2164 = vmatpush3.msra.mxu1 %v514_v47  ;;  %v596_v46 = vld [vmem:[%s3902_s1 + $0xba8] sm:$0xff]  ;;  %v547_v47 = vld [vmem:[%s3902_s1 + $0xa20] sm:$0xff] }
  0xb8   : > { %2132 = vmatprep.subr.mxu0 %v496_v48  ;;  %2165 = vmatprep.subr.mxu1 %v529_v50  ;;  %v580_v48 = vld [vmem:[%s3902_s1 + $0xb28] sm:$0xff]  ;;  %v562_v50 = vld [vmem:[%s3902_s1 + $0xa98] sm:$0xff] }
  0xb9   : > { %2133 = vmatpush3.msra.mxu0 %v480_v51  ;;  %2166 = vmatpush3.msra.mxu1 %v513_v52  ;;  %v595_v51 = vld [vmem:[%s3902_s1 + $0xba0] sm:$0xff]  ;;  %v546_v52 = vld [vmem:[%s3902_s1 + $0xa18] sm:$0xff] }
  0xba   : > { %2134 = vmatprep.subr.mxu0 %v495_v54  ;;  %2167 = vmatprep.subr.mxu1 %v528_v55  ;;  %v579_v54 = vld [vmem:[%s3902_s1 + $0xb20] sm:$0xff]  ;;  %v561_v55 = vld [vmem:[%s3902_s1 + $0xa90] sm:$0xff] }
  0xbb   : > { %2135 = vmatpush3.msra.mxu0 %v479_v23  ;;  %1371 = vmatprep.mubr.f32.mxu0 %v691_v57  ;;  %v594_v23 = vld [vmem:[%s3902_s1 + $0xb98] sm:$0xff]  ;;  %v545_v57 = vld [vmem:[%s3902_s1 + $0xa10] sm:$0xff] }
  0xbc   : > { %2168 = vmatpush3.msra.mxu1 %v512_v58  ;;  %1372 = vmatmul.mubr.f32.vlgmr.msra.gmra.mxu0 %v687_v60  ;;  %v578_v58 = vld [vmem:[%s3902_s1 + $0xb18] sm:$0xff]  ;;  %v560_v60 = vld [vmem:[%s3902_s1 + $0xa88] sm:$0xff] }
  0xbd   : > { %2169 = vmatprep.subr.mxu1 %v527_v61  ;;  %2174 = vmatprep.subr.mxu0 %v574_v53  ;;  %v593_v61 = vld [vmem:[%s3902_s1 + $0xb90] sm:$0xff]  ;;  %v544_v53 = vld [vmem:[%s3902_s1 + $0xa08] sm:$0xff] }
  0xbe   : > { %2170 = vmatpush3.msra.mxu1 %v511_v62  ;;  %1441 = vmatprep.mubr.f32.mxu1 %v699_v63  ;;  %v577_v62 = vld [vmem:[%s3902_s1 + $0xb10] sm:$0xff]  ;;  %v559_v63 = vld [vmem:[%s3902_s1 + $0xa80] sm:$0xff] }
  0xbf   : > { %2175 = vmatpush3.msra.mxu0 %v558_v59  ;;  %1442 = vmatmul.mubr.f32.vlgmr.msra.gmra.mxu1 %v695_v0  ;;  %v592_v59 = vld [vmem:[%s3902_s1 + $0xb88] sm:$0xff]  ;;  %v543_v0 = vld [vmem:[%s3902_s1 + $0xa00] sm:$0xff] }
  0xc0   : > { %2176 = vmatprep.subr.mxu0 %v573_v2  ;;  %2209 = vmatprep.subr.mxu1 %v606_v1  ;;  %v707_v2 = vrot.slane %v3519_v49, %v2898_v6  ;;  %v576_v1 = vld [vmem:[%s3902_s1 + $0xb08] sm:$0xff]  ;;  %v575_v6 = vld [vmem:[%s3902_s1 + $0xb00] sm:$0xff] }
  0xc1   : > { %2177 = vmatpush3.msra.mxu0 %v557_v4  ;;  %2210 = vmatpush3.msra.mxu1 %v590_v3  ;;  %v703_v4 = vrot.slane %v3519_v49, %v2907_v9  ;;  %v591_v3 = vld [vmem:[%s3902_s1 + $0xb80] sm:$0xff]  ;;  %v614_v9 = vld [vmem:[%s3902_s1 + $0xc38] sm:$0xff] }
  0xc2   : > { %2178 = vmatprep.subr.mxu0 %v572_v5  ;;  %2211 = vmatprep.subr.mxu1 %v605_v7  ;;  %v715_v5 = vrot.slane %v3519_v49, %v2922_v14  ;;  %v711_v7 = vrot.slane %v3519_v49, %v2933_v18  ;;  %v612_v14 = vld [vmem:[%s3902_s1 + $0xc28] sm:$0xff]  ;;  %v611_v18 = vld [vmem:[%s3902_s1 + $0xc20] sm:$0xff]  ;;  %v610_v49 = vld [vmem:[%s3902_s1 + $0xc18] sm:$0xff] }
  0xc3   : > { %2179 = vmatpush3.msra.mxu0 %v556_v8  ;;  %2212 = vmatpush3.msra.mxu1 %v589_v10  ;;  %v2428_v8 = vmov 0.0   ;;  %v613_v10 = vld [vmem:[%s3902_s1 + $0xc30] sm:$0xff] }
  0xc4   : > { %2180 = vmatprep.subr.mxu0 %v571_v11  ;;  %2213 = vmatprep.subr.mxu1 %v604_v12  ;;  %v609_v11 = vld [vmem:[%s3902_s1 + $0xc10] sm:$0xff]  ;;  %v608_v12 = vld [vmem:[%s3902_s1 + $0xc08] sm:$0xff] }
  0xc5   : > { %2181 = vmatpush3.msra.mxu0 %v555_v13  ;;  %2214 = vmatpush3.msra.mxu1 %v588_v15  ;;  %v607_v13 = vld [vmem:[%s3902_s1 + $0xc00] sm:$0xff]  ;;  %v1819_v15 = vld [vmem:[%s2662_s9 + $0x18] ss:$0 sm:$0xff]  ;;  %s214_s9 = scalar_lea.vmem [#allocation2], %s213_s12 }
  0xc6   : > { %2182 = vmatprep.subr.mxu0 %v570_v16  ;;  %2215 = vmatprep.subr.mxu1 %v603_v17  ;;  %v1673_v16 = vld [vmem:[%s3904_s3 + $0x78] sm:$0xff]  ;;  %v1672_v17 = vld [vmem:[%s3904_s3 + $0x70] sm:$0xff]  ;;  %s1760_s15 = sshll.u32 %s214_s9, 4  ;;  %s1761_s15 = int_to_ptr.vmem [resolvable:$true] %s1760_s15 }
  0xc7   : > { %2183 = vmatpush3.msra.mxu0 %v554_v19  ;;  %2216 = vmatpush3.msra.mxu1 %v587_v20  ;;  %v1671_v19 = vld [vmem:[%s3904_s3 + $0x68] sm:$0xff]  ;;  %v1670_v20 = vld [vmem:[%s3904_s3 + $0x60] sm:$0xff]  ;;  %s2366_s26 = scalar_lea.vmem %s1761_s15, 16  ;;  %p2373_p0 = scmp.lt.s32.totalorder %s1761_s15, %s2371_s6 }
  0xc8   : > { %2184 = vmatprep.subr.mxu0 %v569_v21  ;;  %2217 = vmatprep.subr.mxu1 %v602_v44  ;;  %v1669_v21 = vld [vmem:[%s3904_s3 + $0x58] sm:$0xff]  ;;  %v1668_v44 = vld [vmem:[%s3904_s3 + $0x50] sm:$0xff]  ;;  %p2367_p11 = scmp.ne.s32.totalorder %s1761_s15, %s2366_s26  ;;  %p2374_p1 = scmp.lt.s32.totalorder %s2372_s7, %s2366_s26 }
  0xc9   : > { %2185 = vmatpush3.msra.mxu0 %v553_v22  ;;  %2218 = vmatpush3.msra.mxu1 %v586_v24  ;;  %v1667_v22 = vld [vmem:[%s3904_s3 + $0x48] sm:$0xff]  ;;  %v1666_v24 = vld [vmem:[%s3904_s3 + $0x40] sm:$0xff] }
  0xca   : > { %2186 = vmatprep.subr.mxu0 %v568_v25  ;;  %2219 = vmatprep.subr.mxu1 %v601_v26  ;;  %v1665_v25 = vld [vmem:[%s3904_s3 + $0x38] sm:$0xff]  ;;  %v1664_v26 = vld [vmem:[%s3904_s3 + $0x30] sm:$0xff]  ;;  %p2368_p12 = pnand %p2367_p11, %p2499_p5  ;;  %p2375_p2 = por %p2374_p1, %p2373_p0 }
  0xcb   : > { %2187 = vmatpush3.msra.mxu0 %v552_v27  ;;  %2220 = vmatpush3.msra.mxu1 %v585_v28  ;;  %v1663_v27 = vld [vmem:[%s3904_s3 + $0x28] sm:$0xff]  ;;  %v1662_v28 = vld [vmem:[%s3904_s3 + $0x20] sm:$0xff] }
  0xcc   : > { %2188 = vmatprep.subr.mxu0 %v567_v56  ;;  %2221 = vmatprep.subr.mxu1 %v600_v29  ;;  %v1661_v56 = vld [vmem:[%s3904_s3 + $0x18] sm:$0xff]  ;;  %v1660_v29 = vld [vmem:[%s3904_s3 + $0x10] sm:$0xff]  ;;  %p2369_p13 = pneg %p2368_p12 }
  0xcd   : > { %2189 = vmatpush3.msra.mxu0 %v551_v30  ;;  %2222 = vmatpush3.msra.mxu1 %v584_v31  ;;  %v1659_v30 = vld [vmem:[%s3904_s3 + $0x8] sm:$0xff]  ;;  %v1658_v31 = vld [vmem:[%s3904_s3] sm:$0xff] }
  0xce   : > { %2190 = vmatprep.subr.mxu0 %v566_v32  ;;  %2223 = vmatprep.subr.mxu1 %v599_v33  ;;  %p2376_p3 = pnand %p2375_p2, %p2369_p13 }
  0xcf   : > { %2191 = vmatpush3.msra.mxu0 %v550_v34  ;;  %2224 = vmatpush3.msra.mxu1 %v583_v35 }
  0xd0   : > { %2192 = vmatprep.subr.mxu0 %v565_v36  ;;  %2225 = vmatprep.subr.mxu1 %v598_v37  ;;  %v615_v37 = vld [vmem:[%s3903_s2] sm:$0x1] }
  0xd1   : > { %2193 = vmatpush3.msra.mxu0 %v549_v38  ;;  %2226 = vmatpush3.msra.mxu1 %v582_v39 }
  0xd2   : > { %2194 = vmatprep.subr.mxu0 %v564_v40  ;;  %2227 = vmatprep.subr.mxu1 %v597_v41 }
  0xd3   : > { %2195 = vmatpush3.msra.mxu0 %v548_v42  ;;  %2228 = vmatpush3.msra.mxu1 %v581_v43 }
  0xd4   : > { %2196 = vmatprep.subr.mxu0 %v563_v45  ;;  %2229 = vmatprep.subr.mxu1 %v596_v46 }
  0xd5   : > { %2197 = vmatpush3.msra.mxu0 %v547_v47  ;;  %2230 = vmatpush3.msra.mxu1 %v580_v48 }
  0xd6   : > { %2198 = vmatprep.subr.mxu0 %v562_v50  ;;  %2231 = vmatprep.subr.mxu1 %v595_v51 }
  0xd7   : > { %2199 = vmatpush3.msra.mxu0 %v546_v52  ;;  %2232 = vmatpush3.msra.mxu1 %v579_v54 }
  0xd8   : > { %2200 = vmatprep.subr.mxu0 %v561_v55  ;;  %2233 = vmatprep.subr.mxu1 %v594_v23 }
  0xd9   : > { %2201 = vmatpush3.msra.mxu0 %v545_v57  ;;  %2234 = vmatpush3.msra.mxu1 %v578_v58 }
  0xda   : > { %2202 = vmatprep.subr.mxu0 %v560_v60  ;;  %2235 = vmatprep.subr.mxu1 %v593_v61 }
  0xdb   : > { %2203 = vmatpush3.msra.mxu0 %v544_v53  ;;  %2236 = vmatpush3.msra.mxu1 %v577_v62 }
  0xdc   : > { %2204 = vmatprep.subr.mxu0 %v559_v63  ;;  %2237 = vmatprep.subr.mxu1 %v592_v59 }
  0xdd   : > { %2205 = vmatpush3.msra.mxu0 %v543_v0  ;;  %1511 = vmatprep.mubr.f32.mxu0 %v707_v2 }
  0xde   : > { %2238 = vmatpush3.msra.mxu1 %v576_v1  ;;  %1512 = vmatmul.mubr.f32.vlgmr.msra.gmra.mxu0 %v703_v4 }
  0xdf   : > { %2239 = vmatprep.subr.mxu1 %v591_v3  ;;  %2270 = vmatprep.subr.mxu0 %v2428_v8 }
  0xe0   : > { %2240 = vmatpush3.msra.mxu1 %v575_v6  ;;  %1581 = vmatprep.mubr.f32.mxu1 %v715_v5 }
  0xe1   : > { %2271 = vmatpush3.msra.mxu0 %v614_v9  ;;  %1582 = vmatmul.mubr.f32.vlgmr.msra.gmra.mxu1 %v711_v7 }
  0xe2   : > { %2272 = vmatprep.subr.mxu0 %v2428_v8  ;;  %2286 = vmatprep.mubr.msk.f32.mxu0 %vm2429_vm0, %v2428_v8 }
  0xe3   : > { %2273 = vmatpush3.msra.mxu0 %v613_v10  ;;  %2289 = vmatprep.subr.mxu1 %v2428_v8 }
  0xe4   : > { %2274 = vmatprep.subr.mxu0 %v2428_v8  ;;  %2321 = vmatprep.mubr.msk.f32.mxu1 %vm2429_vm0, %v2428_v8 }
  0xe5   : > { %2275 = vmatpush3.msra.mxu0 %v612_v14  ;;  %2290 = vmatpush3.msra.mxu1 %v1673_v16 }
  0xe6   : > { %2276 = vmatprep.subr.mxu0 %v2428_v8  ;;  %2291 = vmatprep.subr.mxu1 %v2428_v8 }
  0xe7   : > { %2277 = vmatpush3.msra.mxu0 %v611_v18  ;;  %2292 = vmatpush3.msra.mxu1 %v1672_v17 }
  0xe8   : > { %2278 = vmatprep.subr.mxu0 %v2428_v8  ;;  %2293 = vmatprep.subr.mxu1 %v2428_v8 }
  0xe9   : > { %2279 = vmatpush3.msra.mxu0 %v610_v49  ;;  %2294 = vmatpush3.msra.mxu1 %v1671_v19 }
  0xea   : > { %2280 = vmatprep.subr.mxu0 %v2428_v8  ;;  %2295 = vmatprep.subr.mxu1 %v2428_v8 }
  0xeb   : > { %2281 = vmatpush3.msra.mxu0 %v609_v11  ;;  %2296 = vmatpush3.msra.mxu1 %v1670_v20 }
  0xec   : > { %2282 = vmatprep.subr.mxu0 %v2428_v8  ;;  %2297 = vmatprep.subr.mxu1 %v2428_v8 }
  0xed   : > { %2283 = vmatpush3.msra.mxu0 %v608_v12  ;;  %2298 = vmatpush3.msra.mxu1 %v1669_v21 }
  0xee   : > { %2284 = vmatprep.subr.mxu0 %v2428_v8  ;;  %2299 = vmatprep.subr.mxu1 %v2428_v8 }
  0xef   : > { %2285 = vmatpush3.msra.mxu0 %v607_v13  ;;  %2300 = vmatpush3.msra.mxu1 %v1668_v44  ;;  %v1674_v44 = vld [vmem:[%s3905_s4] sm:$0x1] }
  0xf0   : > { %2287 = vmatmul.mubr.msk.f32.vlgmr.msra.gmra.mxu0 %vm744_vm1, %v1819_v15  ;;  %2301 = vmatprep.subr.mxu1 %v2428_v8 }
  0xf1   : > { %2302 = vmatpush3.msra.mxu1 %v1667_v22 }
  0xf2   : > { %2303 = vmatprep.subr.mxu1 %v2428_v8 }
  0xf3   : > { %2304 = vmatpush3.msra.mxu1 %v1666_v24 }
  0xf4   : > { %2305 = vmatprep.subr.mxu1 %v2428_v8  ;;  %v1856_v32 = vpop.f32.mrf.mxu0 }
  0xf5   : > { %2306 = vmatpush3.msra.mxu1 %v1665_v25 }
  0xf6   : > { %2307 = vmatprep.subr.mxu1 %v2428_v8  ;;  %v1857_v33 = vpop.f32.mrf.mxu0 }
  0xf7   : > { %2308 = vmatpush3.msra.mxu1 %v1664_v26  ;;  %v1891_v34 = vpop.f32.mrf.mxu1  ;;  %v1858_v36 = vadd.f32 %v1857_v33, %v1856_v32 }
  0xf8   : > { %2309 = vmatprep.subr.mxu1 %v2428_v8 }
  0xf9   : > { %2310 = vmatpush3.msra.mxu1 %v1663_v27  ;;  %v1892_v38 = vpop.f32.mrf.mxu1  ;;  %v814_v41 = vadd.f32 %v1858_v36, %v615_v37 }
  0xfa   : > { %2311 = vmatprep.subr.mxu1 %v2428_v8  ;;  %v1893_v42 = vadd.f32 %v1892_v38, %v1891_v34 }
  0xfb   : > { %2312 = vmatpush3.msra.mxu1 %v1662_v28 }
  0xfc   : > { %2313 = vmatprep.subr.mxu1 %v2428_v8  ;;  %v884_v47 = vadd.f32 %v1893_v42, %v814_v41 }
  0xfd   : > { %2314 = vmatpush3.msra.mxu1 %v1661_v56 }
  0xfe   : > { %2315 = vmatprep.subr.mxu1 %v2428_v8 }
  0xff   : > { %2316 = vmatpush3.msra.mxu1 %v1660_v29 }
 0x100   : > { %2317 = vmatprep.subr.mxu1 %v2428_v8 }
 0x101   : > { %2318 = vmatpush3.msra.mxu1 %v1659_v30 }
 0x102   : > { %2319 = vmatprep.subr.mxu1 %v2428_v8 }
 0x103   : > { %2320 = vmatpush3.msra.mxu1 %v1658_v31 }
 0x116   : > { %v1926_v35 = vpop.f32.mrf.mxu0 }
 0x118   : > { %v1927_v39 = vpop.f32.mrf.mxu0 }
 0x119   : > { %v1961_v40 = vpop.f32.mrf.mxu1  ;;  %v1928_v45 = vadd.f32 %v1927_v39, %v1926_v35 }
 0x11b   : > { %v1962_v46 = vpop.f32.mrf.mxu1  ;;  %v954_v51 = vadd.f32 %v1928_v45, %v884_v47 }
 0x11c   : > { %v1963_v52 = vadd.f32 %v1962_v46, %v1961_v40 }
 0x11e   : > { %v1024_v57 = vadd.f32 %v1963_v52, %v954_v51 }
 0x138   : > { %v1996_v43 = vpop.f32.mrf.mxu0 }
 0x13a   : > { %v1997_v48 = vpop.f32.mrf.mxu0 }
 0x13b   : > { %v2031_v50 = vpop.f32.mrf.mxu1  ;;  %v1998_v55 = vadd.f32 %v1997_v48, %v1996_v43 }
 0x13d   : > { %v2032_v23 = vpop.f32.mrf.mxu1  ;;  %v1094_v61 = vadd.f32 %v1998_v55, %v1024_v57 }
 0x13e   : > { %v2033_v53 = vadd.f32 %v2032_v23, %v2031_v50 }
 0x140   : > { %v1164_v0 = vadd.f32 %v2033_v53, %v1094_v61 }
 0x15a   : > { %v2066_v54 = vpop.f32.mrf.mxu0 }
 0x15c   : > { %v2067_v58 = vpop.f32.mrf.mxu0 }
 0x15d   : > { %v2101_v60 = vpop.f32.mrf.mxu1  ;;  %v2068_v63 = vadd.f32 %v2067_v58, %v2066_v54 }
 0x15f   : > { %v2102_v59 = vpop.f32.mrf.mxu1  ;;  %v1234_v4 = vadd.f32 %v2068_v63, %v1164_v0 }
 0x160   : > { %v2103_v3 = vadd.f32 %v2102_v59, %v2101_v60 }
 0x162   : > { %v1304_v7 = vadd.f32 %v2103_v3, %v1234_v4 }
 0x17c   : > { %v2136_v62 = vpop.f32.mrf.mxu0 }
 0x17e   : > { %v2137_v2 = vpop.f32.mrf.mxu0 }
 0x17f   : > { %v2171_v1 = vpop.f32.mrf.mxu1  ;;  %v2138_v5 = vadd.f32 %v2137_v2, %v2136_v62 }
 0x181   : > { %v2172_v9 = vpop.f32.mrf.mxu1  ;;  %v1374_v14 = vadd.f32 %v2138_v5, %v1304_v7 }
 0x182   : > { %v2173_v18 = vadd.f32 %v2172_v9, %v2171_v1 }
 0x184   : > { %v1444_v12 = vadd.f32 %v2173_v18, %v1374_v14 }
 0x19e   : > { %v2206_v6 = vpop.f32.mrf.mxu0 }
 0x1a0   : > { %v2207_v8 = vpop.f32.mrf.mxu0 }
 0x1a1   : > { %v2241_v10 = vpop.f32.mrf.mxu1  ;;  %v2208_v49 = vadd.f32 %v2207_v8, %v2206_v6 }
 0x1a3   : > { %v2242_v11 = vpop.f32.mrf.mxu1  ;;  %v1514_v13 = vadd.f32 %v2208_v49, %v1444_v12 }
 0x1a4   : > { %v2243_v15 = vadd.f32 %v2242_v11, %v2241_v10 }
 0x1a6   : > { %v1584_v16 = vadd.f32 %v2243_v15, %v1514_v13 }
 0x1b0   : > { %v1653_v17 = vpop.f32.mrf.mxu0 }
 0x1b1   : > { %v1654_v19 = vadd.f32 %v1653_v17, %v1584_v16 }
 0x1b2   : > { %v2288_v20 = vpop.f32.mrf.mxu0 }
 0x1b3   : > { %v1657_v21 = vmax.f32 %v1654_v19, 0.0 }
 0x1b5   : > { %2322 = vmatmul.mubr.f32.vlgmr.msra.gmra.mxu1 %v1657_v21 }
 0x275   : > { %v1741_v22 = vpop.f32.mrf.mxu1 }
 0x276   : > { %v1742_v24 = vadd.f32 %v1741_v22, %v1674_v44 }
 0x277   : > { %v2323_v25 = vpop.f32.mrf.mxu1 }
 0x278   : > { %1746 = vst.msk [vmem:[%s214_s9] sm:$0x1] %vm1745_vm2, %v1742_v24 }
 0x279   : > { %2379 = shalt.err (!%p2376_p3)
}
 0x27a   : > { %s2380_s8 = scalar_lea.hbm %s3866_s17, 16  ;;  %s2384_s12 = scalar_lea.hbm %s3906_s5, 32 }
 0x27b   : > { %p2381_p4 = scmp.ne.s32.totalorder %s3866_s17, %s2380_s8  ;;  %p2385_p9 = scmp.lt.s32.totalorder %s3866_s17, %s3906_s5 }
 0x27c   : > { %p2386_p10 = scmp.lt.s32.totalorder %s2384_s12, %s2380_s8 }
 0x27d   : > { %p2382_p7 = pnand %p2381_p4, %p2499_p5 }
 0x27e   : > { %p2387_p11 = por %p2386_p10, %p2385_p9 }
 0x27f   : > { %p2383_p8 = pneg %p2382_p7 }
 0x281   : > { %p2388_p12 = pnand %p2387_p11, %p2383_p8 }
 0x283   : > { %2391 = shalt.err (!%p2388_p12)
}
 0x284   : > { %2325 = dma.vmem_to_hbm [thread:$0]  (%p2499_p5), %s1761_s15, 16, %s3866_s17, %s1748_s23  }
 0x285 PF: > { %p2331_p13 = scmp.ge.s32.totalorder %s2426_s21, 2  ;;  %s1772_s14 = sand.u32 1, %s2414_s18  }
 0x286   : > { %s1773_s9 = scalar_lea.sflag [#allocation3], %s1772_s14 }
 0x287   : > { %p2328_p0 = pnand %p2331_p13, %p2503_p6 }
 0x289   : > { %p2329_p1 = pneg %p2328_p0 }
 0x28b   : > { %2409 = dma.done.wait (%p2329_p1), %s1773_s9, 16  }
 0x28c   : > { %2411 = vsyncadd (%p2329_p1), %s1773_s9, 4294967280  ;;  %p15_p2 = scmp.ge.s32.totalorder %s2486_s24, 4   ;;  %s3909_s18 = smov %s2418_s19 }
 0x28d   : > { %s3910_s19 = smov %s2422_s20  ;;  %s3911_s20 = smov %s2497_s27 }
 0x28e   : > { %s3912_s21 = smov %s2486_s24  ;;  %17 = sbr.rel (!%p15_p2) target bundleno = 3 (0x3), region = 75 }
 0x293   :  { %1777 = vsyncpa [#allocation3], 1 }
 0x294   :  { %1779 = vsyncpa [#allocation3 + $0x1], 1 }

// kernel: cnn_forward.2
= control target key start
LH: loop header
LB: loop body
LE: loop exit
PB: predicated region body
PF: predicated region fallthrough
CT: control target
= control target key end

     0   :  { %s11328_s21 = smov 0   ;;  %s17892_s0 = inlined_call_operand.vmem [shape: f32[2,4,196,9], index: 0, kind: input, shape index: {}]   ;;  %s17893_s1 = inlined_call_operand.vmem [shape: f32[9,32], index: 1, kind: input, shape index: {}]   ;;  %s17894_s2 = inlined_call_operand.vmem [shape: f32[1,32], index: 2, kind: input, shape index: {}]   ;;  %s17895_s3 = inlined_call_operand.vmem [shape: f32[9,4,49,196], index: 3, kind: input, shape index: {}]   ;;  %s17896_s4 = inlined_call_operand.vmem [shape: f32[9,32,64], index: 4, kind: input, shape index: {}]   ;;  %s17897_s5 = inlined_call_operand.vmem [shape: f32[1,64], index: 5, kind: input, shape index: {}]   ;;  %s17898_s6 = inlined_call_operand.vmem [shape: f32[2,49,64], index: 6, kind: output, shape index: {}]  }
   0x1 LB: > { %s8610_s22 = sadd.s32 4294967295, %s11289_s21   ;;  %p8614_p0 = scmp.ge.s32.totalorder %s11289_s21, 1  ;;  %s11289_s21 = sphi %s11328_s21, %s16_s21  }
   0x2   : > { %p212_p1 = scmp.lt.s32.totalorder %s11289_s21, 3 }
   0x4   : > { %p213_p2 = pnand %p8614_p0, %p212_p1 }
   0x6   : > { %216 = sbr.rel (%p213_p2) target bundleno = 3725 (0xe8d), region = 44 }
   0xb   : > { %v253_v0 = vld [vmem:[%s17893_s1 + $0x8] sm:$0x1]  ;;  %vm355_vm0 = vcmask 1040384   ;;  %v17899_v1 = vmov 0.0   ;;  %v11344_v2 = vld [vmem:[%s17893_s1] sm:$0xff]  ;;  %p242_p3 = scmp.lt.s32.totalorder %s8610_s22, 1 }
   0xc   : > { %10204 = vmatprep.subr.mxu0 %v17899_v1  ;;  %11267 = vmatprep.subr.mxu1 %v17899_v1  ;;  %vm11292_vm1 = vmmov 0   ;;  %vm279_vm2 = vcmask 72704   ;;  %vm1558_vm3 = vcmask 261120   ;;  %vm2093_vm4 = vcmask 556032  }
   0xd   : > { %10205 = vmatpush3.msk.msra.mxu0 %vm355_vm0, %v253_v0  ;;  %11269 = vmatpush3.msk.msra.mxu1 %vm355_vm0, %v253_v0  ;;  %s18242_s22 = smov (!%p242_p3, %s8610_s22), 1  ;;  %vm2115_vm5 = vcmask 1043456   ;;  %vm8546_vm6 = vcmask 523264   ;;  %vm8553_vm7 = vcmask 516096  }
   0xe   : > { %10206 = vmatprep.subr.mxu0 %v17899_v1  ;;  %11268 = vmatprep.subr.mxu1 %v17899_v1  ;;  %s11271_s27 = smul.u32 800, %s18242_s22 }
   0xf   : > { %10207 = vmatpush3.msra.mxu0 %v11344_v2  ;;  %11270 = vmatpush3.msra.mxu1 %v11344_v2  ;;  %s11272_s11 = smul.u32 56, %s18242_s22 }
  0x10   : > { %10208 = vmatprep.mubr.msk.f32.mxu0 %vm11292_vm1, %v17899_v1  ;;  %10271 = vmatprep.mubr.msk.f32.mxu1 %vm11292_vm1, %v17899_v1  ;;  %s11364_s30 = scalar_lea.vmem %s17892_s0, %s11271_s27 }
  0x11   : > { %10283 = vmatprep.subr.mxu1 %v17899_v1  ;;  %10362 = vmatprep.subr.mxu0 %v17899_v1  ;;  %v254_v3 = vld [vmem:[%s11364_s30] sm:$0xff]  ;;  %v275_v4 = vld [vmem:[%s11364_s30 + $0xa8] sm:$0xff]  ;;  %v276_v6 = vld [vmem:[%s11364_s30 + $0xb0] sm:$0xff]  ;;  %s17843_s22 = scalar_lea.vmem %s17898_s6, %s11272_s11 }
  0x12   : > { %10209 = vmatmul.mubr.msk.f32.vlgmr.msra.gmra.mxu0 %vm279_vm2, %v254_v3  ;;  %10272 = vmatmul.mubr.msk.f32.vlgmr.msra.gmra.mxu1 %vm279_vm2, %v275_v4  ;;  %v255_v5 = vld [vmem:[%s11364_s30 + $0x8] sm:$0xff]  ;;  %v256_v7 = vld [vmem:[%s11364_s30 + $0x10] sm:$0xff]  ;;  %v277_v8 = vld [vmem:[%s11364_s30 + $0xb8] sm:$0xff] }
  0x13   : > { %10211 = vmatprep.mubr.msk.f32.mxu0 %vm11292_vm1, %v17899_v1  ;;  %10274 = vmatprep.mubr.msk.f32.mxu1 %vm11292_vm1, %v17899_v1  ;;  %v257_v9 = vld [vmem:[%s11364_s30 + $0x18] sm:$0xff]  ;;  %v278_v10 = vld [vmem:[%s11364_s30 + $0xc0] sm:$0xf]  ;;  %v8643_v12 = vld [vmem:[%s11364_s30 + $0xc8] sm:$0xff] }
  0x14   : > { %10284 = vmatpush3.msk.msra.mxu1 %vm355_vm0, %v253_v0  ;;  %10363 = vmatpush3.msk.msra.mxu0 %vm355_vm0, %v253_v0  ;;  %v258_v11 = vld [vmem:[%s11364_s30 + $0x20] sm:$0xff]  ;;  %v259_v13 = vld [vmem:[%s11364_s30 + $0x28] sm:$0xff]  ;;  %v8644_v14 = vld [vmem:[%s11364_s30 + $0xd0] sm:$0xff] }
  0x15   : > { %10285 = vmatprep.subr.mxu1 %v17899_v1  ;;  %10364 = vmatprep.subr.mxu0 %v17899_v1  ;;  %v260_v15 = vld [vmem:[%s11364_s30 + $0x30] sm:$0xff]  ;;  %v8645_v16 = vld [vmem:[%s11364_s30 + $0xd8] sm:$0xff]  ;;  %v8646_v18 = vld [vmem:[%s11364_s30 + $0xe0] sm:$0xff] }
  0x16   : > { %10212 = vmatmul.mubr.msk.f32.gmra.mxu0 %vm279_vm2, %v255_v5  ;;  %10275 = vmatmul.mubr.msk.f32.gmra.mxu1 %vm279_vm2, %v276_v6  ;;  %v261_v17 = vld [vmem:[%s11364_s30 + $0x38] sm:$0xff]  ;;  %v262_v19 = vld [vmem:[%s11364_s30 + $0x40] sm:$0xff]  ;;  %v8647_v20 = vld [vmem:[%s11364_s30 + $0xe8] sm:$0xff] }
  0x17   : > { %10214 = vmatprep.mubr.msk.f32.mxu0 %vm11292_vm1, %v17899_v1  ;;  %10277 = vmatprep.mubr.msk.f32.mxu1 %vm11292_vm1, %v17899_v1  ;;  %v263_v21 = vld [vmem:[%s11364_s30 + $0x48] sm:$0xff]  ;;  %v8648_v22 = vld [vmem:[%s11364_s30 + $0xf0] sm:$0xff]  ;;  %v8649_v24 = vld [vmem:[%s11364_s30 + $0xf8] sm:$0xff] }
  0x18   : > { %10286 = vmatpush3.msra.mxu1 %v11344_v2  ;;  %10365 = vmatpush3.msra.mxu0 %v11344_v2  ;;  %v264_v23 = vld [vmem:[%s11364_s30 + $0x50] sm:$0xff]  ;;  %v265_v25 = vld [vmem:[%s11364_s30 + $0x58] sm:$0xff]  ;;  %v8650_v26 = vld [vmem:[%s11364_s30 + $0x100] sm:$0xff] }
  0x19   : > { %10441 = vmatprep.subr.mxu1 %v17899_v1  ;;  %10520 = vmatprep.subr.mxu0 %v17899_v1  ;;  %v266_v27 = vld [vmem:[%s11364_s30 + $0x60] sm:$0xff]  ;;  %v8651_v28 = vld [vmem:[%s11364_s30 + $0x108] sm:$0xff]  ;;  %v8652_v30 = vld [vmem:[%s11364_s30 + $0x110] sm:$0xff] }
  0x1a   : > { %10215 = vmatmul.mubr.msk.f32.gmra.mxu0 %vm279_vm2, %v256_v7  ;;  %10278 = vmatmul.mubr.msk.f32.gmra.mxu1 %vm279_vm2, %v277_v8  ;;  %v267_v29 = vld [vmem:[%s11364_s30 + $0x68] sm:$0xff]  ;;  %v268_v31 = vld [vmem:[%s11364_s30 + $0x70] sm:$0xff]  ;;  %v8653_v32 = vld [vmem:[%s11364_s30 + $0x118] sm:$0xff] }
  0x1b   : > { %10217 = vmatprep.mubr.msk.f32.mxu0 %vm11292_vm1, %v17899_v1  ;;  %10280 = vmatprep.mubr.msk.f32.mxu1 %vm11292_vm1, %v17899_v1  ;;  %v269_v33 = vld [vmem:[%s11364_s30 + $0x78] sm:$0xff]  ;;  %v8654_v34 = vld [vmem:[%s11364_s30 + $0x120] sm:$0xff]  ;;  %v8655_v36 = vld [vmem:[%s11364_s30 + $0x128] sm:$0xff] }
  0x1c   : > { %v270_v35 = vld [vmem:[%s11364_s30 + $0x80] sm:$0xff]  ;;  %v271_v37 = vld [vmem:[%s11364_s30 + $0x88] sm:$0xff]  ;;  %v8656_v38 = vld [vmem:[%s11364_s30 + $0x130] sm:$0xff] }
  0x1d   : > { %v272_v39 = vld [vmem:[%s11364_s30 + $0x90] sm:$0xff]  ;;  %v8657_v40 = vld [vmem:[%s11364_s30 + $0x138] sm:$0xff]  ;;  %v8658_v42 = vld [vmem:[%s11364_s30 + $0x140] sm:$0xff] }
  0x1e   : > { %10218 = vmatmul.mubr.msk.f32.gmra.mxu0 %vm279_vm2, %v257_v9  ;;  %10281 = vmatmul.mubr.msk.f32.gmra.mxu1 %vm279_vm2, %v278_v10  ;;  %v273_v41 = vld [vmem:[%s11364_s30 + $0x98] sm:$0xff]  ;;  %v274_v43 = vld [vmem:[%s11364_s30 + $0xa0] sm:$0xff]  ;;  %v8659_v44 = vld [vmem:[%s11364_s30 + $0x148] sm:$0xff] }
  0x1f   : > { %10220 = vmatprep.mubr.msk.f32.mxu0 %vm11292_vm1, %v17899_v1  ;;  %10287 = vmatprep.mubr.msk.f32.mxu1 %vm11292_vm1, %v17899_v1  ;;  %v8660_v45 = vld [vmem:[%s11364_s30 + $0x150] sm:$0xff]  ;;  %v8661_v47 = vld [vmem:[%s11364_s30 + $0x158] sm:$0xff]  ;;  %v8662_v49 = vld [vmem:[%s11364_s30 + $0x160] sm:$0xff] }
  0x20   : > { %v8694_v46 = vld [vmem:[%s11364_s30 + $0x190] sm:$0xff]  ;;  %v8695_v48 = vld [vmem:[%s11364_s30 + $0x198] sm:$0xff]  ;;  %v8696_v50 = vld [vmem:[%s11364_s30 + $0x1a0] sm:$0xff] }
  0x21   : > { %v8663_v51 = vld [vmem:[%s11364_s30 + $0x168] sm:$0xff]  ;;  %v8664_v53 = vld [vmem:[%s11364_s30 + $0x170] sm:$0xff]  ;;  %v8665_v55 = vld [vmem:[%s11364_s30 + $0x178] sm:$0xff] }
  0x22   : > { %10221 = vmatmul.mubr.msk.f32.gmra.mxu0 %vm279_vm2, %v258_v11  ;;  %10288 = vmatmul.mubr.msk.f32.vlgmr.msra.gmra.mxu1 %vm279_vm2, %v8643_v12  ;;  %v8697_v52 = vld [vmem:[%s11364_s30 + $0x1a8] sm:$0xff]  ;;  %v8698_v54 = vld [vmem:[%s11364_s30 + $0x1b0] sm:$0xff]  ;;  %v8699_v56 = vld [vmem:[%s11364_s30 + $0x1b8] sm:$0xff] }
  0x23   : > { %10223 = vmatprep.mubr.msk.f32.mxu0 %vm11292_vm1, %v17899_v1  ;;  %10290 = vmatprep.mubr.msk.f32.mxu1 %vm11292_vm1, %v17899_v1  ;;  %v8666_v57 = vld [vmem:[%s11364_s30 + $0x180] sm:$0xff]  ;;  %v8667_v59 = vld [vmem:[%s11364_s30 + $0x188] sm:$0xf]  ;;  %v8702_v61 = vld [vmem:[%s11364_s30 + $0x1d0] sm:$0xff] }
  0x24   : > { %10442 = vmatpush3.msk.msra.mxu1 %vm355_vm0, %v253_v0  ;;  %v8700_v58 = vld [vmem:[%s11364_s30 + $0x1c0] sm:$0xff]  ;;  %v8701_v60 = vld [vmem:[%s11364_s30 + $0x1c8] sm:$0xff]  ;;  %v8745_v62 = vld [vmem:[%s11364_s30 + $0x258] sm:$0xff] }
  0x25   : > { %10443 = vmatprep.subr.mxu1 %v17899_v1  ;;  %v8703_v63 = vld [vmem:[%s11364_s30 + $0x1d8] sm:$0xff]  ;;  %v8746_v0 = vld [vmem:[%s11364_s30 + $0x260] sm:$0xff]  ;;  %v8747_v3 = vld [vmem:[%s11364_s30 + $0x268] sm:$0xff] }
  0x26   : > { %10224 = vmatmul.mubr.msk.f32.gmra.mxu0 %vm279_vm2, %v259_v13  ;;  %10291 = vmatmul.mubr.msk.f32.gmra.mxu1 %vm279_vm2, %v8644_v14  ;;  %v8705_v4 = vld [vmem:[%s11364_s30 + $0x1e8] sm:$0xff]  ;;  %v8748_v5 = vld [vmem:[%s11364_s30 + $0x270] sm:$0xff]  ;;  %v8749_v7 = vld [vmem:[%s11364_s30 + $0x278] sm:$0xff] }
  0x27   : > { %10226 = vmatprep.mubr.msk.f32.mxu0 %vm11292_vm1, %v17899_v1  ;;  %10293 = vmatprep.mubr.msk.f32.mxu1 %vm11292_vm1, %v17899_v1  ;;  %v8706_v6 = vld [vmem:[%s11364_s30 + $0x1f0] sm:$0xff]  ;;  %v8707_v8 = vld [vmem:[%s11364_s30 + $0x1f8] sm:$0xff]  ;;  %v8750_v9 = vld [vmem:[%s11364_s30 + $0x280] sm:$0xff] }
  0x28   : > { %10444 = vmatpush3.msra.mxu1 %v11344_v2  ;;  %v8704_v2 = vld [vmem:[%s11364_s30 + $0x1e0] sm:$0xff]  ;;  %v8867_v10 = vld [vmem:[%s17896_s4 + $0x38] sm:$0xff]  ;;  %v8751_v12 = vld [vmem:[%s11364_s30 + $0x288] sm:$0xff] }
  0x29   : > { %10603 = vmatprep.subr.mxu1 %v17899_v1  ;;  %v8708_v11 = vld [vmem:[%s11364_s30 + $0x200] sm:$0xff]  ;;  %v8709_v13 = vld [vmem:[%s11364_s30 + $0x208] sm:$0xff]  ;;  %v8752_v14 = vld [vmem:[%s11364_s30 + $0x290] sm:$0xff] }
  0x2a   : > { %10227 = vmatmul.mubr.msk.f32.gmra.mxu0 %vm279_vm2, %v260_v15  ;;  %10294 = vmatmul.mubr.msk.f32.gmra.mxu1 %vm279_vm2, %v8645_v16  ;;  %v8710_v15 = vld [vmem:[%s11364_s30 + $0x210] sm:$0xff]  ;;  %v8753_v16 = vld [vmem:[%s11364_s30 + $0x298] sm:$0xff] }
  0x2b   : > { %10229 = vmatprep.mubr.msk.f32.mxu0 %vm11292_vm1, %v17899_v1  ;;  %10296 = vmatprep.mubr.msk.f32.mxu1 %vm11292_vm1, %v17899_v1 }
  0x2e   : > { %10230 = vmatmul.mubr.msk.f32.gmra.mxu0 %vm279_vm2, %v261_v17  ;;  %10297 = vmatmul.mubr.msk.f32.gmra.mxu1 %vm279_vm2, %v8646_v18  ;;  %v8711_v17 = vld [vmem:[%s11364_s30 + $0x218] sm:$0xff]  ;;  %v8754_v18 = vld [vmem:[%s11364_s30 + $0x2a0] sm:$0xff] }
  0x2f   : > { %10232 = vmatprep.mubr.msk.f32.mxu0 %vm11292_vm1, %v17899_v1  ;;  %10299 = vmatprep.mubr.msk.f32.mxu1 %vm11292_vm1, %v17899_v1 }
  0x32   : > { %10233 = vmatmul.mubr.msk.f32.gmra.mxu0 %vm279_vm2, %v262_v19  ;;  %10300 = vmatmul.mubr.msk.f32.gmra.mxu1 %vm279_vm2, %v8647_v20  ;;  %v8712_v19 = vld [vmem:[%s11364_s30 + $0x220] sm:$0xff]  ;;  %v8755_v20 = vld [vmem:[%s11364_s30 + $0x2a8] sm:$0xff] }
  0x33   : > { %10235 = vmatprep.mubr.msk.f32.mxu0 %vm11292_vm1, %v17899_v1  ;;  %10302 = vmatprep.mubr.msk.f32.mxu1 %vm11292_vm1, %v17899_v1 }
  0x36   : > { %10236 = vmatmul.mubr.msk.f32.gmra.mxu0 %vm279_vm2, %v263_v21  ;;  %10303 = vmatmul.mubr.msk.f32.gmra.mxu1 %vm279_vm2, %v8648_v22  ;;  %v8713_v21 = vld [vmem:[%s11364_s30 + $0x228] sm:$0xff]  ;;  %v8756_v22 = vld [vmem:[%s11364_s30 + $0x2b0] sm:$0xff] }
  0x37   : > { %10238 = vmatprep.mubr.msk.f32.mxu0 %vm11292_vm1, %v17899_v1  ;;  %10305 = vmatprep.mubr.msk.f32.mxu1 %vm11292_vm1, %v17899_v1 }
  0x3a   : > { %10239 = vmatmul.mubr.msk.f32.gmra.mxu0 %vm279_vm2, %v264_v23  ;;  %10306 = vmatmul.mubr.msk.f32.gmra.mxu1 %vm279_vm2, %v8649_v24  ;;  %v8866_v23 = vld [vmem:[%s17896_s4 + $0x30] sm:$0xff] }
  0x3b   : > { %10241 = vmatprep.mubr.msk.f32.mxu0 %vm11292_vm1, %v17899_v1  ;;  %10308 = vmatprep.mubr.msk.f32.mxu1 %vm11292_vm1, %v17899_v1  ;;  %v8714_v24 = vld [vmem:[%s11364_s30 + $0x230] sm:$0xff] }
  0x3e   : > { %10242 = vmatmul.mubr.msk.f32.gmra.mxu0 %vm279_vm2, %v265_v25  ;;  %10309 = vmatmul.mubr.msk.f32.gmra.mxu1 %vm279_vm2, %v8650_v26  ;;  %v8757_v25 = vld [vmem:[%s11364_s30 + $0x2b8] sm:$0xff] }
  0x3f   : > { %10244 = vmatprep.mubr.msk.f32.mxu0 %vm11292_vm1, %v17899_v1  ;;  %10311 = vmatprep.mubr.msk.f32.mxu1 %vm11292_vm1, %v17899_v1  ;;  %v8715_v26 = vld [vmem:[%s11364_s30 + $0x238] sm:$0xff] }
  0x42   : > { %10245 = vmatmul.mubr.msk.f32.gmra.mxu0 %vm279_vm2, %v266_v27  ;;  %10312 = vmatmul.mubr.msk.f32.gmra.mxu1 %vm279_vm2, %v8651_v28  ;;  %v8758_v27 = vld [vmem:[%s11364_s30 + $0x2c0] sm:$0xff] }
  0x43   : > { %10247 = vmatprep.mubr.msk.f32.mxu0 %vm11292_vm1, %v17899_v1  ;;  %10314 = vmatprep.mubr.msk.f32.mxu1 %vm11292_vm1, %v17899_v1  ;;  %v8716_v28 = vld [vmem:[%s11364_s30 + $0x240] sm:$0xff] }
  0x46   : > { %10248 = vmatmul.mubr.msk.f32.gmra.mxu0 %vm279_vm2, %v267_v29  ;;  %10315 = vmatmul.mubr.msk.f32.gmra.mxu1 %vm279_vm2, %v8652_v30  ;;  %v8759_v29 = vld [vmem:[%s11364_s30 + $0x2c8] sm:$0xff] }
  0x47   : > { %10250 = vmatprep.mubr.msk.f32.mxu0 %vm11292_vm1, %v17899_v1  ;;  %10317 = vmatprep.mubr.msk.f32.mxu1 %vm11292_vm1, %v17899_v1  ;;  %v8717_v30 = vld [vmem:[%s11364_s30 + $0x248] sm:$0xff] }
  0x4a   : > { %10251 = vmatmul.mubr.msk.f32.gmra.mxu0 %vm279_vm2, %v268_v31  ;;  %10318 = vmatmul.mubr.msk.f32.gmra.mxu1 %vm279_vm2, %v8653_v32  ;;  %v8760_v31 = vld [vmem:[%s11364_s30 + $0x2d0] sm:$0xff] }
  0x4b   : > { %10253 = vmatprep.mubr.msk.f32.mxu0 %vm11292_vm1, %v17899_v1  ;;  %10320 = vmatprep.mubr.msk.f32.mxu1 %vm11292_vm1, %v17899_v1  ;;  %v8718_v32 = vld [vmem:[%s11364_s30 + $0x250] sm:$0xf] }
  0x4e   : > { %10254 = vmatmul.mubr.msk.f32.gmra.mxu0 %vm279_vm2, %v269_v33  ;;  %10321 = vmatmul.mubr.msk.f32.gmra.mxu1 %vm279_vm2, %v8654_v34  ;;  %v8761_v33 = vld [vmem:[%s11364_s30 + $0x2d8] sm:$0xff] }
  0x4f   : > { %10256 = vmatprep.mubr.msk.f32.mxu0 %vm11292_vm1, %v17899_v1  ;;  %10323 = vmatprep.mubr.msk.f32.mxu1 %vm11292_vm1, %v17899_v1  ;;  %v1557_v34 = vld [vmem:[%s17896_s4 + $0x18] sm:$0xff] }
  0x52   : > { %10257 = vmatmul.mubr.msk.f32.gmra.mxu0 %vm279_vm2, %v270_v35  ;;  %10324 = vmatmul.mubr.msk.f32.gmra.mxu1 %vm279_vm2, %v8655_v36  ;;  %v8762_v35 = vld [vmem:[%s11364_s30 + $0x2e0] sm:$0xff]  ;;  %v1556_v36 = vld [vmem:[%s17896_s4 + $0x10] sm:$0xff] }
  0x53   : > { %10259 = vmatprep.mubr.msk.f32.mxu0 %vm11292_vm1, %v17899_v1  ;;  %10326 = vmatprep.mubr.msk.f32.mxu1 %vm11292_vm1, %v17899_v1 }
  0x56   : > { %10260 = vmatmul.mubr.msk.f32.gmra.mxu0 %vm279_vm2, %v271_v37  ;;  %10327 = vmatmul.mubr.msk.f32.gmra.mxu1 %vm279_vm2, %v8656_v38  ;;  %v1555_v37 = vld [vmem:[%s17896_s4 + $0x8] sm:$0xff] }
  0x57   : > { %10262 = vmatprep.mubr.msk.f32.mxu0 %vm11292_vm1, %v17899_v1  ;;  %10329 = vmatprep.mubr.msk.f32.mxu1 %vm11292_vm1, %v17899_v1  ;;  %v8865_v38 = vld [vmem:[%s17896_s4 + $0x28] sm:$0xff] }
  0x5a   : > { %10263 = vmatmul.mubr.msk.f32.gmra.mxu0 %vm279_vm2, %v272_v39  ;;  %10330 = vmatmul.mubr.msk.f32.gmra.mxu1 %vm279_vm2, %v8657_v40  ;;  %v8763_v39 = vld [vmem:[%s11364_s30 + $0x2e8] sm:$0xff]  ;;  %v1554_v40 = vld [vmem:[%s17896_s4] sm:$0xff] }
  0x5b   : > { %10265 = vmatprep.mubr.msk.f32.mxu0 %vm11292_vm1, %v17899_v1  ;;  %10332 = vmatprep.mubr.msk.f32.mxu1 %vm11292_vm1, %v17899_v1 }
  0x5e   : > { %10266 = vmatmul.mubr.msk.f32.gmra.mxu0 %vm279_vm2, %v273_v41  ;;  %10333 = vmatmul.mubr.msk.f32.gmra.mxu1 %vm279_vm2, %v8658_v42  ;;  %v8864_v41 = vld [vmem:[%s17896_s4 + $0x20] sm:$0xff]  ;;  %v8764_v42 = vld [vmem:[%s11364_s30 + $0x2f0] sm:$0xff] }
  0x5f   : > { %10268 = vmatprep.mubr.msk.f32.mxu0 %vm11292_vm1, %v17899_v1  ;;  %10335 = vmatprep.mubr.msk.f32.mxu1 %vm11292_vm1, %v17899_v1 }
  0x62   : > { %10269 = vmatmul.mubr.msk.f32.gmra.mxu0 %vm279_vm2, %v274_v43  ;;  %10336 = vmatmul.mubr.msk.f32.gmra.mxu1 %vm279_vm2, %v8659_v44 }
  0x63   : > { %10338 = vmatprep.mubr.msk.f32.mxu1 %vm11292_vm1, %v17899_v1  ;;  %10366 = vmatprep.mubr.msk.f32.mxu0 %vm11292_vm1, %v17899_v1 }
  0x66   : > { %10339 = vmatmul.mubr.msk.f32.gmra.mxu1 %vm279_vm2, %v8660_v45  ;;  %10367 = vmatmul.mubr.msk.f32.vlgmr.msra.gmra.mxu0 %vm279_vm2, %v8694_v46  ;;  %v8765_v45 = vld [vmem:[%s11364_s30 + $0x2f8] sm:$0xff] }
  0x67   : > { %10341 = vmatprep.mubr.msk.f32.mxu1 %vm11292_vm1, %v17899_v1  ;;  %10369 = vmatprep.mubr.msk.f32.mxu0 %vm11292_vm1, %v17899_v1 }
  0x68   : > { %10521 = vmatpush3.msra.mxu0 %v1557_v34 }
  0x69   : > { %10522 = vmatprep.subr.mxu0 %v17899_v1 }
  0x6a   : > { %10342 = vmatmul.mubr.msk.f32.gmra.mxu1 %vm279_vm2, %v8661_v47  ;;  %10370 = vmatmul.mubr.msk.f32.gmra.mxu0 %vm279_vm2, %v8695_v48 }
  0x6b   : > { %10344 = vmatprep.mubr.msk.f32.mxu1 %vm11292_vm1, %v17899_v1  ;;  %10372 = vmatprep.mubr.msk.f32.mxu0 %vm11292_vm1, %v17899_v1 }
  0x6c   : > { %10523 = vmatpush3.msra.mxu0 %v1556_v36 }
  0x6d   : > { %10524 = vmatprep.subr.mxu0 %v17899_v1 }
  0x6e   : > { %10345 = vmatmul.mubr.msk.f32.gmra.mxu1 %vm279_vm2, %v8662_v49  ;;  %10373 = vmatmul.mubr.msk.f32.gmra.mxu0 %vm279_vm2, %v8696_v50  ;;  %v8766_v50 = vld [vmem:[%s11364_s30 + $0x300] sm:$0xff] }
  0x6f   : > { %10347 = vmatprep.mubr.msk.f32.mxu1 %vm11292_vm1, %v17899_v1  ;;  %10375 = vmatprep.mubr.msk.f32.mxu0 %vm11292_vm1, %v17899_v1 }
  0x70   : > { %10525 = vmatpush3.msra.mxu0 %v1555_v37 }
  0x71   : > { %10526 = vmatprep.subr.mxu0 %v17899_v1 }
  0x72   : > { %10348 = vmatmul.mubr.msk.f32.gmra.mxu1 %vm279_vm2, %v8663_v51  ;;  %10376 = vmatmul.mubr.msk.f32.gmra.mxu0 %vm279_vm2, %v8697_v52 }
  0x73   : > { %10350 = vmatprep.mubr.msk.f32.mxu1 %vm11292_vm1, %v17899_v1  ;;  %10378 = vmatprep.mubr.msk.f32.mxu0 %vm11292_vm1, %v17899_v1 }
  0x74   : > { %10527 = vmatpush3.msra.mxu0 %v1554_v40 }
  0x75   : > { %2119 = vmatprep.subr.mxu0 %v17899_v1 }
  0x76   : > { %10351 = vmatmul.mubr.msk.f32.gmra.mxu1 %vm279_vm2, %v8664_v53  ;;  %10379 = vmatmul.mubr.msk.f32.gmra.mxu0 %vm279_vm2, %v8698_v54 }
  0x77   : > { %10353 = vmatprep.mubr.msk.f32.mxu1 %vm11292_vm1, %v17899_v1  ;;  %10381 = vmatprep.mubr.msk.f32.mxu0 %vm11292_vm1, %v17899_v1 }
  0x7a   : > { %10354 = vmatmul.mubr.msk.f32.gmra.mxu1 %vm279_vm2, %v8665_v55  ;;  %10382 = vmatmul.mubr.msk.f32.gmra.mxu0 %vm279_vm2, %v8699_v56  ;;  %v8767_v55 = vld [vmem:[%s11364_s30 + $0x308] sm:$0xff] }
  0x7b   : > { %10356 = vmatprep.mubr.msk.f32.mxu1 %vm11292_vm1, %v17899_v1  ;;  %10384 = vmatprep.mubr.msk.f32.mxu0 %vm11292_vm1, %v17899_v1 }
  0x7e   : > { %10357 = vmatmul.mubr.msk.f32.gmra.mxu1 %vm279_vm2, %v8666_v57  ;;  %10385 = vmatmul.mubr.msk.f32.gmra.mxu0 %vm279_vm2, %v8700_v58 }
  0x7f   : > { %10359 = vmatprep.mubr.msk.f32.mxu1 %vm11292_vm1, %v17899_v1  ;;  %10387 = vmatprep.mubr.msk.f32.mxu0 %vm11292_vm1, %v17899_v1 }
  0x82   : > { %10360 = vmatmul.mubr.msk.f32.gmra.mxu1 %vm279_vm2, %v8667_v59  ;;  %10388 = vmatmul.mubr.msk.f32.gmra.mxu0 %vm279_vm2, %v8701_v60  ;;  %v8768_v60 = vld [vmem:[%s11364_s30 + $0x310] sm:$0xff] }
  0x83   : > { %10390 = vmatprep.mubr.msk.f32.mxu0 %vm11292_vm1, %v17899_v1  ;;  %10445 = vmatprep.mubr.msk.f32.mxu1 %vm11292_vm1, %v17899_v1 }
  0x86   : > { %10391 = vmatmul.mubr.msk.f32.gmra.mxu0 %vm279_vm2, %v8702_v61  ;;  %10446 = vmatmul.mubr.msk.f32.vlgmr.msra.gmra.mxu1 %vm279_vm2, %v8745_v62 }
  0x87   : > { %10393 = vmatprep.mubr.msk.f32.mxu0 %vm11292_vm1, %v17899_v1  ;;  %10448 = vmatprep.mubr.msk.f32.mxu1 %vm11292_vm1, %v17899_v1 }
  0x88   : > { %10604 = vmatpush3.msra.mxu1 %v8867_v10 }
  0x89   : > { %10605 = vmatprep.subr.mxu1 %v17899_v1 }
  0x8a   : > { %10394 = vmatmul.mubr.msk.f32.gmra.mxu0 %vm279_vm2, %v8703_v63  ;;  %10449 = vmatmul.mubr.msk.f32.gmra.mxu1 %vm279_vm2, %v8746_v0 }
  0x8b   : > { %10396 = vmatprep.mubr.msk.f32.mxu0 %vm11292_vm1, %v17899_v1  ;;  %10451 = vmatprep.mubr.msk.f32.mxu1 %vm11292_vm1, %v17899_v1 }
  0x8c   : > { %10606 = vmatpush3.msra.mxu1 %v8866_v23 }
  0x8d   : > { %10607 = vmatprep.subr.mxu1 %v17899_v1 }
  0x8e   : > { %10397 = vmatmul.mubr.msk.f32.gmra.mxu0 %vm279_vm2, %v8704_v2  ;;  %10452 = vmatmul.mubr.msk.f32.gmra.mxu1 %vm279_vm2, %v8747_v3  ;;  %v8769_v3 = vld [vmem:[%s11364_s30 + $0x318] sm:$0xf] }
  0x8f   : > { %10399 = vmatprep.mubr.msk.f32.mxu0 %vm11292_vm1, %v17899_v1  ;;  %10454 = vmatprep.mubr.msk.f32.mxu1 %vm11292_vm1, %v17899_v1 }
  0x90   : > { %10608 = vmatpush3.msra.mxu1 %v8865_v38 }
  0x91   : > { %10609 = vmatprep.subr.mxu1 %v17899_v1 }
  0x92   : > { %10400 = vmatmul.mubr.msk.f32.gmra.mxu0 %vm279_vm2, %v8705_v4  ;;  %10455 = vmatmul.mubr.msk.f32.gmra.mxu1 %vm279_vm2, %v8748_v5 }
  0x93   : > { %10402 = vmatprep.mubr.msk.f32.mxu0 %vm11292_vm1, %v17899_v1  ;;  %10457 = vmatprep.mubr.msk.f32.mxu1 %vm11292_vm1, %v17899_v1 }
  0x94   : > { %10610 = vmatpush3.msra.mxu1 %v8864_v41 }
  0x95   : > { %2243 = vmatprep.subr.mxu1 %v17899_v1 }
  0x96   : > { %10403 = vmatmul.mubr.msk.f32.gmra.mxu0 %vm279_vm2, %v8706_v6  ;;  %10458 = vmatmul.mubr.msk.f32.gmra.mxu1 %vm279_vm2, %v8749_v7 }
  0x97   : > { %10405 = vmatprep.mubr.msk.f32.mxu0 %vm11292_vm1, %v17899_v1  ;;  %10460 = vmatprep.mubr.msk.f32.mxu1 %vm11292_vm1, %v17899_v1 }
  0x9a   : > { %10406 = vmatmul.mubr.msk.f32.gmra.mxu0 %vm279_vm2, %v8707_v8  ;;  %10461 = vmatmul.mubr.msk.f32.gmra.mxu1 %vm279_vm2, %v8750_v9 }
  0x9b   : > { %10408 = vmatprep.mubr.msk.f32.mxu0 %vm11292_vm1, %v17899_v1  ;;  %10463 = vmatprep.mubr.msk.f32.mxu1 %vm11292_vm1, %v17899_v1 }
  0x9e   : > { %10409 = vmatmul.mubr.msk.f32.gmra.mxu0 %vm279_vm2, %v8708_v11  ;;  %10464 = vmatmul.mubr.msk.f32.gmra.mxu1 %vm279_vm2, %v8751_v12 }
  0x9f   : > { %10411 = vmatprep.mubr.msk.f32.mxu0 %vm11292_vm1, %v17899_v1  ;;  %10466 = vmatprep.mubr.msk.f32.mxu1 %vm11292_vm1, %v17899_v1 }
  0xa2   : > { %10412 = vmatmul.mubr.msk.f32.gmra.mxu0 %vm279_vm2, %v8709_v13  ;;  %10467 = vmatmul.mubr.msk.f32.gmra.mxu1 %vm279_vm2, %v8752_v14 }
  0xa3   : > { %10414 = vmatprep.mubr.msk.f32.mxu0 %vm11292_vm1, %v17899_v1  ;;  %10469 = vmatprep.mubr.msk.f32.mxu1 %vm11292_vm1, %v17899_v1 }
  0xa6   : > { %10415 = vmatmul.mubr.msk.f32.gmra.mxu0 %vm279_vm2, %v8710_v15  ;;  %10470 = vmatmul.mubr.msk.f32.gmra.mxu1 %vm279_vm2, %v8753_v16 }
  0xa7   : > { %10417 = vmatprep.mubr.msk.f32.mxu0 %vm11292_vm1, %v17899_v1  ;;  %10472 = vmatprep.mubr.msk.f32.mxu1 %vm11292_vm1, %v17899_v1 }
  0xaa   : > { %10418 = vmatmul.mubr.msk.f32.gmra.mxu0 %vm279_vm2, %v8711_v17  ;;  %10473 = vmatmul.mubr.msk.f32.gmra.mxu1 %vm279_vm2, %v8754_v18 }
  0xab   : > { %10420 = vmatprep.mubr.msk.f32.mxu0 %vm11292_vm1, %v17899_v1  ;;  %10475 = vmatprep.mubr.msk.f32.mxu1 %vm11292_vm1, %v17899_v1 }
  0xae   : > { %10421 = vmatmul.mubr.msk.f32.gmra.mxu0 %vm279_vm2, %v8712_v19  ;;  %10476 = vmatmul.mubr.msk.f32.gmra.mxu1 %vm279_vm2, %v8755_v20 }
  0xaf   : > { %10423 = vmatprep.mubr.msk.f32.mxu0 %vm11292_vm1, %v17899_v1  ;;  %10478 = vmatprep.mubr.msk.f32.mxu1 %vm11292_vm1, %v17899_v1 }
  0xb2   : > { %10424 = vmatmul.mubr.msk.f32.gmra.mxu0 %vm279_vm2, %v8713_v21  ;;  %10479 = vmatmul.mubr.msk.f32.gmra.mxu1 %vm279_vm2, %v8756_v22 }
  0xb3   : > { %10426 = vmatprep.mubr.msk.f32.mxu0 %vm11292_vm1, %v17899_v1  ;;  %10481 = vmatprep.mubr.msk.f32.mxu1 %vm11292_vm1, %v17899_v1 }
  0xb6   : > { %10427 = vmatmul.mubr.msk.f32.gmra.mxu0 %vm279_vm2, %v8714_v24  ;;  %10482 = vmatmul.mubr.msk.f32.gmra.mxu1 %vm279_vm2, %v8757_v25 }
  0xb7   : > { %10429 = vmatprep.mubr.msk.f32.mxu0 %vm11292_vm1, %v17899_v1  ;;  %10484 = vmatprep.mubr.msk.f32.mxu1 %vm11292_vm1, %v17899_v1 }
  0xba   : > { %10430 = vmatmul.mubr.msk.f32.gmra.mxu0 %vm279_vm2, %v8715_v26  ;;  %10485 = vmatmul.mubr.msk.f32.gmra.mxu1 %vm279_vm2, %v8758_v27 }
  0xbb   : > { %10432 = vmatprep.mubr.msk.f32.mxu0 %vm11292_vm1, %v17899_v1  ;;  %10487 = vmatprep.mubr.msk.f32.mxu1 %vm11292_vm1, %v17899_v1 }
  0xbe   : > { %10433 = vmatmul.mubr.msk.f32.gmra.mxu0 %vm279_vm2, %v8716_v28  ;;  %10488 = vmatmul.mubr.msk.f32.gmra.mxu1 %vm279_vm2, %v8759_v29 }
  0xbf   : > { %10435 = vmatprep.mubr.msk.f32.mxu0 %vm11292_vm1, %v17899_v1  ;;  %10490 = vmatprep.mubr.msk.f32.mxu1 %vm11292_vm1, %v17899_v1 }
  0xc2   : > { %10436 = vmatmul.mubr.msk.f32.gmra.mxu0 %vm279_vm2, %v8717_v30  ;;  %10491 = vmatmul.mubr.msk.f32.gmra.mxu1 %vm279_vm2, %v8760_v31 }
  0xc3   : > { %10438 = vmatprep.mubr.msk.f32.mxu0 %vm11292_vm1, %v17899_v1  ;;  %10493 = vmatprep.mubr.msk.f32.mxu1 %vm11292_vm1, %v17899_v1 }
  0xc6   : > { %10439 = vmatmul.mubr.msk.f32.gmra.mxu0 %vm279_vm2, %v8718_v32  ;;  %10494 = vmatmul.mubr.msk.f32.gmra.mxu1 %vm279_vm2, %v8761_v33 }
  0xc7   : > { %10496 = vmatprep.mubr.msk.f32.mxu1 %vm11292_vm1, %v17899_v1  ;;  %10528 = vmatprep.mubr.msk.f32.mxu0 %vm11292_vm1, %v17899_v1 }
  0xca   : > { %10497 = vmatmul.mubr.msk.f32.gmra.mxu1 %vm279_vm2, %v8762_v35 }
  0xcb   : > { %10499 = vmatprep.mubr.msk.f32.mxu1 %vm11292_vm1, %v17899_v1 }
  0xce   : > { %10500 = vmatmul.mubr.msk.f32.gmra.mxu1 %vm279_vm2, %v8763_v39 }
  0xcf   : > { %10502 = vmatprep.mubr.msk.f32.mxu1 %vm11292_vm1, %v17899_v1 }
  0xd2   : > { %v11787_v43 = vpop.f32.mrf.mxu0  ;;  %v11789_v44 = vpop.f32.mrf.mxu1  ;;  %10503 = vmatmul.mubr.msk.f32.gmra.mxu1 %vm279_vm2, %v8764_v42 }
  0xd3   : > { %17933 = vst [vmem:[#allocation2_spill] sm:$0xff] %v11789_v44  ;;  %10505 = vmatprep.mubr.msk.f32.mxu1 %vm11292_vm1, %v17899_v1 }
  0xd4   : > { %v10210_v46 = vpop.f32.mrf.mxu0  ;;  %v10273_v47 = vpop.f32.mrf.mxu1 }
  0xd6   : > { %v11795_v48 = vpop.f32.mrf.mxu0  ;;  %v11797_v49 = vpop.f32.mrf.mxu1  ;;  %10506 = vmatmul.mubr.msk.f32.gmra.mxu1 %vm279_vm2, %v8765_v45 }
  0xd7   : > { %17934 = vst [vmem:[#allocation3_spill] sm:$0xff] %v11797_v49  ;;  %10508 = vmatprep.mubr.msk.f32.mxu1 %vm11292_vm1, %v17899_v1 }
  0xd8   : > { %v10213_v51 = vpop.f32.mrf.mxu0  ;;  %v10276_v52 = vpop.f32.mrf.mxu1 }
  0xda   : > { %v11803_v53 = vpop.f32.mrf.mxu0  ;;  %v11805_v54 = vpop.f32.mrf.mxu1  ;;  %10509 = vmatmul.mubr.msk.f32.gmra.mxu1 %vm279_vm2, %v8766_v50 }
  0xdb   : > { %17935 = vst [vmem:[#allocation4_spill] sm:$0xff] %v11805_v54  ;;  %10511 = vmatprep.mubr.msk.f32.mxu1 %vm11292_vm1, %v17899_v1 }
  0xdc   : > { %v10216_v56 = vpop.f32.mrf.mxu0  ;;  %v10279_v57 = vpop.f32.mrf.mxu1 }
  0xde   : > { %v11811_v58 = vpop.f32.mrf.mxu0  ;;  %v11813_v59 = vpop.f32.mrf.mxu1  ;;  %10512 = vmatmul.mubr.msk.f32.gmra.mxu1 %vm279_vm2, %v8767_v55 }
  0xdf   : > { %17936 = vst [vmem:[#allocation5_spill] sm:$0xff] %v11813_v59  ;;  %10514 = vmatprep.mubr.msk.f32.mxu1 %vm11292_vm1, %v17899_v1 }
  0xe0   : > { %v10219_v61 = vpop.f32.mrf.mxu0  ;;  %v10282_v62 = vpop.f32.mrf.mxu1 }
  0xe2   : > { %v11819_v63 = vpop.f32.mrf.mxu0  ;;  %v11821_v0 = vpop.f32.mrf.mxu1  ;;  %10515 = vmatmul.mubr.msk.f32.gmra.mxu1 %vm279_vm2, %v8768_v60 }
  0xe3   : > { %10517 = vmatprep.mubr.msk.f32.mxu1 %vm11292_vm1, %v17899_v1 }
  0xe4   : > { %v10222_v4 = vpop.f32.mrf.mxu0  ;;  %v10289_v5 = vpop.f32.mrf.mxu1 }
  0xe6   : > { %v11829_v6 = vpop.f32.mrf.mxu0  ;;  %v11831_v7 = vpop.f32.mrf.mxu1  ;;  %10518 = vmatmul.mubr.msk.f32.gmra.mxu1 %vm279_vm2, %v8769_v3 }
  0xe7   : > { %10611 = vmatprep.mubr.msk.f32.mxu1 %vm11292_vm1, %v17899_v1 }
  0xe8   : > { %v10225_v9 = vpop.f32.mrf.mxu0  ;;  %v10292_v10 = vpop.f32.mrf.mxu1 }
  0xea   : > { %v11838_v11 = vpop.f32.mrf.mxu0  ;;  %v11840_v12 = vpop.f32.mrf.mxu1 }
  0xec   : > { %v10228_v14 = vpop.f32.mrf.mxu0  ;;  %v10295_v15 = vpop.f32.mrf.mxu1 }
  0xee   : > { %v11844_v16 = vpop.f32.mrf.mxu0  ;;  %v11846_v17 = vpop.f32.mrf.mxu1 }
  0xf0   : > { %v10231_v19 = vpop.f32.mrf.mxu0  ;;  %v10298_v20 = vpop.f32.mrf.mxu1 }
  0xf2   : > { %v11850_v21 = vpop.f32.mrf.mxu0  ;;  %v11852_v22 = vpop.f32.mrf.mxu1 }
  0xf4   : > { %v10234_v24 = vpop.f32.mrf.mxu0  ;;  %v10301_v25 = vpop.f32.mrf.mxu1 }
  0xf6   : > { %v11856_v26 = vpop.f32.mrf.mxu0  ;;  %v11858_v27 = vpop.f32.mrf.mxu1 }
  0xf8   : > { %v10237_v29 = vpop.f32.mrf.mxu0  ;;  %v10304_v30 = vpop.f32.mrf.mxu1 }
  0xfa   : > { %v11862_v31 = vpop.f32.mrf.mxu0  ;;  %v11864_v32 = vpop.f32.mrf.mxu1 }
  0xfc   : > { %v10240_v34 = vpop.f32.mrf.mxu0  ;;  %v10307_v35 = vpop.f32.mrf.mxu1 }
  0xfe   : > { %v11868_v36 = vpop.f32.mrf.mxu0  ;;  %v11870_v37 = vpop.f32.mrf.mxu1 }
 0x100   : > { %v10243_v39 = vpop.f32.mrf.mxu0  ;;  %v10310_v40 = vpop.f32.mrf.mxu1 }
 0x102   : > { %v11874_v41 = vpop.f32.mrf.mxu0  ;;  %v11876_v42 = vpop.f32.mrf.mxu1 }
 0x104   : > { %v10246_v46 = vpop.f32.mrf.mxu0  ;;  %v10313_v47 = vpop.f32.mrf.mxu1 }
 0x106   : > { %v11880_v50 = vpop.f32.mrf.mxu0  ;;  %v11882_v51 = vpop.f32.mrf.mxu1 }
 0x108   : > { %v10249_v55 = vpop.f32.mrf.mxu0  ;;  %v10316_v56 = vpop.f32.mrf.mxu1 }
 0x10a   : > { %v11886_v57 = vpop.f32.mrf.mxu0  ;;  %v11888_v60 = vpop.f32.mrf.mxu1 }
 0x10c   : > { %v10252_v62 = vpop.f32.mrf.mxu0  ;;  %v10319_v3 = vpop.f32.mrf.mxu1 }
 0x10e   : > { %v11892_v4 = vpop.f32.mrf.mxu0  ;;  %v11894_v5 = vpop.f32.mrf.mxu1 }
 0x110   : > { %v10255_v10 = vpop.f32.mrf.mxu0  ;;  %v10322_v14 = vpop.f32.mrf.mxu1 }
 0x112   : > { %v11898_v15 = vpop.f32.mrf.mxu0  ;;  %v11900_v19 = vpop.f32.mrf.mxu1 }
 0x114   : > { %v10258_v24 = vpop.f32.mrf.mxu0  ;;  %v10325_v25 = vpop.f32.mrf.mxu1 }
 0x116   : > { %v11904_v29 = vpop.f32.mrf.mxu0  ;;  %v11906_v30 = vpop.f32.mrf.mxu1 }
 0x118   : > { %v10261_v35 = vpop.f32.mrf.mxu0  ;;  %v10328_v39 = vpop.f32.mrf.mxu1 }
 0x11a   : > { %v11910_v40 = vpop.f32.mrf.mxu0  ;;  %v11912_v46 = vpop.f32.mrf.mxu1 }
 0x11c   : > { %v10264_v55 = vpop.f32.mrf.mxu0  ;;  %v10331_v56 = vpop.f32.mrf.mxu1 }
 0x11e   : > { %v11916_v62 = vpop.f32.mrf.mxu0  ;;  %v11918_v3 = vpop.f32.mrf.mxu1 }
 0x120   : > { %v10267_v14 = vpop.f32.mrf.mxu0  ;;  %v10334_v24 = vpop.f32.mrf.mxu1 }
 0x122   : > { %v11922_v25 = vpop.f32.mrf.mxu0  ;;  %v11924_v35 = vpop.f32.mrf.mxu1 }
 0x124   : > { %v10270_v34 = vpop.f32.mrf.mxu0  ;;  %v10337_v47 = vpop.f32.mrf.mxu1 }
 0x126   : > { %v11928_v55 = vpop.f32.mrf.mxu1  ;;  %v1032_v56 = vpop.f32.mrf.mxu0 }
 0x128   : > { %v10340_v9 = vpop.f32.mrf.mxu1  ;;  %v10368_v61 = vpop.f32.mrf.mxu0 }
 0x12a   : > { %v11932_v10 = vpop.f32.mrf.mxu1  ;;  %v1037_v14 = vpop.f32.mrf.mxu0 }
 0x12c   : > { %v10343_v52 = vpop.f32.mrf.mxu1  ;;  %v10371_v45 = vpop.f32.mrf.mxu0 }
 0x12e   : > { %v11936_v38 = vpop.f32.mrf.mxu1  ;;  %v1042_v34 = vpop.f32.mrf.mxu0 }
 0x130   : > { %v10346_v39 = vpop.f32.mrf.mxu1  ;;  %v10374_v33 = vpop.f32.mrf.mxu0 }
 0x132   : > { %v11940_v28 = vpop.f32.mrf.mxu1  ;;  %v1047_v9 = vpop.f32.mrf.mxu0 }
 0x134   : > { %v10349_v20 = vpop.f32.mrf.mxu1  ;;  %v10377_v23 = vpop.f32.mrf.mxu0 }
 0x136   : > { %v11944_v18 = vpop.f32.mrf.mxu1  ;;  %v1052_v52 = vpop.f32.mrf.mxu0 }
 0x138   : > { %v10352_v45 = vpop.f32.mrf.mxu1  ;;  %v10380_v24 = vpop.f32.mrf.mxu0 }
 0x139   : > { %v17940_v24 = vmax.f32 %v11787_v43, %v11821_v0 }
 0x13a   : > { %v11946_v1 = vpop.f32.mrf.mxu1  ;;  %v11948_v13 = vpop.f32.mrf.mxu0 }
 0x13b   : > { %17937 = vst [vmem:[#allocation6_spill] sm:$0xff] %v11946_v1  ;;  %v1156_v45 = vmax.f32 %v17940_v24, %v1032_v56 }
 0x13c   : > { %v10355_v47 = vpop.f32.mrf.mxu1  ;;  %v10383_v39 = vpop.f32.mrf.mxu0 }
 0x13d   : > { %v11966_v39 = vld [vmem:[%s17894_s2] ss:$0 sm:$0xff] }
 0x13e   : > { %v11950_v33 = vpop.f32.mrf.mxu1  ;;  %v11952_v8 = vpop.f32.mrf.mxu0 }
 0x13f   : > { %17938 = vst [vmem:[#allocation7_spill] sm:$0xff] %v11950_v33 }
 0x140   : > { %v10358_v2 = vpop.f32.mrf.mxu1  ;;  %v10386_v59 = vpop.f32.mrf.mxu0 }
 0x142   : > { %v11954_v61 = vpop.f32.mrf.mxu1  ;;  %v11956_v23 = vpop.f32.mrf.mxu0 }
 0x143   : > { %17939 = vst [vmem:[#allocation8_spill] sm:$0xff] %v11954_v61  ;;  %v17941_v61 = vmax.f32 %v11795_v48, %v11831_v7 }
 0x144   : > { %v10361_v20 = vpop.f32.mrf.mxu1  ;;  %v10389_v54 = vpop.f32.mrf.mxu0 }
 0x145   : > { %v1157_v20 = vmax.f32 %v17941_v61, %v1037_v14  ;;  %v17943_v14 = vmov 0.0   ;;  %v17944_v61 = vmax.f32 %v11811_v58, %v11846_v17 }
 0x146   : > { %v11961_v49 = vpop.f32.mrf.mxu0  ;;  %v1348_v47 = vpop.f32.mrf.mxu1 }
 0x147   : > { %v1472_v2 = vmax.f32 %v1156_v45, %v1348_v47  ;;  %v17942_v45 = vmax.f32 %v11803_v53, %v11840_v12 }
 0x148   : > { %v10392_v59 = vpop.f32.mrf.mxu0  ;;  %v10447_v33 = vpop.f32.mrf.mxu1 }
 0x149   : > { %v1504_v54 = vadd.f32 %v11966_v39, %v1472_v2  ;;  %v1158_v47 = vmax.f32 %v17942_v45, %v1042_v34  ;;  %v1159_v2 = vmax.f32 %v17944_v61, %v1047_v9 }
 0x14a   : > { %v11972_v1 = vpop.f32.mrf.mxu0  ;;  %v1353_v43 = vpop.f32.mrf.mxu1 }
 0x14b   : > { %v11974_v0 = vmax.f32 %v1504_v54, 0.0  ;;  %v1473_v56 = vmax.f32 %v1157_v20, %v1353_v43 }
 0x14c   : > { %v10395_v24 = vpop.f32.mrf.mxu0  ;;  %v10450_v44 = vpop.f32.mrf.mxu1 }
 0x14d   : > { %v1505_v33 = vadd.f32 %v11966_v39, %v1473_v56  ;;  %10529 = vmatmul.mubr.msk.f32.vlgmr.msra.gmra.mxu0 %vm1558_vm3, %v11974_v0  ;;  %10612 = vmatmul.mubr.msk.f32.vlgmr.msra.gmra.mxu1 %vm1558_vm3, %v11974_v0  ;;  %v17945_v56 = vmax.f32 %v11819_v63, %v11852_v22 }
 0x14e   : > { %v11984_v48 = vpop.f32.mrf.mxu0  ;;  %v1358_v7 = vpop.f32.mrf.mxu1  ;;  %10531 = vmatprep.mubr.msk.f32.mxu0 %vm11292_vm1, %v17943_v14  ;;  %10614 = vmatprep.mubr.msk.f32.mxu1 %vm11292_vm1, %v17943_v14 }
 0x14f   : > { %v11990_v44 = vmax.f32 %v1505_v33, 0.0  ;;  %v1474_v53 = vmax.f32 %v1158_v47, %v1358_v7  ;;  %v1160_v24 = vmax.f32 %v17945_v56, %v1052_v52 }
 0x150   : > { %v10398_v12 = vpop.f32.mrf.mxu0  ;;  %v10453_v34 = vpop.f32.mrf.mxu1 }
 0x151   : > { %v1506_v59 = vadd.f32 %v11966_v39, %v1474_v53  ;;  %10532 = vmatmul.mubr.msk.f32.gmra.mxu0 %vm1558_vm3, %v11990_v44  ;;  %10615 = vmatmul.mubr.msk.f32.gmra.mxu1 %vm1558_vm3, %v11990_v44  ;;  %v17946_v53 = vmax.f32 %v11829_v6, %v11858_v27 }
 0x152   : > { %v12000_v20 = vpop.f32.mrf.mxu0  ;;  %v1363_v54 = vpop.f32.mrf.mxu1  ;;  %10534 = vmatprep.mubr.msk.f32.mxu0 %vm11292_vm1, %v17943_v14  ;;  %10617 = vmatprep.mubr.msk.f32.mxu1 %vm11292_vm1, %v17943_v14 }
 0x153   : > { %v12006_v43 = vmax.f32 %v1506_v59, 0.0  ;;  %v1475_v58 = vmax.f32 %v1159_v2, %v1363_v54  ;;  %v1161_v12 = vmax.f32 %v17946_v53, %v11948_v13  ;;  %v17947_v54 = vmax.f32 %v11838_v11, %v11864_v32 }
 0x154   : > { %v10401_v17 = vpop.f32.mrf.mxu0  ;;  %v10456_v9 = vpop.f32.mrf.mxu1 }
 0x155   : > { %v1507_v45 = vadd.f32 %v11966_v39, %v1475_v58  ;;  %10535 = vmatmul.mubr.msk.f32.gmra.mxu0 %vm1558_vm3, %v12006_v43  ;;  %10618 = vmatmul.mubr.msk.f32.gmra.mxu1 %vm1558_vm3, %v12006_v43  ;;  %v1162_v58 = vmax.f32 %v17947_v54, %v11952_v8  ;;  %v17950_v54 = vmax.f32 %v11856_v26, %v11882_v51 }
 0x156   : > { %v12016_v47 = vpop.f32.mrf.mxu0  ;;  %v1368_v33 = vpop.f32.mrf.mxu1  ;;  %10537 = vmatprep.mubr.msk.f32.mxu0 %vm11292_vm1, %v17943_v14  ;;  %10620 = vmatprep.mubr.msk.f32.mxu1 %vm11292_vm1, %v17943_v14 }
 0x157   : > { %v12022_v7 = vmax.f32 %v1507_v45, 0.0  ;;  %v1476_v63 = vmax.f32 %v1160_v24, %v1368_v33  ;;  %v17948_v45 = vmax.f32 %v11844_v16, %v11870_v37 }
 0x158   : > { %v10404_v22 = vpop.f32.mrf.mxu0  ;;  %v10459_v52 = vpop.f32.mrf.mxu1 }
 0x159   : > { %v1508_v34 = vadd.f32 %v11966_v39, %v1476_v63  ;;  %10538 = vmatmul.mubr.msk.f32.gmra.mxu0 %vm1558_vm3, %v12022_v7  ;;  %10621 = vmatmul.mubr.msk.f32.gmra.mxu1 %vm1558_vm3, %v12022_v7  ;;  %v1163_v33 = vmax.f32 %v17948_v45, %v11956_v23 }
 0x15a   : > { %v12033_v61 = vpop.f32.mrf.mxu0  ;;  %v1373_v2 = vpop.f32.mrf.mxu1  ;;  %10540 = vmatprep.mubr.msk.f32.mxu0 %vm11292_vm1, %v17943_v14  ;;  %10623 = vmatprep.mubr.msk.f32.mxu1 %vm11292_vm1, %v17943_v14 }
 0x15b   : > { %v12039_v59 = vmax.f32 %v1508_v34, 0.0  ;;  %v1477_v6 = vmax.f32 %v1161_v12, %v1373_v2  ;;  %v17949_v12 = vmax.f32 %v11850_v21, %v11876_v42 }
 0x15c   : > { %v10407_v13 = vpop.f32.mrf.mxu0  ;;  %v10462_v27 = vpop.f32.mrf.mxu1 }
 0x15d   : > { %v1509_v17 = vadd.f32 %v11966_v39, %v1477_v6  ;;  %10541 = vmatmul.mubr.msk.f32.gmra.mxu0 %vm1558_vm3, %v12039_v59  ;;  %10624 = vmatmul.mubr.msk.f32.gmra.mxu1 %vm1558_vm3, %v12039_v59  ;;  %v1164_v34 = vmax.f32 %v17949_v12, %v11961_v49 }
 0x15e   : > { %v12050_v9 = vpop.f32.mrf.mxu0  ;;  %v1378_v56 = vpop.f32.mrf.mxu1  ;;  %10543 = vmatprep.mubr.msk.f32.mxu0 %vm11292_vm1, %v17943_v14  ;;  %10626 = vmatprep.mubr.msk.f32.mxu1 %vm11292_vm1, %v17943_v14 }
 0x15f   : > { %v12056_v24 = vmax.f32 %v1509_v17, 0.0  ;;  %v1478_v8 = vmax.f32 %v1162_v58, %v1378_v56  ;;  %v1165_v58 = vmax.f32 %v17950_v54, %v11972_v1 }
 0x160   : > { %v10410_v11 = vpop.f32.mrf.mxu0  ;;  %v10465_v32 = vpop.f32.mrf.mxu1 }
 0x161   : > { %v1510_v63 = vadd.f32 %v11966_v39, %v1478_v8  ;;  %10544 = vmatmul.mubr.msk.f32.gmra.mxu0 %vm1558_vm3, %v12056_v24  ;;  %10627 = vmatmul.mubr.msk.f32.gmra.mxu1 %vm1558_vm3, %v12056_v24  ;;  %v17951_v32 = vmax.f32 %v11862_v31, %v11888_v60 }
 0x162   : > { %v12067_v22 = vpop.f32.mrf.mxu0  ;;  %v1383_v52 = vpop.f32.mrf.mxu1  ;;  %10546 = vmatprep.mubr.msk.f32.mxu0 %vm11292_vm1, %v17943_v14  ;;  %10629 = vmatprep.mubr.msk.f32.mxu1 %vm11292_vm1, %v17943_v14 }
 0x163   : > { %v12073_v53 = vmax.f32 %v1510_v63, 0.0  ;;  %v1479_v16 = vmax.f32 %v1163_v33, %v1383_v52  ;;  %v1166_v45 = vmax.f32 %v17951_v32, %v11984_v48 }
 0x164   : > { %v10413_v37 = vpop.f32.mrf.mxu0  ;;  %v10468_v23 = vpop.f32.mrf.mxu1 }
 0x165   : > { %v1511_v2 = vadd.f32 %v11966_v39, %v1479_v16  ;;  %10547 = vmatmul.mubr.msk.f32.gmra.mxu0 %vm1558_vm3, %v12073_v53  ;;  %10630 = vmatmul.mubr.msk.f32.gmra.mxu1 %vm1558_vm3, %v12073_v53  ;;  %v17953_v37 = vmax.f32 %v11868_v36, %v11894_v5 }
 0x166   : > { %v12084_v6 = vpop.f32.mrf.mxu0  ;;  %v1388_v13 = vpop.f32.mrf.mxu1  ;;  %10549 = vmatprep.mubr.msk.f32.mxu0 %vm11292_vm1, %v17943_v14  ;;  %10632 = vmatprep.mubr.msk.f32.mxu1 %vm11292_vm1, %v17943_v14 }
 0x167   : > { %v12090_v27 = vmax.f32 %v1511_v2, 0.0  ;;  %v1480_v49 = vmax.f32 %v1164_v34, %v1388_v13  ;;  %v1167_v23 = vmax.f32 %v17953_v37, %v12000_v20 }
 0x168   : > { %v10416_v21 = vpop.f32.mrf.mxu0  ;;  %v10471_v42 = vpop.f32.mrf.mxu1 }
 0x169   : > { %v1512_v17 = vadd.f32 %v11966_v39, %v1480_v49  ;;  %10550 = vmatmul.mubr.msk.f32.gmra.mxu0 %vm1558_vm3, %v12090_v27  ;;  %10633 = vmatmul.mubr.msk.f32.gmra.mxu1 %vm1558_vm3, %v12090_v27  ;;  %v17955_v49 = vmax.f32 %v11874_v41, %v11900_v19 }
 0x16a   : > { %v12101_v56 = vpop.f32.mrf.mxu0  ;;  %v1393_v8 = vpop.f32.mrf.mxu1  ;;  %10552 = vmatprep.mubr.msk.f32.mxu0 %vm11292_vm1, %v17943_v14  ;;  %10635 = vmatprep.mubr.msk.f32.mxu1 %vm11292_vm1, %v17943_v14 }
 0x16b   : > { %v12107_v11 = vmax.f32 %v1512_v17, 0.0  ;;  %v1481_v1 = vmax.f32 %v1165_v58, %v1393_v8  ;;  %v1168_v21 = vmax.f32 %v17955_v49, %v12016_v47  ;;  %v17957_v8 = vmax.f32 %v11880_v50, %v11906_v30 }
 0x16c   : > { %v10419_v26 = vpop.f32.mrf.mxu0  ;;  %v10474_v51 = vpop.f32.mrf.mxu1  ;;  %v17963_v49 = vmax.f32 %v11898_v15, %v11924_v35 }
 0x16d   : > { %v1513_v33 = vadd.f32 %v11966_v39, %v1481_v1  ;;  %10553 = vmatmul.mubr.msk.f32.gmra.mxu0 %vm1558_vm3, %v12107_v11  ;;  %10636 = vmatmul.mubr.msk.f32.gmra.mxu1 %vm1558_vm3, %v12107_v11  ;;  %v1169_v1 = vmax.f32 %v17957_v8, %v12033_v61 }
 0x16e   : > { %v12118_v63 = vpop.f32.mrf.mxu0  ;;  %v1398_v52 = vpop.f32.mrf.mxu1  ;;  %10555 = vmatprep.mubr.msk.f32.mxu0 %vm11292_vm1, %v17943_v14  ;;  %10638 = vmatprep.mubr.msk.f32.mxu1 %vm11292_vm1, %v17943_v14 }
 0x16f   : > { %v12124_v16 = vmax.f32 %v1513_v33, 0.0  ;;  %v1482_v31 = vmax.f32 %v1166_v45, %v1398_v52  ;;  %v17959_v33 = vmax.f32 %v11886_v57, %v11912_v46 }
 0x170   : > { %v10422_v60 = vpop.f32.mrf.mxu0  ;;  %v10477_v48 = vpop.f32.mrf.mxu1 }
 0x171   : > { %17952 = vst [vmem:[#allocation9_spill] sm:$0xff] %v12124_v16  ;;  %v1514_v12 = vadd.f32 %v11966_v39, %v1482_v31  ;;  %10556 = vmatmul.mubr.msk.f32.gmra.mxu0 %vm1558_vm3, %v12124_v16  ;;  %10639 = vmatmul.mubr.msk.f32.gmra.mxu1 %vm1558_vm3, %v12124_v16  ;;  %v1170_v52 = vmax.f32 %v17959_v33, %v12050_v9 }
 0x172   : > { %v12135_v34 = vpop.f32.mrf.mxu0  ;;  %v1403_v2 = vpop.f32.mrf.mxu1  ;;  %10558 = vmatprep.mubr.msk.f32.mxu0 %vm11292_vm1, %v17943_v14  ;;  %10641 = vmatprep.mubr.msk.f32.mxu1 %vm11292_vm1, %v17943_v14 }
 0x173   : > { %v12141_v13 = vmax.f32 %v1514_v12, 0.0  ;;  %v1483_v36 = vmax.f32 %v1167_v23, %v1403_v2  ;;  %v17961_v23 = vmax.f32 %v11892_v4, %v11918_v3 }
 0x174   : > { %v10425_v5 = vpop.f32.mrf.mxu0  ;;  %v10480_v20 = vpop.f32.mrf.mxu1 }
 0x175   : > { %17954 = vst [vmem:[#allocation10_spill] sm:$0xff] %v12141_v13  ;;  %v1515_v42 = vadd.f32 %v11966_v39, %v1483_v36  ;;  %10559 = vmatmul.mubr.msk.f32.gmra.mxu0 %vm1558_vm3, %v12141_v13  ;;  %10642 = vmatmul.mubr.msk.f32.gmra.mxu1 %vm1558_vm3, %v12141_v13  ;;  %v1171_v12 = vmax.f32 %v17961_v23, %v12067_v22 }
 0x176   : > { %v12152_v54 = vpop.f32.mrf.mxu0  ;;  %v1408_v58 = vpop.f32.mrf.mxu1  ;;  %10561 = vmatprep.mubr.msk.f32.mxu0 %vm11292_vm1, %v17943_v14  ;;  %10644 = vmatprep.mubr.msk.f32.mxu1 %vm11292_vm1, %v17943_v14 }
 0x177   : > { %v12158_v17 = vmax.f32 %v1515_v42, 0.0  ;;  %v1484_v41 = vmax.f32 %v1168_v21, %v1408_v58  ;;  %v1172_v21 = vmax.f32 %v17963_v49, %v12084_v6 }
 0x178   : > { %v10428_v19 = vpop.f32.mrf.mxu0  ;;  %v10483_v47 = vpop.f32.mrf.mxu1 }
 0x179   : > { %17956 = vst [vmem:[#allocation11_spill] sm:$0xff] %v12158_v17  ;;  %v1516_v26 = vadd.f32 %v11966_v39, %v1484_v41  ;;  %10562 = vmatmul.mubr.msk.f32.gmra.mxu0 %vm1558_vm3, %v12158_v17  ;;  %10645 = vmatmul.mubr.msk.f32.gmra.mxu1 %vm1558_vm3, %v12158_v17  ;;  %v17965_v47 = vmax.f32 %v11904_v29, %v11928_v55 }
 0x17a   : > { %v12169_v51 = vpop.f32.mrf.mxu0  ;;  %v1413_v32 = vpop.f32.mrf.mxu1  ;;  %10564 = vmatprep.mubr.msk.f32.mxu0 %vm11292_vm1, %v17943_v14  ;;  %10647 = vmatprep.mubr.msk.f32.mxu1 %vm11292_vm1, %v17943_v14  ;;  %v17967_v55 = vmax.f32 %v11910_v40, %v11932_v10  ;;  %v17969_v10 = vmax.f32 %v11916_v62, %v11936_v38  ;;  %v17971_v62 = vmax.f32 %v11922_v25, %v11940_v28 }
 0x17b   : > { %v12175_v45 = vmax.f32 %v1516_v26, 0.0  ;;  %v1485_v50 = vmax.f32 %v1169_v1, %v1413_v32  ;;  %v1173_v8 = vmax.f32 %v17965_v47, %v12101_v56  ;;  %v17978_v47 = vld [vmem:[#allocation4_spill] sm:$0xff] }
 0x17c   : > { %v10431_v30 = vpop.f32.mrf.mxu0  ;;  %v10486_v61 = vpop.f32.mrf.mxu1  ;;  %v1174_v56 = vmax.f32 %v17967_v55, %v12118_v63  ;;  %v1175_v63 = vmax.f32 %v17969_v10, %v12135_v34  ;;  %v1176_v34 = vmax.f32 %v17971_v62, %v12152_v54 }
 0x17d   : > { %17958 = vst [vmem:[#allocation12_spill] sm:$0xff] %v12175_v45  ;;  %v1517_v31 = vadd.f32 %v11966_v39, %v1485_v50  ;;  %10565 = vmatmul.mubr.msk.f32.gmra.mxu0 %vm1558_vm3, %v12175_v45  ;;  %10648 = vmatmul.mubr.msk.f32.gmra.mxu1 %vm1558_vm3, %v12175_v45 }
 0x17e   : > { %v12186_v60 = vpop.f32.mrf.mxu0  ;;  %v1418_v48 = vpop.f32.mrf.mxu1  ;;  %10567 = vmatprep.mubr.msk.f32.mxu0 %vm11292_vm1, %v17943_v14  ;;  %10650 = vmatprep.mubr.msk.f32.mxu1 %vm11292_vm1, %v17943_v14 }
 0x17f   : > { %v12192_v37 = vmax.f32 %v1517_v31, 0.0  ;;  %v1486_v57 = vmax.f32 %v1170_v52, %v1418_v48 }
 0x180   : > { %v10434_v46 = vpop.f32.mrf.mxu0  ;;  %v10489_v9 = vpop.f32.mrf.mxu1 }
 0x181   : > { %17960 = vst [vmem:[#allocation13_spill] sm:$0xff] %v12192_v37  ;;  %v1518_v2 = vadd.f32 %v11966_v39, %v1486_v57  ;;  %10568 = vmatmul.mubr.msk.f32.gmra.mxu0 %vm1558_vm3, %v12192_v37  ;;  %10651 = vmatmul.mubr.msk.f32.gmra.mxu1 %vm1558_vm3, %v12192_v37 }
 0x182   : > { %v12203_v36 = vpop.f32.mrf.mxu0  ;;  %v1423_v5 = vpop.f32.mrf.mxu1  ;;  %10570 = vmatprep.mubr.msk.f32.mxu0 %vm11292_vm1, %v17943_v14  ;;  %10653 = vmatprep.mubr.msk.f32.mxu1 %vm11292_vm1, %v17943_v14 }
 0x183   : > { %v12209_v20 = vmax.f32 %v1518_v2, 0.0  ;;  %v1487_v4 = vmax.f32 %v1171_v12, %v1423_v5  ;;  %v17972_v12 = vld [vmem:[#allocation2_spill] sm:$0xff] }
 0x184   : > { %v10437_v3 = vpop.f32.mrf.mxu0  ;;  %v10492_v22 = vpop.f32.mrf.mxu1  ;;  %v861_v2 = vmax.f32 %v17972_v12, %v11944_v18  ;;  %v17974_v18 = vld [vmem:[#allocation6_spill] sm:$0xff] }
 0x185   : > { %17962 = vst [vmem:[#allocation14_spill] sm:$0xff] %v12209_v20  ;;  %v1519_v42 = vadd.f32 %v11966_v39, %v1487_v4  ;;  %10571 = vmatmul.mubr.msk.f32.gmra.mxu0 %vm1558_vm3, %v12209_v20  ;;  %10654 = vmatmul.mubr.msk.f32.gmra.mxu1 %vm1558_vm3, %v12209_v20  ;;  %v17975_v22 = vld [vmem:[#allocation3_spill] sm:$0xff] }
 0x186   : > { %v12220_v58 = vpop.f32.mrf.mxu0  ;;  %v1428_v41 = vpop.f32.mrf.mxu1  ;;  %10573 = vmatprep.mubr.msk.f32.mxu0 %vm11292_vm1, %v17943_v14  ;;  %10656 = vmatprep.mubr.msk.f32.mxu1 %vm11292_vm1, %v17943_v14  ;;  %v1177_v5 = vmax.f32 %v861_v2, %v12169_v51  ;;  %v862_v49 = vmax.f32 %v17975_v22, %v17974_v18 }
 0x187   : > { %v12226_v19 = vmax.f32 %v1519_v42, 0.0  ;;  %v1488_v15 = vmax.f32 %v1172_v21, %v1428_v41 }
 0x188   : > { %v10495_v35 = vpop.f32.mrf.mxu1  ;;  %v10440_v6 = vpop.f32.mrf.mxu0  ;;  %v1178_v41 = vmax.f32 %v862_v49, %v12186_v60 }
 0x189   : > { %17964 = vst [vmem:[#allocation15_spill] sm:$0xff] %v12226_v19  ;;  %v1520_v1 = vadd.f32 %v11966_v39, %v1488_v15  ;;  %10574 = vmatmul.mubr.msk.f32.gmra.mxu0 %vm1558_vm3, %v12226_v19  ;;  %10657 = vmatmul.mubr.msk.f32.gmra.mxu1 %vm1558_vm3, %v12226_v19  ;;  %v17977_v6 = vld [vmem:[#allocation7_spill] sm:$0xff] }
 0x18a   : > { %v1433_v26 = vpop.f32.mrf.mxu1  ;;  %10576 = vmatprep.mubr.msk.f32.mxu0 %vm11292_vm1, %v17943_v14  ;;  %10659 = vmatprep.mubr.msk.f32.mxu1 %vm11292_vm1, %v17943_v14 }
 0x18b   : > { %v12241_v32 = vmax.f32 %v1520_v1, 0.0  ;;  %v1489_v50 = vmax.f32 %v1173_v8, %v1433_v26  ;;  %v863_v8 = vmax.f32 %v17978_v47, %v17977_v6 }
 0x18c   : > { %v10498_v29 = vpop.f32.mrf.mxu1 }
 0x18d   : > { %17966 = vst [vmem:[#allocation16_spill] sm:$0xff] %v12241_v32  ;;  %v1521_v30 = vadd.f32 %v11966_v39, %v1489_v50  ;;  %10577 = vmatmul.mubr.msk.f32.gmra.mxu0 %vm1558_vm3, %v12241_v32  ;;  %10660 = vmatmul.mubr.msk.f32.gmra.mxu1 %vm1558_vm3, %v12241_v32  ;;  %v1179_v50 = vmax.f32 %v863_v8, %v12203_v36 }
 0x18e   : > { %v1438_v61 = vpop.f32.mrf.mxu1  ;;  %10579 = vmatprep.mubr.msk.f32.mxu0 %vm11292_vm1, %v17943_v14  ;;  %10662 = vmatprep.mubr.msk.f32.mxu1 %vm11292_vm1, %v17943_v14 }
 0x18f   : > { %v12256_v33 = vmax.f32 %v1521_v30, 0.0  ;;  %v1490_v52 = vmax.f32 %v1174_v56, %v1438_v61  ;;  %v17980_v56 = vld [vmem:[#allocation8_spill] sm:$0xff]  ;;  %v17981_v30 = vld [vmem:[#allocation5_spill] sm:$0xff] }
 0x190   : > { %v10501_v40 = vpop.f32.mrf.mxu1  ;;  %v864_v61 = vmax.f32 %v17981_v30, %v17980_v56 }
 0x191   : > { %17968 = vst [vmem:[#allocation17_spill] sm:$0xff] %v12256_v33  ;;  %v1522_v31 = vadd.f32 %v11966_v39, %v1490_v52  ;;  %10580 = vmatmul.mubr.msk.f32.gmra.mxu0 %vm1558_vm3, %v12256_v33  ;;  %10663 = vmatmul.mubr.msk.f32.gmra.mxu1 %vm1558_vm3, %v12256_v33 }
 0x192   : > { %v1443_v48 = vpop.f32.mrf.mxu1  ;;  %10582 = vmatprep.mubr.msk.f32.mxu0 %vm11292_vm1, %v17943_v14  ;;  %10665 = vmatprep.mubr.msk.f32.mxu1 %vm11292_vm1, %v17943_v14  ;;  %v1180_v10 = vmax.f32 %v864_v61, %v12220_v58 }
 0x193   : > { %v12271_v57 = vmax.f32 %v1522_v31, 0.0  ;;  %v1491_v46 = vmax.f32 %v1175_v63, %v1443_v48 }
 0x194   : > { %v10504_v38 = vpop.f32.mrf.mxu1 }
 0x195   : > { %17970 = vst [vmem:[#allocation18_spill] sm:$0xff] %v12271_v57  ;;  %v1523_v9 = vadd.f32 %v11966_v39, %v1491_v46  ;;  %10583 = vmatmul.mubr.msk.f32.gmra.mxu0 %vm1558_vm3, %v12271_v57  ;;  %10666 = vmatmul.mubr.msk.f32.gmra.mxu1 %vm1558_vm3, %v12271_v57 }
 0x196   : > { %v1448_v23 = vpop.f32.mrf.mxu1  ;;  %10585 = vmatprep.mubr.msk.f32.mxu0 %vm11292_vm1, %v17943_v14  ;;  %10668 = vmatprep.mubr.msk.f32.mxu1 %vm11292_vm1, %v17943_v14 }
 0x197   : > { %v12288_v28 = vmax.f32 %v1523_v9, 0.0  ;;  %v1492_v25 = vmax.f32 %v1176_v34, %v1448_v23  ;;  %v1825_v34 = vld [vmem:[%s17895_s3 + $0x8] sm:$0xff] }
 0x198   : > { %v10507_v54 = vpop.f32.mrf.mxu1 }
 0x199   : > { %17973 = vst [vmem:[#allocation2_spill] sm:$0xff] %v12288_v28  ;;  %v1524_v4 = vadd.f32 %v11966_v39, %v1492_v25  ;;  %10586 = vmatmul.mubr.msk.f32.gmra.mxu0 %vm1558_vm3, %v12288_v28  ;;  %10669 = vmatmul.mubr.msk.f32.gmra.mxu1 %vm1558_vm3, %v12288_v28 }
 0x19a   : > { %v1453_v3 = vpop.f32.mrf.mxu1  ;;  %10588 = vmatprep.mubr.msk.f32.mxu0 %vm11292_vm1, %v17943_v14  ;;  %10671 = vmatprep.mubr.msk.f32.mxu1 %vm11292_vm1, %v17943_v14 }
 0x19b   : > { %v12302_v21 = vmax.f32 %v1524_v4, 0.0  ;;  %v1493_v51 = vmax.f32 %v1177_v5, %v1453_v3 }
 0x19c   : > { %v10510_v42 = vpop.f32.mrf.mxu1 }
 0x19d   : > { %17976 = vst [vmem:[#allocation6_spill] sm:$0xff] %v12302_v21  ;;  %v1525_v15 = vadd.f32 %v11966_v39, %v1493_v51  ;;  %10589 = vmatmul.mubr.msk.f32.gmra.mxu0 %vm1558_vm3, %v12302_v21  ;;  %10672 = vmatmul.mubr.msk.f32.gmra.mxu1 %vm1558_vm3, %v12302_v21 }
 0x19e   : > { %v1458_v35 = vpop.f32.mrf.mxu1  ;;  %10591 = vmatprep.mubr.msk.f32.mxu0 %vm11292_vm1, %v17943_v14  ;;  %10674 = vmatprep.mubr.msk.f32.mxu1 %vm11292_vm1, %v17943_v14 }
 0x19f   : > { %v12316_v1 = vmax.f32 %v1525_v15, 0.0  ;;  %v1494_v60 = vmax.f32 %v1178_v41, %v1458_v35 }
 0x1a0   : > { %v10513_v26 = vpop.f32.mrf.mxu1 }
 0x1a1   : > { %17979 = vst [vmem:[#allocation3_spill] sm:$0xff] %v12316_v1  ;;  %v1526_v29 = vadd.f32 %v11966_v39, %v1494_v60  ;;  %10592 = vmatmul.mubr.msk.f32.gmra.mxu0 %vm1558_vm3, %v12316_v1  ;;  %10675 = vmatmul.mubr.msk.f32.gmra.mxu1 %vm1558_vm3, %v12316_v1 }
 0x1a2   : > { %v1463_v55 = vpop.f32.mrf.mxu1  ;;  %10594 = vmatprep.mubr.msk.f32.mxu0 %vm11292_vm1, %v17943_v14  ;;  %10677 = vmatprep.mubr.msk.f32.mxu1 %vm11292_vm1, %v17943_v14 }
 0x1a3   : > { %v12330_v52 = vmax.f32 %v1526_v29, 0.0  ;;  %v1495_v36 = vmax.f32 %v1179_v50, %v1463_v55 }
 0x1a4   : > { %v10516_v40 = vpop.f32.mrf.mxu1 }
 0x1a5   : > { %17982 = vst [vmem:[#allocation7_spill] sm:$0xff] %v12330_v52  ;;  %v1527_v63 = vadd.f32 %v11966_v39, %v1495_v36  ;;  %10595 = vmatmul.mubr.msk.f32.gmra.mxu0 %vm1558_vm3, %v12330_v52  ;;  %10678 = vmatmul.mubr.msk.f32.gmra.mxu1 %vm1558_vm3, %v12330_v52 }
 0x1a6   : > { %v1468_v31 = vpop.f32.mrf.mxu1  ;;  %10597 = vmatprep.mubr.msk.f32.mxu0 %vm11292_vm1, %v17943_v14  ;;  %10680 = vmatprep.mubr.msk.f32.mxu1 %vm11292_vm1, %v17943_v14 }
 0x1a7   : > { %v12342_v48 = vmax.f32 %v1527_v63, 0.0  ;;  %v1496_v46 = vmax.f32 %v1180_v10, %v1468_v31 }
 0x1a8   : > { %v10519_v38 = vpop.f32.mrf.mxu1 }
 0x1a9   : > { %17983 = vst [vmem:[#allocation4_spill] sm:$0xff] %v12342_v48  ;;  %v1528_v58 = vadd.f32 %v11966_v39, %v1496_v46  ;;  %10598 = vmatmul.mubr.msk.f32.gmra.mxu0 %vm1558_vm3, %v12342_v48  ;;  %10681 = vmatmul.mubr.msk.f32.gmra.mxu1 %vm1558_vm3, %v12342_v48  ;;  %v8894_v39 = vld [vmem:[%s17895_s3 + $0x1c8] sm:$0xff] }
 0x1aa   : > { %10600 = vmatprep.mubr.msk.f32.mxu0 %vm11292_vm1, %v17943_v14  ;;  %10683 = vmatprep.mubr.msk.f32.mxu1 %vm11292_vm1, %v17943_v14 }
 0x1ab   : > { %v12353_v62 = vmax.f32 %v1528_v58, 0.0 }
 0x1ad   : > { %17984 = vst [vmem:[#allocation8_spill] sm:$0xff] %v12353_v62  ;;  %10601 = vmatmul.mubr.msk.f32.gmra.mxu0 %vm1558_vm3, %v12353_v62  ;;  %10684 = vmatmul.mubr.msk.f32.gmra.mxu1 %vm1558_vm3, %v12353_v62 }
 0x1ae   : > { %8908 = vmatprep.mubr.msk.f32.mxu0 %vm2093_vm4, %v8894_v39  ;;  %8916 = vmatprep.mubr.msk.f32.mxu1 %vm2093_vm4, %v1825_v34 }
 0x20d   : > { %v12367_v9 = vpop.f32.mrf.mxu0  ;;  %v12369_v23 = vpop.f32.mrf.mxu1 }
 0x20f   : > { %v10530_v12 = vpop.f32.mrf.mxu0  ;;  %v10613_v2 = vpop.f32.mrf.mxu1 }
 0x211   : > { %v12371_v25 = vpop.f32.mrf.mxu0  ;;  %v12373_v54 = vpop.f32.mrf.mxu1 }
 0x213   : > { %v10533_v5 = vpop.f32.mrf.mxu0  ;;  %v10616_v4 = vpop.f32.mrf.mxu1 }
 0x215   : > { %v12375_v3 = vpop.f32.mrf.mxu0  ;;  %v12377_v18 = vpop.f32.mrf.mxu1 }
 0x217   : > { %v10536_v22 = vpop.f32.mrf.mxu0  ;;  %v10619_v49 = vpop.f32.mrf.mxu1 }
 0x219   : > { %v12379_v51 = vpop.f32.mrf.mxu0  ;;  %v12381_v42 = vpop.f32.mrf.mxu1 }
 0x21b   : > { %v10539_v41 = vpop.f32.mrf.mxu0  ;;  %v10622_v15 = vpop.f32.mrf.mxu1 }
 0x21d   : > { %v12383_v35 = vpop.f32.mrf.mxu0  ;;  %v12385_v6 = vpop.f32.mrf.mxu1 }
 0x21f   : > { %v10542_v47 = vpop.f32.mrf.mxu0  ;;  %v10625_v8 = vpop.f32.mrf.mxu1 }
 0x221   : > { %v12387_v60 = vpop.f32.mrf.mxu0  ;;  %v12389_v26 = vpop.f32.mrf.mxu1 }
 0x223   : > { %v10545_v50 = vpop.f32.mrf.mxu0  ;;  %v10628_v29 = vpop.f32.mrf.mxu1 }
 0x225   : > { %v12391_v55 = vpop.f32.mrf.mxu0  ;;  %v12393_v56 = vpop.f32.mrf.mxu1 }
 0x227   : > { %v10548_v30 = vpop.f32.mrf.mxu0  ;;  %v10631_v61 = vpop.f32.mrf.mxu1 }
 0x229   : > { %v12395_v36 = vpop.f32.mrf.mxu0  ;;  %v12397_v40 = vpop.f32.mrf.mxu1 }
 0x22b   : > { %v10551_v10 = vpop.f32.mrf.mxu0  ;;  %v10634_v63 = vpop.f32.mrf.mxu1 }
 0x22d   : > { %v12399_v31 = vpop.f32.mrf.mxu0  ;;  %v12401_v46 = vpop.f32.mrf.mxu1 }
 0x22f   : > { %v10554_v38 = vpop.f32.mrf.mxu0  ;;  %v10637_v58 = vpop.f32.mrf.mxu1 }
 0x231   : > { %v12403_v39 = vpop.f32.mrf.mxu0  ;;  %v12405_v34 = vpop.f32.mrf.mxu1 }
 0x233   : > { %v10557_v12 = vpop.f32.mrf.mxu0  ;;  %v10640_v2 = vpop.f32.mrf.mxu1 }
 0x235   : > { %v12407_v5 = vpop.f32.mrf.mxu0  ;;  %v12409_v4 = vpop.f32.mrf.mxu1 }
 0x237   : > { %v10560_v22 = vpop.f32.mrf.mxu0  ;;  %v10643_v49 = vpop.f32.mrf.mxu1 }
 0x239   : > { %v12411_v41 = vpop.f32.mrf.mxu0  ;;  %v12413_v15 = vpop.f32.mrf.mxu1 }
 0x23b   : > { %v10563_v47 = vpop.f32.mrf.mxu0  ;;  %v10646_v8 = vpop.f32.mrf.mxu1 }
 0x23d   : > { %v12415_v50 = vpop.f32.mrf.mxu0  ;;  %v12417_v29 = vpop.f32.mrf.mxu1 }
 0x23f   : > { %v10566_v30 = vpop.f32.mrf.mxu0  ;;  %v10649_v61 = vpop.f32.mrf.mxu1 }
 0x241   : > { %v12419_v10 = vpop.f32.mrf.mxu0  ;;  %v12421_v63 = vpop.f32.mrf.mxu1 }
 0x243   : > { %v10569_v38 = vpop.f32.mrf.mxu0  ;;  %v10652_v58 = vpop.f32.mrf.mxu1 }
 0x245   : > { %v12423_v12 = vpop.f32.mrf.mxu0  ;;  %v12425_v2 = vpop.f32.mrf.mxu1 }
 0x247   : > { %v10572_v22 = vpop.f32.mrf.mxu0  ;;  %v10655_v49 = vpop.f32.mrf.mxu1 }
 0x249   : > { %v12427_v47 = vpop.f32.mrf.mxu0  ;;  %v12429_v8 = vpop.f32.mrf.mxu1 }
 0x24a   : > { %2120 = vmatpush1.msra.mxu0 %v12429_v8  ;;  %2244 = vmatpush1.msra.mxu1 %v12427_v47 }
 0x24b   : > { %v10575_v30 = vpop.f32.mrf.mxu0  ;;  %v10658_v61 = vpop.f32.mrf.mxu1  ;;  %2121 = vmatprep.subr.mxu0 %v17943_v14  ;;  %2245 = vmatprep.subr.mxu1 %v17943_v14 }
 0x24c   : > { %2122 = vmatpush1.msra.mxu0 %v12425_v2  ;;  %2246 = vmatpush1.msra.mxu1 %v12423_v12 }
 0x24d   : > { %v12437_v38 = vpop.f32.mrf.mxu0  ;;  %v12439_v58 = vpop.f32.mrf.mxu1  ;;  %2123 = vmatprep.subr.mxu0 %v17943_v14  ;;  %2247 = vmatprep.subr.mxu1 %v17943_v14 }
 0x24e   : > { %2124 = vmatpush1.msra.mxu0 %v12421_v63  ;;  %2248 = vmatpush1.msra.mxu1 %v12419_v10 }
 0x24f   : > { %v10578_v22 = vpop.f32.mrf.mxu0  ;;  %v10661_v49 = vpop.f32.mrf.mxu1  ;;  %2125 = vmatprep.subr.mxu0 %v17943_v14  ;;  %2249 = vmatprep.subr.mxu1 %v17943_v14 }
 0x250   : > { %2126 = vmatpush1.msra.mxu0 %v12417_v29  ;;  %2250 = vmatpush1.msra.mxu1 %v12415_v50 }
 0x251   : > { %v12449_v30 = vpop.f32.mrf.mxu0  ;;  %v12451_v61 = vpop.f32.mrf.mxu1  ;;  %2127 = vmatprep.subr.mxu0 %v17943_v14  ;;  %2251 = vmatprep.subr.mxu1 %v17943_v14 }
 0x252   : > { %2128 = vmatpush1.msra.mxu0 %v12413_v15  ;;  %2252 = vmatpush1.msra.mxu1 %v12411_v41 }
 0x253   : > { %v10581_v22 = vpop.f32.mrf.mxu0  ;;  %v10664_v49 = vpop.f32.mrf.mxu1  ;;  %2129 = vmatprep.subr.mxu0 %v17943_v14  ;;  %2253 = vmatprep.subr.mxu1 %v17943_v14 }
 0x254   : > { %2130 = vmatpush1.msra.mxu0 %v12409_v4  ;;  %2254 = vmatpush1.msra.mxu1 %v12407_v5 }
 0x255   : > { %v12461_v62 = vpop.f32.mrf.mxu0  ;;  %v12463_v48 = vpop.f32.mrf.mxu1  ;;  %2131 = vmatprep.subr.mxu0 %v17943_v14  ;;  %2255 = vmatprep.subr.mxu1 %v17943_v14 }
 0x256   : > { %2132 = vmatpush1.msra.mxu0 %v12405_v34  ;;  %2256 = vmatpush1.msra.mxu1 %v12403_v39 }
 0x257   : > { %v10584_v22 = vpop.f32.mrf.mxu0  ;;  %v10667_v49 = vpop.f32.mrf.mxu1  ;;  %2133 = vmatprep.subr.mxu0 %v17943_v14  ;;  %2257 = vmatprep.subr.mxu1 %v17943_v14 }
 0x258   : > { %2134 = vmatpush1.msra.mxu0 %v12401_v46  ;;  %2258 = vmatpush1.msra.mxu1 %v12399_v31 }
 0x259   : > { %v12473_v52 = vpop.f32.mrf.mxu0  ;;  %v12475_v1 = vpop.f32.mrf.mxu1  ;;  %2135 = vmatprep.subr.mxu0 %v17943_v14  ;;  %2259 = vmatprep.subr.mxu1 %v17943_v14 }
 0x25a   : > { %2136 = vmatpush1.msra.mxu0 %v12397_v40  ;;  %2260 = vmatpush1.msra.mxu1 %v12395_v36 }
 0x25b   : > { %v10587_v22 = vpop.f32.mrf.mxu0  ;;  %v10670_v49 = vpop.f32.mrf.mxu1  ;;  %2137 = vmatprep.subr.mxu0 %v17943_v14  ;;  %2261 = vmatprep.subr.mxu1 %v17943_v14 }
 0x25c   : > { %2138 = vmatpush1.msra.mxu0 %v12393_v56  ;;  %2262 = vmatpush1.msra.mxu1 %v12391_v55 }
 0x25d   : > { %v12485_v21 = vpop.f32.mrf.mxu0  ;;  %v12487_v28 = vpop.f32.mrf.mxu1  ;;  %2139 = vmatprep.subr.mxu0 %v17943_v14  ;;  %2263 = vmatprep.subr.mxu1 %v17943_v14 }
 0x25e   : > { %2140 = vmatpush1.msra.mxu0 %v12389_v26  ;;  %2264 = vmatpush1.msra.mxu1 %v12387_v60 }
 0x25f   : > { %v10590_v22 = vpop.f32.mrf.mxu0  ;;  %v10673_v49 = vpop.f32.mrf.mxu1  ;;  %2141 = vmatprep.subr.mxu0 %v17943_v14  ;;  %2265 = vmatprep.subr.mxu1 %v17943_v14 }
 0x260   : > { %2142 = vmatpush1.msra.mxu0 %v12385_v6  ;;  %2266 = vmatpush1.msra.mxu1 %v12383_v35 }
 0x261   : > { %v12497_v57 = vpop.f32.mrf.mxu0  ;;  %v12499_v33 = vpop.f32.mrf.mxu1  ;;  %2143 = vmatprep.subr.mxu0 %v17943_v14  ;;  %2267 = vmatprep.subr.mxu1 %v17943_v14 }
 0x262   : > { %2144 = vmatpush1.msra.mxu0 %v12381_v42  ;;  %2268 = vmatpush1.msra.mxu1 %v12379_v51 }
 0x263   : > { %v10593_v22 = vpop.f32.mrf.mxu0  ;;  %v10676_v49 = vpop.f32.mrf.mxu1  ;;  %2145 = vmatprep.subr.mxu0 %v17943_v14  ;;  %2269 = vmatprep.subr.mxu1 %v17943_v14 }
 0x264   : > { %2146 = vmatpush1.msra.mxu0 %v12377_v18  ;;  %2270 = vmatpush1.msra.mxu1 %v12375_v3 }
 0x265   : > { %v12509_v32 = vpop.f32.mrf.mxu0  ;;  %v12511_v19 = vpop.f32.mrf.mxu1  ;;  %2147 = vmatprep.subr.mxu0 %v17943_v14  ;;  %2271 = vmatprep.subr.mxu1 %v17943_v14 }
 0x266   : > { %2148 = vmatpush1.msra.mxu0 %v12373_v54  ;;  %2272 = vmatpush1.msra.mxu1 %v12371_v25 }
 0x267   : > { %v10596_v22 = vpop.f32.mrf.mxu0  ;;  %v10679_v49 = vpop.f32.mrf.mxu1  ;;  %2149 = vmatprep.subr.mxu0 %v17943_v14  ;;  %2273 = vmatprep.subr.mxu1 %v17943_v14 }
 0x268   : > { %2150 = vmatpush1.msra.mxu0 %v12369_v23  ;;  %2274 = vmatpush1.msra.mxu1 %v12367_v9 }
 0x269   : > { %v12521_v20 = vpop.f32.mrf.mxu0  ;;  %v12523_v37 = vpop.f32.mrf.mxu1  ;;  %2165 = vmatprep.subr.mxu0 %v17943_v14  ;;  %2289 = vmatprep.subr.mxu1 %v17943_v14 }
 0x26b   : > { %v10599_v45 = vpop.f32.mrf.mxu0  ;;  %v10682_v17 = vpop.f32.mrf.mxu1 }
 0x26c   : > { %v8896_v17 = vld [vmem:[%s17895_s3 + $0x1d8] sm:$0xff]  ;;  %v8895_v45 = vld [vmem:[%s17895_s3 + $0x1d0] sm:$0xff] }
 0x26d   : > { %v12527_v22 = vpop.f32.mrf.mxu0  ;;  %v12529_v49 = vpop.f32.mrf.mxu1 }
 0x26e   : > { %8907 = vmatpush2.msk.msra.mxu0 %vm2115_vm5, %v12529_v49  ;;  %8915 = vmatpush2.msk.msra.mxu1 %vm2115_vm5, %v12527_v22 }
 0x26f   : > { %v10602_v13 = vpop.f32.mrf.mxu0  ;;  %v10685_v16 = vpop.f32.mrf.mxu1  ;;  %2167 = vmatprep.subr.mxu0 %v17943_v14  ;;  %2291 = vmatprep.subr.mxu1 %v17943_v14 }
 0x270   : > { %2168 = vmatpush2.msra.mxu0 %v12523_v37  ;;  %2292 = vmatpush2.msra.mxu1 %v12521_v20  ;;  %v8893_v16 = vld [vmem:[%s17895_s3 + $0x1c0] sm:$0xff] }
 0x271   : > { %2169 = vmatprep.subr.mxu0 %v17943_v14  ;;  %2293 = vmatprep.subr.mxu1 %v17943_v14  ;;  %v1824_v13 = vld [vmem:[%s17895_s3] sm:$0xff] }
 0x272   : > { %2170 = vmatpush2.msra.mxu0 %v12511_v19  ;;  %2294 = vmatpush2.msra.mxu1 %v12509_v32 }
 0x273   : > { %2171 = vmatprep.subr.mxu0 %v17943_v14  ;;  %2295 = vmatprep.subr.mxu1 %v17943_v14 }
 0x274   : > { %2172 = vmatpush2.msra.mxu0 %v12499_v33  ;;  %2296 = vmatpush2.msra.mxu1 %v12497_v57 }
 0x275   : > { %2173 = vmatprep.subr.mxu0 %v17943_v14  ;;  %2297 = vmatprep.subr.mxu1 %v17943_v14 }
 0x276   : > { %2174 = vmatpush2.msra.mxu0 %v12487_v28  ;;  %2298 = vmatpush2.msra.mxu1 %v12485_v21 }
 0x277   : > { %2175 = vmatprep.subr.mxu0 %v17943_v14  ;;  %2299 = vmatprep.subr.mxu1 %v17943_v14 }
 0x278   : > { %2176 = vmatpush2.msra.mxu0 %v12475_v1  ;;  %2300 = vmatpush2.msra.mxu1 %v12473_v52 }
 0x279   : > { %2177 = vmatprep.subr.mxu0 %v17943_v14  ;;  %2301 = vmatprep.subr.mxu1 %v17943_v14 }
 0x27a   : > { %2178 = vmatpush2.msra.mxu0 %v12463_v48  ;;  %2302 = vmatpush2.msra.mxu1 %v12461_v62 }
 0x27b   : > { %2179 = vmatprep.subr.mxu0 %v17943_v14  ;;  %2303 = vmatprep.subr.mxu1 %v17943_v14 }
 0x27c   : > { %2180 = vmatpush2.msra.mxu0 %v12451_v61  ;;  %2304 = vmatpush2.msra.mxu1 %v12449_v30 }
 0x27d   : > { %2181 = vmatprep.subr.mxu0 %v17943_v14  ;;  %2305 = vmatprep.subr.mxu1 %v17943_v14 }
 0x27e   : > { %2182 = vmatpush2.msra.mxu0 %v12439_v58  ;;  %2306 = vmatpush2.msra.mxu1 %v12437_v38 }
 0x27f   : > { %2184 = vmatmul.mubr.f32.vlgmr.msra.gmra.mxu0 %v8893_v16  ;;  %2379 = vmatprep.subr.mxu0 %v17943_v14  ;;  %v1827_v16 = vld [vmem:[%s17895_s3 + $0x18] sm:$0xff] }
 0x280   : > { %2500 = vmatprep.subr.mxu1 %v17943_v14  ;;  %2308 = vmatmul.mubr.f32.vlgmr.msra.gmra.mxu1 %v1824_v13  ;;  %v1826_v13 = vld [vmem:[%s17895_s3 + $0x10] sm:$0xff] }
 0x281   : > { %2380 = vmatpush1.msra.mxu0 %v12429_v8  ;;  %2501 = vmatpush1.msra.mxu1 %v12427_v47 }
 0x282   : > { %2381 = vmatprep.subr.mxu0 %v17943_v14  ;;  %2502 = vmatprep.subr.mxu1 %v17943_v14 }
 0x283   : > { %2382 = vmatpush1.msra.mxu0 %v12425_v2  ;;  %2503 = vmatpush1.msra.mxu1 %v12423_v12 }
 0x284   : > { %2383 = vmatprep.subr.mxu0 %v17943_v14  ;;  %2504 = vmatprep.subr.mxu1 %v17943_v14 }
 0x285   : > { %2384 = vmatpush1.msra.mxu0 %v12421_v63  ;;  %2505 = vmatpush1.msra.mxu1 %v12419_v10 }
 0x286   : > { %2385 = vmatprep.subr.mxu0 %v17943_v14  ;;  %2506 = vmatprep.subr.mxu1 %v17943_v14 }
 0x287   : > { %2386 = vmatpush1.msra.mxu0 %v12417_v29  ;;  %2507 = vmatpush1.msra.mxu1 %v12415_v50 }
 0x288   : > { %2387 = vmatprep.subr.mxu0 %v17943_v14  ;;  %2508 = vmatprep.subr.mxu1 %v17943_v14 }
 0x289   : > { %2388 = vmatpush1.msra.mxu0 %v12413_v15  ;;  %2509 = vmatpush1.msra.mxu1 %v12411_v41 }
 0x28a   : > { %2389 = vmatprep.subr.mxu0 %v17943_v14  ;;  %2510 = vmatprep.subr.mxu1 %v17943_v14 }
 0x28b   : > { %2390 = vmatpush1.msra.mxu0 %v12409_v4  ;;  %2511 = vmatpush1.msra.mxu1 %v12407_v5 }
 0x28c   : > { %2391 = vmatprep.subr.mxu0 %v17943_v14  ;;  %2512 = vmatprep.subr.mxu1 %v17943_v14 }
 0x28d   : > { %2392 = vmatpush1.msra.mxu0 %v12405_v34  ;;  %2513 = vmatpush1.msra.mxu1 %v12403_v39 }
 0x28e   : > { %2393 = vmatprep.subr.mxu0 %v17943_v14  ;;  %2514 = vmatprep.subr.mxu1 %v17943_v14 }
 0x28f   : > { %2394 = vmatpush1.msra.mxu0 %v12401_v46  ;;  %2515 = vmatpush1.msra.mxu1 %v12399_v31 }
 0x290   : > { %2395 = vmatprep.subr.mxu0 %v17943_v14  ;;  %2516 = vmatprep.subr.mxu1 %v17943_v14 }
 0x291   : > { %2396 = vmatpush1.msra.mxu0 %v12397_v40  ;;  %2517 = vmatpush1.msra.mxu1 %v12395_v36 }
 0x292   : > { %2397 = vmatprep.subr.mxu0 %v17943_v14  ;;  %2518 = vmatprep.subr.mxu1 %v17943_v14 }
 0x293   : > { %2398 = vmatpush1.msra.mxu0 %v12393_v56  ;;  %2519 = vmatpush1.msra.mxu1 %v12391_v55 }
 0x294   : > { %2399 = vmatprep.subr.mxu0 %v17943_v14  ;;  %2520 = vmatprep.subr.mxu1 %v17943_v14 }
 0x295   : > { %2400 = vmatpush1.msra.mxu0 %v12389_v26  ;;  %2521 = vmatpush1.msra.mxu1 %v12387_v60 }
 0x296   : > { %2401 = vmatprep.subr.mxu0 %v17943_v14  ;;  %2522 = vmatprep.subr.mxu1 %v17943_v14 }
 0x297   : > { %2402 = vmatpush1.msra.mxu0 %v12385_v6  ;;  %2523 = vmatpush1.msra.mxu1 %v12383_v35 }
 0x298   : > { %8909 = vmatprep.mubr.msk.f32.mxu0 %vm2093_vm4, %v8896_v17  ;;  %2403 = vmatprep.subr.mxu0 %v17943_v14  ;;  %v8898_v17 = vld [vmem:[%s17895_s3 + $0x1e8] sm:$0xff] }
 0x299   : > { %2524 = vmatprep.subr.mxu1 %v17943_v14  ;;  %2189 = vmatmul.mubr.f32.gmra.mxu0 %v8895_v45  ;;  %v8897_v45 = vld [vmem:[%s17895_s3 + $0x1e0] sm:$0xff] }
 0x29a   : > { %2404 = vmatpush1.msra.mxu0 %v12381_v42  ;;  %2525 = vmatpush1.msra.mxu1 %v12379_v51 }
 0x29b   : > { %8917 = vmatprep.mubr.msk.f32.mxu1 %vm2093_vm4, %v1827_v16  ;;  %2405 = vmatprep.subr.mxu0 %v17943_v14  ;;  %v1829_v16 = vld [vmem:[%s17895_s3 + $0x28] sm:$0xff] }
 0x29c   : > { %2526 = vmatprep.subr.mxu1 %v17943_v14  ;;  %2313 = vmatmul.mubr.f32.gmra.mxu1 %v1826_v13  ;;  %v1828_v13 = vld [vmem:[%s17895_s3 + $0x20] sm:$0xff] }
 0x29d   : > { %2406 = vmatpush1.msra.mxu0 %v12377_v18  ;;  %2527 = vmatpush1.msra.mxu1 %v12375_v3 }
 0x29e   : > { %8910 = vmatprep.mubr.msk.f32.mxu0 %vm2093_vm4, %v8898_v17  ;;  %2407 = vmatprep.subr.mxu0 %v17943_v14  ;;  %v8900_v17 = vld [vmem:[%s17895_s3 + $0x1f8] sm:$0xff] }
 0x29f   : > { %2528 = vmatprep.subr.mxu1 %v17943_v14  ;;  %2194 = vmatmul.mubr.f32.gmra.mxu0 %v8897_v45  ;;  %v8899_v45 = vld [vmem:[%s17895_s3 + $0x1f0] sm:$0xff] }
 0x2a0   : > { %2408 = vmatpush1.msra.mxu0 %v12373_v54  ;;  %2529 = vmatpush1.msra.mxu1 %v12371_v25 }
 0x2a1   : > { %8918 = vmatprep.mubr.msk.f32.mxu1 %vm2093_vm4, %v1829_v16  ;;  %2409 = vmatprep.subr.mxu0 %v17943_v14  ;;  %v1831_v16 = vld [vmem:[%s17895_s3 + $0x38] sm:$0xff] }
 0x2a2   : > { %2530 = vmatprep.subr.mxu1 %v17943_v14  ;;  %2318 = vmatmul.mubr.f32.gmra.mxu1 %v1828_v13  ;;  %v1830_v13 = vld [vmem:[%s17895_s3 + $0x30] sm:$0xff] }
 0x2a3   : > { %2410 = vmatpush1.msra.mxu0 %v12369_v23  ;;  %2531 = vmatpush1.msra.mxu1 %v12367_v9 }
 0x2a4   : > { %8911 = vmatprep.mubr.msk.f32.mxu0 %vm2093_vm4, %v8900_v17  ;;  %2425 = vmatprep.subr.mxu0 %v17943_v14  ;;  %v8902_v17 = vld [vmem:[%s17895_s3 + $0x208] sm:$0xff] }
 0x2a5   : > { %2546 = vmatprep.subr.mxu1 %v17943_v14  ;;  %2199 = vmatmul.mubr.f32.gmra.mxu0 %v8899_v45  ;;  %v8901_v45 = vld [vmem:[%s17895_s3 + $0x200] sm:$0xff] }
 0x2a6   : > { %8937 = vmatpush2.msk.msra.mxu0 %vm2115_vm5, %v12529_v49  ;;  %8945 = vmatpush2.msk.msra.mxu1 %vm2115_vm5, %v12527_v22 }
 0x2a7   : > { %8919 = vmatprep.mubr.msk.f32.mxu1 %vm2093_vm4, %v1831_v16  ;;  %2427 = vmatprep.subr.mxu0 %v17943_v14  ;;  %v1833_v16 = vld [vmem:[%s17895_s3 + $0x48] sm:$0xff] }
 0x2a8   : > { %2548 = vmatprep.subr.mxu1 %v17943_v14  ;;  %2323 = vmatmul.mubr.f32.gmra.mxu1 %v1830_v13  ;;  %v1832_v13 = vld [vmem:[%s17895_s3 + $0x40] sm:$0xff] }
 0x2a9   : > { %2428 = vmatpush2.msra.mxu0 %v12523_v37  ;;  %2549 = vmatpush2.msra.mxu1 %v12521_v20 }
 0x2aa   : > { %8912 = vmatprep.mubr.msk.f32.mxu0 %vm2093_vm4, %v8902_v17  ;;  %2429 = vmatprep.subr.mxu0 %v17943_v14  ;;  %v8904_v17 = vld [vmem:[%s17895_s3 + $0x218] sm:$0xff] }
 0x2ab   : > { %2550 = vmatprep.subr.mxu1 %v17943_v14  ;;  %2204 = vmatmul.mubr.f32.gmra.mxu0 %v8901_v45  ;;  %v8903_v45 = vld [vmem:[%s17895_s3 + $0x210] sm:$0xff] }
 0x2ac   : > { %2430 = vmatpush2.msra.mxu0 %v12511_v19  ;;  %2551 = vmatpush2.msra.mxu1 %v12509_v32 }
 0x2ad   : > { %8920 = vmatprep.mubr.msk.f32.mxu1 %vm2093_vm4, %v1833_v16  ;;  %2431 = vmatprep.subr.mxu0 %v17943_v14  ;;  %v1835_v16 = vld [vmem:[%s17895_s3 + $0x58] sm:$0xff] }
 0x2ae   : > { %2552 = vmatprep.subr.mxu1 %v17943_v14  ;;  %2328 = vmatmul.mubr.f32.gmra.mxu1 %v1832_v13  ;;  %v1834_v13 = vld [vmem:[%s17895_s3 + $0x50] sm:$0xff] }
 0x2af   : > { %2432 = vmatpush2.msra.mxu0 %v12499_v33  ;;  %2553 = vmatpush2.msra.mxu1 %v12497_v57 }
 0x2b0   : > { %8913 = vmatprep.mubr.msk.f32.mxu0 %vm2093_vm4, %v8904_v17  ;;  %2433 = vmatprep.subr.mxu0 %v17943_v14  ;;  %v8906_v17 = vld [vmem:[%s17895_s3 + $0x228] sm:$0x1] }
 0x2b1   : > { %2554 = vmatprep.subr.mxu1 %v17943_v14  ;;  %2209 = vmatmul.mubr.f32.gmra.mxu0 %v8903_v45  ;;  %v8905_v45 = vld [vmem:[%s17895_s3 + $0x220] sm:$0x1] }
 0x2b2   : > { %2434 = vmatpush2.msra.mxu0 %v12487_v28  ;;  %2555 = vmatpush2.msra.mxu1 %v12485_v21 }
 0x2b3   : > { %8921 = vmatprep.mubr.msk.f32.mxu1 %vm2093_vm4, %v1835_v16  ;;  %2435 = vmatprep.subr.mxu0 %v17943_v14  ;;  %v1837_v16 = vld [vmem:[%s17895_s3 + $0x68] sm:$0x1] }
 0x2b4   : > { %2556 = vmatprep.subr.mxu1 %v17943_v14  ;;  %2333 = vmatmul.mubr.f32.gmra.mxu1 %v1834_v13  ;;  %v1836_v13 = vld [vmem:[%s17895_s3 + $0x60] sm:$0x1] }
 0x2b5   : > { %2436 = vmatpush2.msra.mxu0 %v12475_v1  ;;  %2557 = vmatpush2.msra.mxu1 %v12473_v52 }
 0x2b6   : > { %8914 = vmatprep.mubr.msk.f32.mxu0 %vm2093_vm4, %v8906_v17  ;;  %2437 = vmatprep.subr.mxu0 %v17943_v14  ;;  %v8924_v17 = vld [vmem:[%s17895_s3 + $0x238] sm:$0xff] }
 0x2b7   : > { %2558 = vmatprep.subr.mxu1 %v17943_v14  ;;  %2214 = vmatmul.mubr.f32.gmra.mxu0 %v8905_v45  ;;  %v8923_v45 = vld [vmem:[%s17895_s3 + $0x230] sm:$0xff] }
 0x2b8   : > { %2438 = vmatpush2.msra.mxu0 %v12463_v48  ;;  %2559 = vmatpush2.msra.mxu1 %v12461_v62 }
 0x2b9   : > { %8922 = vmatprep.mubr.msk.f32.mxu1 %vm2093_vm4, %v1837_v16  ;;  %2439 = vmatprep.subr.mxu0 %v17943_v14  ;;  %v8823_v16 = vld [vmem:[%s17895_s3 + $0x78] sm:$0xff] }
 0x2ba   : > { %2560 = vmatprep.subr.mxu1 %v17943_v14  ;;  %2338 = vmatmul.mubr.f32.gmra.mxu1 %v1836_v13  ;;  %v8822_v13 = vld [vmem:[%s17895_s3 + $0x70] sm:$0xff] }
 0x2bb   : > { %2440 = vmatpush2.msra.mxu0 %v12451_v61  ;;  %2561 = vmatpush2.msra.mxu1 %v12449_v30 }
 0x2bc   : > { %2441 = vmatprep.subr.mxu0 %v17943_v14  ;;  %2562 = vmatprep.subr.mxu1 %v17943_v14 }
 0x2bd   : > { %2442 = vmatpush2.msra.mxu0 %v12439_v58  ;;  %8938 = vmatprep.mubr.msk.f32.mxu0 %vm2093_vm4, %v8924_v17  ;;  %v8926_v17 = vld [vmem:[%s17895_s3 + $0x248] sm:$0xff] }
 0x2be   : > { %2563 = vmatpush2.msra.mxu1 %v12437_v38  ;;  %2444 = vmatmul.mubr.f32.vlgmr.msra.gmra.mxu0 %v8923_v45  ;;  %v8925_v45 = vld [vmem:[%s17895_s3 + $0x240] sm:$0xff] }
 0x2bf   : > { %8946 = vmatprep.mubr.msk.f32.mxu1 %vm2093_vm4, %v8823_v16  ;;  %2636 = vmatprep.subr.mxu0 %v17943_v14  ;;  %v8825_v16 = vld [vmem:[%s17895_s3 + $0x88] sm:$0xff] }
 0x2c0   : > { %2757 = vmatprep.subr.mxu1 %v17943_v14  ;;  %2565 = vmatmul.mubr.f32.vlgmr.msra.gmra.mxu1 %v8822_v13  ;;  %v8824_v13 = vld [vmem:[%s17895_s3 + $0x80] sm:$0xff] }
 0x2c1   : > { %2637 = vmatpush1.msra.mxu0 %v12429_v8  ;;  %2758 = vmatpush1.msra.mxu1 %v12427_v47 }
 0x2c2   : > { %2638 = vmatprep.subr.mxu0 %v17943_v14  ;;  %2759 = vmatprep.subr.mxu1 %v17943_v14 }
 0x2c3   : > { %2639 = vmatpush1.msra.mxu0 %v12425_v2  ;;  %2760 = vmatpush1.msra.mxu1 %v12423_v12 }
 0x2c4   : > { %2640 = vmatprep.subr.mxu0 %v17943_v14  ;;  %2761 = vmatprep.subr.mxu1 %v17943_v14 }
 0x2c5   : > { %2641 = vmatpush1.msra.mxu0 %v12421_v63  ;;  %2762 = vmatpush1.msra.mxu1 %v12419_v10 }
 0x2c6   : > { %2642 = vmatprep.subr.mxu0 %v17943_v14  ;;  %2763 = vmatprep.subr.mxu1 %v17943_v14 }
 0x2c7   : > { %2643 = vmatpush1.msra.mxu0 %v12417_v29  ;;  %2764 = vmatpush1.msra.mxu1 %v12415_v50 }
 0x2c8   : > { %2644 = vmatprep.subr.mxu0 %v17943_v14  ;;  %2765 = vmatprep.subr.mxu1 %v17943_v14 }
 0x2c9   : > { %2645 = vmatpush1.msra.mxu0 %v12413_v15  ;;  %2766 = vmatpush1.msra.mxu1 %v12411_v41 }
 0x2ca   : > { %2646 = vmatprep.subr.mxu0 %v17943_v14  ;;  %2767 = vmatprep.subr.mxu1 %v17943_v14 }
 0x2cb   : > { %2647 = vmatpush1.msra.mxu0 %v12409_v4  ;;  %2768 = vmatpush1.msra.mxu1 %v12407_v5 }
 0x2cc   : > { %2648 = vmatprep.subr.mxu0 %v17943_v14  ;;  %2769 = vmatprep.subr.mxu1 %v17943_v14 }
 0x2cd   : > { %2649 = vmatpush1.msra.mxu0 %v12405_v34  ;;  %2770 = vmatpush1.msra.mxu1 %v12403_v39 }
 0x2ce   : > { %2650 = vmatprep.subr.mxu0 %v17943_v14  ;;  %2771 = vmatprep.subr.mxu1 %v17943_v14 }
 0x2cf   : > { %2651 = vmatpush1.msra.mxu0 %v12401_v46  ;;  %2772 = vmatpush1.msra.mxu1 %v12399_v31 }
 0x2d0   : > { %2652 = vmatprep.subr.mxu0 %v17943_v14  ;;  %2773 = vmatprep.subr.mxu1 %v17943_v14 }
 0x2d1   : > { %2653 = vmatpush1.msra.mxu0 %v12397_v40  ;;  %2774 = vmatpush1.msra.mxu1 %v12395_v36 }
 0x2d2   : > { %2654 = vmatprep.subr.mxu0 %v17943_v14  ;;  %2775 = vmatprep.subr.mxu1 %v17943_v14 }
 0x2d3   : > { %2655 = vmatpush1.msra.mxu0 %v12393_v56  ;;  %2776 = vmatpush1.msra.mxu1 %v12391_v55 }
 0x2d4   : > { %2656 = vmatprep.subr.mxu0 %v17943_v14  ;;  %2777 = vmatprep.subr.mxu1 %v17943_v14 }
 0x2d5   : > { %2657 = vmatpush1.msra.mxu0 %v12389_v26  ;;  %2778 = vmatpush1.msra.mxu1 %v12387_v60 }
 0x2d6   : > { %2658 = vmatprep.subr.mxu0 %v17943_v14  ;;  %2779 = vmatprep.subr.mxu1 %v17943_v14 }
 0x2d7   : > { %2659 = vmatpush1.msra.mxu0 %v12385_v6  ;;  %2780 = vmatpush1.msra.mxu1 %v12383_v35 }
 0x2d8   : > { %8939 = vmatprep.mubr.msk.f32.mxu0 %vm2093_vm4, %v8926_v17  ;;  %2660 = vmatprep.subr.mxu0 %v17943_v14  ;;  %v8928_v17 = vld [vmem:[%s17895_s3 + $0x258] sm:$0xff] }
 0x2d9   : > { %2781 = vmatprep.subr.mxu1 %v17943_v14  ;;  %2449 = vmatmul.mubr.f32.gmra.mxu0 %v8925_v45  ;;  %v8927_v45 = vld [vmem:[%s17895_s3 + $0x250] sm:$0xff] }
 0x2da   : > { %2661 = vmatpush1.msra.mxu0 %v12381_v42  ;;  %2782 = vmatpush1.msra.mxu1 %v12379_v51 }
 0x2db   : > { %8947 = vmatprep.mubr.msk.f32.mxu1 %vm2093_vm4, %v8825_v16  ;;  %2662 = vmatprep.subr.mxu0 %v17943_v14  ;;  %v8827_v16 = vld [vmem:[%s17895_s3 + $0x98] sm:$0xff] }
 0x2dc   : > { %2783 = vmatprep.subr.mxu1 %v17943_v14  ;;  %2570 = vmatmul.mubr.f32.gmra.mxu1 %v8824_v13  ;;  %v8826_v13 = vld [vmem:[%s17895_s3 + $0x90] sm:$0xff] }
 0x2dd   : > { %2663 = vmatpush1.msra.mxu0 %v12377_v18  ;;  %2784 = vmatpush1.msra.mxu1 %v12375_v3 }
 0x2de   : > { %8940 = vmatprep.mubr.msk.f32.mxu0 %vm2093_vm4, %v8928_v17  ;;  %2664 = vmatprep.subr.mxu0 %v17943_v14  ;;  %v8930_v17 = vld [vmem:[%s17895_s3 + $0x268] sm:$0xff] }
 0x2df   : > { %2785 = vmatprep.subr.mxu1 %v17943_v14  ;;  %2454 = vmatmul.mubr.f32.gmra.mxu0 %v8927_v45  ;;  %v8929_v45 = vld [vmem:[%s17895_s3 + $0x260] sm:$0xff] }
 0x2e0   : > { %2665 = vmatpush1.msra.mxu0 %v12373_v54  ;;  %2786 = vmatpush1.msra.mxu1 %v12371_v25 }
 0x2e1   : > { %8948 = vmatprep.mubr.msk.f32.mxu1 %vm2093_vm4, %v8827_v16  ;;  %2666 = vmatprep.subr.mxu0 %v17943_v14  ;;  %v8829_v16 = vld [vmem:[%s17895_s3 + $0xa8] sm:$0xff] }
 0x2e2   : > { %2787 = vmatprep.subr.mxu1 %v17943_v14  ;;  %2575 = vmatmul.mubr.f32.gmra.mxu1 %v8826_v13  ;;  %v8828_v13 = vld [vmem:[%s17895_s3 + $0xa0] sm:$0xff] }
 0x2e3   : > { %2667 = vmatpush1.msra.mxu0 %v12369_v23  ;;  %2788 = vmatpush1.msra.mxu1 %v12367_v9 }
 0x2e4   : > { %8941 = vmatprep.mubr.msk.f32.mxu0 %vm2093_vm4, %v8930_v17  ;;  %2682 = vmatprep.subr.mxu0 %v17943_v14  ;;  %v8932_v17 = vld [vmem:[%s17895_s3 + $0x278] sm:$0xff] }
 0x2e5   : > { %2803 = vmatprep.subr.mxu1 %v17943_v14  ;;  %2459 = vmatmul.mubr.f32.gmra.mxu0 %v8929_v45  ;;  %v8931_v45 = vld [vmem:[%s17895_s3 + $0x270] sm:$0xff] }
 0x2e6   : > { %8967 = vmatpush2.msk.msra.mxu0 %vm2115_vm5, %v12529_v49  ;;  %8975 = vmatpush2.msk.msra.mxu1 %vm2115_vm5, %v12527_v22 }
 0x2e7   : > { %8949 = vmatprep.mubr.msk.f32.mxu1 %vm2093_vm4, %v8829_v16  ;;  %2684 = vmatprep.subr.mxu0 %v17943_v14  ;;  %v8831_v16 = vld [vmem:[%s17895_s3 + $0xb8] sm:$0xff] }
 0x2e8   : > { %2805 = vmatprep.subr.mxu1 %v17943_v14  ;;  %2580 = vmatmul.mubr.f32.gmra.mxu1 %v8828_v13  ;;  %v8830_v13 = vld [vmem:[%s17895_s3 + $0xb0] sm:$0xff] }
 0x2e9   : > { %2685 = vmatpush2.msra.mxu0 %v12523_v37  ;;  %2806 = vmatpush2.msra.mxu1 %v12521_v20 }
 0x2ea   : > { %8942 = vmatprep.mubr.msk.f32.mxu0 %vm2093_vm4, %v8932_v17  ;;  %2686 = vmatprep.subr.mxu0 %v17943_v14  ;;  %v8934_v17 = vld [vmem:[%s17895_s3 + $0x288] sm:$0xff] }
 0x2eb   : > { %2807 = vmatprep.subr.mxu1 %v17943_v14  ;;  %2464 = vmatmul.mubr.f32.gmra.mxu0 %v8931_v45  ;;  %v8933_v45 = vld [vmem:[%s17895_s3 + $0x280] sm:$0xff] }
 0x2ec   : > { %2687 = vmatpush2.msra.mxu0 %v12511_v19  ;;  %2808 = vmatpush2.msra.mxu1 %v12509_v32 }
 0x2ed   : > { %8950 = vmatprep.mubr.msk.f32.mxu1 %vm2093_vm4, %v8831_v16  ;;  %2688 = vmatprep.subr.mxu0 %v17943_v14  ;;  %v8833_v16 = vld [vmem:[%s17895_s3 + $0xc8] sm:$0xff] }
 0x2ee   : > { %2809 = vmatprep.subr.mxu1 %v17943_v14  ;;  %2585 = vmatmul.mubr.f32.gmra.mxu1 %v8830_v13  ;;  %v8832_v13 = vld [vmem:[%s17895_s3 + $0xc0] sm:$0xff] }
 0x2ef   : > { %2689 = vmatpush2.msra.mxu0 %v12499_v33  ;;  %2810 = vmatpush2.msra.mxu1 %v12497_v57 }
 0x2f0   : > { %8943 = vmatprep.mubr.msk.f32.mxu0 %vm2093_vm4, %v8934_v17  ;;  %2690 = vmatprep.subr.mxu0 %v17943_v14  ;;  %v8936_v17 = vld [vmem:[%s17895_s3 + $0x298] sm:$0x1] }
 0x2f1   : > { %2811 = vmatprep.subr.mxu1 %v17943_v14  ;;  %2469 = vmatmul.mubr.f32.gmra.mxu0 %v8933_v45  ;;  %v8935_v45 = vld [vmem:[%s17895_s3 + $0x290] sm:$0x1] }
 0x2f2   : > { %2691 = vmatpush2.msra.mxu0 %v12487_v28  ;;  %2812 = vmatpush2.msra.mxu1 %v12485_v21 }
 0x2f3   : > { %8951 = vmatprep.mubr.msk.f32.mxu1 %vm2093_vm4, %v8833_v16  ;;  %2692 = vmatprep.subr.mxu0 %v17943_v14  ;;  %v8835_v16 = vld [vmem:[%s17895_s3 + $0xd8] sm:$0x1] }
 0x2f4   : > { %2813 = vmatprep.subr.mxu1 %v17943_v14  ;;  %2590 = vmatmul.mubr.f32.gmra.mxu1 %v8832_v13  ;;  %v8834_v13 = vld [vmem:[%s17895_s3 + $0xd0] sm:$0x1] }
 0x2f5   : > { %2693 = vmatpush2.msra.mxu0 %v12475_v1  ;;  %2814 = vmatpush2.msra.mxu1 %v12473_v52 }
 0x2f6   : > { %8944 = vmatprep.mubr.msk.f32.mxu0 %vm2093_vm4, %v8936_v17  ;;  %2694 = vmatprep.subr.mxu0 %v17943_v14  ;;  %v8954_v17 = vld [vmem:[%s17895_s3 + $0x2a8] sm:$0xff] }
 0x2f7   : > { %2815 = vmatprep.subr.mxu1 %v17943_v14  ;;  %2474 = vmatmul.mubr.f32.gmra.mxu0 %v8935_v45  ;;  %v8953_v45 = vld [vmem:[%s17895_s3 + $0x2a0] sm:$0xff] }
 0x2f8   : > { %2695 = vmatpush2.msra.mxu0 %v12463_v48  ;;  %2816 = vmatpush2.msra.mxu1 %v12461_v62 }
 0x2f9   : > { %8952 = vmatprep.mubr.msk.f32.mxu1 %vm2093_vm4, %v8835_v16  ;;  %2696 = vmatprep.subr.mxu0 %v17943_v14  ;;  %v8837_v16 = vld [vmem:[%s17895_s3 + $0xe8] sm:$0xff] }
 0x2fa   : > { %2817 = vmatprep.subr.mxu1 %v17943_v14  ;;  %2595 = vmatmul.mubr.f32.gmra.mxu1 %v8834_v13  ;;  %v8836_v13 = vld [vmem:[%s17895_s3 + $0xe0] sm:$0xff] }
 0x2fb   : > { %2697 = vmatpush2.msra.mxu0 %v12451_v61  ;;  %2818 = vmatpush2.msra.mxu1 %v12449_v30 }
 0x2fc   : > { %2698 = vmatprep.subr.mxu0 %v17943_v14  ;;  %2819 = vmatprep.subr.mxu1 %v17943_v14 }
 0x2fd   : > { %2699 = vmatpush2.msra.mxu0 %v12439_v58  ;;  %8968 = vmatprep.mubr.msk.f32.mxu0 %vm2093_vm4, %v8954_v17  ;;  %v9013_v17 = vld [vmem:[%s17896_s4 + $0x40] sm:$0xff] }
 0x2fe   : > { %2820 = vmatpush2.msra.mxu1 %v12437_v38  ;;  %2701 = vmatmul.mubr.f32.vlgmr.msra.gmra.mxu0 %v8953_v45  ;;  %v8991_v45 = vld [vmem:[%s17895_s3 + $0x350] sm:$0xff] }
 0x2ff   : > { %8976 = vmatprep.mubr.msk.f32.mxu1 %vm2093_vm4, %v8837_v16  ;;  %2893 = vmatprep.subr.mxu0 %v17943_v14  ;;  %v8858_v16 = vld [vmem:[%s17895_s3 + $0x190] sm:$0xff] }
 0x300   : > { %3014 = vmatprep.subr.mxu1 %v17943_v14  ;;  %2822 = vmatmul.mubr.f32.vlgmr.msra.gmra.mxu1 %v8836_v13  ;;  %v8994_v13 = vld [vmem:[%s17895_s3 + $0x368] sm:$0xff] }
 0x301   : > { %2894 = vmatpush1.msra.mxu0 %v12429_v8  ;;  %3015 = vmatpush1.msra.mxu1 %v12427_v47  ;;  %v8854_v47 = vld [vmem:[%s17895_s3 + $0x170] sm:$0xff]  ;;  %v8990_v8 = vld [vmem:[%s17895_s3 + $0x348] sm:$0xff] }
 0x302   : > { %2895 = vmatprep.subr.mxu0 %v17943_v14  ;;  %3016 = vmatprep.subr.mxu1 %v17943_v14 }
 0x303   : > { %2896 = vmatpush1.msra.mxu0 %v12425_v2  ;;  %3017 = vmatpush1.msra.mxu1 %v12423_v12  ;;  %v9015_v12 = vld [vmem:[%s17896_s4 + $0x50] sm:$0xff] }
 0x304   : > { %2897 = vmatprep.subr.mxu0 %v17943_v14  ;;  %3018 = vmatprep.subr.mxu1 %v17943_v14  ;;  %v8987_v2 = vld [vmem:[%s17895_s3 + $0x330] sm:$0xff] }
 0x305   : > { %2898 = vmatpush1.msra.mxu0 %v12421_v63  ;;  %3019 = vmatpush1.msra.mxu1 %v12419_v10 }
 0x306   : > { %2899 = vmatprep.subr.mxu0 %v17943_v14  ;;  %3020 = vmatprep.subr.mxu1 %v17943_v14 }
 0x307   : > { %2900 = vmatpush1.msra.mxu0 %v12417_v29  ;;  %3021 = vmatpush1.msra.mxu1 %v12415_v50  ;;  %v8855_v50 = vld [vmem:[%s17895_s3 + $0x178] sm:$0xff] }
 0x308   : > { %2901 = vmatprep.subr.mxu0 %v17943_v14  ;;  %3022 = vmatprep.subr.mxu1 %v17943_v14 }
 0x309   : > { %2902 = vmatpush1.msra.mxu0 %v12413_v15  ;;  %3023 = vmatpush1.msra.mxu1 %v12411_v41  ;;  %v8988_v15 = vld [vmem:[%s17895_s3 + $0x338] sm:$0xff] }
 0x30a   : > { %2903 = vmatprep.subr.mxu0 %v17943_v14  ;;  %3024 = vmatprep.subr.mxu1 %v17943_v14 }
 0x30b   : > { %2904 = vmatpush1.msra.mxu0 %v12409_v4  ;;  %3025 = vmatpush1.msra.mxu1 %v12407_v5  ;;  %v8985_v5 = vld [vmem:[%s17895_s3 + $0x320] sm:$0xff] }
 0x30c   : > { %2905 = vmatprep.subr.mxu0 %v17943_v14  ;;  %3026 = vmatprep.subr.mxu1 %v17943_v14  ;;  %v8852_v4 = vld [vmem:[%s17895_s3 + $0x160] sm:$0xff] }
 0x30d   : > { %2906 = vmatpush1.msra.mxu0 %v12405_v34  ;;  %3027 = vmatpush1.msra.mxu1 %v12403_v39  ;;  %v9016_v39 = vld [vmem:[%s17896_s4 + $0x58] sm:$0xff] }
 0x30e   : > { %2907 = vmatprep.subr.mxu0 %v17943_v14  ;;  %3028 = vmatprep.subr.mxu1 %v17943_v14 }
 0x30f   : > { %2908 = vmatpush1.msra.mxu0 %v12401_v46  ;;  %3029 = vmatpush1.msra.mxu1 %v12399_v31  ;;  %v8956_v31 = vld [vmem:[%s17895_s3 + $0x2b8] sm:$0xff]  ;;  %v8853_v46 = vld [vmem:[%s17895_s3 + $0x168] sm:$0xff] }
 0x310   : > { %2909 = vmatprep.subr.mxu0 %v17943_v14  ;;  %3030 = vmatprep.subr.mxu1 %v17943_v14 }
 0x311   : > { %2910 = vmatpush1.msra.mxu0 %v12397_v40  ;;  %3031 = vmatpush1.msra.mxu1 %v12395_v36  ;;  %v8955_v36 = vld [vmem:[%s17895_s3 + $0x2b0] sm:$0xff]  ;;  %v8986_v40 = vld [vmem:[%s17895_s3 + $0x328] sm:$0xff] }
 0x312   : > { %2911 = vmatprep.subr.mxu0 %v17943_v14  ;;  %3032 = vmatprep.subr.mxu1 %v17943_v14 }
 0x313   : > { %2912 = vmatpush1.msra.mxu0 %v12393_v56  ;;  %3033 = vmatpush1.msra.mxu1 %v12391_v55  ;;  %v8839_v55 = vld [vmem:[%s17895_s3 + $0xf8] sm:$0xff]  ;;  %v8844_v56 = vld [vmem:[%s17895_s3 + $0x120] sm:$0xff] }
 0x314   : > { %2913 = vmatprep.subr.mxu0 %v17943_v14  ;;  %3034 = vmatprep.subr.mxu1 %v17943_v14 }
 0x315   : > { %2914 = vmatpush1.msra.mxu0 %v12389_v26  ;;  %3035 = vmatpush1.msra.mxu1 %v12387_v60  ;;  %v8838_v60 = vld [vmem:[%s17895_s3 + $0xf0] sm:$0xff]  ;;  %v8845_v26 = vld [vmem:[%s17895_s3 + $0x128] sm:$0xff] }
 0x316   : > { %2915 = vmatprep.subr.mxu0 %v17943_v14  ;;  %3036 = vmatprep.subr.mxu1 %v17943_v14 }
 0x317   : > { %8969 = vmatprep.mubr.msk.f32.mxu0 %vm2093_vm4, %v8956_v31  ;;  %2916 = vmatpush1.msra.mxu0 %v12385_v6  ;;  %v8958_v6 = vld [vmem:[%s17895_s3 + $0x2c8] sm:$0xff] }
 0x318   : > { %3037 = vmatpush1.msra.mxu1 %v12383_v35  ;;  %2706 = vmatmul.mubr.f32.gmra.mxu0 %v8955_v36  ;;  %v8957_v35 = vld [vmem:[%s17895_s3 + $0x2c0] sm:$0xff]  ;;  %v8861_v31 = vld [vmem:[%s17895_s3 + $0x1a8] sm:$0xff] }
 0x319   : > { %2917 = vmatprep.subr.mxu0 %v17943_v14  ;;  %3038 = vmatprep.subr.mxu1 %v17943_v14  ;;  %v8993_v36 = vld [vmem:[%s17895_s3 + $0x360] sm:$0xff] }
 0x31a   : > { %8977 = vmatprep.mubr.msk.f32.mxu1 %vm2093_vm4, %v8839_v55  ;;  %2918 = vmatpush1.msra.mxu0 %v12381_v42  ;;  %v8841_v42 = vld [vmem:[%s17895_s3 + $0x108] sm:$0xff]  ;;  %v8860_v55 = vld [vmem:[%s17895_s3 + $0x1a0] sm:$0xff] }
 0x31b   : > { %3039 = vmatpush1.msra.mxu1 %v12379_v51  ;;  %2919 = vmatprep.subr.mxu0 %v17943_v14  ;;  %v8840_v51 = vld [vmem:[%s17895_s3 + $0x100] sm:$0xff] }
 0x31c   : > { %2827 = vmatmul.mubr.f32.gmra.mxu1 %v8838_v60  ;;  %3040 = vmatprep.subr.mxu1 %v17943_v14  ;;  %v8996_v60 = vld [vmem:[%s17895_s3 + $0x378] sm:$0x1] }
 0x31d   : > { %8970 = vmatprep.mubr.msk.f32.mxu0 %vm2093_vm4, %v8958_v6  ;;  %2920 = vmatpush1.msra.mxu0 %v12377_v18  ;;  %v8960_v18 = vld [vmem:[%s17895_s3 + $0x2d8] sm:$0xff] }
 0x31e   : > { %3041 = vmatpush1.msra.mxu1 %v12375_v3  ;;  %2711 = vmatmul.mubr.f32.gmra.mxu0 %v8957_v35  ;;  %v8959_v3 = vld [vmem:[%s17895_s3 + $0x2d0] sm:$0xff]  ;;  %v8863_v6 = vld [vmem:[%s17895_s3 + $0x1b8] sm:$0x1] }
 0x31f   : > { %2921 = vmatprep.subr.mxu0 %v17943_v14  ;;  %3042 = vmatprep.subr.mxu1 %v17943_v14  ;;  %v8995_v35 = vld [vmem:[%s17895_s3 + $0x370] sm:$0x1] }
 0x320   : > { %8978 = vmatprep.mubr.msk.f32.mxu1 %vm2093_vm4, %v8841_v42  ;;  %2922 = vmatpush1.msra.mxu0 %v12373_v54  ;;  %v8843_v54 = vld [vmem:[%s17895_s3 + $0x118] sm:$0xff]  ;;  %v8862_v42 = vld [vmem:[%s17895_s3 + $0x1b0] sm:$0x1] }
 0x321   : > { %3043 = vmatpush1.msra.mxu1 %v12371_v25  ;;  %2923 = vmatprep.subr.mxu0 %v17943_v14  ;;  %v8842_v25 = vld [vmem:[%s17895_s3 + $0x110] sm:$0xff] }
 0x322   : > { %2832 = vmatmul.mubr.f32.gmra.mxu1 %v8840_v51  ;;  %3044 = vmatprep.subr.mxu1 %v17943_v14 }
 0x323   : > { %8971 = vmatprep.mubr.msk.f32.mxu0 %vm2093_vm4, %v8960_v18  ;;  %2924 = vmatpush1.msra.mxu0 %v12369_v23  ;;  %v8962_v23 = vld [vmem:[%s17895_s3 + $0x2e8] sm:$0xff] }
 0x324   : > { %3045 = vmatpush1.msra.mxu1 %v12367_v9  ;;  %2716 = vmatmul.mubr.f32.gmra.mxu0 %v8959_v3  ;;  %v8961_v9 = vld [vmem:[%s17895_s3 + $0x2e0] sm:$0xff] }
 0x325   : > { %2939 = vmatprep.subr.mxu0 %v17943_v14  ;;  %3060 = vmatprep.subr.mxu1 %v17943_v14 }
 0x326   : > { %8979 = vmatprep.mubr.msk.f32.mxu1 %vm2093_vm4, %v8843_v54  ;;  %8997 = vmatpush2.msk.msra.mxu0 %vm2115_vm5, %v12529_v49  ;;  %v8859_v49 = vld [vmem:[%s17895_s3 + $0x198] sm:$0xff] }
 0x327   : > { %9005 = vmatpush2.msk.msra.mxu1 %vm2115_vm5, %v12527_v22  ;;  %2941 = vmatprep.subr.mxu0 %v17943_v14  ;;  %v8992_v22 = vld [vmem:[%s17895_s3 + $0x358] sm:$0xff] }
 0x328   : > { %2837 = vmatmul.mubr.f32.gmra.mxu1 %v8842_v25  ;;  %3062 = vmatprep.subr.mxu1 %v17943_v14 }
 0x329   : > { %8972 = vmatprep.mubr.msk.f32.mxu0 %vm2093_vm4, %v8962_v23  ;;  %2942 = vmatpush2.msra.mxu0 %v12523_v37  ;;  %v8964_v37 = vld [vmem:[%s17895_s3 + $0x2f8] sm:$0xff] }
 0x32a   : > { %3063 = vmatpush2.msra.mxu1 %v12521_v20  ;;  %2721 = vmatmul.mubr.f32.gmra.mxu0 %v8961_v9  ;;  %v8963_v20 = vld [vmem:[%s17895_s3 + $0x2f0] sm:$0xff] }
 0x32b   : > { %2943 = vmatprep.subr.mxu0 %v17943_v14  ;;  %3064 = vmatprep.subr.mxu1 %v17943_v14 }
 0x32c   : > { %8980 = vmatprep.mubr.msk.f32.mxu1 %vm2093_vm4, %v8845_v26  ;;  %2944 = vmatpush2.msra.mxu0 %v12511_v19  ;;  %v8847_v19 = vld [vmem:[%s17895_s3 + $0x138] sm:$0xff] }
 0x32d   : > { %3065 = vmatpush2.msra.mxu1 %v12509_v32  ;;  %2945 = vmatprep.subr.mxu0 %v17943_v14  ;;  %v8846_v32 = vld [vmem:[%s17895_s3 + $0x130] sm:$0xff] }
 0x32e   : > { %2842 = vmatmul.mubr.f32.gmra.mxu1 %v8844_v56  ;;  %3066 = vmatprep.subr.mxu1 %v17943_v14 }
 0x32f   : > { %8973 = vmatprep.mubr.msk.f32.mxu0 %vm2093_vm4, %v8964_v37  ;;  %2946 = vmatpush2.msra.mxu0 %v12499_v33  ;;  %v8966_v33 = vld [vmem:[%s17895_s3 + $0x308] sm:$0x1] }
 0x330   : > { %3067 = vmatpush2.msra.mxu1 %v12497_v57  ;;  %2726 = vmatmul.mubr.f32.gmra.mxu0 %v8963_v20  ;;  %v8965_v57 = vld [vmem:[%s17895_s3 + $0x300] sm:$0x1] }
 0x331   : > { %2947 = vmatprep.subr.mxu0 %v17943_v14  ;;  %3068 = vmatprep.subr.mxu1 %v17943_v14 }
 0x332   : > { %8981 = vmatprep.mubr.msk.f32.mxu1 %vm2093_vm4, %v8847_v19  ;;  %2948 = vmatpush2.msra.mxu0 %v12487_v28  ;;  %v8849_v28 = vld [vmem:[%s17895_s3 + $0x148] sm:$0x1] }
 0x333   : > { %3069 = vmatpush2.msra.mxu1 %v12485_v21  ;;  %2949 = vmatprep.subr.mxu0 %v17943_v14  ;;  %v8848_v21 = vld [vmem:[%s17895_s3 + $0x140] sm:$0x1] }
 0x334   : > { %2847 = vmatmul.mubr.f32.gmra.mxu1 %v8846_v32  ;;  %3070 = vmatprep.subr.mxu1 %v17943_v14 }
 0x335   : > { %8974 = vmatprep.mubr.msk.f32.mxu0 %vm2093_vm4, %v8966_v33  ;;  %2950 = vmatpush2.msra.mxu0 %v12475_v1  ;;  %v8984_v1 = vld [vmem:[%s17895_s3 + $0x318] sm:$0xff] }
 0x336   : > { %3071 = vmatpush2.msra.mxu1 %v12473_v52  ;;  %2731 = vmatmul.mubr.f32.gmra.mxu0 %v8965_v57  ;;  %v8851_v52 = vld [vmem:[%s17895_s3 + $0x158] sm:$0xff] }
 0x337   : > { %2951 = vmatprep.subr.mxu0 %v17943_v14  ;;  %3072 = vmatprep.subr.mxu1 %v17943_v14 }
 0x338   : > { %8982 = vmatprep.mubr.msk.f32.mxu1 %vm2093_vm4, %v8849_v28  ;;  %2952 = vmatpush2.msra.mxu0 %v12463_v48  ;;  %v8983_v48 = vld [vmem:[%s17895_s3 + $0x310] sm:$0xff] }
 0x339   : > { %3073 = vmatpush2.msra.mxu1 %v12461_v62  ;;  %2953 = vmatprep.subr.mxu0 %v17943_v14  ;;  %v8850_v62 = vld [vmem:[%s17895_s3 + $0x150] sm:$0xff] }
 0x33a   : > { %2852 = vmatmul.mubr.f32.gmra.mxu1 %v8848_v21  ;;  %3074 = vmatprep.subr.mxu1 %v17943_v14 }
 0x33b   : > { %2954 = vmatpush2.msra.mxu0 %v12451_v61  ;;  %3075 = vmatpush2.msra.mxu1 %v12449_v30  ;;  %v8989_v30 = vld [vmem:[%s17895_s3 + $0x340] sm:$0xff] }
 0x33c   : > { %2955 = vmatprep.subr.mxu0 %v17943_v14  ;;  %3076 = vmatprep.subr.mxu1 %v17943_v14  ;;  %v8856_v61 = vld [vmem:[%s17895_s3 + $0x180] sm:$0xff] }
 0x33d   : > { %2956 = vmatpush2.msra.mxu0 %v12439_v58  ;;  %8998 = vmatprep.mubr.msk.f32.mxu0 %vm2093_vm4, %v8984_v1  ;;  %v9014_v58 = vld [vmem:[%s17896_s4 + $0x48] sm:$0xff] }
 0x33e   : > { %3077 = vmatpush2.msra.mxu1 %v12437_v38  ;;  %9006 = vmatprep.mubr.msk.f32.mxu1 %vm2093_vm4, %v8851_v52  ;;  %v8857_v38 = vld [vmem:[%s17895_s3 + $0x188] sm:$0xff] }
 0x33f   : > { %2958 = vmatmul.mubr.f32.vlgmr.msra.gmra.mxu0 %v8983_v48  ;;  %3079 = vmatmul.mubr.f32.vlgmr.msra.gmra.mxu1 %v8850_v62  ;;  %v2185_v34 = vpop.f32.mrf.mxu0 }
 0x340   : > { %8999 = vmatprep.mubr.msk.f32.mxu0 %vm2093_vm4, %v8986_v40  ;;  %9007 = vmatprep.mubr.msk.f32.mxu1 %vm2093_vm4, %v8853_v46  ;;  %v2309_v41 = vpop.f32.mrf.mxu1 }
 0x341   : > { %10686 = vmatprep.subr.mxu0 %v17943_v14  ;;  %v13197_v29 = vadd.f32 %v2309_v41, %v2185_v34  ;;  %v2187_v10 = vpop.f32.mrf.mxu0  ;;  %3348 = vmatprep.subr.mxu1 %v17943_v14 }
 0x342   : > { %10687 = vmatpush3.msra.mxu0 %v9016_v39  ;;  %v2311_v63 = vpop.f32.mrf.mxu1 }
 0x343   : > { %2963 = vmatmul.mubr.f32.gmra.mxu0 %v8985_v5  ;;  %3084 = vmatmul.mubr.f32.gmra.mxu1 %v8852_v4  ;;  %v17988_v63 = vld [vmem:[#allocation9_spill] sm:$0xff] }
 0x344   : > { %9000 = vmatprep.mubr.msk.f32.mxu0 %vm2093_vm4, %v8988_v15  ;;  %9008 = vmatprep.mubr.msk.f32.mxu1 %vm2093_vm4, %v8855_v50 }
 0x345   : > { %10688 = vmatprep.subr.mxu0 %v17943_v14 }
 0x346   : > { %10689 = vmatpush3.msra.mxu0 %v9015_v12 }
 0x347   : > { %2968 = vmatmul.mubr.f32.gmra.mxu0 %v8987_v2  ;;  %3089 = vmatmul.mubr.f32.gmra.mxu1 %v8854_v47 }
 0x348   : > { %9001 = vmatprep.mubr.msk.f32.mxu0 %vm2093_vm4, %v8990_v8  ;;  %9009 = vmatprep.mubr.msk.f32.mxu1 %vm2093_vm4, %v8857_v38  ;;  %v17990_v38 = vld [vmem:[#allocation10_spill] sm:$0xff] }
 0x349   : > { %10690 = vmatprep.subr.mxu0 %v17943_v14 }
 0x34a   : > { %10691 = vmatpush3.msra.mxu0 %v9014_v58  ;;  %v17991_v58 = vld [vmem:[#allocation11_spill] sm:$0xff] }
 0x34b   : > { %2973 = vmatmul.mubr.f32.gmra.mxu0 %v8989_v30  ;;  %3094 = vmatmul.mubr.f32.gmra.mxu1 %v8856_v61  ;;  %v17992_v30 = vld [vmem:[#allocation12_spill] sm:$0xff]  ;;  %v17993_v61 = vld [vmem:[#allocation13_spill] sm:$0xff] }
 0x34c   : > { %9002 = vmatprep.mubr.msk.f32.mxu0 %vm2093_vm4, %v8992_v22  ;;  %9010 = vmatprep.mubr.msk.f32.mxu1 %vm2093_vm4, %v8859_v49  ;;  %v17994_v22 = vld [vmem:[#allocation14_spill] sm:$0xff]  ;;  %v17995_v49 = vld [vmem:[#allocation15_spill] sm:$0xff] }
 0x34d   : > { %10692 = vmatprep.subr.mxu0 %v17943_v14 }
 0x34e   : > { %10693 = vmatpush3.msra.mxu0 %v9013_v17 }
 0x34f   : > { %2978 = vmatmul.mubr.f32.gmra.mxu0 %v8991_v45  ;;  %3099 = vmatmul.mubr.f32.gmra.mxu1 %v8858_v16  ;;  %v17996_v45 = vld [vmem:[#allocation16_spill] sm:$0xff] }
 0x350   : > { %9003 = vmatprep.mubr.msk.f32.mxu0 %vm2093_vm4, %v8994_v13  ;;  %9011 = vmatprep.mubr.msk.f32.mxu1 %vm2093_vm4, %v8861_v31 }
 0x351   : > { %3634 = vmatprep.subr.mxu0 %v17943_v14 }
 0x353   : > { %2983 = vmatmul.mubr.f32.gmra.mxu0 %v8993_v36  ;;  %3104 = vmatmul.mubr.f32.gmra.mxu1 %v8860_v55  ;;  %v17998_v55 = vld [vmem:[#allocation17_spill] sm:$0xff] }
 0x354   : > { %9004 = vmatprep.mubr.msk.f32.mxu0 %vm2093_vm4, %v8996_v60  ;;  %9012 = vmatprep.mubr.msk.f32.mxu1 %vm2093_vm4, %v8863_v6 }
 0x357   : > { %2988 = vmatmul.mubr.f32.gmra.mxu0 %v8995_v35  ;;  %3109 = vmatmul.mubr.f32.gmra.mxu1 %v8862_v42  ;;  %v17999_v42 = vld [vmem:[#allocation18_spill] sm:$0xff] }
 0x358   : > { %10694 = vmatprep.mubr.msk.f32.mxu0 %vm11292_vm1, %v17943_v14 }
 0x359   : > { %v2190_v51 = vpop.f32.mrf.mxu0 }
 0x35b   : > { %10695 = vmatmul.mubr.msk.f32.vlgmr.msra.gmra.mxu0 %vm1558_vm3, %v11974_v0  ;;  %v2192_v18 = vpop.f32.mrf.mxu0 }
 0x35c   : > { %10697 = vmatprep.mubr.msk.f32.mxu0 %vm11292_vm1, %v17943_v14  ;;  %v2314_v3 = vpop.f32.mrf.mxu1 }
 0x35d   : > { %v13283_v54 = vadd.f32 %v2314_v3, %v2190_v51 }
 0x35e   : > { %v2316_v25 = vpop.f32.mrf.mxu1 }
 0x35f   : > { %10698 = vmatmul.mubr.msk.f32.gmra.mxu0 %vm1558_vm3, %v11990_v44  ;;  %v2195_v23 = vpop.f32.mrf.mxu0  ;;  %v18001_v25 = vld [vmem:[#allocation2_spill] sm:$0xff] }
 0x360   : > { %10700 = vmatprep.mubr.msk.f32.mxu0 %vm11292_vm1, %v17943_v14 }
 0x361   : > { %v2197_v9 = vpop.f32.mrf.mxu0 }
 0x362   : > { %v2319_v26 = vpop.f32.mrf.mxu1 }
 0x363   : > { %10701 = vmatmul.mubr.msk.f32.gmra.mxu0 %vm1558_vm3, %v12006_v43  ;;  %v13291_v56 = vadd.f32 %v2319_v26, %v2195_v23 }
 0x364   : > { %10703 = vmatprep.mubr.msk.f32.mxu0 %vm11292_vm1, %v17943_v14  ;;  %v2321_v37 = vpop.f32.mrf.mxu1 }
 0x365   : > { %v2200_v20 = vpop.f32.mrf.mxu0 }
 0x367   : > { %10704 = vmatmul.mubr.msk.f32.gmra.mxu0 %vm1558_vm3, %v12022_v7  ;;  %v2202_v19 = vpop.f32.mrf.mxu0 }
 0x368   : > { %10706 = vmatprep.mubr.msk.f32.mxu0 %vm11292_vm1, %v17943_v14  ;;  %v2324_v32 = vpop.f32.mrf.mxu1 }
 0x369   : > { %v13299_v33 = vadd.f32 %v2324_v32, %v2200_v20  ;;  %v18003_v20 = vld [vmem:[#allocation6_spill] sm:$0xff] }
 0x36a   : > { %v2326_v57 = vpop.f32.mrf.mxu1 }
 0x36b   : > { %10707 = vmatmul.mubr.msk.f32.gmra.mxu0 %vm1558_vm3, %v12039_v59  ;;  %v2205_v28 = vpop.f32.mrf.mxu0 }
 0x36c   : > { %10709 = vmatprep.mubr.msk.f32.mxu0 %vm11292_vm1, %v17943_v14 }
 0x36d   : > { %v2207_v21 = vpop.f32.mrf.mxu0 }
 0x36e   : > { %v2329_v1 = vpop.f32.mrf.mxu1 }
 0x36f   : > { %10710 = vmatmul.mubr.msk.f32.gmra.mxu0 %vm1558_vm3, %v12056_v24  ;;  %v13307_v52 = vadd.f32 %v2329_v1, %v2205_v28  ;;  %v18004_v28 = vld [vmem:[#allocation3_spill] sm:$0xff] }
 0x370   : > { %10712 = vmatprep.mubr.msk.f32.mxu0 %vm11292_vm1, %v17943_v14  ;;  %v2331_v48 = vpop.f32.mrf.mxu1 }
 0x371   : > { %17985 = vst [vmem:[#allocation5_spill] sm:$0xff] %v13307_v52  ;;  %v2210_v62 = vpop.f32.mrf.mxu0  ;;  %v9044_v52 = vld [vmem:[%s17895_s3 + $0x390] sm:$0xff] }
 0x373   : > { %10713 = vmatmul.mubr.msk.f32.gmra.mxu0 %vm1558_vm3, %v12073_v53  ;;  %v2212_v40 = vpop.f32.mrf.mxu0 }
 0x374   : > { %10715 = vmatprep.mubr.msk.f32.mxu0 %vm11292_vm1, %v17943_v14  ;;  %v2334_v46 = vpop.f32.mrf.mxu1 }
 0x375   : > { %v13315_v39 = vadd.f32 %v2334_v46, %v2210_v62  ;;  %v18006_v62 = vld [vmem:[#allocation7_spill] sm:$0xff] }
 0x376   : > { %v2336_v34 = vpop.f32.mrf.mxu1 }
 0x377   : > { %17986 = vst [vmem:[#allocation19_spill] sm:$0xff] %v13315_v39  ;;  %10716 = vmatmul.mubr.msk.f32.gmra.mxu0 %vm1558_vm3, %v12090_v27  ;;  %v2215_v5 = vpop.f32.mrf.mxu0  ;;  %v9045_v39 = vld [vmem:[%s17895_s3 + $0x398] sm:$0xff] }
 0x378   : > { %10718 = vmatprep.mubr.msk.f32.mxu0 %vm11292_vm1, %v17943_v14 }
 0x379   : > { %v2217_v4 = vpop.f32.mrf.mxu0 }
 0x37a   : > { %v2339_v41 = vpop.f32.mrf.mxu1  ;;  %v18008_v4 = vld [vmem:[#allocation4_spill] sm:$0xff] }
 0x37b   : > { %10719 = vmatmul.mubr.msk.f32.gmra.mxu0 %vm1558_vm3, %v12107_v11  ;;  %v13323_v15 = vadd.f32 %v2339_v41, %v2215_v5 }
 0x37c   : > { %10721 = vmatprep.mubr.msk.f32.mxu0 %vm11292_vm1, %v17943_v14  ;;  %v2341_v50 = vpop.f32.mrf.mxu1 }
 0x37d   : > { %17987 = vst [vmem:[#allocation20_spill] sm:$0xff] %v13323_v15 }
 0x37e   : > { %v2445_v10 = vpop.f32.mrf.mxu0 }
 0x37f   : > { %10722 = vmatmul.mubr.msk.f32.gmra.mxu0 %vm1558_vm3, %v17988_v63 }
 0x380   : > { %10724 = vmatprep.mubr.msk.f32.mxu0 %vm11292_vm1, %v17943_v14  ;;  %v2566_v12 = vpop.f32.mrf.mxu1  ;;  %v2447_v2 = vpop.f32.mrf.mxu0 }
 0x381   : > { %v13331_v47 = vadd.f32 %v2566_v12, %v2445_v10  ;;  %v18009_v12 = vld [vmem:[#allocation8_spill] sm:$0xff] }
 0x382   : > { %v2568_v8 = vpop.f32.mrf.mxu1 }
 0x383   : > { %17989 = vst [vmem:[#allocation9_spill] sm:$0xff] %v13331_v47  ;;  %10725 = vmatmul.mubr.msk.f32.gmra.mxu0 %vm1558_vm3, %v17990_v38 }
 0x384   : > { %10727 = vmatprep.mubr.msk.f32.mxu0 %vm11292_vm1, %v17943_v14 }
 0x387   : > { %10728 = vmatmul.mubr.msk.f32.gmra.mxu0 %vm1558_vm3, %v17991_v58 }
 0x388   : > { %10730 = vmatprep.mubr.msk.f32.mxu0 %vm11292_vm1, %v17943_v14 }
 0x38b   : > { %10731 = vmatmul.mubr.msk.f32.gmra.mxu0 %vm1558_vm3, %v17992_v30 }
 0x38c   : > { %10733 = vmatprep.mubr.msk.f32.mxu0 %vm11292_vm1, %v17943_v14 }
 0x38f   : > { %10734 = vmatmul.mubr.msk.f32.gmra.mxu0 %vm1558_vm3, %v17993_v61 }
 0x390   : > { %10736 = vmatprep.mubr.msk.f32.mxu0 %vm11292_vm1, %v17943_v14 }
 0x393   : > { %10737 = vmatmul.mubr.msk.f32.gmra.mxu0 %vm1558_vm3, %v17994_v22 }
 0x394   : > { %10739 = vmatprep.mubr.msk.f32.mxu0 %vm11292_vm1, %v17943_v14 }
 0x397   : > { %10740 = vmatmul.mubr.msk.f32.gmra.mxu0 %vm1558_vm3, %v17995_v49 }
 0x398   : > { %10742 = vmatprep.mubr.msk.f32.mxu0 %vm11292_vm1, %v17943_v14 }
 0x399   : > { %v2450_v17 = vpop.f32.mrf.mxu0 }
 0x39b   : > { %10743 = vmatmul.mubr.msk.f32.gmra.mxu0 %vm1558_vm3, %v17996_v45  ;;  %v2452_v16 = vpop.f32.mrf.mxu0 }
 0x39c   : > { %10745 = vmatprep.mubr.msk.f32.mxu0 %vm11292_vm1, %v17943_v14  ;;  %v2571_v13 = vpop.f32.mrf.mxu1 }
 0x39d   : > { %v13361_v31 = vadd.f32 %v2571_v13, %v2450_v17 }
 0x39e   : > { %v2573_v36 = vpop.f32.mrf.mxu1 }
 0x39f   : > { %17997 = vst [vmem:[#allocation10_spill] sm:$0xff] %v13361_v31  ;;  %10746 = vmatmul.mubr.msk.f32.gmra.mxu0 %vm1558_vm3, %v17998_v55  ;;  %v2455_v60 = vpop.f32.mrf.mxu0 }
 0x3a0   : > { %10748 = vmatprep.mubr.msk.f32.mxu0 %vm11292_vm1, %v17943_v14 }
 0x3a1   : > { %v2457_v6 = vpop.f32.mrf.mxu0 }
 0x3a2   : > { %v2576_v35 = vpop.f32.mrf.mxu1 }
 0x3a3   : > { %10749 = vmatmul.mubr.msk.f32.gmra.mxu0 %vm1558_vm3, %v17999_v42  ;;  %v13369_v51 = vadd.f32 %v2576_v35, %v2455_v60 }
 0x3a4   : > { %10751 = vmatprep.mubr.msk.f32.mxu0 %vm11292_vm1, %v17943_v14  ;;  %v2578_v18 = vpop.f32.mrf.mxu1 }
 0x3a5   : > { %18000 = vst [vmem:[#allocation11_spill] sm:$0xff] %v13369_v51  ;;  %v2460_v3 = vpop.f32.mrf.mxu0 }
 0x3a7   : > { %10752 = vmatmul.mubr.msk.f32.gmra.mxu0 %vm1558_vm3, %v18001_v25  ;;  %v2462_v23 = vpop.f32.mrf.mxu0 }
 0x3a8   : > { %10754 = vmatprep.mubr.msk.f32.mxu0 %vm11292_vm1, %v17943_v14  ;;  %v2581_v9 = vpop.f32.mrf.mxu1 }
 0x3a9   : > { %v13377_v26 = vadd.f32 %v2581_v9, %v2460_v3 }
 0x3aa   : > { %v2583_v37 = vpop.f32.mrf.mxu1 }
 0x3ab   : > { %18002 = vst [vmem:[#allocation12_spill] sm:$0xff] %v13377_v26  ;;  %10755 = vmatmul.mubr.msk.f32.gmra.mxu0 %vm1558_vm3, %v18003_v20  ;;  %v2465_v19 = vpop.f32.mrf.mxu0 }
 0x3ac   : > { %10757 = vmatprep.mubr.msk.f32.mxu0 %vm11292_vm1, %v17943_v14 }
 0x3ad   : > { %v2467_v32 = vpop.f32.mrf.mxu0 }
 0x3ae   : > { %v2586_v57 = vpop.f32.mrf.mxu1 }
 0x3af   : > { %10758 = vmatmul.mubr.msk.f32.gmra.mxu0 %vm1558_vm3, %v18004_v28  ;;  %v13385_v21 = vadd.f32 %v2586_v57, %v2465_v19 }
 0x3b0   : > { %10760 = vmatprep.mubr.msk.f32.mxu0 %vm11292_vm1, %v17943_v14  ;;  %v2588_v1 = vpop.f32.mrf.mxu1 }
 0x3b1   : > { %18005 = vst [vmem:[#allocation13_spill] sm:$0xff] %v13385_v21  ;;  %v2470_v48 = vpop.f32.mrf.mxu0 }
 0x3b3   : > { %10761 = vmatmul.mubr.msk.f32.gmra.mxu0 %vm1558_vm3, %v18006_v62  ;;  %v2472_v40 = vpop.f32.mrf.mxu0 }
 0x3b4   : > { %10763 = vmatprep.mubr.msk.f32.mxu0 %vm11292_vm1, %v17943_v14  ;;  %v2591_v46 = vpop.f32.mrf.mxu1 }
 0x3b5   : > { %v13393_v34 = vadd.f32 %v2591_v46, %v2470_v48 }
 0x3b6   : > { %v2593_v5 = vpop.f32.mrf.mxu1 }
 0x3b7   : > { %18007 = vst [vmem:[#allocation14_spill] sm:$0xff] %v13393_v34  ;;  %10764 = vmatmul.mubr.msk.f32.gmra.mxu0 %vm1558_vm3, %v18008_v4  ;;  %v2475_v41 = vpop.f32.mrf.mxu0 }
 0x3b8   : > { %10766 = vmatprep.mubr.msk.f32.mxu0 %vm11292_vm1, %v17943_v14 }
 0x3b9   : > { %v2477_v50 = vpop.f32.mrf.mxu0 }
 0x3ba   : > { %v2596_v10 = vpop.f32.mrf.mxu1 }
 0x3bb   : > { %10767 = vmatmul.mubr.msk.f32.gmra.mxu0 %vm1558_vm3, %v18009_v12  ;;  %v13401_v2 = vadd.f32 %v2596_v10, %v2475_v41 }
 0x3bc   : > { %v2598_v8 = vpop.f32.mrf.mxu1 }
 0x3bd   : > { %18010 = vst [vmem:[#allocation15_spill] sm:$0xff] %v13401_v2 }
 0x3be   : > { %v2702_v17 = vpop.f32.mrf.mxu0 }
 0x3c0   : > { %v2823_v16 = vpop.f32.mrf.mxu1  ;;  %v2704_v13 = vpop.f32.mrf.mxu0 }
 0x3c1   : > { %v13403_v36 = vadd.f32 %v2823_v16, %v2702_v17 }
 0x3c2   : > { %v2825_v60 = vpop.f32.mrf.mxu1 }
 0x3d8   : > { %v2707_v6 = vpop.f32.mrf.mxu0 }
 0x3da   : > { %v2709_v35 = vpop.f32.mrf.mxu0 }
 0x3dc   : > { %v2828_v18 = vpop.f32.mrf.mxu1 }
 0x3dd   : > { %v13405_v3 = vadd.f32 %v2828_v18, %v2707_v6 }
 0x3de   : > { %v2712_v23 = vpop.f32.mrf.mxu0  ;;  %v2830_v9 = vpop.f32.mrf.mxu1 }
 0x3e0   : > { %v2714_v37 = vpop.f32.mrf.mxu0 }
 0x3e2   : > { %v2833_v19 = vpop.f32.mrf.mxu1 }
 0x3e3   : > { %v13407_v32 = vadd.f32 %v2833_v19, %v2712_v23 }
 0x3e4   : > { %v2717_v57 = vpop.f32.mrf.mxu0  ;;  %v2835_v1 = vpop.f32.mrf.mxu1 }
 0x3e6   : > { %v2719_v48 = vpop.f32.mrf.mxu0 }
 0x3e8   : > { %v2838_v40 = vpop.f32.mrf.mxu1 }
 0x3e9   : > { %v13409_v46 = vadd.f32 %v2838_v40, %v2717_v57 }
 0x3ea   : > { %v2722_v5 = vpop.f32.mrf.mxu0  ;;  %v2840_v41 = vpop.f32.mrf.mxu1 }
 0x3eb   : > { %18011 = vst [vmem:[#allocation16_spill] sm:$0xff] %v13409_v46  ;;  %v9091_v46 = vld [vmem:[%s17895_s3 + $0x488] sm:$0xff] }
 0x3ec   : > { %v2724_v50 = vpop.f32.mrf.mxu0 }
 0x3ee   : > { %v2843_v10 = vpop.f32.mrf.mxu1 }
 0x3ef   : > { %v13411_v8 = vadd.f32 %v2843_v10, %v2722_v5 }
 0x3f0   : > { %v2727_v17 = vpop.f32.mrf.mxu0  ;;  %v2845_v16 = vpop.f32.mrf.mxu1 }
 0x3f1   : > { %18012 = vst [vmem:[#allocation17_spill] sm:$0xff] %v13411_v8  ;;  %v9089_v8 = vld [vmem:[%s17895_s3 + $0x478] sm:$0xff] }
 0x3f2   : > { %v2729_v13 = vpop.f32.mrf.mxu0 }
 0x3f4   : > { %v2848_v60 = vpop.f32.mrf.mxu1 }
 0x3f5   : > { %v13413_v6 = vadd.f32 %v2848_v60, %v2727_v17 }
 0x3f6   : > { %v2732_v35 = vpop.f32.mrf.mxu0  ;;  %v2850_v18 = vpop.f32.mrf.mxu1 }
 0x3f7   : > { %18013 = vst [vmem:[#allocation18_spill] sm:$0xff] %v13413_v6 }
 0x3f8   : > { %v2734_v23 = vpop.f32.mrf.mxu0 }
 0x3fa   : > { %v2853_v9 = vpop.f32.mrf.mxu1 }
 0x3fb   : > { %v13415_v37 = vadd.f32 %v2853_v9, %v2732_v35 }
 0x3fc   : > { %v2855_v19 = vpop.f32.mrf.mxu1 }
 0x3fd   : > { %18014 = vst [vmem:[#allocation2_spill] sm:$0xff] %v13415_v37 }
 0x3ff   : > { %v2959_v57 = vpop.f32.mrf.mxu0  ;;  %v3080_v1 = vpop.f32.mrf.mxu1 }
 0x400   : > { %v13417_v48 = vadd.f32 %v3080_v1, %v2959_v57  ;;  %v9043_v57 = vld [vmem:[%s17895_s3 + $0x388] sm:$0xff] }
 0x401   : > { %v2961_v40 = vpop.f32.mrf.mxu0  ;;  %v3082_v5 = vpop.f32.mrf.mxu1  ;;  %v9087_v1 = vld [vmem:[%s17895_s3 + $0x468] sm:$0xff]  ;;  %9057 = vmatprep.mubr.msk.f32.mxu1 %vm2093_vm4, %v9043_v57 }
 0x402   : > { %18015 = vst [vmem:[#allocation6_spill] sm:$0xff] %v13417_v48  ;;  %9101 = vmatprep.mubr.msk.f32.mxu0 %vm2093_vm4, %v9087_v1 }
 0x403   : > { %v2964_v41 = vpop.f32.mrf.mxu0  ;;  %v3085_v50 = vpop.f32.mrf.mxu1 }
 0x404   : > { %v13419_v10 = vadd.f32 %v3085_v50, %v2964_v41 }
 0x405   : > { %v2966_v16 = vpop.f32.mrf.mxu0  ;;  %v3087_v17 = vpop.f32.mrf.mxu1 }
 0x406   : > { %18016 = vst [vmem:[#allocation3_spill] sm:$0xff] %v13419_v10 }
 0x407   : > { %v2969_v13 = vpop.f32.mrf.mxu0  ;;  %v3090_v60 = vpop.f32.mrf.mxu1 }
 0x408   : > { %v13421_v18 = vadd.f32 %v3090_v60, %v2969_v13 }
 0x409   : > { %v2971_v23 = vpop.f32.mrf.mxu0  ;;  %v3092_v35 = vpop.f32.mrf.mxu1 }
 0x40a   : > { %18017 = vst [vmem:[#allocation7_spill] sm:$0xff] %v13421_v18 }
 0x40b   : > { %v2974_v9 = vpop.f32.mrf.mxu0  ;;  %v3095_v19 = vpop.f32.mrf.mxu1 }
 0x40c   : > { %v13429_v40 = vadd.f32 %v3095_v19, %v2974_v9 }
 0x40d   : > { %v2976_v5 = vpop.f32.mrf.mxu0  ;;  %v3097_v41 = vpop.f32.mrf.mxu1 }
 0x40e   : > { %18018 = vst [vmem:[#allocation4_spill] sm:$0xff] %v13429_v40 }
 0x40f   : > { %v2979_v50 = vpop.f32.mrf.mxu0  ;;  %v3100_v16 = vpop.f32.mrf.mxu1 }
 0x410   : > { %v13433_v17 = vadd.f32 %v3100_v16, %v2979_v50 }
 0x411   : > { %v2981_v13 = vpop.f32.mrf.mxu0  ;;  %v3102_v60 = vpop.f32.mrf.mxu1 }
 0x412   : > { %18019 = vst [vmem:[#allocation8_spill] sm:$0xff] %v13433_v17 }
 0x413   : > { %v2984_v23 = vpop.f32.mrf.mxu0  ;;  %v3105_v35 = vpop.f32.mrf.mxu1 }
 0x414   : > { %v13435_v18 = vadd.f32 %v3105_v35, %v2984_v23 }
 0x415   : > { %v2986_v10 = vpop.f32.mrf.mxu0  ;;  %v3107_v48 = vpop.f32.mrf.mxu1 }
 0x416   : > { %18020 = vst [vmem:[#allocation21_spill] sm:$0xff] %v13435_v18 }
 0x417   : > { %v2989_v9 = vpop.f32.mrf.mxu0  ;;  %v3110_v19 = vpop.f32.mrf.mxu1 }
 0x418   : > { %v13437_v40 = vadd.f32 %v3110_v19, %v2989_v9 }
 0x419   : > { %v2991_v57 = vpop.f32.mrf.mxu0  ;;  %v3112_v1 = vpop.f32.mrf.mxu1 }
 0x41a   : > { %18021 = vst [vmem:[#allocation22_spill] sm:$0xff] %v13437_v40 }
 0x41b   : > { %v13439_v5 = vpop.f32.mrf.mxu0 }
 0x41d   : > { %v10696_v41 = vpop.f32.mrf.mxu0 }
 0x41f   : > { %v13441_v2 = vpop.f32.mrf.mxu0 }
 0x421   : > { %v10699_v50 = vpop.f32.mrf.mxu0 }
 0x423   : > { %v13443_v16 = vpop.f32.mrf.mxu0 }
 0x425   : > { %v10702_v13 = vpop.f32.mrf.mxu0 }
 0x427   : > { %v13445_v60 = vpop.f32.mrf.mxu0 }
 0x429   : > { %v10705_v23 = vpop.f32.mrf.mxu0 }
 0x42b   : > { %v13447_v10 = vpop.f32.mrf.mxu0 }
 0x42d   : > { %v10708_v48 = vpop.f32.mrf.mxu0 }
 0x42f   : > { %v13449_v35 = vpop.f32.mrf.mxu0 }
 0x431   : > { %v10711_v9 = vpop.f32.mrf.mxu0 }
 0x433   : > { %v13451_v19 = vpop.f32.mrf.mxu0 }
 0x435   : > { %v10714_v57 = vpop.f32.mrf.mxu0 }
 0x437   : > { %v13453_v1 = vpop.f32.mrf.mxu0 }
 0x439   : > { %v10717_v41 = vpop.f32.mrf.mxu0 }
 0x43b   : > { %v13455_v40 = vpop.f32.mrf.mxu0 }
 0x43d   : > { %v10720_v50 = vpop.f32.mrf.mxu0 }
 0x43f   : > { %v13457_v18 = vpop.f32.mrf.mxu0 }
 0x441   : > { %v10723_v13 = vpop.f32.mrf.mxu0 }
 0x443   : > { %v13459_v17 = vpop.f32.mrf.mxu0 }
 0x445   : > { %v10726_v23 = vpop.f32.mrf.mxu0 }
 0x447   : > { %v13461_v34 = vpop.f32.mrf.mxu0 }
 0x449   : > { %v10729_v48 = vpop.f32.mrf.mxu0 }
 0x44b   : > { %v13463_v21 = vpop.f32.mrf.mxu0 }
 0x44d   : > { %v10732_v9 = vpop.f32.mrf.mxu0 }
 0x44f   : > { %v13465_v26 = vpop.f32.mrf.mxu0 }
 0x451   : > { %v10735_v57 = vpop.f32.mrf.mxu0 }
 0x453   : > { %v13467_v51 = vpop.f32.mrf.mxu0 }
 0x455   : > { %v10738_v41 = vpop.f32.mrf.mxu0 }
 0x457   : > { %v13469_v31 = vpop.f32.mrf.mxu0 }
 0x458   : > { %3349 = vmatpush1.msra.mxu1 %v13469_v31  ;;  %3635 = vmatpush1.msra.mxu0 %v13469_v31 }
 0x459   : > { %v10741_v50 = vpop.f32.mrf.mxu0  ;;  %3350 = vmatprep.subr.mxu1 %v17943_v14  ;;  %3636 = vmatprep.subr.mxu0 %v17943_v14 }
 0x45a   : > { %3351 = vmatpush1.msra.mxu1 %v13467_v51  ;;  %3637 = vmatpush1.msra.mxu0 %v13467_v51 }
 0x45b   : > { %v13477_v13 = vpop.f32.mrf.mxu0  ;;  %3352 = vmatprep.subr.mxu1 %v17943_v14  ;;  %3638 = vmatprep.subr.mxu0 %v17943_v14 }
 0x45c   : > { %3353 = vmatpush1.msra.mxu1 %v13465_v26  ;;  %3639 = vmatpush1.msra.mxu0 %v13465_v26 }
 0x45d   : > { %v10744_v23 = vpop.f32.mrf.mxu0  ;;  %3354 = vmatprep.subr.mxu1 %v17943_v14  ;;  %3640 = vmatprep.subr.mxu0 %v17943_v14 }
 0x45e   : > { %3355 = vmatpush1.msra.mxu1 %v13463_v21  ;;  %3641 = vmatpush1.msra.mxu0 %v13463_v21 }
 0x45f   : > { %v13487_v48 = vpop.f32.mrf.mxu0  ;;  %3356 = vmatprep.subr.mxu1 %v17943_v14  ;;  %3642 = vmatprep.subr.mxu0 %v17943_v14 }
 0x460   : > { %3357 = vmatpush1.msra.mxu1 %v13461_v34  ;;  %3643 = vmatpush1.msra.mxu0 %v13461_v34 }
 0x461   : > { %v10747_v9 = vpop.f32.mrf.mxu0  ;;  %3358 = vmatprep.subr.mxu1 %v17943_v14  ;;  %3644 = vmatprep.subr.mxu0 %v17943_v14 }
 0x462   : > { %3359 = vmatpush1.msra.mxu1 %v13459_v17  ;;  %3645 = vmatpush1.msra.mxu0 %v13459_v17 }
 0x463   : > { %v13497_v57 = vpop.f32.mrf.mxu0  ;;  %3360 = vmatprep.subr.mxu1 %v17943_v14  ;;  %3646 = vmatprep.subr.mxu0 %v17943_v14 }
 0x464   : > { %3361 = vmatpush1.msra.mxu1 %v13457_v18  ;;  %3647 = vmatpush1.msra.mxu0 %v13457_v18 }
 0x465   : > { %v10750_v41 = vpop.f32.mrf.mxu0  ;;  %3362 = vmatprep.subr.mxu1 %v17943_v14  ;;  %3648 = vmatprep.subr.mxu0 %v17943_v14 }
 0x466   : > { %3363 = vmatpush1.msra.mxu1 %v13455_v40  ;;  %3649 = vmatpush1.msra.mxu0 %v13455_v40 }
 0x467   : > { %v13507_v50 = vpop.f32.mrf.mxu0  ;;  %3364 = vmatprep.subr.mxu1 %v17943_v14  ;;  %3650 = vmatprep.subr.mxu0 %v17943_v14 }
 0x468   : > { %3365 = vmatpush1.msra.mxu1 %v13453_v1  ;;  %3651 = vmatpush1.msra.mxu0 %v13453_v1 }
 0x469   : > { %v10753_v23 = vpop.f32.mrf.mxu0  ;;  %3366 = vmatprep.subr.mxu1 %v17943_v14  ;;  %3652 = vmatprep.subr.mxu0 %v17943_v14 }
 0x46a   : > { %3367 = vmatpush1.msra.mxu1 %v13451_v19  ;;  %3653 = vmatpush1.msra.mxu0 %v13451_v19 }
 0x46b   : > { %v13517_v9 = vpop.f32.mrf.mxu0  ;;  %3368 = vmatprep.subr.mxu1 %v17943_v14  ;;  %3654 = vmatprep.subr.mxu0 %v17943_v14 }
 0x46c   : > { %3369 = vmatpush1.msra.mxu1 %v13449_v35  ;;  %3655 = vmatpush1.msra.mxu0 %v13449_v35 }
 0x46d   : > { %v10756_v41 = vpop.f32.mrf.mxu0  ;;  %3370 = vmatprep.subr.mxu1 %v17943_v14  ;;  %3656 = vmatprep.subr.mxu0 %v17943_v14 }
 0x46e   : > { %3371 = vmatpush1.msra.mxu1 %v13447_v10  ;;  %3657 = vmatpush1.msra.mxu0 %v13447_v10 }
 0x46f   : > { %v13527_v23 = vpop.f32.mrf.mxu0  ;;  %3372 = vmatprep.subr.mxu1 %v17943_v14  ;;  %3658 = vmatprep.subr.mxu0 %v17943_v14 }
 0x470   : > { %3373 = vmatpush1.msra.mxu1 %v13445_v60  ;;  %3659 = vmatpush1.msra.mxu0 %v13445_v60 }
 0x471   : > { %v10759_v47 = vpop.f32.mrf.mxu0  ;;  %3374 = vmatprep.subr.mxu1 %v17943_v14  ;;  %3660 = vmatprep.subr.mxu0 %v17943_v14 }
 0x472   : > { %3375 = vmatpush1.msra.mxu1 %v13443_v16  ;;  %3661 = vmatpush1.msra.mxu0 %v13443_v16 }
 0x473   : > { %v13537_v41 = vpop.f32.mrf.mxu0  ;;  %3376 = vmatprep.subr.mxu1 %v17943_v14  ;;  %3662 = vmatprep.subr.mxu0 %v17943_v14 }
 0x474   : > { %3377 = vmatpush1.msra.mxu1 %v13441_v2  ;;  %3663 = vmatpush1.msra.mxu0 %v13441_v2 }
 0x475   : > { %v10762_v37 = vpop.f32.mrf.mxu0  ;;  %3378 = vmatprep.subr.mxu1 %v17943_v14  ;;  %3664 = vmatprep.subr.mxu0 %v17943_v14 }
 0x476   : > { %3379 = vmatpush1.msra.mxu1 %v13439_v5  ;;  %3665 = vmatpush1.msra.mxu0 %v13439_v5 }
 0x477   : > { %v13547_v47 = vpop.f32.mrf.mxu0  ;;  %3394 = vmatprep.subr.mxu1 %v17943_v14  ;;  %3680 = vmatprep.subr.mxu0 %v17943_v14 }
 0x479   : > { %v10765_v15 = vpop.f32.mrf.mxu0 }
 0x47a   : > { %v9042_v15 = vld [vmem:[%s17895_s3 + $0x380] sm:$0xff] }
 0x47b   : > { %v13551_v6 = vpop.f32.mrf.mxu0 }
 0x47c   : > { %9056 = vmatpush2.msk.msra.mxu1 %vm2115_vm5, %v13551_v6  ;;  %9100 = vmatpush2.msk.msra.mxu0 %vm2115_vm5, %v13551_v6 }
 0x47d   : > { %v10768_v37 = vpop.f32.mrf.mxu0  ;;  %3396 = vmatprep.subr.mxu1 %v17943_v14  ;;  %3682 = vmatprep.subr.mxu0 %v17943_v14 }
 0x47e   : > { %3397 = vmatpush2.msra.mxu1 %v13547_v47  ;;  %3683 = vmatpush2.msra.mxu0 %v13547_v47  ;;  %v9086_v37 = vld [vmem:[%s17895_s3 + $0x460] sm:$0xff] }
 0x47f   : > { %3398 = vmatprep.subr.mxu1 %v17943_v14  ;;  %3684 = vmatprep.subr.mxu0 %v17943_v14 }
 0x480   : > { %3399 = vmatpush2.msra.mxu1 %v13537_v41  ;;  %3685 = vmatpush2.msra.mxu0 %v13537_v41 }
 0x481   : > { %3400 = vmatprep.subr.mxu1 %v17943_v14  ;;  %3686 = vmatprep.subr.mxu0 %v17943_v14 }
 0x482   : > { %3401 = vmatpush2.msra.mxu1 %v13527_v23  ;;  %3687 = vmatpush2.msra.mxu0 %v13527_v23 }
 0x483   : > { %3402 = vmatprep.subr.mxu1 %v17943_v14  ;;  %3688 = vmatprep.subr.mxu0 %v17943_v14 }
 0x484   : > { %3403 = vmatpush2.msra.mxu1 %v13517_v9  ;;  %3689 = vmatpush2.msra.mxu0 %v13517_v9 }
 0x485   : > { %3404 = vmatprep.subr.mxu1 %v17943_v14  ;;  %3690 = vmatprep.subr.mxu0 %v17943_v14 }
 0x486   : > { %3405 = vmatpush2.msra.mxu1 %v13507_v50  ;;  %3691 = vmatpush2.msra.mxu0 %v13507_v50 }
 0x487   : > { %3406 = vmatprep.subr.mxu1 %v17943_v14  ;;  %3692 = vmatprep.subr.mxu0 %v17943_v14 }
 0x488   : > { %3407 = vmatpush2.msra.mxu1 %v13497_v57  ;;  %3693 = vmatpush2.msra.mxu0 %v13497_v57 }
 0x489   : > { %3408 = vmatprep.subr.mxu1 %v17943_v14  ;;  %3694 = vmatprep.subr.mxu0 %v17943_v14 }
 0x48a   : > { %3409 = vmatpush2.msra.mxu1 %v13487_v48  ;;  %3695 = vmatpush2.msra.mxu0 %v13487_v48 }
 0x48b   : > { %3410 = vmatprep.subr.mxu1 %v17943_v14  ;;  %3696 = vmatprep.subr.mxu0 %v17943_v14 }
 0x48c   : > { %3411 = vmatpush2.msra.mxu1 %v13477_v13  ;;  %3697 = vmatpush2.msra.mxu0 %v13477_v13 }
 0x48d   : > { %3413 = vmatmul.mubr.f32.vlgmr.msra.gmra.mxu1 %v9042_v15  ;;  %3491 = vmatprep.subr.mxu1 %v17943_v14  ;;  %v9088_v15 = vld [vmem:[%s17895_s3 + $0x470] sm:$0xff] }
 0x48e   : > { %3699 = vmatmul.mubr.f32.vlgmr.msra.gmra.mxu0 %v9086_v37  ;;  %3492 = vmatpush1.msra.mxu1 %v13469_v31  ;;  %v9047_v37 = vld [vmem:[%s17895_s3 + $0x3a8] sm:$0xff] }
 0x48f   : > { %3493 = vmatprep.subr.mxu1 %v17943_v14  ;;  %9058 = vmatprep.mubr.msk.f32.mxu1 %vm2093_vm4, %v9045_v39  ;;  %v9046_v39 = vld [vmem:[%s17895_s3 + $0x3a0] sm:$0xff] }
 0x490   : > { %3494 = vmatpush1.msra.mxu1 %v13467_v51  ;;  %9102 = vmatprep.mubr.msk.f32.mxu0 %vm2093_vm4, %v9089_v8  ;;  %v9049_v8 = vld [vmem:[%s17895_s3 + $0x3b8] sm:$0xff] }
 0x491   : > { %3418 = vmatmul.mubr.f32.gmra.mxu1 %v9044_v52  ;;  %3495 = vmatprep.subr.mxu1 %v17943_v14  ;;  %v9090_v52 = vld [vmem:[%s17895_s3 + $0x480] sm:$0xff] }
 0x492   : > { %3704 = vmatmul.mubr.f32.gmra.mxu0 %v9088_v15  ;;  %3496 = vmatpush1.msra.mxu1 %v13465_v26  ;;  %v9093_v15 = vld [vmem:[%s17895_s3 + $0x498] sm:$0xff] }
 0x493   : > { %3497 = vmatprep.subr.mxu1 %v17943_v14  ;;  %9059 = vmatprep.mubr.msk.f32.mxu1 %vm2093_vm4, %v9047_v37  ;;  %v9048_v37 = vld [vmem:[%s17895_s3 + $0x3b0] sm:$0xff] }
 0x494   : > { %3498 = vmatpush1.msra.mxu1 %v13463_v21  ;;  %9103 = vmatprep.mubr.msk.f32.mxu0 %vm2093_vm4, %v9091_v46  ;;  %v9092_v46 = vld [vmem:[%s17895_s3 + $0x490] sm:$0xff] }
 0x495   : > { %3423 = vmatmul.mubr.f32.gmra.mxu1 %v9046_v39  ;;  %3499 = vmatprep.subr.mxu1 %v17943_v14  ;;  %v9051_v39 = vld [vmem:[%s17895_s3 + $0x3c8] sm:$0xff] }
 0x496   : > { %3709 = vmatmul.mubr.f32.gmra.mxu0 %v9090_v52  ;;  %3500 = vmatpush1.msra.mxu1 %v13461_v34  ;;  %v9095_v52 = vld [vmem:[%s17895_s3 + $0x4a8] sm:$0xff] }
 0x497   : > { %3501 = vmatprep.subr.mxu1 %v17943_v14  ;;  %9060 = vmatprep.mubr.msk.f32.mxu1 %vm2093_vm4, %v9049_v8  ;;  %v9050_v8 = vld [vmem:[%s17895_s3 + $0x3c0] sm:$0xff] }
 0x498   : > { %3502 = vmatpush1.msra.mxu1 %v13459_v17  ;;  %9104 = vmatprep.mubr.msk.f32.mxu0 %vm2093_vm4, %v9093_v15  ;;  %v9094_v15 = vld [vmem:[%s17895_s3 + $0x4a0] sm:$0xff] }
 0x499   : > { %3428 = vmatmul.mubr.f32.gmra.mxu1 %v9048_v37  ;;  %3503 = vmatprep.subr.mxu1 %v17943_v14  ;;  %v9053_v37 = vld [vmem:[%s17895_s3 + $0x3d8] sm:$0xff] }
 0x49a   : > { %3714 = vmatmul.mubr.f32.gmra.mxu0 %v9092_v46  ;;  %3504 = vmatpush1.msra.mxu1 %v13457_v18  ;;  %v9097_v46 = vld [vmem:[%s17895_s3 + $0x4b8] sm:$0xff] }
 0x49b   : > { %3505 = vmatprep.subr.mxu1 %v17943_v14  ;;  %9061 = vmatprep.mubr.msk.f32.mxu1 %vm2093_vm4, %v9051_v39  ;;  %v9052_v39 = vld [vmem:[%s17895_s3 + $0x3d0] sm:$0xff] }
 0x49c   : > { %3506 = vmatpush1.msra.mxu1 %v13455_v40  ;;  %9105 = vmatprep.mubr.msk.f32.mxu0 %vm2093_vm4, %v9095_v52  ;;  %v9096_v52 = vld [vmem:[%s17895_s3 + $0x4b0] sm:$0xff] }
 0x49d   : > { %3433 = vmatmul.mubr.f32.gmra.mxu1 %v9050_v8  ;;  %3507 = vmatprep.subr.mxu1 %v17943_v14  ;;  %v9133_v8 = vld [vmem:[%s17896_s4 + $0x78] sm:$0xff] }
 0x49e   : > { %3719 = vmatmul.mubr.f32.gmra.mxu0 %v9094_v15  ;;  %3508 = vmatpush1.msra.mxu1 %v13453_v1  ;;  %v9055_v15 = vld [vmem:[%s17895_s3 + $0x3e8] sm:$0x1] }
 0x49f   : > { %3509 = vmatprep.subr.mxu1 %v17943_v14  ;;  %9062 = vmatprep.mubr.msk.f32.mxu1 %vm2093_vm4, %v9053_v37  ;;  %v9099_v37 = vld [vmem:[%s17895_s3 + $0x4c8] sm:$0x1] }
 0x4a0   : > { %3510 = vmatpush1.msra.mxu1 %v13451_v19  ;;  %9106 = vmatprep.mubr.msk.f32.mxu0 %vm2093_vm4, %v9097_v46  ;;  %v9132_v46 = vld [vmem:[%s17896_s4 + $0x70] sm:$0xff] }
 0x4a1   : > { %3438 = vmatmul.mubr.f32.gmra.mxu1 %v9052_v39  ;;  %3511 = vmatprep.subr.mxu1 %v17943_v14  ;;  %v9054_v39 = vld [vmem:[%s17895_s3 + $0x3e0] sm:$0x1] }
 0x4a2   : > { %3724 = vmatmul.mubr.f32.gmra.mxu0 %v9096_v52  ;;  %10769 = vmatprep.subr.mxu0 %v17943_v14  ;;  %v9098_v52 = vld [vmem:[%s17895_s3 + $0x4c0] sm:$0x1] }
 0x4a3   : > { %3512 = vmatpush1.msra.mxu1 %v13449_v35  ;;  %10770 = vmatpush3.msra.mxu0 %v9133_v8  ;;  %v9131_v8 = vld [vmem:[%s17896_s4 + $0x68] sm:$0xff] }
 0x4a4   : > { %3513 = vmatprep.subr.mxu1 %v17943_v14  ;;  %10771 = vmatprep.subr.mxu0 %v17943_v14 }
 0x4a5   : > { %9063 = vmatprep.mubr.msk.f32.mxu1 %vm2093_vm4, %v9055_v15  ;;  %3514 = vmatpush1.msra.mxu1 %v13447_v10  ;;  %v9130_v15 = vld [vmem:[%s17896_s4 + $0x60] sm:$0xff] }
 0x4a6   : > { %9107 = vmatprep.mubr.msk.f32.mxu0 %vm2093_vm4, %v9099_v37  ;;  %10772 = vmatpush3.msra.mxu0 %v9132_v46  ;;  %v9065_v37 = vld [vmem:[%s17895_s3 + $0x3f8] sm:$0xff]  ;;  %v9064_v46 = vld [vmem:[%s17895_s3 + $0x3f0] sm:$0xff] }
 0x4a7   : > { %3443 = vmatmul.mubr.f32.gmra.mxu1 %v9054_v39  ;;  %3515 = vmatprep.subr.mxu1 %v17943_v14  ;;  %v9067_v39 = vld [vmem:[%s17895_s3 + $0x408] sm:$0xff] }
 0x4a8   : > { %3729 = vmatmul.mubr.f32.gmra.mxu0 %v9098_v52  ;;  %10773 = vmatprep.subr.mxu0 %v17943_v14  ;;  %v9066_v52 = vld [vmem:[%s17895_s3 + $0x400] sm:$0xff] }
 0x4a9   : > { %3516 = vmatpush1.msra.mxu1 %v13445_v60  ;;  %10774 = vmatpush3.msra.mxu0 %v9131_v8  ;;  %v9068_v8 = vld [vmem:[%s17895_s3 + $0x410] sm:$0xff] }
 0x4aa   : > { %3517 = vmatprep.subr.mxu1 %v17943_v14  ;;  %10775 = vmatprep.subr.mxu0 %v17943_v14 }
 0x4ab   : > { %3518 = vmatpush1.msra.mxu1 %v13443_v16  ;;  %10776 = vmatpush3.msra.mxu0 %v9130_v15 }
 0x4ac   : > { %10777 = vmatprep.mubr.msk.f32.mxu0 %vm11292_vm1, %v17943_v14  ;;  %3519 = vmatprep.subr.mxu1 %v17943_v14 }
 0x4ad   : > { %10778 = vmatmul.mubr.msk.f32.vlgmr.msra.gmra.mxu0 %vm1558_vm3, %v11974_v0  ;;  %3520 = vmatpush1.msra.mxu1 %v13441_v2 }
 0x4ae   : > { %3521 = vmatprep.subr.mxu1 %v17943_v14  ;;  %10780 = vmatprep.mubr.msk.f32.mxu0 %vm11292_vm1, %v17943_v14 }
 0x4af   : > { %3522 = vmatpush1.msra.mxu1 %v13439_v5  ;;  %9079 = vmatprep.mubr.msk.f32.mxu1 %vm2093_vm4, %v9065_v37 }
 0x4b0   : > { %3537 = vmatprep.subr.mxu1 %v17943_v14  ;;  %4404 = vmatprep.subr.mxu0 %v17943_v14 }
 0x4b1   : > { %10781 = vmatmul.mubr.msk.f32.gmra.mxu0 %vm1558_vm3, %v11990_v44  ;;  %9078 = vmatpush2.msk.msra.mxu1 %vm2115_vm5, %v13551_v6 }
 0x4b2   : > { %3539 = vmatprep.subr.mxu1 %v17943_v14  ;;  %10783 = vmatprep.mubr.msk.f32.mxu0 %vm11292_vm1, %v17943_v14 }
 0x4b3   : > { %3540 = vmatpush2.msra.mxu1 %v13547_v47 }
 0x4b4   : > { %3541 = vmatprep.subr.mxu1 %v17943_v14 }
 0x4b5   : > { %10784 = vmatmul.mubr.msk.f32.gmra.mxu0 %vm1558_vm3, %v12006_v43  ;;  %3542 = vmatpush2.msra.mxu1 %v13537_v41 }
 0x4b6   : > { %3543 = vmatprep.subr.mxu1 %v17943_v14  ;;  %10786 = vmatprep.mubr.msk.f32.mxu0 %vm11292_vm1, %v17943_v14 }
 0x4b7   : > { %3544 = vmatpush2.msra.mxu1 %v13527_v23 }
 0x4b8   : > { %3545 = vmatprep.subr.mxu1 %v17943_v14 }
 0x4b9   : > { %10787 = vmatmul.mubr.msk.f32.gmra.mxu0 %vm1558_vm3, %v12022_v7  ;;  %3546 = vmatpush2.msra.mxu1 %v13517_v9 }
 0x4ba   : > { %3547 = vmatprep.subr.mxu1 %v17943_v14  ;;  %10789 = vmatprep.mubr.msk.f32.mxu0 %vm11292_vm1, %v17943_v14 }
 0x4bb   : > { %3548 = vmatpush2.msra.mxu1 %v13507_v50 }
 0x4bc   : > { %3549 = vmatprep.subr.mxu1 %v17943_v14 }
 0x4bd   : > { %10790 = vmatmul.mubr.msk.f32.gmra.mxu0 %vm1558_vm3, %v12039_v59  ;;  %3550 = vmatpush2.msra.mxu1 %v13497_v57 }
 0x4be   : > { %3551 = vmatprep.subr.mxu1 %v17943_v14  ;;  %10792 = vmatprep.mubr.msk.f32.mxu0 %vm11292_vm1, %v17943_v14 }
 0x4bf   : > { %3552 = vmatpush2.msra.mxu1 %v13487_v48 }
 0x4c0   : > { %3553 = vmatprep.subr.mxu1 %v17943_v14 }
 0x4c1   : > { %10793 = vmatmul.mubr.msk.f32.gmra.mxu0 %vm1558_vm3, %v12056_v24  ;;  %3554 = vmatpush2.msra.mxu1 %v13477_v13 }
 0x4c2   : > { %3556 = vmatmul.mubr.f32.vlgmr.msra.gmra.mxu1 %v9064_v46  ;;  %3777 = vmatprep.subr.mxu1 %v17943_v14 }
 0x4c3   : > { %3778 = vmatpush1.msra.mxu1 %v13469_v31  ;;  %10795 = vmatprep.mubr.msk.f32.mxu0 %vm11292_vm1, %v17943_v14  ;;  %v9069_v31 = vld [vmem:[%s17895_s3 + $0x418] sm:$0xff] }
 0x4c4   : > { %3779 = vmatprep.subr.mxu1 %v17943_v14  ;;  %9080 = vmatprep.mubr.msk.f32.mxu1 %vm2093_vm4, %v9067_v39 }
 0x4c5   : > { %10796 = vmatmul.mubr.msk.f32.gmra.mxu0 %vm1558_vm3, %v12073_v53  ;;  %3780 = vmatpush1.msra.mxu1 %v13467_v51  ;;  %v9071_v51 = vld [vmem:[%s17895_s3 + $0x428] sm:$0xff] }
 0x4c6   : > { %3561 = vmatmul.mubr.f32.gmra.mxu1 %v9066_v52  ;;  %3781 = vmatprep.subr.mxu1 %v17943_v14 }
 0x4c7   : > { %3782 = vmatpush1.msra.mxu1 %v13465_v26  ;;  %10798 = vmatprep.mubr.msk.f32.mxu0 %vm11292_vm1, %v17943_v14  ;;  %v9070_v26 = vld [vmem:[%s17895_s3 + $0x420] sm:$0xff] }
 0x4c8   : > { %3783 = vmatprep.subr.mxu1 %v17943_v14  ;;  %9081 = vmatprep.mubr.msk.f32.mxu1 %vm2093_vm4, %v9069_v31 }
 0x4c9   : > { %10799 = vmatmul.mubr.msk.f32.gmra.mxu0 %vm1558_vm3, %v12090_v27  ;;  %3784 = vmatpush1.msra.mxu1 %v13463_v21  ;;  %v9073_v21 = vld [vmem:[%s17895_s3 + $0x438] sm:$0xff] }
 0x4ca   : > { %3566 = vmatmul.mubr.f32.gmra.mxu1 %v9068_v8  ;;  %3785 = vmatprep.subr.mxu1 %v17943_v14 }
 0x4cb   : > { %3786 = vmatpush1.msra.mxu1 %v13461_v34  ;;  %10801 = vmatprep.mubr.msk.f32.mxu0 %vm11292_vm1, %v17943_v14  ;;  %v9072_v34 = vld [vmem:[%s17895_s3 + $0x430] sm:$0xff] }
 0x4cc   : > { %3787 = vmatprep.subr.mxu1 %v17943_v14  ;;  %9082 = vmatprep.mubr.msk.f32.mxu1 %vm2093_vm4, %v9071_v51 }
 0x4cd   : > { %10802 = vmatmul.mubr.msk.f32.gmra.mxu0 %vm1558_vm3, %v12107_v11  ;;  %3788 = vmatpush1.msra.mxu1 %v13459_v17  ;;  %v9074_v17 = vld [vmem:[%s17895_s3 + $0x440] sm:$0xff] }
 0x4ce   : > { %3571 = vmatmul.mubr.f32.gmra.mxu1 %v9070_v26  ;;  %3789 = vmatprep.subr.mxu1 %v17943_v14 }
 0x4cf   : > { %3790 = vmatpush1.msra.mxu1 %v13457_v18  ;;  %10804 = vmatprep.mubr.msk.f32.mxu0 %vm11292_vm1, %v17943_v14  ;;  %v9075_v18 = vld [vmem:[%s17895_s3 + $0x448] sm:$0xff] }
 0x4d0   : > { %3791 = vmatprep.subr.mxu1 %v17943_v14  ;;  %9083 = vmatprep.mubr.msk.f32.mxu1 %vm2093_vm4, %v9073_v21 }
 0x4d1   : > { %10805 = vmatmul.mubr.msk.f32.gmra.mxu0 %vm1558_vm3, %v17988_v63  ;;  %3792 = vmatpush1.msra.mxu1 %v13455_v40  ;;  %v9077_v40 = vld [vmem:[%s17895_s3 + $0x458] sm:$0x1] }
 0x4d2   : > { %3576 = vmatmul.mubr.f32.gmra.mxu1 %v9072_v34  ;;  %3793 = vmatprep.subr.mxu1 %v17943_v14 }
 0x4d3   : > { %3794 = vmatpush1.msra.mxu1 %v13453_v1  ;;  %10807 = vmatprep.mubr.msk.f32.mxu0 %vm11292_vm1, %v17943_v14  ;;  %v9076_v1 = vld [vmem:[%s17895_s3 + $0x450] sm:$0x1] }
 0x4d4   : > { %3795 = vmatprep.subr.mxu1 %v17943_v14  ;;  %9084 = vmatprep.mubr.msk.f32.mxu1 %vm2093_vm4, %v9075_v18 }
 0x4d5   : > { %10808 = vmatmul.mubr.msk.f32.gmra.mxu0 %vm1558_vm3, %v17990_v38  ;;  %3796 = vmatpush1.msra.mxu1 %v13451_v19  ;;  %v9114_v19 = vld [vmem:[%s17895_s3 + $0x500] sm:$0xff] }
 0x4d6   : > { %3581 = vmatmul.mubr.f32.gmra.mxu1 %v9074_v17  ;;  %3797 = vmatprep.subr.mxu1 %v17943_v14 }
 0x4d7   : > { %3798 = vmatpush1.msra.mxu1 %v13449_v35  ;;  %10810 = vmatprep.mubr.msk.f32.mxu0 %vm11292_vm1, %v17943_v14  ;;  %v9109_v35 = vld [vmem:[%s17895_s3 + $0x4d8] sm:$0xff] }
 0x4d8   : > { %3799 = vmatprep.subr.mxu1 %v17943_v14  ;;  %9085 = vmatprep.mubr.msk.f32.mxu1 %vm2093_vm4, %v9077_v40 }
 0x4d9   : > { %10811 = vmatmul.mubr.msk.f32.gmra.mxu0 %vm1558_vm3, %v17991_v58  ;;  %3800 = vmatpush1.msra.mxu1 %v13447_v10  ;;  %v9115_v10 = vld [vmem:[%s17895_s3 + $0x508] sm:$0xff] }
 0x4da   : > { %3586 = vmatmul.mubr.f32.gmra.mxu1 %v9076_v1  ;;  %3801 = vmatprep.subr.mxu1 %v17943_v14 }
 0x4db   : > { %3802 = vmatpush1.msra.mxu1 %v13445_v60  ;;  %10813 = vmatprep.mubr.msk.f32.mxu0 %vm11292_vm1, %v17943_v14  ;;  %v9112_v60 = vld [vmem:[%s17895_s3 + $0x4f0] sm:$0xff] }
 0x4dc   : > { %3803 = vmatprep.subr.mxu1 %v17943_v14  ;;  %9123 = vmatprep.mubr.msk.f32.mxu1 %vm2093_vm4, %v9109_v35 }
 0x4dd   : > { %10814 = vmatmul.mubr.msk.f32.gmra.mxu0 %vm1558_vm3, %v17992_v30  ;;  %3804 = vmatpush1.msra.mxu1 %v13443_v16  ;;  %v9113_v16 = vld [vmem:[%s17895_s3 + $0x4f8] sm:$0xff] }
 0x4de   : > { %3805 = vmatprep.subr.mxu1 %v17943_v14  ;;  %10816 = vmatprep.mubr.msk.f32.mxu0 %vm11292_vm1, %v17943_v14 }
 0x4df   : > { %3806 = vmatpush1.msra.mxu1 %v13441_v2  ;;  %v9108_v2 = vld [vmem:[%s17895_s3 + $0x4d0] sm:$0xff] }
 0x4e0   : > { %3807 = vmatprep.subr.mxu1 %v17943_v14 }
 0x4e1   : > { %10817 = vmatmul.mubr.msk.f32.gmra.mxu0 %vm1558_vm3, %v17993_v61  ;;  %3808 = vmatpush1.msra.mxu1 %v13439_v5  ;;  %v9110_v5 = vld [vmem:[%s17895_s3 + $0x4e0] sm:$0xff] }
 0x4e2   : > { %3823 = vmatprep.subr.mxu1 %v17943_v14  ;;  %10819 = vmatprep.mubr.msk.f32.mxu0 %vm11292_vm1, %v17943_v14 }
 0x4e3   : > { %9122 = vmatpush2.msk.msra.mxu1 %vm2115_vm5, %v13551_v6  ;;  %v9111_v6 = vld [vmem:[%s17895_s3 + $0x4e8] sm:$0xff] }
 0x4e4   : > { %3825 = vmatprep.subr.mxu1 %v17943_v14 }
 0x4e5   : > { %10820 = vmatmul.mubr.msk.f32.gmra.mxu0 %vm1558_vm3, %v17994_v22  ;;  %3826 = vmatpush2.msra.mxu1 %v13547_v47 }
 0x4e6   : > { %3827 = vmatprep.subr.mxu1 %v17943_v14  ;;  %10822 = vmatprep.mubr.msk.f32.mxu0 %vm11292_vm1, %v17943_v14 }
 0x4e7   : > { %3828 = vmatpush2.msra.mxu1 %v13537_v41 }
 0x4e8   : > { %3829 = vmatprep.subr.mxu1 %v17943_v14 }
 0x4e9   : > { %10823 = vmatmul.mubr.msk.f32.gmra.mxu0 %vm1558_vm3, %v17995_v49  ;;  %3830 = vmatpush2.msra.mxu1 %v13527_v23  ;;  %v9120_v23 = vld [vmem:[%s17895_s3 + $0x530] sm:$0x1] }
 0x4ea   : > { %3831 = vmatprep.subr.mxu1 %v17943_v14  ;;  %10825 = vmatprep.mubr.msk.f32.mxu0 %vm11292_vm1, %v17943_v14 }
 0x4eb   : > { %3832 = vmatpush2.msra.mxu1 %v13517_v9  ;;  %v9121_v9 = vld [vmem:[%s17895_s3 + $0x538] sm:$0x1] }
 0x4ec   : > { %3833 = vmatprep.subr.mxu1 %v17943_v14 }
 0x4ed   : > { %10826 = vmatmul.mubr.msk.f32.gmra.mxu0 %vm1558_vm3, %v17996_v45  ;;  %3834 = vmatpush2.msra.mxu1 %v13507_v50  ;;  %v9118_v50 = vld [vmem:[%s17895_s3 + $0x520] sm:$0xff] }
 0x4ee   : > { %3835 = vmatprep.subr.mxu1 %v17943_v14  ;;  %10828 = vmatprep.mubr.msk.f32.mxu0 %vm11292_vm1, %v17943_v14 }
 0x4ef   : > { %3836 = vmatpush2.msra.mxu1 %v13497_v57  ;;  %v9119_v57 = vld [vmem:[%s17895_s3 + $0x528] sm:$0xff] }
 0x4f0   : > { %3837 = vmatprep.subr.mxu1 %v17943_v14 }
 0x4f1   : > { %10829 = vmatmul.mubr.msk.f32.gmra.mxu0 %vm1558_vm3, %v17998_v55  ;;  %3838 = vmatpush2.msra.mxu1 %v13487_v48  ;;  %v9116_v48 = vld [vmem:[%s17895_s3 + $0x510] sm:$0xff] }
 0x4f2   : > { %3839 = vmatprep.subr.mxu1 %v17943_v14  ;;  %10831 = vmatprep.mubr.msk.f32.mxu0 %vm11292_vm1, %v17943_v14 }
 0x4f3   : > { %3840 = vmatpush2.msra.mxu1 %v13477_v13  ;;  %v9117_v13 = vld [vmem:[%s17895_s3 + $0x518] sm:$0xff] }
 0x4f4   : > { %3842 = vmatmul.mubr.f32.vlgmr.msra.gmra.mxu1 %v9108_v2  ;;  %4118 = vmatprep.subr.mxu1 %v17943_v14  ;;  %v18024_v2 = vld [vmem:[#allocation16_spill] sm:$0xff] }
 0x4f5   : > { %10832 = vmatmul.mubr.msk.f32.gmra.mxu0 %vm1558_vm3, %v17999_v42  ;;  %9124 = vmatprep.mubr.msk.f32.mxu1 %vm2093_vm4, %v9111_v6 }
 0x4f6   : > { %10834 = vmatprep.mubr.msk.f32.mxu0 %vm11292_vm1, %v17943_v14 }
 0x4f8   : > { %3847 = vmatmul.mubr.f32.gmra.mxu1 %v9110_v5 }
 0x4f9   : > { %10835 = vmatmul.mubr.msk.f32.gmra.mxu0 %vm1558_vm3, %v18001_v25  ;;  %9125 = vmatprep.mubr.msk.f32.mxu1 %vm2093_vm4, %v9113_v16 }
 0x4fa   : > { %10837 = vmatprep.mubr.msk.f32.mxu0 %vm11292_vm1, %v17943_v14 }
 0x4fc   : > { %3852 = vmatmul.mubr.f32.gmra.mxu1 %v9112_v60  ;;  %v18026_v60 = vld [vmem:[#allocation5_spill] sm:$0xff] }
 0x4fd   : > { %10838 = vmatmul.mubr.msk.f32.gmra.mxu0 %vm1558_vm3, %v18003_v20  ;;  %9126 = vmatprep.mubr.msk.f32.mxu1 %vm2093_vm4, %v9115_v10 }
 0x4fe   : > { %10840 = vmatprep.mubr.msk.f32.mxu0 %vm11292_vm1, %v17943_v14 }
 0x500   : > { %3857 = vmatmul.mubr.f32.gmra.mxu1 %v9114_v19  ;;  %v18028_v19 = vld [vmem:[#allocation17_spill] sm:$0xff] }
 0x501   : > { %10841 = vmatmul.mubr.msk.f32.gmra.mxu0 %vm1558_vm3, %v18004_v28  ;;  %9127 = vmatprep.mubr.msk.f32.mxu1 %vm2093_vm4, %v9117_v13 }
 0x502   : > { %10843 = vmatprep.mubr.msk.f32.mxu0 %vm11292_vm1, %v17943_v14 }
 0x504   : > { %3862 = vmatmul.mubr.f32.gmra.mxu1 %v9116_v48 }
 0x505   : > { %10844 = vmatmul.mubr.msk.f32.gmra.mxu0 %vm1558_vm3, %v18006_v62  ;;  %9128 = vmatprep.mubr.msk.f32.mxu1 %vm2093_vm4, %v9119_v57 }
 0x506   : > { %10846 = vmatprep.mubr.msk.f32.mxu0 %vm11292_vm1, %v17943_v14 }
 0x508   : > { %3867 = vmatmul.mubr.f32.gmra.mxu1 %v9118_v50 }
 0x509   : > { %10847 = vmatmul.mubr.msk.f32.gmra.mxu0 %vm1558_vm3, %v18008_v4  ;;  %9129 = vmatprep.mubr.msk.f32.mxu1 %vm2093_vm4, %v9121_v9  ;;  %v18030_v9 = vld [vmem:[#allocation19_spill] sm:$0xff] }
 0x50a   : > { %10849 = vmatprep.mubr.msk.f32.mxu0 %vm11292_vm1, %v17943_v14 }
 0x50c   : > { %3872 = vmatmul.mubr.f32.gmra.mxu1 %v9120_v23 }
 0x50d   : > { %10850 = vmatmul.mubr.msk.f32.gmra.mxu0 %vm1558_vm3, %v18009_v12 }
 0x54d   : > { %v3414_v41 = vpop.f32.mrf.mxu1 }
 0x54e   : > { %v13998_v47 = vadd.f32 %v3414_v41, %v13197_v29  ;;  %v3700_v15 = vpop.f32.mrf.mxu0 }
 0x54f   : > { %v14001_v37 = vadd.f32 %v3700_v15, %v13403_v36  ;;  %v3416_v46 = vpop.f32.mrf.mxu1  ;;  %v18032_v15 = vld [vmem:[#allocation18_spill] sm:$0xff] }
 0x550   : > { %v3702_v39 = vpop.f32.mrf.mxu0 }
 0x551   : > { %v3419_v52 = vpop.f32.mrf.mxu1 }
 0x552   : > { %v14004_v31 = vadd.f32 %v3419_v52, %v13283_v54  ;;  %v3705_v8 = vpop.f32.mrf.mxu0 }
 0x553   : > { %v14007_v51 = vadd.f32 %v3705_v8, %v13405_v3  ;;  %v3421_v26 = vpop.f32.mrf.mxu1 }
 0x554   : > { %v3707_v21 = vpop.f32.mrf.mxu0  ;;  %v18034_v26 = vld [vmem:[#allocation20_spill] sm:$0xff] }
 0x555   : > { %v3424_v34 = vpop.f32.mrf.mxu1 }
 0x556   : > { %v14010_v29 = vadd.f32 %v3424_v34, %v13291_v56  ;;  %v3710_v18 = vpop.f32.mrf.mxu0  ;;  %v9160_v56 = vld [vmem:[%s17895_s3 + $0x548] sm:$0xff] }
 0x557   : > { %v14013_v36 = vadd.f32 %v3710_v18, %v13407_v32  ;;  %v3426_v17 = vpop.f32.mrf.mxu1  ;;  %v9204_v32 = vld [vmem:[%s17895_s3 + $0x628] sm:$0xff]  ;;  %9174 = vmatprep.mubr.msk.f32.mxu1 %vm2093_vm4, %v9160_v56  ;;  %v18036_v18 = vld [vmem:[#allocation2_spill] sm:$0xff] }
 0x558   : > { %v3712_v40 = vpop.f32.mrf.mxu0  ;;  %9218 = vmatprep.mubr.msk.f32.mxu0 %vm2093_vm4, %v9204_v32 }
 0x559   : > { %18022 = vst [vmem:[#allocation23_spill] sm:$0xff] %v14013_v36  ;;  %v3429_v1 = vpop.f32.mrf.mxu1 }
 0x55a   : > { %v14016_v54 = vadd.f32 %v3429_v1, %v13299_v33  ;;  %v3715_v35 = vpop.f32.mrf.mxu0 }
 0x55b   : > { %v14019_v3 = vadd.f32 %v3715_v35, %v18024_v2  ;;  %v3431_v6 = vpop.f32.mrf.mxu1 }
 0x55c   : > { %18023 = vst [vmem:[#allocation24_spill] sm:$0xff] %v14016_v54  ;;  %v3717_v5 = vpop.f32.mrf.mxu0 }
 0x55d   : > { %18025 = vst [vmem:[#allocation16_spill] sm:$0xff] %v14019_v3  ;;  %v3434_v16 = vpop.f32.mrf.mxu1  ;;  %v18063_v3 = vld [vmem:[#allocation22_spill] sm:$0xff] }
 0x55e   : > { %v14028_v10 = vadd.f32 %v3434_v16, %v18026_v60  ;;  %v3720_v33 = vpop.f32.mrf.mxu0 }
 0x55f   : > { %v14033_v13 = vadd.f32 %v3720_v33, %v18028_v19  ;;  %v3436_v48 = vpop.f32.mrf.mxu1 }
 0x560   : > { %18027 = vst [vmem:[#allocation5_spill] sm:$0xff] %v14028_v10  ;;  %v3722_v57 = vpop.f32.mrf.mxu0 }
 0x561   : > { %18029 = vst [vmem:[#allocation17_spill] sm:$0xff] %v14033_v13  ;;  %v3439_v50 = vpop.f32.mrf.mxu1 }
 0x562   : > { %v14036_v23 = vadd.f32 %v3439_v50, %v18030_v9  ;;  %v3725_v41 = vpop.f32.mrf.mxu0  ;;  %v18038_v50 = vld [vmem:[#allocation9_spill] sm:$0xff] }
 0x563   : > { %v14039_v46 = vadd.f32 %v3725_v41, %v18032_v15  ;;  %v3441_v39 = vpop.f32.mrf.mxu1 }
 0x564   : > { %18031 = vst [vmem:[#allocation19_spill] sm:$0xff] %v14036_v23  ;;  %v3727_v52 = vpop.f32.mrf.mxu0 }
 0x565   : > { %18033 = vst [vmem:[#allocation18_spill] sm:$0xff] %v14039_v46 }
 0x567   : > { %v3444_v8 = vpop.f32.mrf.mxu1 }
 0x568   : > { %v14042_v21 = vadd.f32 %v3444_v8, %v18034_v26  ;;  %v3730_v34 = vpop.f32.mrf.mxu0  ;;  %v18040_v8 = vld [vmem:[#allocation10_spill] sm:$0xff] }
 0x569   : > { %v14045_v17 = vadd.f32 %v3730_v34, %v18036_v18  ;;  %v3446_v40 = vpop.f32.mrf.mxu1 }
 0x56a   : > { %18035 = vst [vmem:[#allocation20_spill] sm:$0xff] %v14042_v21  ;;  %v3732_v1 = vpop.f32.mrf.mxu0 }
 0x56b   : > { %18037 = vst [vmem:[#allocation2_spill] sm:$0xff] %v14045_v17 }
 0x56d   : > { %v14047_v35 = vpop.f32.mrf.mxu0 }
 0x56f   : > { %v10779_v2 = vpop.f32.mrf.mxu0 }
 0x570   : > { %v18042_v2 = vld [vmem:[#allocation11_spill] sm:$0xff] }
 0x571   : > { %v14049_v6 = vpop.f32.mrf.mxu0 }
 0x573   : > { %v10782_v5 = vpop.f32.mrf.mxu0 }
 0x575   : > { %v14051_v16 = vpop.f32.mrf.mxu0 }
 0x577   : > { %v10785_v56 = vpop.f32.mrf.mxu0 }
 0x579   : > { %v14053_v32 = vpop.f32.mrf.mxu0 }
 0x57b   : > { %v10788_v60 = vpop.f32.mrf.mxu0 }
 0x57d   : > { %v14055_v33 = vpop.f32.mrf.mxu0 }
 0x57f   : > { %v10791_v19 = vpop.f32.mrf.mxu0 }
 0x581   : > { %v14057_v48 = vpop.f32.mrf.mxu0 }
 0x582   : > { %v3557_v57 = vpop.f32.mrf.mxu1 }
 0x583   : > { %v14060_v9 = vadd.f32 %v3557_v57, %v18038_v50  ;;  %v10794_v41 = vpop.f32.mrf.mxu0  ;;  %v18044_v50 = vld [vmem:[#allocation12_spill] sm:$0xff] }
 0x584   : > { %v3559_v15 = vpop.f32.mrf.mxu1 }
 0x585   : > { %18039 = vst [vmem:[#allocation9_spill] sm:$0xff] %v14060_v9  ;;  %v14062_v39 = vpop.f32.mrf.mxu0 }
 0x586   : > { %v3562_v52 = vpop.f32.mrf.mxu1 }
 0x587   : > { %v14065_v26 = vadd.f32 %v3562_v52, %v18040_v8  ;;  %v10797_v34 = vpop.f32.mrf.mxu0 }
 0x588   : > { %v3564_v18 = vpop.f32.mrf.mxu1  ;;  %v18046_v34 = vld [vmem:[#allocation13_spill] sm:$0xff] }
 0x589   : > { %18041 = vst [vmem:[#allocation10_spill] sm:$0xff] %v14065_v26  ;;  %v14067_v40 = vpop.f32.mrf.mxu0 }
 0x58a   : > { %v3567_v1 = vpop.f32.mrf.mxu1 }
 0x58b   : > { %v14070_v5 = vadd.f32 %v3567_v1, %v18042_v2  ;;  %v10800_v56 = vpop.f32.mrf.mxu0 }
 0x58c   : > { %v3569_v60 = vpop.f32.mrf.mxu1  ;;  %v18048_v56 = vld [vmem:[#allocation14_spill] sm:$0xff] }
 0x58d   : > { %18043 = vst [vmem:[#allocation11_spill] sm:$0xff] %v14070_v5  ;;  %v14072_v19 = vpop.f32.mrf.mxu0 }
 0x58e   : > { %v3572_v57 = vpop.f32.mrf.mxu1 }
 0x58f   : > { %v14075_v41 = vadd.f32 %v3572_v57, %v18044_v50  ;;  %v10803_v15 = vpop.f32.mrf.mxu0 }
 0x590   : > { %v3574_v9 = vpop.f32.mrf.mxu1 }
 0x591   : > { %18045 = vst [vmem:[#allocation12_spill] sm:$0xff] %v14075_v41  ;;  %v14077_v52 = vpop.f32.mrf.mxu0  ;;  %v18050_v9 = vld [vmem:[#allocation15_spill] sm:$0xff] }
 0x592   : > { %v3577_v8 = vpop.f32.mrf.mxu1 }
 0x593   : > { %v14080_v18 = vadd.f32 %v3577_v8, %v18046_v34  ;;  %v10806_v26 = vpop.f32.mrf.mxu0 }
 0x594   : > { %v3579_v17 = vpop.f32.mrf.mxu1 }
 0x595   : > { %18047 = vst [vmem:[#allocation13_spill] sm:$0xff] %v14080_v18  ;;  %v14082_v1 = vpop.f32.mrf.mxu0 }
 0x596   : > { %v3582_v2 = vpop.f32.mrf.mxu1 }
 0x597   : > { %v14085_v60 = vadd.f32 %v3582_v2, %v18048_v56  ;;  %v10809_v5 = vpop.f32.mrf.mxu0 }
 0x598   : > { %v3584_v21 = vpop.f32.mrf.mxu1 }
 0x599   : > { %18049 = vst [vmem:[#allocation14_spill] sm:$0xff] %v14085_v60  ;;  %v14087_v57 = vpop.f32.mrf.mxu0 }
 0x59a   : > { %v3587_v50 = vpop.f32.mrf.mxu1 }
 0x59b   : > { %v14090_v15 = vadd.f32 %v3587_v50, %v18050_v9  ;;  %v10812_v41 = vpop.f32.mrf.mxu0 }
 0x59c   : > { %v3589_v46 = vpop.f32.mrf.mxu1 }
 0x59d   : > { %18051 = vst [vmem:[#allocation15_spill] sm:$0xff] %v14090_v15  ;;  %v14092_v8 = vpop.f32.mrf.mxu0 }
 0x59f   : > { %v10815_v26 = vpop.f32.mrf.mxu0 }
 0x5a0   : > { %v18052_v26 = vld [vmem:[#allocation6_spill] sm:$0xff] }
 0x5a1   : > { %v14094_v17 = vpop.f32.mrf.mxu0 }
 0x5a3   : > { %v10818_v34 = vpop.f32.mrf.mxu0 }
 0x5a5   : > { %v14096_v18 = vpop.f32.mrf.mxu0 }
 0x5a7   : > { %v10821_v2 = vpop.f32.mrf.mxu0 }
 0x5a9   : > { %v14098_v56 = vpop.f32.mrf.mxu0 }
 0x5aa   : > { %4119 = vmatpush1.msra.mxu1 %v14098_v56  ;;  %4405 = vmatpush1.msra.mxu0 %v14098_v56 }
 0x5ab   : > { %v10824_v21 = vpop.f32.mrf.mxu0  ;;  %4120 = vmatprep.subr.mxu1 %v17943_v14  ;;  %4406 = vmatprep.subr.mxu0 %v17943_v14 }
 0x5ac   : > { %4121 = vmatpush1.msra.mxu1 %v14096_v18  ;;  %4407 = vmatpush1.msra.mxu0 %v14096_v18 }
 0x5ad   : > { %v14106_v46 = vpop.f32.mrf.mxu0  ;;  %4122 = vmatprep.subr.mxu1 %v17943_v14  ;;  %4408 = vmatprep.subr.mxu0 %v17943_v14 }
 0x5ae   : > { %4123 = vmatpush1.msra.mxu1 %v14094_v17  ;;  %4409 = vmatpush1.msra.mxu0 %v14094_v17 }
 0x5af   : > { %v10827_v5 = vpop.f32.mrf.mxu0  ;;  %4124 = vmatprep.subr.mxu1 %v17943_v14  ;;  %4410 = vmatprep.subr.mxu0 %v17943_v14 }
 0x5b0   : > { %4125 = vmatpush1.msra.mxu1 %v14092_v8  ;;  %4411 = vmatpush1.msra.mxu0 %v14092_v8 }
 0x5b1   : > { %v14116_v41 = vpop.f32.mrf.mxu0  ;;  %4126 = vmatprep.subr.mxu1 %v17943_v14  ;;  %4412 = vmatprep.subr.mxu0 %v17943_v14 }
 0x5b2   : > { %4127 = vmatpush1.msra.mxu1 %v14087_v57  ;;  %4413 = vmatpush1.msra.mxu0 %v14087_v57 }
 0x5b3   : > { %v10830_v50 = vpop.f32.mrf.mxu0  ;;  %4128 = vmatprep.subr.mxu1 %v17943_v14  ;;  %4414 = vmatprep.subr.mxu0 %v17943_v14 }
 0x5b4   : > { %4129 = vmatpush1.msra.mxu1 %v14082_v1  ;;  %4415 = vmatpush1.msra.mxu0 %v14082_v1  ;;  %v3843_v9 = vpop.f32.mrf.mxu1 }
 0x5b5   : > { %v14127_v34 = vadd.f32 %v3843_v9, %v18052_v26  ;;  %v14129_v2 = vpop.f32.mrf.mxu0  ;;  %4130 = vmatprep.subr.mxu1 %v17943_v14  ;;  %4416 = vmatprep.subr.mxu0 %v17943_v14  ;;  %v18054_v9 = vld [vmem:[#allocation3_spill] sm:$0xff] }
 0x5b6   : > { %4131 = vmatpush1.msra.mxu1 %v14077_v52  ;;  %4417 = vmatpush1.msra.mxu0 %v14077_v52  ;;  %v3845_v21 = vpop.f32.mrf.mxu1 }
 0x5b7   : > { %18053 = vst [vmem:[#allocation6_spill] sm:$0xff] %v14127_v34  ;;  %v10833_v5 = vpop.f32.mrf.mxu0  ;;  %4132 = vmatprep.subr.mxu1 %v17943_v14  ;;  %4418 = vmatprep.subr.mxu0 %v17943_v14 }
 0x5b8   : > { %4133 = vmatpush1.msra.mxu1 %v14072_v19  ;;  %4419 = vmatpush1.msra.mxu0 %v14072_v19  ;;  %v3848_v50 = vpop.f32.mrf.mxu1 }
 0x5b9   : > { %v14140_v26 = vadd.f32 %v3848_v50, %v18054_v9  ;;  %v14142_v34 = vpop.f32.mrf.mxu0  ;;  %4134 = vmatprep.subr.mxu1 %v17943_v14  ;;  %4420 = vmatprep.subr.mxu0 %v17943_v14  ;;  %v18056_v9 = vld [vmem:[#allocation7_spill] sm:$0xff] }
 0x5ba   : > { %4135 = vmatpush1.msra.mxu1 %v14067_v40  ;;  %4421 = vmatpush1.msra.mxu0 %v14067_v40  ;;  %v3850_v21 = vpop.f32.mrf.mxu1 }
 0x5bb   : > { %18055 = vst [vmem:[#allocation3_spill] sm:$0xff] %v14140_v26  ;;  %v10836_v5 = vpop.f32.mrf.mxu0  ;;  %4136 = vmatprep.subr.mxu1 %v17943_v14  ;;  %4422 = vmatprep.subr.mxu0 %v17943_v14 }
 0x5bc   : > { %4137 = vmatpush1.msra.mxu1 %v14062_v39  ;;  %4423 = vmatpush1.msra.mxu0 %v14062_v39  ;;  %v3853_v50 = vpop.f32.mrf.mxu1 }
 0x5bd   : > { %v14153_v26 = vadd.f32 %v3853_v50, %v18056_v9  ;;  %v14155_v15 = vpop.f32.mrf.mxu0  ;;  %4138 = vmatprep.subr.mxu1 %v17943_v14  ;;  %4424 = vmatprep.subr.mxu0 %v17943_v14  ;;  %v18058_v9 = vld [vmem:[#allocation4_spill] sm:$0xff] }
 0x5be   : > { %4139 = vmatpush1.msra.mxu1 %v14057_v48  ;;  %4425 = vmatpush1.msra.mxu0 %v14057_v48  ;;  %v3855_v21 = vpop.f32.mrf.mxu1 }
 0x5bf   : > { %18057 = vst [vmem:[#allocation7_spill] sm:$0xff] %v14153_v26  ;;  %v10839_v5 = vpop.f32.mrf.mxu0  ;;  %4140 = vmatprep.subr.mxu1 %v17943_v14  ;;  %4426 = vmatprep.subr.mxu0 %v17943_v14 }
 0x5c0   : > { %4141 = vmatpush1.msra.mxu1 %v14055_v33  ;;  %4427 = vmatpush1.msra.mxu0 %v14055_v33  ;;  %v3858_v50 = vpop.f32.mrf.mxu1 }
 0x5c1   : > { %v14166_v26 = vadd.f32 %v3858_v50, %v18058_v9  ;;  %v14168_v60 = vpop.f32.mrf.mxu0  ;;  %4142 = vmatprep.subr.mxu1 %v17943_v14  ;;  %4428 = vmatprep.subr.mxu0 %v17943_v14  ;;  %v18060_v9 = vld [vmem:[#allocation8_spill] sm:$0xff] }
 0x5c2   : > { %4143 = vmatpush1.msra.mxu1 %v14053_v32  ;;  %4429 = vmatpush1.msra.mxu0 %v14053_v32  ;;  %v3860_v21 = vpop.f32.mrf.mxu1 }
 0x5c3   : > { %18059 = vst [vmem:[#allocation4_spill] sm:$0xff] %v14166_v26  ;;  %v10842_v5 = vpop.f32.mrf.mxu0  ;;  %4144 = vmatprep.subr.mxu1 %v17943_v14  ;;  %4430 = vmatprep.subr.mxu0 %v17943_v14 }
 0x5c4   : > { %4145 = vmatpush1.msra.mxu1 %v14051_v16  ;;  %4431 = vmatpush1.msra.mxu0 %v14051_v16  ;;  %v3863_v50 = vpop.f32.mrf.mxu1 }
 0x5c5   : > { %v14179_v26 = vadd.f32 %v3863_v50, %v18060_v9  ;;  %v14181_v23 = vpop.f32.mrf.mxu0  ;;  %4146 = vmatprep.subr.mxu1 %v17943_v14  ;;  %4432 = vmatprep.subr.mxu0 %v17943_v14  ;;  %v18062_v9 = vld [vmem:[#allocation21_spill] sm:$0xff] }
 0x5c6   : > { %4147 = vmatpush1.msra.mxu1 %v14049_v6  ;;  %4433 = vmatpush1.msra.mxu0 %v14049_v6  ;;  %v3865_v21 = vpop.f32.mrf.mxu1 }
 0x5c7   : > { %18061 = vst [vmem:[#allocation8_spill] sm:$0xff] %v14179_v26  ;;  %v10845_v5 = vpop.f32.mrf.mxu0  ;;  %4148 = vmatprep.subr.mxu1 %v17943_v14  ;;  %4434 = vmatprep.subr.mxu0 %v17943_v14 }
 0x5c8   : > { %4149 = vmatpush1.msra.mxu1 %v14047_v35  ;;  %4435 = vmatpush1.msra.mxu0 %v14047_v35  ;;  %v3868_v50 = vpop.f32.mrf.mxu1 }
 0x5c9   : > { %v14192_v26 = vadd.f32 %v3868_v50, %v18062_v9  ;;  %v14194_v13 = vpop.f32.mrf.mxu0  ;;  %4164 = vmatprep.subr.mxu1 %v17943_v14  ;;  %4450 = vmatprep.subr.mxu0 %v17943_v14 }
 0x5ca   : > { %v3870_v21 = vpop.f32.mrf.mxu1 }
 0x5cb   : > { %v10848_v5 = vpop.f32.mrf.mxu0  ;;  %v9162_v21 = vld [vmem:[%s17895_s3 + $0x558] sm:$0xff] }
 0x5cc   : > { %v3873_v10 = vpop.f32.mrf.mxu1  ;;  %v9206_v5 = vld [vmem:[%s17895_s3 + $0x638] sm:$0xff] }
 0x5cd   : > { %v14199_v54 = vadd.f32 %v3873_v10, %v18063_v3  ;;  %v14201_v36 = vpop.f32.mrf.mxu0  ;;  %v9159_v3 = vld [vmem:[%s17895_s3 + $0x540] sm:$0xff] }
 0x5ce   : > { %9173 = vmatpush2.msk.msra.mxu1 %vm2115_vm5, %v14201_v36  ;;  %9217 = vmatpush2.msk.msra.mxu0 %vm2115_vm5, %v14201_v36  ;;  %v3875_v50 = vpop.f32.mrf.mxu1  ;;  %v9203_v10 = vld [vmem:[%s17895_s3 + $0x620] sm:$0xff] }
 0x5cf   : > { %v10851_v9 = vpop.f32.mrf.mxu0  ;;  %4166 = vmatprep.subr.mxu1 %v17943_v14  ;;  %4452 = vmatprep.subr.mxu0 %v17943_v14  ;;  %v9161_v50 = vld [vmem:[%s17895_s3 + $0x550] sm:$0xff] }
 0x5d0   : > { %4167 = vmatpush2.msra.mxu1 %v14194_v13  ;;  %4453 = vmatpush2.msra.mxu0 %v14194_v13  ;;  %v9205_v9 = vld [vmem:[%s17895_s3 + $0x630] sm:$0xff] }
 0x5d1   : > { %4168 = vmatprep.subr.mxu1 %v17943_v14  ;;  %4454 = vmatprep.subr.mxu0 %v17943_v14 }
 0x5d2   : > { %4169 = vmatpush2.msra.mxu1 %v14181_v23  ;;  %4455 = vmatpush2.msra.mxu0 %v14181_v23 }
 0x5d3   : > { %4170 = vmatprep.subr.mxu1 %v17943_v14  ;;  %4456 = vmatprep.subr.mxu0 %v17943_v14 }
 0x5d4   : > { %4171 = vmatpush2.msra.mxu1 %v14168_v60  ;;  %4457 = vmatpush2.msra.mxu0 %v14168_v60 }
 0x5d5   : > { %4172 = vmatprep.subr.mxu1 %v17943_v14  ;;  %4458 = vmatprep.subr.mxu0 %v17943_v14 }
 0x5d6   : > { %4173 = vmatpush2.msra.mxu1 %v14155_v15  ;;  %4459 = vmatpush2.msra.mxu0 %v14155_v15 }
 0x5d7   : > { %4174 = vmatprep.subr.mxu1 %v17943_v14  ;;  %4460 = vmatprep.subr.mxu0 %v17943_v14 }
 0x5d8   : > { %4175 = vmatpush2.msra.mxu1 %v14142_v34  ;;  %4461 = vmatpush2.msra.mxu0 %v14142_v34 }
 0x5d9   : > { %4176 = vmatprep.subr.mxu1 %v17943_v14  ;;  %4462 = vmatprep.subr.mxu0 %v17943_v14 }
 0x5da   : > { %4177 = vmatpush2.msra.mxu1 %v14129_v2  ;;  %4463 = vmatpush2.msra.mxu0 %v14129_v2 }
 0x5db   : > { %4178 = vmatprep.subr.mxu1 %v17943_v14  ;;  %4464 = vmatprep.subr.mxu0 %v17943_v14 }
 0x5dc   : > { %4179 = vmatpush2.msra.mxu1 %v14116_v41  ;;  %4465 = vmatpush2.msra.mxu0 %v14116_v41 }
 0x5dd   : > { %4180 = vmatprep.subr.mxu1 %v17943_v14  ;;  %4466 = vmatprep.subr.mxu0 %v17943_v14 }
 0x5de   : > { %4181 = vmatpush2.msra.mxu1 %v14106_v46  ;;  %4467 = vmatpush2.msra.mxu0 %v14106_v46 }
 0x5df   : > { %4183 = vmatmul.mubr.f32.vlgmr.msra.gmra.mxu1 %v9159_v3  ;;  %4261 = vmatprep.subr.mxu1 %v17943_v14  ;;  %v9164_v3 = vld [vmem:[%s17895_s3 + $0x568] sm:$0xff] }
 0x5e0   : > { %4469 = vmatmul.mubr.f32.vlgmr.msra.gmra.mxu0 %v9203_v10  ;;  %4262 = vmatpush1.msra.mxu1 %v14098_v56  ;;  %v9208_v10 = vld [vmem:[%s17895_s3 + $0x648] sm:$0xff] }
 0x5e1   : > { %4263 = vmatprep.subr.mxu1 %v17943_v14  ;;  %9175 = vmatprep.mubr.msk.f32.mxu1 %vm2093_vm4, %v9162_v21  ;;  %v9163_v21 = vld [vmem:[%s17895_s3 + $0x560] sm:$0xff] }
 0x5e2   : > { %4264 = vmatpush1.msra.mxu1 %v14096_v18  ;;  %9219 = vmatprep.mubr.msk.f32.mxu0 %vm2093_vm4, %v9206_v5  ;;  %v9207_v5 = vld [vmem:[%s17895_s3 + $0x640] sm:$0xff] }
 0x5e3   : > { %4188 = vmatmul.mubr.f32.gmra.mxu1 %v9161_v50  ;;  %4265 = vmatprep.subr.mxu1 %v17943_v14  ;;  %v9166_v50 = vld [vmem:[%s17895_s3 + $0x578] sm:$0xff] }
 0x5e4   : > { %4474 = vmatmul.mubr.f32.gmra.mxu0 %v9205_v9  ;;  %4266 = vmatpush1.msra.mxu1 %v14094_v17  ;;  %v9210_v9 = vld [vmem:[%s17895_s3 + $0x658] sm:$0xff] }
 0x5e5   : > { %4267 = vmatprep.subr.mxu1 %v17943_v14  ;;  %9176 = vmatprep.mubr.msk.f32.mxu1 %vm2093_vm4, %v9164_v3  ;;  %v9165_v3 = vld [vmem:[%s17895_s3 + $0x570] sm:$0xff] }
 0x5e6   : > { %4268 = vmatpush1.msra.mxu1 %v14092_v8  ;;  %9220 = vmatprep.mubr.msk.f32.mxu0 %vm2093_vm4, %v9208_v10  ;;  %v9209_v10 = vld [vmem:[%s17895_s3 + $0x650] sm:$0xff] }
 0x5e7   : > { %4193 = vmatmul.mubr.f32.gmra.mxu1 %v9163_v21  ;;  %4269 = vmatprep.subr.mxu1 %v17943_v14  ;;  %v9168_v21 = vld [vmem:[%s17895_s3 + $0x588] sm:$0xff] }
 0x5e8   : > { %4479 = vmatmul.mubr.f32.gmra.mxu0 %v9207_v5  ;;  %4270 = vmatpush1.msra.mxu1 %v14087_v57  ;;  %v9212_v5 = vld [vmem:[%s17895_s3 + $0x668] sm:$0xff] }
 0x5e9   : > { %4271 = vmatprep.subr.mxu1 %v17943_v14  ;;  %9177 = vmatprep.mubr.msk.f32.mxu1 %vm2093_vm4, %v9166_v50  ;;  %v9167_v50 = vld [vmem:[%s17895_s3 + $0x580] sm:$0xff] }
 0x5ea   : > { %4272 = vmatpush1.msra.mxu1 %v14082_v1  ;;  %9221 = vmatprep.mubr.msk.f32.mxu0 %vm2093_vm4, %v9210_v9  ;;  %v9211_v9 = vld [vmem:[%s17895_s3 + $0x660] sm:$0xff] }
 0x5eb   : > { %4198 = vmatmul.mubr.f32.gmra.mxu1 %v9165_v3  ;;  %4273 = vmatprep.subr.mxu1 %v17943_v14  ;;  %v9170_v3 = vld [vmem:[%s17895_s3 + $0x598] sm:$0xff] }
 0x5ec   : > { %4484 = vmatmul.mubr.f32.gmra.mxu0 %v9209_v10  ;;  %4274 = vmatpush1.msra.mxu1 %v14077_v52  ;;  %v9214_v10 = vld [vmem:[%s17895_s3 + $0x678] sm:$0xff] }
 0x5ed   : > { %4275 = vmatprep.subr.mxu1 %v17943_v14  ;;  %9178 = vmatprep.mubr.msk.f32.mxu1 %vm2093_vm4, %v9168_v21  ;;  %v9169_v21 = vld [vmem:[%s17895_s3 + $0x590] sm:$0xff] }
 0x5ee   : > { %4276 = vmatpush1.msra.mxu1 %v14072_v19  ;;  %9222 = vmatprep.mubr.msk.f32.mxu0 %vm2093_vm4, %v9212_v5  ;;  %v9213_v5 = vld [vmem:[%s17895_s3 + $0x670] sm:$0xff] }
 0x5ef   : > { %4203 = vmatmul.mubr.f32.gmra.mxu1 %v9167_v50  ;;  %4277 = vmatprep.subr.mxu1 %v17943_v14  ;;  %v9250_v50 = vld [vmem:[%s17896_s4 + $0x98] sm:$0xff] }
 0x5f0   : > { %4489 = vmatmul.mubr.f32.gmra.mxu0 %v9211_v9  ;;  %4278 = vmatpush1.msra.mxu1 %v14067_v40  ;;  %v9172_v9 = vld [vmem:[%s17895_s3 + $0x5a8] sm:$0x1] }
 0x5f1   : > { %4279 = vmatprep.subr.mxu1 %v17943_v14  ;;  %9179 = vmatprep.mubr.msk.f32.mxu1 %vm2093_vm4, %v9170_v3  ;;  %v9216_v3 = vld [vmem:[%s17895_s3 + $0x688] sm:$0x1] }
 0x5f2   : > { %4280 = vmatpush1.msra.mxu1 %v14062_v39  ;;  %9223 = vmatprep.mubr.msk.f32.mxu0 %vm2093_vm4, %v9214_v10  ;;  %v9249_v10 = vld [vmem:[%s17896_s4 + $0x90] sm:$0xff] }
 0x5f3   : > { %4208 = vmatmul.mubr.f32.gmra.mxu1 %v9169_v21  ;;  %4281 = vmatprep.subr.mxu1 %v17943_v14  ;;  %v9171_v21 = vld [vmem:[%s17895_s3 + $0x5a0] sm:$0x1] }
 0x5f4   : > { %4494 = vmatmul.mubr.f32.gmra.mxu0 %v9213_v5  ;;  %10852 = vmatprep.subr.mxu0 %v17943_v14  ;;  %v9215_v5 = vld [vmem:[%s17895_s3 + $0x680] sm:$0x1] }
 0x5f5   : > { %4282 = vmatpush1.msra.mxu1 %v14057_v48  ;;  %10853 = vmatpush3.msra.mxu0 %v9250_v50  ;;  %v9248_v50 = vld [vmem:[%s17896_s4 + $0x88] sm:$0xff] }
 0x5f6   : > { %4283 = vmatprep.subr.mxu1 %v17943_v14  ;;  %10854 = vmatprep.subr.mxu0 %v17943_v14 }
 0x5f7   : > { %9180 = vmatprep.mubr.msk.f32.mxu1 %vm2093_vm4, %v9172_v9  ;;  %4284 = vmatpush1.msra.mxu1 %v14055_v33  ;;  %v9247_v9 = vld [vmem:[%s17896_s4 + $0x80] sm:$0xff] }
 0x5f8   : > { %9224 = vmatprep.mubr.msk.f32.mxu0 %vm2093_vm4, %v9216_v3  ;;  %10855 = vmatpush3.msra.mxu0 %v9249_v10  ;;  %v9182_v3 = vld [vmem:[%s17895_s3 + $0x5b8] sm:$0xff]  ;;  %v9181_v10 = vld [vmem:[%s17895_s3 + $0x5b0] sm:$0xff] }
 0x5f9   : > { %4213 = vmatmul.mubr.f32.gmra.mxu1 %v9171_v21  ;;  %4285 = vmatprep.subr.mxu1 %v17943_v14  ;;  %v9184_v21 = vld [vmem:[%s17895_s3 + $0x5c8] sm:$0xff] }
 0x5fa   : > { %4499 = vmatmul.mubr.f32.gmra.mxu0 %v9215_v5  ;;  %10856 = vmatprep.subr.mxu0 %v17943_v14  ;;  %v9183_v5 = vld [vmem:[%s17895_s3 + $0x5c0] sm:$0xff] }
 0x5fb   : > { %4286 = vmatpush1.msra.mxu1 %v14053_v32  ;;  %10857 = vmatpush3.msra.mxu0 %v9248_v50  ;;  %v9185_v50 = vld [vmem:[%s17895_s3 + $0x5d0] sm:$0xff] }
 0x5fc   : > { %4287 = vmatprep.subr.mxu1 %v17943_v14  ;;  %10858 = vmatprep.subr.mxu0 %v17943_v14 }
 0x5fd   : > { %4288 = vmatpush1.msra.mxu1 %v14051_v16  ;;  %10859 = vmatpush3.msra.mxu0 %v9247_v9 }
 0x5fe   : > { %10860 = vmatprep.mubr.msk.f32.mxu0 %vm11292_vm1, %v17943_v14  ;;  %4289 = vmatprep.subr.mxu1 %v17943_v14 }
 0x5ff   : > { %10861 = vmatmul.mubr.msk.f32.vlgmr.msra.gmra.mxu0 %vm1558_vm3, %v11974_v0  ;;  %4290 = vmatpush1.msra.mxu1 %v14049_v6 }
 0x600   : > { %4291 = vmatprep.subr.mxu1 %v17943_v14  ;;  %10863 = vmatprep.mubr.msk.f32.mxu0 %vm11292_vm1, %v17943_v14 }
 0x601   : > { %4292 = vmatpush1.msra.mxu1 %v14047_v35  ;;  %9196 = vmatprep.mubr.msk.f32.mxu1 %vm2093_vm4, %v9182_v3 }
 0x602   : > { %4307 = vmatprep.subr.mxu1 %v17943_v14  ;;  %5031 = vmatprep.subr.mxu0 %v17943_v14 }
 0x603   : > { %10864 = vmatmul.mubr.msk.f32.gmra.mxu0 %vm1558_vm3, %v11990_v44  ;;  %9195 = vmatpush2.msk.msra.mxu1 %vm2115_vm5, %v14201_v36 }
 0x604   : > { %4309 = vmatprep.subr.mxu1 %v17943_v14  ;;  %10866 = vmatprep.mubr.msk.f32.mxu0 %vm11292_vm1, %v17943_v14 }
 0x605   : > { %4310 = vmatpush2.msra.mxu1 %v14194_v13 }
 0x606   : > { %4311 = vmatprep.subr.mxu1 %v17943_v14 }
 0x607   : > { %10867 = vmatmul.mubr.msk.f32.gmra.mxu0 %vm1558_vm3, %v12006_v43  ;;  %4312 = vmatpush2.msra.mxu1 %v14181_v23 }
 0x608   : > { %4313 = vmatprep.subr.mxu1 %v17943_v14  ;;  %10869 = vmatprep.mubr.msk.f32.mxu0 %vm11292_vm1, %v17943_v14 }
 0x609   : > { %4314 = vmatpush2.msra.mxu1 %v14168_v60 }
 0x60a   : > { %4315 = vmatprep.subr.mxu1 %v17943_v14 }
 0x60b   : > { %10870 = vmatmul.mubr.msk.f32.gmra.mxu0 %vm1558_vm3, %v12022_v7  ;;  %4316 = vmatpush2.msra.mxu1 %v14155_v15 }
 0x60c   : > { %4317 = vmatprep.subr.mxu1 %v17943_v14  ;;  %10872 = vmatprep.mubr.msk.f32.mxu0 %vm11292_vm1, %v17943_v14 }
 0x60d   : > { %4318 = vmatpush2.msra.mxu1 %v14142_v34 }
 0x60e   : > { %4319 = vmatprep.subr.mxu1 %v17943_v14 }
 0x60f   : > { %10873 = vmatmul.mubr.msk.f32.gmra.mxu0 %vm1558_vm3, %v12039_v59  ;;  %4320 = vmatpush2.msra.mxu1 %v14129_v2 }
 0x610   : > { %4321 = vmatprep.subr.mxu1 %v17943_v14  ;;  %10875 = vmatprep.mubr.msk.f32.mxu0 %vm11292_vm1, %v17943_v14 }
 0x611   : > { %4322 = vmatpush2.msra.mxu1 %v14116_v41 }
 0x612   : > { %4323 = vmatprep.subr.mxu1 %v17943_v14 }
 0x613   : > { %10876 = vmatmul.mubr.msk.f32.gmra.mxu0 %vm1558_vm3, %v12056_v24  ;;  %4324 = vmatpush2.msra.mxu1 %v14106_v46 }
 0x614   : > { %4326 = vmatmul.mubr.f32.vlgmr.msra.gmra.mxu1 %v9181_v10  ;;  %4547 = vmatprep.subr.mxu1 %v17943_v14 }
 0x615   : > { %4548 = vmatpush1.msra.mxu1 %v14098_v56  ;;  %10878 = vmatprep.mubr.msk.f32.mxu0 %vm11292_vm1, %v17943_v14  ;;  %v9186_v56 = vld [vmem:[%s17895_s3 + $0x5d8] sm:$0xff] }
 0x616   : > { %4549 = vmatprep.subr.mxu1 %v17943_v14  ;;  %9197 = vmatprep.mubr.msk.f32.mxu1 %vm2093_vm4, %v9184_v21 }
 0x617   : > { %10879 = vmatmul.mubr.msk.f32.gmra.mxu0 %vm1558_vm3, %v12073_v53  ;;  %4550 = vmatpush1.msra.mxu1 %v14096_v18  ;;  %v9188_v18 = vld [vmem:[%s17895_s3 + $0x5e8] sm:$0xff] }
 0x618   : > { %4331 = vmatmul.mubr.f32.gmra.mxu1 %v9183_v5  ;;  %4551 = vmatprep.subr.mxu1 %v17943_v14 }
 0x619   : > { %4552 = vmatpush1.msra.mxu1 %v14094_v17  ;;  %10881 = vmatprep.mubr.msk.f32.mxu0 %vm11292_vm1, %v17943_v14  ;;  %v9187_v17 = vld [vmem:[%s17895_s3 + $0x5e0] sm:$0xff] }
 0x61a   : > { %4553 = vmatprep.subr.mxu1 %v17943_v14  ;;  %9198 = vmatprep.mubr.msk.f32.mxu1 %vm2093_vm4, %v9186_v56 }
 0x61b   : > { %10882 = vmatmul.mubr.msk.f32.gmra.mxu0 %vm1558_vm3, %v12090_v27  ;;  %4554 = vmatpush1.msra.mxu1 %v14092_v8  ;;  %v9189_v8 = vld [vmem:[%s17895_s3 + $0x5f0] sm:$0xff] }
 0x61c   : > { %4336 = vmatmul.mubr.f32.gmra.mxu1 %v9185_v50  ;;  %4555 = vmatprep.subr.mxu1 %v17943_v14 }
 0x61d   : > { %4556 = vmatpush1.msra.mxu1 %v14087_v57  ;;  %10884 = vmatprep.mubr.msk.f32.mxu0 %vm11292_vm1, %v17943_v14  ;;  %v9190_v57 = vld [vmem:[%s17895_s3 + $0x5f8] sm:$0xff] }
 0x61e   : > { %4557 = vmatprep.subr.mxu1 %v17943_v14  ;;  %9199 = vmatprep.mubr.msk.f32.mxu1 %vm2093_vm4, %v9188_v18 }
 0x61f   : > { %10885 = vmatmul.mubr.msk.f32.gmra.mxu0 %vm1558_vm3, %v12107_v11  ;;  %4558 = vmatpush1.msra.mxu1 %v14082_v1  ;;  %v9191_v1 = vld [vmem:[%s17895_s3 + $0x600] sm:$0xff] }
 0x620   : > { %4341 = vmatmul.mubr.f32.gmra.mxu1 %v9187_v17  ;;  %4559 = vmatprep.subr.mxu1 %v17943_v14 }
 0x621   : > { %4560 = vmatpush1.msra.mxu1 %v14077_v52  ;;  %10887 = vmatprep.mubr.msk.f32.mxu0 %vm11292_vm1, %v17943_v14  ;;  %v9192_v52 = vld [vmem:[%s17895_s3 + $0x608] sm:$0xff] }
 0x622   : > { %4561 = vmatprep.subr.mxu1 %v17943_v14  ;;  %9200 = vmatprep.mubr.msk.f32.mxu1 %vm2093_vm4, %v9190_v57 }
 0x623   : > { %10888 = vmatmul.mubr.msk.f32.gmra.mxu0 %vm1558_vm3, %v17988_v63  ;;  %4562 = vmatpush1.msra.mxu1 %v14072_v19  ;;  %v9193_v19 = vld [vmem:[%s17895_s3 + $0x610] sm:$0x1] }
 0x624   : > { %4346 = vmatmul.mubr.f32.gmra.mxu1 %v9189_v8  ;;  %4563 = vmatprep.subr.mxu1 %v17943_v14 }
 0x625   : > { %4564 = vmatpush1.msra.mxu1 %v14067_v40  ;;  %10890 = vmatprep.mubr.msk.f32.mxu0 %vm11292_vm1, %v17943_v14  ;;  %v9194_v40 = vld [vmem:[%s17895_s3 + $0x618] sm:$0x1] }
 0x626   : > { %4565 = vmatprep.subr.mxu1 %v17943_v14  ;;  %9201 = vmatprep.mubr.msk.f32.mxu1 %vm2093_vm4, %v9192_v52 }
 0x627   : > { %10891 = vmatmul.mubr.msk.f32.gmra.mxu0 %vm1558_vm3, %v17990_v38  ;;  %4566 = vmatpush1.msra.mxu1 %v14062_v39  ;;  %v9233_v39 = vld [vmem:[%s17895_s3 + $0x6d0] sm:$0xff] }
 0x628   : > { %4351 = vmatmul.mubr.f32.gmra.mxu1 %v9191_v1  ;;  %4567 = vmatprep.subr.mxu1 %v17943_v14  ;;  %v18066_v1 = vld [vmem:[#allocation23_spill] sm:$0xff] }
 0x629   : > { %4568 = vmatpush1.msra.mxu1 %v14057_v48  ;;  %10893 = vmatprep.mubr.msk.f32.mxu0 %vm11292_vm1, %v17943_v14  ;;  %v9226_v48 = vld [vmem:[%s17895_s3 + $0x698] sm:$0xff] }
 0x62a   : > { %4569 = vmatprep.subr.mxu1 %v17943_v14  ;;  %9202 = vmatprep.mubr.msk.f32.mxu1 %vm2093_vm4, %v9194_v40 }
 0x62b   : > { %10894 = vmatmul.mubr.msk.f32.gmra.mxu0 %vm1558_vm3, %v17991_v58  ;;  %4570 = vmatpush1.msra.mxu1 %v14055_v33  ;;  %v9234_v33 = vld [vmem:[%s17895_s3 + $0x6d8] sm:$0xff] }
 0x62c   : > { %4356 = vmatmul.mubr.f32.gmra.mxu1 %v9193_v19  ;;  %4571 = vmatprep.subr.mxu1 %v17943_v14 }
 0x62d   : > { %4572 = vmatpush1.msra.mxu1 %v14053_v32  ;;  %10896 = vmatprep.mubr.msk.f32.mxu0 %vm11292_vm1, %v17943_v14  ;;  %v9231_v32 = vld [vmem:[%s17895_s3 + $0x6c0] sm:$0xff] }
 0x62e   : > { %4573 = vmatprep.subr.mxu1 %v17943_v14  ;;  %9240 = vmatprep.mubr.msk.f32.mxu1 %vm2093_vm4, %v9226_v48 }
 0x62f   : > { %10897 = vmatmul.mubr.msk.f32.gmra.mxu0 %vm1558_vm3, %v17992_v30  ;;  %4574 = vmatpush1.msra.mxu1 %v14051_v16  ;;  %v9232_v16 = vld [vmem:[%s17895_s3 + $0x6c8] sm:$0xff] }
 0x630   : > { %4575 = vmatprep.subr.mxu1 %v17943_v14  ;;  %10899 = vmatprep.mubr.msk.f32.mxu0 %vm11292_vm1, %v17943_v14 }
 0x631   : > { %4576 = vmatpush1.msra.mxu1 %v14049_v6  ;;  %v9229_v6 = vld [vmem:[%s17895_s3 + $0x6b0] sm:$0xff] }
 0x632   : > { %4577 = vmatprep.subr.mxu1 %v17943_v14 }
 0x633   : > { %10900 = vmatmul.mubr.msk.f32.gmra.mxu0 %vm1558_vm3, %v17993_v61  ;;  %4578 = vmatpush1.msra.mxu1 %v14047_v35  ;;  %v9230_v35 = vld [vmem:[%s17895_s3 + $0x6b8] sm:$0xff] }
 0x634   : > { %4593 = vmatprep.subr.mxu1 %v17943_v14  ;;  %10902 = vmatprep.mubr.msk.f32.mxu0 %vm11292_vm1, %v17943_v14 }
 0x635   : > { %9239 = vmatpush2.msk.msra.mxu1 %vm2115_vm5, %v14201_v36  ;;  %v9225_v36 = vld [vmem:[%s17895_s3 + $0x690] sm:$0xff] }
 0x636   : > { %4595 = vmatprep.subr.mxu1 %v17943_v14 }
 0x637   : > { %10903 = vmatmul.mubr.msk.f32.gmra.mxu0 %vm1558_vm3, %v17994_v22  ;;  %4596 = vmatpush2.msra.mxu1 %v14194_v13  ;;  %v9228_v13 = vld [vmem:[%s17895_s3 + $0x6a8] sm:$0xff] }
 0x638   : > { %4597 = vmatprep.subr.mxu1 %v17943_v14  ;;  %10905 = vmatprep.mubr.msk.f32.mxu0 %vm11292_vm1, %v17943_v14 }
 0x639   : > { %4598 = vmatpush2.msra.mxu1 %v14181_v23  ;;  %v9227_v23 = vld [vmem:[%s17895_s3 + $0x6a0] sm:$0xff] }
 0x63a   : > { %4599 = vmatprep.subr.mxu1 %v17943_v14 }
 0x63b   : > { %10906 = vmatmul.mubr.msk.f32.gmra.mxu0 %vm1558_vm3, %v17995_v49  ;;  %4600 = vmatpush2.msra.mxu1 %v14168_v60  ;;  %v9236_v60 = vld [vmem:[%s17895_s3 + $0x6e8] sm:$0xff] }
 0x63c   : > { %4601 = vmatprep.subr.mxu1 %v17943_v14  ;;  %10908 = vmatprep.mubr.msk.f32.mxu0 %vm11292_vm1, %v17943_v14 }
 0x63d   : > { %4602 = vmatpush2.msra.mxu1 %v14155_v15  ;;  %v9235_v15 = vld [vmem:[%s17895_s3 + $0x6e0] sm:$0xff] }
 0x63e   : > { %4603 = vmatprep.subr.mxu1 %v17943_v14 }
 0x63f   : > { %10909 = vmatmul.mubr.msk.f32.gmra.mxu0 %vm1558_vm3, %v17996_v45  ;;  %4604 = vmatpush2.msra.mxu1 %v14142_v34 }
 0x640   : > { %4605 = vmatprep.subr.mxu1 %v17943_v14  ;;  %10911 = vmatprep.mubr.msk.f32.mxu0 %vm11292_vm1, %v17943_v14 }
 0x641   : > { %4606 = vmatpush2.msra.mxu1 %v14129_v2 }
 0x642   : > { %4607 = vmatprep.subr.mxu1 %v17943_v14 }
 0x643   : > { %10912 = vmatmul.mubr.msk.f32.gmra.mxu0 %vm1558_vm3, %v17998_v55  ;;  %4608 = vmatpush2.msra.mxu1 %v14116_v41  ;;  %v9237_v41 = vld [vmem:[%s17895_s3 + $0x6f0] sm:$0x1] }
 0x644   : > { %4609 = vmatprep.subr.mxu1 %v17943_v14  ;;  %10914 = vmatprep.mubr.msk.f32.mxu0 %vm11292_vm1, %v17943_v14 }
 0x645   : > { %4610 = vmatpush2.msra.mxu1 %v14106_v46  ;;  %v9238_v46 = vld [vmem:[%s17895_s3 + $0x6f8] sm:$0x1] }
 0x646   : > { %4612 = vmatmul.mubr.f32.vlgmr.msra.gmra.mxu1 %v9225_v36  ;;  %4888 = vmatprep.subr.mxu1 %v17943_v14  ;;  %v18068_v36 = vld [vmem:[#allocation24_spill] sm:$0xff] }
 0x647   : > { %10915 = vmatmul.mubr.msk.f32.gmra.mxu0 %vm1558_vm3, %v17999_v42  ;;  %9241 = vmatprep.mubr.msk.f32.mxu1 %vm2093_vm4, %v9228_v13 }
 0x648   : > { %10917 = vmatprep.mubr.msk.f32.mxu0 %vm11292_vm1, %v17943_v14 }
 0x64a   : > { %4617 = vmatmul.mubr.f32.gmra.mxu1 %v9227_v23  ;;  %v18070_v23 = vld [vmem:[#allocation16_spill] sm:$0xff] }
 0x64b   : > { %10918 = vmatmul.mubr.msk.f32.gmra.mxu0 %vm1558_vm3, %v18001_v25  ;;  %9242 = vmatprep.mubr.msk.f32.mxu1 %vm2093_vm4, %v9230_v35 }
 0x64c   : > { %10920 = vmatprep.mubr.msk.f32.mxu0 %vm11292_vm1, %v17943_v14 }
 0x64e   : > { %4622 = vmatmul.mubr.f32.gmra.mxu1 %v9229_v6 }
 0x64f   : > { %10921 = vmatmul.mubr.msk.f32.gmra.mxu0 %vm1558_vm3, %v18003_v20  ;;  %9243 = vmatprep.mubr.msk.f32.mxu1 %vm2093_vm4, %v9232_v16 }
 0x650   : > { %10923 = vmatprep.mubr.msk.f32.mxu0 %vm11292_vm1, %v17943_v14 }
 0x652   : > { %4627 = vmatmul.mubr.f32.gmra.mxu1 %v9231_v32  ;;  %v9299_v32 = vld [vmem:[%s17895_s3 + $0x778] sm:$0xff] }
 0x653   : > { %10924 = vmatmul.mubr.msk.f32.gmra.mxu0 %vm1558_vm3, %v18004_v28  ;;  %9244 = vmatprep.mubr.msk.f32.mxu1 %vm2093_vm4, %v9234_v33  ;;  %v18072_v33 = vld [vmem:[#allocation5_spill] sm:$0xff] }
 0x654   : > { %10926 = vmatprep.mubr.msk.f32.mxu0 %vm11292_vm1, %v17943_v14 }
 0x656   : > { %4632 = vmatmul.mubr.f32.gmra.mxu1 %v9233_v39 }
 0x657   : > { %10927 = vmatmul.mubr.msk.f32.gmra.mxu0 %vm1558_vm3, %v18006_v62  ;;  %9245 = vmatprep.mubr.msk.f32.mxu1 %vm2093_vm4, %v9236_v60 }
 0x658   : > { %10929 = vmatprep.mubr.msk.f32.mxu0 %vm11292_vm1, %v17943_v14 }
 0x65a   : > { %4637 = vmatmul.mubr.f32.gmra.mxu1 %v9235_v15  ;;  %v18074_v15 = vld [vmem:[#allocation17_spill] sm:$0xff] }
 0x65b   : > { %10930 = vmatmul.mubr.msk.f32.gmra.mxu0 %vm1558_vm3, %v18008_v4  ;;  %9246 = vmatprep.mubr.msk.f32.mxu1 %vm2093_vm4, %v9238_v46 }
 0x65c   : > { %10932 = vmatprep.mubr.msk.f32.mxu0 %vm11292_vm1, %v17943_v14 }
 0x65e   : > { %4642 = vmatmul.mubr.f32.gmra.mxu1 %v9237_v41 }
 0x65f   : > { %10933 = vmatmul.mubr.msk.f32.gmra.mxu0 %vm1558_vm3, %v18009_v12 }
 0x660   : > { %9313 = vmatprep.mubr.msk.f32.mxu0 %vm2093_vm4, %v9299_v32 }
 0x69f   : > { %v4184_v34 = vpop.f32.mrf.mxu1 }
 0x6a0   : > { %v14648_v2 = vadd.f32 %v4184_v34, %v13998_v47  ;;  %v4470_v9 = vpop.f32.mrf.mxu0 }
 0x6a1   : > { %v14651_v3 = vadd.f32 %v4470_v9, %v14001_v37  ;;  %v4186_v10 = vpop.f32.mrf.mxu1 }
 0x6a2   : > { %v4472_v21 = vpop.f32.mrf.mxu0  ;;  %v18076_v10 = vld [vmem:[#allocation19_spill] sm:$0xff] }
 0x6a3   : > { %18064 = vst [vmem:[#allocation21_spill] sm:$0xff] %v14651_v3  ;;  %v4189_v5 = vpop.f32.mrf.mxu1 }
 0x6a4   : > { %v14654_v56 = vadd.f32 %v4189_v5, %v14004_v31  ;;  %v4475_v50 = vpop.f32.mrf.mxu0 }
 0x6a5   : > { %v14657_v18 = vadd.f32 %v4475_v50, %v14007_v51  ;;  %v4191_v17 = vpop.f32.mrf.mxu1  ;;  %v18078_v50 = vld [vmem:[#allocation18_spill] sm:$0xff] }
 0x6a6   : > { %v4477_v57 = vpop.f32.mrf.mxu0 }
 0x6a7   : > { %18065 = vst [vmem:[#allocation22_spill] sm:$0xff] %v14657_v18  ;;  %v4194_v8 = vpop.f32.mrf.mxu1 }
 0x6a8   : > { %v14660_v47 = vadd.f32 %v4194_v8, %v14010_v29  ;;  %v4480_v52 = vpop.f32.mrf.mxu0  ;;  %v9277_v29 = vld [vmem:[%s17895_s3 + $0x708] sm:$0xff] }
 0x6a9   : > { %v14663_v37 = vadd.f32 %v4480_v52, %v18066_v1  ;;  %v4196_v40 = vpop.f32.mrf.mxu1  ;;  %9291 = vmatprep.mubr.msk.f32.mxu1 %vm2093_vm4, %v9277_v29  ;;  %v18080_v1 = vld [vmem:[#allocation20_spill] sm:$0xff] }
 0x6aa   : > { %v4482_v19 = vpop.f32.mrf.mxu0 }
 0x6ab   : > { %18067 = vst [vmem:[#allocation23_spill] sm:$0xff] %v14663_v37  ;;  %v4199_v48 = vpop.f32.mrf.mxu1 }
 0x6ac   : > { %v14666_v31 = vadd.f32 %v4199_v48, %v18068_v36  ;;  %v4485_v13 = vpop.f32.mrf.mxu0  ;;  %v18082_v48 = vld [vmem:[#allocation2_spill] sm:$0xff] }
 0x6ad   : > { %v14669_v51 = vadd.f32 %v4485_v13, %v18070_v23  ;;  %v4201_v35 = vpop.f32.mrf.mxu1 }
 0x6ae   : > { %18069 = vst [vmem:[#allocation24_spill] sm:$0xff] %v14666_v31  ;;  %v4487_v6 = vpop.f32.mrf.mxu0 }
 0x6af   : > { %18071 = vst [vmem:[#allocation16_spill] sm:$0xff] %v14669_v51  ;;  %v4204_v16 = vpop.f32.mrf.mxu1 }
 0x6b0   : > { %v14678_v39 = vadd.f32 %v4204_v16, %v18072_v33  ;;  %v4490_v60 = vpop.f32.mrf.mxu0 }
 0x6b1   : > { %v14683_v46 = vadd.f32 %v4490_v60, %v18074_v15  ;;  %v4206_v41 = vpop.f32.mrf.mxu1 }
 0x6b2   : > { %18073 = vst [vmem:[#allocation5_spill] sm:$0xff] %v14678_v39  ;;  %v4492_v34 = vpop.f32.mrf.mxu0 }
 0x6b3   : > { %18075 = vst [vmem:[#allocation17_spill] sm:$0xff] %v14683_v46  ;;  %v4209_v9 = vpop.f32.mrf.mxu1 }
 0x6b4   : > { %v14686_v21 = vadd.f32 %v4209_v9, %v18076_v10  ;;  %v4495_v5 = vpop.f32.mrf.mxu0 }
 0x6b5   : > { %v14689_v17 = vadd.f32 %v4495_v5, %v18078_v50  ;;  %v4211_v57 = vpop.f32.mrf.mxu1  ;;  %v18084_v5 = vld [vmem:[#allocation9_spill] sm:$0xff] }
 0x6b6   : > { %18077 = vst [vmem:[#allocation19_spill] sm:$0xff] %v14686_v21  ;;  %v4497_v8 = vpop.f32.mrf.mxu0 }
 0x6b7   : > { %18079 = vst [vmem:[#allocation18_spill] sm:$0xff] %v14689_v17 }
 0x6b9   : > { %v4214_v52 = vpop.f32.mrf.mxu1 }
 0x6ba   : > { %v14692_v40 = vadd.f32 %v4214_v52, %v18080_v1  ;;  %v4500_v19 = vpop.f32.mrf.mxu0 }
 0x6bb   : > { %v14695_v36 = vadd.f32 %v4500_v19, %v18082_v48  ;;  %v4216_v13 = vpop.f32.mrf.mxu1  ;;  %v18085_v19 = vld [vmem:[#allocation10_spill] sm:$0xff] }
 0x6bc   : > { %18081 = vst [vmem:[#allocation20_spill] sm:$0xff] %v14692_v40  ;;  %v4502_v23 = vpop.f32.mrf.mxu0 }
 0x6bd   : > { %18083 = vst [vmem:[#allocation2_spill] sm:$0xff] %v14695_v36 }
 0x6bf   : > { %v14697_v35 = vpop.f32.mrf.mxu0 }
 0x6c1   : > { %v10862_v6 = vpop.f32.mrf.mxu0 }
 0x6c3   : > { %v14699_v16 = vpop.f32.mrf.mxu0 }
 0x6c5   : > { %v10865_v29 = vpop.f32.mrf.mxu0 }
 0x6c7   : > { %v14701_v32 = vpop.f32.mrf.mxu0 }
 0x6c9   : > { %v10868_v33 = vpop.f32.mrf.mxu0 }
 0x6ca   : > { %v18086_v33 = vld [vmem:[#allocation11_spill] sm:$0xff] }
 0x6cb   : > { %v14703_v60 = vpop.f32.mrf.mxu0 }
 0x6cd   : > { %v10871_v15 = vpop.f32.mrf.mxu0 }
 0x6cf   : > { %v14705_v41 = vpop.f32.mrf.mxu0 }
 0x6d1   : > { %v10874_v34 = vpop.f32.mrf.mxu0 }
 0x6d3   : > { %v14707_v9 = vpop.f32.mrf.mxu0 }
 0x6d4   : > { %v4327_v10 = vpop.f32.mrf.mxu1 }
 0x6d5   : > { %v14710_v50 = vadd.f32 %v4327_v10, %v18084_v5  ;;  %v10877_v57 = vpop.f32.mrf.mxu0 }
 0x6d6   : > { %v4329_v8 = vpop.f32.mrf.mxu1  ;;  %v18088_v57 = vld [vmem:[#allocation12_spill] sm:$0xff] }
 0x6d7   : > { %v14712_v52 = vpop.f32.mrf.mxu0 }
 0x6d8   : > { %v4332_v1 = vpop.f32.mrf.mxu1 }
 0x6d9   : > { %v14715_v48 = vadd.f32 %v4332_v1, %v18085_v19  ;;  %v10880_v13 = vpop.f32.mrf.mxu0 }
 0x6da   : > { %v4334_v23 = vpop.f32.mrf.mxu1  ;;  %v18090_v13 = vld [vmem:[#allocation13_spill] sm:$0xff] }
 0x6db   : > { %v14717_v6 = vpop.f32.mrf.mxu0 }
 0x6dc   : > { %v4337_v29 = vpop.f32.mrf.mxu1 }
 0x6dd   : > { %v14720_v15 = vadd.f32 %v4337_v29, %v18086_v33  ;;  %v10883_v34 = vpop.f32.mrf.mxu0 }
 0x6de   : > { %v4339_v36 = vpop.f32.mrf.mxu1 }
 0x6df   : > { %18087 = vst [vmem:[#allocation9_spill] sm:$0xff] %v14720_v15  ;;  %v14722_v10 = vpop.f32.mrf.mxu0  ;;  %v18092_v36 = vld [vmem:[#allocation14_spill] sm:$0xff] }
 0x6e0   : > { %v4342_v5 = vpop.f32.mrf.mxu1 }
 0x6e1   : > { %v14725_v8 = vadd.f32 %v4342_v5, %v18088_v57  ;;  %v10886_v17 = vpop.f32.mrf.mxu0 }
 0x6e2   : > { %v4344_v46 = vpop.f32.mrf.mxu1 }
 0x6e3   : > { %18089 = vst [vmem:[#allocation10_spill] sm:$0xff] %v14725_v8  ;;  %v14727_v1 = vpop.f32.mrf.mxu0  ;;  %v18094_v46 = vld [vmem:[#allocation15_spill] sm:$0xff] }
 0x6e4   : > { %v4347_v19 = vpop.f32.mrf.mxu1 }
 0x6e5   : > { %v14730_v23 = vadd.f32 %v4347_v19, %v18090_v13  ;;  %v10889_v51 = vpop.f32.mrf.mxu0 }
 0x6e6   : > { %v4349_v37 = vpop.f32.mrf.mxu1 }
 0x6e7   : > { %18091 = vst [vmem:[#allocation11_spill] sm:$0xff] %v14730_v23  ;;  %v14732_v29 = vpop.f32.mrf.mxu0 }
 0x6e8   : > { %v4352_v33 = vpop.f32.mrf.mxu1 }
 0x6e9   : > { %v14735_v34 = vadd.f32 %v4352_v33, %v18092_v36  ;;  %v10892_v18 = vpop.f32.mrf.mxu0 }
 0x6ea   : > { %v4354_v3 = vpop.f32.mrf.mxu1 }
 0x6eb   : > { %18093 = vst [vmem:[#allocation12_spill] sm:$0xff] %v14735_v34  ;;  %v14737_v5 = vpop.f32.mrf.mxu0 }
 0x6ec   : > { %v4357_v17 = vpop.f32.mrf.mxu1 }
 0x6ed   : > { %v14740_v57 = vadd.f32 %v4357_v17, %v18094_v46  ;;  %v10895_v40 = vpop.f32.mrf.mxu0 }
 0x6ee   : > { %v4359_v21 = vpop.f32.mrf.mxu1 }
 0x6ef   : > { %18095 = vst [vmem:[#allocation13_spill] sm:$0xff] %v14740_v57  ;;  %v14742_v19 = vpop.f32.mrf.mxu0 }
 0x6f1   : > { %v10898_v51 = vpop.f32.mrf.mxu0 }
 0x6f2   : > { %v18096_v51 = vld [vmem:[#allocation6_spill] sm:$0xff] }
 0x6f3   : > { %v14744_v37 = vpop.f32.mrf.mxu0 }
 0x6f5   : > { %v10901_v13 = vpop.f32.mrf.mxu0 }
 0x6f7   : > { %v14746_v23 = vpop.f32.mrf.mxu0 }
 0x6f9   : > { %v10904_v33 = vpop.f32.mrf.mxu0 }
 0x6fb   : > { %v14748_v36 = vpop.f32.mrf.mxu0 }
 0x6fc   : > { %4889 = vmatpush1.msra.mxu1 %v14748_v36  ;;  %5032 = vmatpush1.msra.mxu0 %v14748_v36 }
 0x6fd   : > { %v10907_v3 = vpop.f32.mrf.mxu0  ;;  %4890 = vmatprep.subr.mxu1 %v17943_v14  ;;  %5033 = vmatprep.subr.mxu0 %v17943_v14 }
 0x6fe   : > { %4891 = vmatpush1.msra.mxu1 %v14746_v23  ;;  %5034 = vmatpush1.msra.mxu0 %v14746_v23 }
 0x6ff   : > { %v14756_v18 = vpop.f32.mrf.mxu0  ;;  %4892 = vmatprep.subr.mxu1 %v17943_v14  ;;  %5035 = vmatprep.subr.mxu0 %v17943_v14 }
 0x700   : > { %4893 = vmatpush1.msra.mxu1 %v14744_v37  ;;  %5036 = vmatpush1.msra.mxu0 %v14744_v37 }
 0x701   : > { %v10910_v21 = vpop.f32.mrf.mxu0  ;;  %4894 = vmatprep.subr.mxu1 %v17943_v14  ;;  %5037 = vmatprep.subr.mxu0 %v17943_v14 }
 0x702   : > { %4895 = vmatpush1.msra.mxu1 %v14742_v19  ;;  %5038 = vmatpush1.msra.mxu0 %v14742_v19 }
 0x703   : > { %v14766_v40 = vpop.f32.mrf.mxu0  ;;  %4896 = vmatprep.subr.mxu1 %v17943_v14  ;;  %5039 = vmatprep.subr.mxu0 %v17943_v14 }
 0x704   : > { %4897 = vmatpush1.msra.mxu1 %v14737_v5  ;;  %5040 = vmatpush1.msra.mxu0 %v14737_v5 }
 0x705   : > { %v10913_v17 = vpop.f32.mrf.mxu0  ;;  %4898 = vmatprep.subr.mxu1 %v17943_v14  ;;  %5041 = vmatprep.subr.mxu0 %v17943_v14 }
 0x706   : > { %4899 = vmatpush1.msra.mxu1 %v14732_v29  ;;  %5042 = vmatpush1.msra.mxu0 %v14732_v29  ;;  %v4613_v46 = vpop.f32.mrf.mxu1 }
 0x707   : > { %v14777_v13 = vadd.f32 %v4613_v46, %v18096_v51  ;;  %v14779_v33 = vpop.f32.mrf.mxu0  ;;  %4900 = vmatprep.subr.mxu1 %v17943_v14  ;;  %5043 = vmatprep.subr.mxu0 %v17943_v14  ;;  %v18098_v46 = vld [vmem:[#allocation3_spill] sm:$0xff] }
 0x708   : > { %4901 = vmatpush1.msra.mxu1 %v14727_v1  ;;  %5044 = vmatpush1.msra.mxu0 %v14727_v1  ;;  %v4615_v3 = vpop.f32.mrf.mxu1 }
 0x709   : > { %18097 = vst [vmem:[#allocation14_spill] sm:$0xff] %v14777_v13  ;;  %v10916_v21 = vpop.f32.mrf.mxu0  ;;  %4902 = vmatprep.subr.mxu1 %v17943_v14  ;;  %5045 = vmatprep.subr.mxu0 %v17943_v14 }
 0x70a   : > { %4903 = vmatpush1.msra.mxu1 %v14722_v10  ;;  %5046 = vmatpush1.msra.mxu0 %v14722_v10  ;;  %v4618_v17 = vpop.f32.mrf.mxu1 }
 0x70b   : > { %v14790_v51 = vadd.f32 %v4618_v17, %v18098_v46  ;;  %v14792_v13 = vpop.f32.mrf.mxu0  ;;  %4904 = vmatprep.subr.mxu1 %v17943_v14  ;;  %5047 = vmatprep.subr.mxu0 %v17943_v14  ;;  %v18100_v46 = vld [vmem:[#allocation7_spill] sm:$0xff] }
 0x70c   : > { %4905 = vmatpush1.msra.mxu1 %v14717_v6  ;;  %5048 = vmatpush1.msra.mxu0 %v14717_v6  ;;  %v4620_v3 = vpop.f32.mrf.mxu1 }
 0x70d   : > { %18099 = vst [vmem:[#allocation15_spill] sm:$0xff] %v14790_v51  ;;  %v10919_v21 = vpop.f32.mrf.mxu0  ;;  %4906 = vmatprep.subr.mxu1 %v17943_v14  ;;  %5049 = vmatprep.subr.mxu0 %v17943_v14 }
 0x70e   : > { %4907 = vmatpush1.msra.mxu1 %v14712_v52  ;;  %5050 = vmatpush1.msra.mxu0 %v14712_v52  ;;  %v4623_v17 = vpop.f32.mrf.mxu1 }
 0x70f   : > { %v14803_v51 = vadd.f32 %v4623_v17, %v18100_v46  ;;  %v14805_v57 = vpop.f32.mrf.mxu0  ;;  %4908 = vmatprep.subr.mxu1 %v17943_v14  ;;  %5051 = vmatprep.subr.mxu0 %v17943_v14  ;;  %v18102_v46 = vld [vmem:[#allocation4_spill] sm:$0xff] }
 0x710   : > { %4909 = vmatpush1.msra.mxu1 %v14707_v9  ;;  %5052 = vmatpush1.msra.mxu0 %v14707_v9  ;;  %v4625_v3 = vpop.f32.mrf.mxu1 }
 0x711   : > { %18101 = vst [vmem:[#allocation6_spill] sm:$0xff] %v14803_v51  ;;  %v10922_v21 = vpop.f32.mrf.mxu0  ;;  %4910 = vmatprep.subr.mxu1 %v17943_v14  ;;  %5053 = vmatprep.subr.mxu0 %v17943_v14 }
 0x712   : > { %4911 = vmatpush1.msra.mxu1 %v14705_v41  ;;  %5054 = vmatpush1.msra.mxu0 %v14705_v41  ;;  %v4628_v17 = vpop.f32.mrf.mxu1 }
 0x713   : > { %v14816_v51 = vadd.f32 %v4628_v17, %v18102_v46  ;;  %v14818_v34 = vpop.f32.mrf.mxu0  ;;  %4912 = vmatprep.subr.mxu1 %v17943_v14  ;;  %5055 = vmatprep.subr.mxu0 %v17943_v14  ;;  %v18104_v46 = vld [vmem:[#allocation8_spill] sm:$0xff] }
 0x714   : > { %4913 = vmatpush1.msra.mxu1 %v14703_v60  ;;  %5056 = vmatpush1.msra.mxu0 %v14703_v60  ;;  %v4630_v3 = vpop.f32.mrf.mxu1 }
 0x715   : > { %18103 = vst [vmem:[#allocation3_spill] sm:$0xff] %v14816_v51  ;;  %v10925_v21 = vpop.f32.mrf.mxu0  ;;  %4914 = vmatprep.subr.mxu1 %v17943_v14  ;;  %5057 = vmatprep.subr.mxu0 %v17943_v14 }
 0x716   : > { %4915 = vmatpush1.msra.mxu1 %v14701_v32  ;;  %5058 = vmatpush1.msra.mxu0 %v14701_v32  ;;  %v4633_v17 = vpop.f32.mrf.mxu1 }
 0x717   : > { %v14829_v51 = vadd.f32 %v4633_v17, %v18104_v46  ;;  %v14831_v39 = vpop.f32.mrf.mxu0  ;;  %4916 = vmatprep.subr.mxu1 %v17943_v14  ;;  %5059 = vmatprep.subr.mxu0 %v17943_v14 }
 0x718   : > { %4917 = vmatpush1.msra.mxu1 %v14699_v16  ;;  %5060 = vmatpush1.msra.mxu0 %v14699_v16  ;;  %v4635_v3 = vpop.f32.mrf.mxu1 }
 0x719   : > { %18105 = vst [vmem:[#allocation7_spill] sm:$0xff] %v14829_v51  ;;  %v10928_v21 = vpop.f32.mrf.mxu0  ;;  %4918 = vmatprep.subr.mxu1 %v17943_v14  ;;  %5061 = vmatprep.subr.mxu0 %v17943_v14 }
 0x71a   : > { %4919 = vmatpush1.msra.mxu1 %v14697_v35  ;;  %5062 = vmatpush1.msra.mxu0 %v14697_v35  ;;  %v4638_v17 = vpop.f32.mrf.mxu1 }
 0x71b   : > { %v14842_v46 = vadd.f32 %v4638_v17, %v14192_v26  ;;  %v14844_v51 = vpop.f32.mrf.mxu0  ;;  %4934 = vmatprep.subr.mxu1 %v17943_v14  ;;  %5077 = vmatprep.subr.mxu0 %v17943_v14 }
 0x71c   : > { %v4640_v3 = vpop.f32.mrf.mxu1 }
 0x71d   : > { %v10931_v21 = vpop.f32.mrf.mxu0  ;;  %v9279_v3 = vld [vmem:[%s17895_s3 + $0x718] sm:$0xff] }
 0x71e   : > { %v4643_v8 = vpop.f32.mrf.mxu1  ;;  %v9301_v21 = vld [vmem:[%s17895_s3 + $0x788] sm:$0xff] }
 0x71f   : > { %v14849_v31 = vadd.f32 %v4643_v8, %v14199_v54  ;;  %v14851_v15 = vpop.f32.mrf.mxu0  ;;  %v9276_v54 = vld [vmem:[%s17895_s3 + $0x700] sm:$0xff]  ;;  %v9298_v8 = vld [vmem:[%s17895_s3 + $0x770] sm:$0xff] }
 0x720   : > { %9290 = vmatpush2.msk.msra.mxu1 %vm2115_vm5, %v14851_v15  ;;  %9312 = vmatpush2.msk.msra.mxu0 %vm2115_vm5, %v14851_v15  ;;  %v4645_v26 = vpop.f32.mrf.mxu1 }
 0x721   : > { %v10934_v17 = vpop.f32.mrf.mxu0  ;;  %4936 = vmatprep.subr.mxu1 %v17943_v14  ;;  %5079 = vmatprep.subr.mxu0 %v17943_v14  ;;  %v9278_v26 = vld [vmem:[%s17895_s3 + $0x710] sm:$0xff] }
 0x722   : > { %4937 = vmatpush2.msra.mxu1 %v14844_v51  ;;  %5080 = vmatpush2.msra.mxu0 %v14844_v51  ;;  %v9300_v17 = vld [vmem:[%s17895_s3 + $0x780] sm:$0xff] }
 0x723   : > { %4938 = vmatprep.subr.mxu1 %v17943_v14  ;;  %5081 = vmatprep.subr.mxu0 %v17943_v14 }
 0x724   : > { %4939 = vmatpush2.msra.mxu1 %v14831_v39  ;;  %5082 = vmatpush2.msra.mxu0 %v14831_v39 }
 0x725   : > { %4940 = vmatprep.subr.mxu1 %v17943_v14  ;;  %5083 = vmatprep.subr.mxu0 %v17943_v14 }
 0x726   : > { %4941 = vmatpush2.msra.mxu1 %v14818_v34  ;;  %5084 = vmatpush2.msra.mxu0 %v14818_v34 }
 0x727   : > { %4942 = vmatprep.subr.mxu1 %v17943_v14  ;;  %5085 = vmatprep.subr.mxu0 %v17943_v14 }
 0x728   : > { %4943 = vmatpush2.msra.mxu1 %v14805_v57  ;;  %5086 = vmatpush2.msra.mxu0 %v14805_v57 }
 0x729   : > { %4944 = vmatprep.subr.mxu1 %v17943_v14  ;;  %5087 = vmatprep.subr.mxu0 %v17943_v14 }
 0x72a   : > { %4945 = vmatpush2.msra.mxu1 %v14792_v13  ;;  %5088 = vmatpush2.msra.mxu0 %v14792_v13 }
 0x72b   : > { %4946 = vmatprep.subr.mxu1 %v17943_v14  ;;  %5089 = vmatprep.subr.mxu0 %v17943_v14 }
 0x72c   : > { %4947 = vmatpush2.msra.mxu1 %v14779_v33  ;;  %5090 = vmatpush2.msra.mxu0 %v14779_v33 }
 0x72d   : > { %4948 = vmatprep.subr.mxu1 %v17943_v14  ;;  %5091 = vmatprep.subr.mxu0 %v17943_v14 }
 0x72e   : > { %4949 = vmatpush2.msra.mxu1 %v14766_v40  ;;  %5092 = vmatpush2.msra.mxu0 %v14766_v40 }
 0x72f   : > { %4950 = vmatprep.subr.mxu1 %v17943_v14  ;;  %5093 = vmatprep.subr.mxu0 %v17943_v14 }
 0x730   : > { %4951 = vmatpush2.msra.mxu1 %v14756_v18  ;;  %5094 = vmatpush2.msra.mxu0 %v14756_v18 }
 0x731   : > { %4953 = vmatmul.mubr.f32.vlgmr.msra.gmra.mxu1 %v9276_v54  ;;  %5096 = vmatmul.mubr.f32.vlgmr.msra.gmra.mxu0 %v9298_v8  ;;  %v9303_v54 = vld [vmem:[%s17895_s3 + $0x798] sm:$0xff]  ;;  %v9302_v8 = vld [vmem:[%s17895_s3 + $0x790] sm:$0xff] }
 0x732   : > { %5174 = vmatprep.subr.mxu1 %v17943_v14  ;;  %5317 = vmatprep.subr.mxu0 %v17943_v14 }
 0x733   : > { %5175 = vmatpush1.msra.mxu1 %v14748_v36  ;;  %5318 = vmatpush1.msra.mxu0 %v14748_v36  ;;  %v9281_v36 = vld [vmem:[%s17895_s3 + $0x728] sm:$0xff] }
 0x734   : > { %5176 = vmatprep.subr.mxu1 %v17943_v14  ;;  %5319 = vmatprep.subr.mxu0 %v17943_v14 }
 0x735   : > { %9292 = vmatprep.mubr.msk.f32.mxu1 %vm2093_vm4, %v9279_v3  ;;  %9314 = vmatprep.mubr.msk.f32.mxu0 %vm2093_vm4, %v9301_v21  ;;  %v9305_v3 = vld [vmem:[%s17895_s3 + $0x7a8] sm:$0xff]  ;;  %v9304_v21 = vld [vmem:[%s17895_s3 + $0x7a0] sm:$0xff] }
 0x736   : > { %5177 = vmatpush1.msra.mxu1 %v14746_v23  ;;  %5320 = vmatpush1.msra.mxu0 %v14746_v23  ;;  %v9280_v23 = vld [vmem:[%s17895_s3 + $0x720] sm:$0xff] }
 0x737   : > { %4958 = vmatmul.mubr.f32.gmra.mxu1 %v9278_v26  ;;  %5101 = vmatmul.mubr.f32.gmra.mxu0 %v9300_v17  ;;  %v9307_v26 = vld [vmem:[%s17895_s3 + $0x7b8] sm:$0xff]  ;;  %v9306_v17 = vld [vmem:[%s17895_s3 + $0x7b0] sm:$0xff] }
 0x738   : > { %5178 = vmatprep.subr.mxu1 %v17943_v14  ;;  %5321 = vmatprep.subr.mxu0 %v17943_v14 }
 0x739   : > { %5179 = vmatpush1.msra.mxu1 %v14744_v37  ;;  %5322 = vmatpush1.msra.mxu0 %v14744_v37  ;;  %v9283_v37 = vld [vmem:[%s17895_s3 + $0x738] sm:$0xff] }
 0x73a   : > { %5180 = vmatprep.subr.mxu1 %v17943_v14  ;;  %5323 = vmatprep.subr.mxu0 %v17943_v14 }
 0x73b   : > { %9293 = vmatprep.mubr.msk.f32.mxu1 %vm2093_vm4, %v9281_v36  ;;  %9315 = vmatprep.mubr.msk.f32.mxu0 %vm2093_vm4, %v9303_v54  ;;  %v9309_v36 = vld [vmem:[%s17895_s3 + $0x7c8] sm:$0xff]  ;;  %v9308_v54 = vld [vmem:[%s17895_s3 + $0x7c0] sm:$0xff] }
 0x73c   : > { %5181 = vmatpush1.msra.mxu1 %v14742_v19  ;;  %5324 = vmatpush1.msra.mxu0 %v14742_v19  ;;  %v9282_v19 = vld [vmem:[%s17895_s3 + $0x730] sm:$0xff] }
 0x73d   : > { %4963 = vmatmul.mubr.f32.gmra.mxu1 %v9280_v23  ;;  %5106 = vmatmul.mubr.f32.gmra.mxu0 %v9302_v8  ;;  %v9311_v23 = vld [vmem:[%s17895_s3 + $0x7d8] sm:$0x1]  ;;  %v9310_v8 = vld [vmem:[%s17895_s3 + $0x7d0] sm:$0x1] }
 0x73e   : > { %5182 = vmatprep.subr.mxu1 %v17943_v14  ;;  %5325 = vmatprep.subr.mxu0 %v17943_v14 }
 0x73f   : > { %5183 = vmatpush1.msra.mxu1 %v14737_v5  ;;  %5326 = vmatpush1.msra.mxu0 %v14737_v5  ;;  %v9285_v5 = vld [vmem:[%s17895_s3 + $0x748] sm:$0xff] }
 0x740   : > { %5184 = vmatprep.subr.mxu1 %v17943_v14  ;;  %5327 = vmatprep.subr.mxu0 %v17943_v14 }
 0x741   : > { %9294 = vmatprep.mubr.msk.f32.mxu1 %vm2093_vm4, %v9283_v37  ;;  %9316 = vmatprep.mubr.msk.f32.mxu0 %vm2093_vm4, %v9305_v3  ;;  %v9349_v37 = vld [vmem:[%s17895_s3 + $0x888] sm:$0xff] }
 0x742   : > { %5185 = vmatpush1.msra.mxu1 %v14732_v29  ;;  %5328 = vmatpush1.msra.mxu0 %v14732_v29  ;;  %v9284_v29 = vld [vmem:[%s17895_s3 + $0x740] sm:$0xff]  ;;  %v9365_v3 = vld [vmem:[%s17896_s4 + $0xa8] sm:$0xff] }
 0x743   : > { %4968 = vmatmul.mubr.f32.gmra.mxu1 %v9282_v19  ;;  %5111 = vmatmul.mubr.f32.gmra.mxu0 %v9304_v21  ;;  %v9326_v19 = vld [vmem:[%s17895_s3 + $0x810] sm:$0xff]  ;;  %v9348_v21 = vld [vmem:[%s17895_s3 + $0x880] sm:$0xff] }
 0x744   : > { %5186 = vmatprep.subr.mxu1 %v17943_v14  ;;  %5329 = vmatprep.subr.mxu0 %v17943_v14 }
 0x745   : > { %5187 = vmatpush1.msra.mxu1 %v14727_v1  ;;  %5330 = vmatpush1.msra.mxu0 %v14727_v1  ;;  %v9287_v1 = vld [vmem:[%s17895_s3 + $0x758] sm:$0xff] }
 0x746   : > { %5188 = vmatprep.subr.mxu1 %v17943_v14  ;;  %5331 = vmatprep.subr.mxu0 %v17943_v14 }
 0x747   : > { %9295 = vmatprep.mubr.msk.f32.mxu1 %vm2093_vm4, %v9285_v5  ;;  %9317 = vmatprep.mubr.msk.f32.mxu0 %vm2093_vm4, %v9307_v26  ;;  %v9329_v5 = vld [vmem:[%s17895_s3 + $0x828] sm:$0xff]  ;;  %v9351_v26 = vld [vmem:[%s17895_s3 + $0x898] sm:$0xff] }
 0x748   : > { %5189 = vmatpush1.msra.mxu1 %v14722_v10  ;;  %5332 = vmatpush1.msra.mxu0 %v14722_v10  ;;  %v9286_v10 = vld [vmem:[%s17895_s3 + $0x750] sm:$0xff] }
 0x749   : > { %4973 = vmatmul.mubr.f32.gmra.mxu1 %v9284_v29  ;;  %5116 = vmatmul.mubr.f32.gmra.mxu0 %v9306_v17  ;;  %v9364_v29 = vld [vmem:[%s17896_s4 + $0xa0] sm:$0xff] }
 0x74a   : > { %5190 = vmatprep.subr.mxu1 %v17943_v14  ;;  %5333 = vmatprep.subr.mxu0 %v17943_v14  ;;  %v9328_v17 = vld [vmem:[%s17895_s3 + $0x820] sm:$0xff] }
 0x74b   : > { %5191 = vmatpush1.msra.mxu1 %v14717_v6  ;;  %5334 = vmatpush1.msra.mxu0 %v14717_v6  ;;  %v9289_v6 = vld [vmem:[%s17895_s3 + $0x768] sm:$0x1] }
 0x74c   : > { %5192 = vmatprep.subr.mxu1 %v17943_v14  ;;  %5335 = vmatprep.subr.mxu0 %v17943_v14 }
 0x74d   : > { %9296 = vmatprep.mubr.msk.f32.mxu1 %vm2093_vm4, %v9287_v1  ;;  %9318 = vmatprep.mubr.msk.f32.mxu0 %vm2093_vm4, %v9309_v36  ;;  %v9350_v1 = vld [vmem:[%s17895_s3 + $0x890] sm:$0xff]  ;;  %v9331_v36 = vld [vmem:[%s17895_s3 + $0x838] sm:$0xff] }
 0x74e   : > { %5193 = vmatpush1.msra.mxu1 %v14712_v52  ;;  %5336 = vmatpush1.msra.mxu0 %v14712_v52  ;;  %v9288_v52 = vld [vmem:[%s17895_s3 + $0x760] sm:$0x1] }
 0x74f   : > { %4978 = vmatmul.mubr.f32.gmra.mxu1 %v9286_v10  ;;  %5121 = vmatmul.mubr.f32.gmra.mxu0 %v9308_v54  ;;  %v9353_v10 = vld [vmem:[%s17895_s3 + $0x8a8] sm:$0xff]  ;;  %v9330_v54 = vld [vmem:[%s17895_s3 + $0x830] sm:$0xff] }
 0x750   : > { %5194 = vmatprep.subr.mxu1 %v17943_v14  ;;  %5337 = vmatprep.subr.mxu0 %v17943_v14 }
 0x751   : > { %5195 = vmatpush1.msra.mxu1 %v14707_v9  ;;  %5338 = vmatpush1.msra.mxu0 %v14707_v9  ;;  %v9367_v9 = vld [vmem:[%s17896_s4 + $0xb8] sm:$0xff] }
 0x752   : > { %5196 = vmatprep.subr.mxu1 %v17943_v14  ;;  %5339 = vmatprep.subr.mxu0 %v17943_v14 }
 0x753   : > { %9297 = vmatprep.mubr.msk.f32.mxu1 %vm2093_vm4, %v9289_v6  ;;  %9319 = vmatprep.mubr.msk.f32.mxu0 %vm2093_vm4, %v9311_v23  ;;  %v9352_v6 = vld [vmem:[%s17895_s3 + $0x8a0] sm:$0xff]  ;;  %v9333_v23 = vld [vmem:[%s17895_s3 + $0x848] sm:$0x1] }
 0x754   : > { %5197 = vmatpush1.msra.mxu1 %v14705_v41  ;;  %5340 = vmatpush1.msra.mxu0 %v14705_v41  ;;  %v9345_v41 = vld [vmem:[%s17895_s3 + $0x868] sm:$0xff] }
 0x755   : > { %4983 = vmatmul.mubr.f32.gmra.mxu1 %v9288_v52  ;;  %5126 = vmatmul.mubr.f32.gmra.mxu0 %v9310_v8  ;;  %v9355_v52 = vld [vmem:[%s17895_s3 + $0x8b8] sm:$0x1]  ;;  %v9332_v8 = vld [vmem:[%s17895_s3 + $0x840] sm:$0x1] }
 0x756   : > { %5198 = vmatprep.subr.mxu1 %v17943_v14  ;;  %5341 = vmatprep.subr.mxu0 %v17943_v14 }
 0x757   : > { %5199 = vmatpush1.msra.mxu1 %v14703_v60  ;;  %5342 = vmatpush1.msra.mxu0 %v14703_v60  ;;  %v9323_v60 = vld [vmem:[%s17895_s3 + $0x7f8] sm:$0xff] }
 0x758   : > { %5200 = vmatprep.subr.mxu1 %v17943_v14  ;;  %5343 = vmatprep.subr.mxu0 %v17943_v14 }
 0x759   : > { %5201 = vmatpush1.msra.mxu1 %v14701_v32  ;;  %5344 = vmatpush1.msra.mxu0 %v14701_v32  ;;  %v9342_v32 = vld [vmem:[%s17895_s3 + $0x850] sm:$0xff] }
 0x75a   : > { %5202 = vmatprep.subr.mxu1 %v17943_v14  ;;  %5345 = vmatprep.subr.mxu0 %v17943_v14 }
 0x75b   : > { %5203 = vmatpush1.msra.mxu1 %v14699_v16  ;;  %5346 = vmatpush1.msra.mxu0 %v14699_v16  ;;  %v9320_v16 = vld [vmem:[%s17895_s3 + $0x7e0] sm:$0xff] }
 0x75c   : > { %5204 = vmatprep.subr.mxu1 %v17943_v14  ;;  %5347 = vmatprep.subr.mxu0 %v17943_v14 }
 0x75d   : > { %5205 = vmatpush1.msra.mxu1 %v14697_v35  ;;  %5348 = vmatpush1.msra.mxu0 %v14697_v35  ;;  %v9343_v35 = vld [vmem:[%s17895_s3 + $0x858] sm:$0xff] }
 0x75e   : > { %5220 = vmatprep.subr.mxu1 %v17943_v14  ;;  %5363 = vmatprep.subr.mxu0 %v17943_v14 }
 0x75f   : > { %9334 = vmatpush2.msk.msra.mxu1 %vm2115_vm5, %v14851_v15  ;;  %9356 = vmatpush2.msk.msra.mxu0 %vm2115_vm5, %v14851_v15  ;;  %v9322_v15 = vld [vmem:[%s17895_s3 + $0x7f0] sm:$0xff] }
 0x760   : > { %5222 = vmatprep.subr.mxu1 %v17943_v14  ;;  %5365 = vmatprep.subr.mxu0 %v17943_v14 }
 0x761   : > { %5223 = vmatpush2.msra.mxu1 %v14844_v51  ;;  %5366 = vmatpush2.msra.mxu0 %v14844_v51  ;;  %v9327_v51 = vld [vmem:[%s17895_s3 + $0x818] sm:$0xff] }
 0x762   : > { %5224 = vmatprep.subr.mxu1 %v17943_v14  ;;  %5367 = vmatprep.subr.mxu0 %v17943_v14 }
 0x763   : > { %5225 = vmatpush2.msra.mxu1 %v14831_v39  ;;  %5368 = vmatpush2.msra.mxu0 %v14831_v39  ;;  %v9321_v39 = vld [vmem:[%s17895_s3 + $0x7e8] sm:$0xff] }
 0x764   : > { %5226 = vmatprep.subr.mxu1 %v17943_v14  ;;  %5369 = vmatprep.subr.mxu0 %v17943_v14 }
 0x765   : > { %5227 = vmatpush2.msra.mxu1 %v14818_v34  ;;  %5370 = vmatpush2.msra.mxu0 %v14818_v34  ;;  %v9344_v34 = vld [vmem:[%s17895_s3 + $0x860] sm:$0xff] }
 0x766   : > { %5228 = vmatprep.subr.mxu1 %v17943_v14  ;;  %5371 = vmatprep.subr.mxu0 %v17943_v14 }
 0x767   : > { %5229 = vmatpush2.msra.mxu1 %v14805_v57  ;;  %5372 = vmatpush2.msra.mxu0 %v14805_v57  ;;  %v9325_v57 = vld [vmem:[%s17895_s3 + $0x808] sm:$0xff] }
 0x768   : > { %5230 = vmatprep.subr.mxu1 %v17943_v14  ;;  %5373 = vmatprep.subr.mxu0 %v17943_v14 }
 0x769   : > { %5231 = vmatpush2.msra.mxu1 %v14792_v13  ;;  %5374 = vmatpush2.msra.mxu0 %v14792_v13  ;;  %v9324_v13 = vld [vmem:[%s17895_s3 + $0x800] sm:$0xff] }
 0x76a   : > { %5232 = vmatprep.subr.mxu1 %v17943_v14  ;;  %5375 = vmatprep.subr.mxu0 %v17943_v14 }
 0x76b   : > { %5233 = vmatpush2.msra.mxu1 %v14779_v33  ;;  %5376 = vmatpush2.msra.mxu0 %v14779_v33  ;;  %v9346_v33 = vld [vmem:[%s17895_s3 + $0x870] sm:$0xff] }
 0x76c   : > { %5234 = vmatprep.subr.mxu1 %v17943_v14  ;;  %5377 = vmatprep.subr.mxu0 %v17943_v14 }
 0x76d   : > { %5235 = vmatpush2.msra.mxu1 %v14766_v40  ;;  %5378 = vmatpush2.msra.mxu0 %v14766_v40  ;;  %v9366_v40 = vld [vmem:[%s17896_s4 + $0xb0] sm:$0xff] }
 0x76e   : > { %5236 = vmatprep.subr.mxu1 %v17943_v14  ;;  %5379 = vmatprep.subr.mxu0 %v17943_v14 }
 0x76f   : > { %5237 = vmatpush2.msra.mxu1 %v14756_v18  ;;  %9335 = vmatprep.mubr.msk.f32.mxu1 %vm2093_vm4, %v9321_v39  ;;  %v9354_v39 = vld [vmem:[%s17895_s3 + $0x8b0] sm:$0x1] }
 0x770   : > { %5380 = vmatpush2.msra.mxu0 %v14756_v18  ;;  %9357 = vmatprep.mubr.msk.f32.mxu0 %vm2093_vm4, %v9343_v35  ;;  %v9347_v18 = vld [vmem:[%s17895_s3 + $0x878] sm:$0xff] }
 0x771   : > { %5239 = vmatmul.mubr.f32.vlgmr.msra.gmra.mxu1 %v9320_v16  ;;  %5382 = vmatmul.mubr.f32.vlgmr.msra.gmra.mxu0 %v9342_v32 }
 0x772   : > { %9336 = vmatprep.mubr.msk.f32.mxu1 %vm2093_vm4, %v9323_v60  ;;  %9358 = vmatprep.mubr.msk.f32.mxu0 %vm2093_vm4, %v9345_v41 }
 0x773   : > { %10935 = vmatprep.subr.mxu1 %v17943_v14  ;;  %5658 = vmatprep.subr.mxu0 %v17943_v14 }
 0x774   : > { %10936 = vmatpush3.msra.mxu1 %v9367_v9 }
 0x775   : > { %5244 = vmatmul.mubr.f32.gmra.mxu1 %v9322_v15  ;;  %5387 = vmatmul.mubr.f32.gmra.mxu0 %v9344_v34 }
 0x776   : > { %9337 = vmatprep.mubr.msk.f32.mxu1 %vm2093_vm4, %v9325_v57  ;;  %9359 = vmatprep.mubr.msk.f32.mxu0 %vm2093_vm4, %v9347_v18 }
 0x777   : > { %10937 = vmatprep.subr.mxu1 %v17943_v14 }
 0x778   : > { %10938 = vmatpush3.msra.mxu1 %v9366_v40 }
 0x779   : > { %5249 = vmatmul.mubr.f32.gmra.mxu1 %v9324_v13  ;;  %5392 = vmatmul.mubr.f32.gmra.mxu0 %v9346_v33 }
 0x77a   : > { %9338 = vmatprep.mubr.msk.f32.mxu1 %vm2093_vm4, %v9327_v51  ;;  %9360 = vmatprep.mubr.msk.f32.mxu0 %vm2093_vm4, %v9349_v37  ;;  %v18106_v37 = vld [vmem:[#allocation9_spill] sm:$0xff] }
 0x77b   : > { %10939 = vmatprep.subr.mxu1 %v17943_v14 }
 0x77c   : > { %10940 = vmatpush3.msra.mxu1 %v9365_v3 }
 0x77d   : > { %5254 = vmatmul.mubr.f32.gmra.mxu1 %v9326_v19  ;;  %5397 = vmatmul.mubr.f32.gmra.mxu0 %v9348_v21 }
 0x77e   : > { %9339 = vmatprep.mubr.msk.f32.mxu1 %vm2093_vm4, %v9329_v5  ;;  %9361 = vmatprep.mubr.msk.f32.mxu0 %vm2093_vm4, %v9351_v26  ;;  %v18107_v26 = vld [vmem:[#allocation24_spill] sm:$0xff] }
 0x77f   : > { %10941 = vmatprep.subr.mxu1 %v17943_v14 }
 0x780   : > { %10942 = vmatpush3.msra.mxu1 %v9364_v29  ;;  %v18108_v29 = vld [vmem:[#allocation10_spill] sm:$0xff] }
 0x781   : > { %5259 = vmatmul.mubr.f32.gmra.mxu1 %v9328_v17  ;;  %5402 = vmatmul.mubr.f32.gmra.mxu0 %v9350_v1 }
 0x782   : > { %9340 = vmatprep.mubr.msk.f32.mxu1 %vm2093_vm4, %v9331_v36  ;;  %9362 = vmatprep.mubr.msk.f32.mxu0 %vm2093_vm4, %v9353_v10 }
 0x783   : > { %5801 = vmatprep.subr.mxu1 %v17943_v14 }
 0x785   : > { %5264 = vmatmul.mubr.f32.gmra.mxu1 %v9330_v54  ;;  %5407 = vmatmul.mubr.f32.gmra.mxu0 %v9352_v6  ;;  %v18109_v54 = vld [vmem:[#allocation5_spill] sm:$0xff]  ;;  %v18110_v6 = vld [vmem:[#allocation11_spill] sm:$0xff] }
 0x786   : > { %9341 = vmatprep.mubr.msk.f32.mxu1 %vm2093_vm4, %v9333_v23  ;;  %9363 = vmatprep.mubr.msk.f32.mxu0 %vm2093_vm4, %v9355_v52 }
 0x789   : > { %5269 = vmatmul.mubr.f32.gmra.mxu1 %v9332_v8  ;;  %5412 = vmatmul.mubr.f32.gmra.mxu0 %v9354_v39 }
 0x78a   : > { %10943 = vmatprep.mubr.msk.f32.mxu1 %vm11292_vm1, %v17943_v14 }
 0x78d   : > { %10944 = vmatmul.mubr.msk.f32.vlgmr.msra.gmra.mxu1 %vm1558_vm3, %v11974_v0 }
 0x78e   : > { %10946 = vmatprep.mubr.msk.f32.mxu1 %vm11292_vm1, %v17943_v14 }
 0x791   : > { %10947 = vmatmul.mubr.msk.f32.gmra.mxu1 %vm1558_vm3, %v11990_v44 }
 0x792   : > { %10949 = vmatprep.mubr.msk.f32.mxu1 %vm11292_vm1, %v17943_v14 }
 0x795   : > { %10950 = vmatmul.mubr.msk.f32.gmra.mxu1 %vm1558_vm3, %v12006_v43 }
 0x796   : > { %10952 = vmatprep.mubr.msk.f32.mxu1 %vm11292_vm1, %v17943_v14 }
 0x799   : > { %10953 = vmatmul.mubr.msk.f32.gmra.mxu1 %vm1558_vm3, %v12022_v7 }
 0x79a   : > { %10955 = vmatprep.mubr.msk.f32.mxu1 %vm11292_vm1, %v17943_v14 }
 0x79d   : > { %10956 = vmatmul.mubr.msk.f32.gmra.mxu1 %vm1558_vm3, %v12039_v59 }
 0x79e   : > { %10958 = vmatprep.mubr.msk.f32.mxu1 %vm11292_vm1, %v17943_v14 }
 0x7a1   : > { %10959 = vmatmul.mubr.msk.f32.gmra.mxu1 %vm1558_vm3, %v12056_v24 }
 0x7a2   : > { %10961 = vmatprep.mubr.msk.f32.mxu1 %vm11292_vm1, %v17943_v14 }
 0x7a5   : > { %10962 = vmatmul.mubr.msk.f32.gmra.mxu1 %vm1558_vm3, %v12073_v53 }
 0x7a6   : > { %10964 = vmatprep.mubr.msk.f32.mxu1 %vm11292_vm1, %v17943_v14 }
 0x7a9   : > { %10965 = vmatmul.mubr.msk.f32.gmra.mxu1 %vm1558_vm3, %v12090_v27 }
 0x7aa   : > { %10967 = vmatprep.mubr.msk.f32.mxu1 %vm11292_vm1, %v17943_v14 }
 0x7ad   : > { %10968 = vmatmul.mubr.msk.f32.gmra.mxu1 %vm1558_vm3, %v12107_v11 }
 0x7ae   : > { %10970 = vmatprep.mubr.msk.f32.mxu1 %vm11292_vm1, %v17943_v14 }
 0x7b1   : > { %10971 = vmatmul.mubr.msk.f32.gmra.mxu1 %vm1558_vm3, %v17988_v63 }
 0x7b2   : > { %10973 = vmatprep.mubr.msk.f32.mxu1 %vm11292_vm1, %v17943_v14 }
 0x7b5   : > { %10974 = vmatmul.mubr.msk.f32.gmra.mxu1 %vm1558_vm3, %v17990_v38 }
 0x7b6   : > { %10976 = vmatprep.mubr.msk.f32.mxu1 %vm11292_vm1, %v17943_v14 }
 0x7b9   : > { %10977 = vmatmul.mubr.msk.f32.gmra.mxu1 %vm1558_vm3, %v17991_v58 }
 0x7ba   : > { %10979 = vmatprep.mubr.msk.f32.mxu1 %vm11292_vm1, %v17943_v14 }
 0x7bd   : > { %10980 = vmatmul.mubr.msk.f32.gmra.mxu1 %vm1558_vm3, %v17992_v30 }
 0x7be   : > { %10982 = vmatprep.mubr.msk.f32.mxu1 %vm11292_vm1, %v17943_v14 }
 0x7c1   : > { %10983 = vmatmul.mubr.msk.f32.gmra.mxu1 %vm1558_vm3, %v17993_v61 }
 0x7c2   : > { %10985 = vmatprep.mubr.msk.f32.mxu1 %vm11292_vm1, %v17943_v14 }
 0x7c5   : > { %10986 = vmatmul.mubr.msk.f32.gmra.mxu1 %vm1558_vm3, %v17994_v22 }
 0x7c6   : > { %10988 = vmatprep.mubr.msk.f32.mxu1 %vm11292_vm1, %v17943_v14 }
 0x7c9   : > { %10989 = vmatmul.mubr.msk.f32.gmra.mxu1 %vm1558_vm3, %v17995_v49 }
 0x7ca   : > { %10991 = vmatprep.mubr.msk.f32.mxu1 %vm11292_vm1, %v17943_v14 }
 0x7cd   : > { %10992 = vmatmul.mubr.msk.f32.gmra.mxu1 %vm1558_vm3, %v17996_v45 }
 0x7ce   : > { %10994 = vmatprep.mubr.msk.f32.mxu1 %vm11292_vm1, %v17943_v14 }
 0x7d1   : > { %10995 = vmatmul.mubr.msk.f32.gmra.mxu1 %vm1558_vm3, %v17998_v55 }
 0x7d2   : > { %10997 = vmatprep.mubr.msk.f32.mxu1 %vm11292_vm1, %v17943_v14 }
 0x7d5   : > { %10998 = vmatmul.mubr.msk.f32.gmra.mxu1 %vm1558_vm3, %v17999_v42 }
 0x7d6   : > { %11000 = vmatprep.mubr.msk.f32.mxu1 %vm11292_vm1, %v17943_v14 }
 0x7d9   : > { %11001 = vmatmul.mubr.msk.f32.gmra.mxu1 %vm1558_vm3, %v18001_v25 }
 0x7da   : > { %11003 = vmatprep.mubr.msk.f32.mxu1 %vm11292_vm1, %v17943_v14 }
 0x7dd   : > { %11004 = vmatmul.mubr.msk.f32.gmra.mxu1 %vm1558_vm3, %v18003_v20 }
 0x7de   : > { %11006 = vmatprep.mubr.msk.f32.mxu1 %vm11292_vm1, %v17943_v14 }
 0x7e1   : > { %11007 = vmatmul.mubr.msk.f32.gmra.mxu1 %vm1558_vm3, %v18004_v28 }
 0x7e2   : > { %11009 = vmatprep.mubr.msk.f32.mxu1 %vm11292_vm1, %v17943_v14 }
 0x7e5   : > { %11010 = vmatmul.mubr.msk.f32.gmra.mxu1 %vm1558_vm3, %v18006_v62 }
 0x7e6   : > { %11012 = vmatprep.mubr.msk.f32.mxu1 %vm11292_vm1, %v17943_v14 }
 0x7e9   : > { %11013 = vmatmul.mubr.msk.f32.gmra.mxu1 %vm1558_vm3, %v18008_v4 }
 0x7ea   : > { %11015 = vmatprep.mubr.msk.f32.mxu1 %vm11292_vm1, %v17943_v14 }
 0x7ed   : > { %11016 = vmatmul.mubr.msk.f32.gmra.mxu1 %vm1558_vm3, %v18009_v12 }
 0x7f1   : > { %v4954_v35 = vpop.f32.mrf.mxu1  ;;  %v5097_v16 = vpop.f32.mrf.mxu0 }
 0x7f2   : > { %v15298_v32 = vadd.f32 %v4954_v35, %v14648_v2  ;;  %v15301_v60 = vadd.f32 %v5097_v16, %v14710_v50  ;;  %v18112_v16 = vld [vmem:[#allocation19_spill] sm:$0xff] }
 0x7f3   : > { %v4956_v41 = vpop.f32.mrf.mxu1  ;;  %v5099_v9 = vpop.f32.mrf.mxu0 }
 0x7f4   : > { %v18114_v9 = vld [vmem:[#allocation12_spill] sm:$0xff] }
 0x7f7   : > { %v4959_v15 = vpop.f32.mrf.mxu1  ;;  %v5102_v34 = vpop.f32.mrf.mxu0 }
 0x7f8   : > { %v15304_v57 = vadd.f32 %v4959_v15, %v14654_v56  ;;  %v15307_v18 = vadd.f32 %v5102_v34, %v14715_v48 }
 0x7f9   : > { %v4961_v40 = vpop.f32.mrf.mxu1  ;;  %v5104_v13 = vpop.f32.mrf.mxu0 }
 0x7fd   : > { %v4964_v33 = vpop.f32.mrf.mxu1  ;;  %v5107_v51 = vpop.f32.mrf.mxu0 }
 0x7fe   : > { %v15310_v2 = vadd.f32 %v4964_v33, %v14660_v47  ;;  %v15313_v50 = vadd.f32 %v5107_v51, %v18106_v37  ;;  %v18116_v51 = vld [vmem:[#allocation20_spill] sm:$0xff] }
 0x7ff   : > { %v4966_v3 = vpop.f32.mrf.mxu1  ;;  %v5109_v19 = vpop.f32.mrf.mxu0 }
 0x800   : > { %v18118_v3 = vld [vmem:[#allocation13_spill] sm:$0xff] }
 0x803   : > { %v4969_v21 = vpop.f32.mrf.mxu1  ;;  %v5112_v5 = vpop.f32.mrf.mxu0 }
 0x804   : > { %v15316_v56 = vadd.f32 %v4969_v21, %v18107_v26  ;;  %v15319_v48 = vadd.f32 %v5112_v5, %v18108_v29 }
 0x805   : > { %v4971_v17 = vpop.f32.mrf.mxu1  ;;  %v5114_v1 = vpop.f32.mrf.mxu0 }
 0x806   : > { %v18120_v17 = vld [vmem:[#allocation21_spill] sm:$0xff] }
 0x809   : > { %v4974_v36 = vpop.f32.mrf.mxu1  ;;  %v5117_v10 = vpop.f32.mrf.mxu0 }
 0x80a   : > { %v15322_v47 = vadd.f32 %v4974_v36, %v18109_v54  ;;  %v15325_v23 = vadd.f32 %v5117_v10, %v18110_v6  ;;  %v18122_v36 = vld [vmem:[#allocation14_spill] sm:$0xff] }
 0x80b   : > { %v4976_v52 = vpop.f32.mrf.mxu1  ;;  %v5119_v8 = vpop.f32.mrf.mxu0 }
 0x80c   : > { %18111 = vst [vmem:[#allocation4_spill] sm:$0xff] %v15325_v23  ;;  %v9418_v23 = vld [vmem:[%s17895_s3 + $0x948] sm:$0xff] }
 0x80f   : > { %v4979_v39 = vpop.f32.mrf.mxu1  ;;  %v5122_v35 = vpop.f32.mrf.mxu0 }
 0x810   : > { %v15328_v41 = vadd.f32 %v4979_v39, %v18112_v16  ;;  %v15331_v15 = vadd.f32 %v5122_v35, %v18114_v9  ;;  %v18124_v39 = vld [vmem:[#allocation22_spill] sm:$0xff]  ;;  %v18126_v16 = vld [vmem:[#allocation15_spill] sm:$0xff] }
 0x811   : > { %v4981_v34 = vpop.f32.mrf.mxu1  ;;  %v5124_v40 = vpop.f32.mrf.mxu0 }
 0x812   : > { %18113 = vst [vmem:[#allocation8_spill] sm:$0xff] %v15328_v41  ;;  %18115 = vst [vmem:[#allocation9_spill] sm:$0xff] %v15331_v15  ;;  %v9396_v41 = vld [vmem:[%s17895_s3 + $0x8d8] sm:$0xff] }
 0x815   : > { %v4984_v13 = vpop.f32.mrf.mxu1  ;;  %v5127_v33 = vpop.f32.mrf.mxu0 }
 0x816   : > { %v15334_v37 = vadd.f32 %v4984_v13, %v18116_v51  ;;  %v15337_v19 = vadd.f32 %v5127_v33, %v18118_v3  ;;  %v18128_v51 = vld [vmem:[#allocation23_spill] sm:$0xff] }
 0x817   : > { %v4986_v21 = vpop.f32.mrf.mxu1  ;;  %v5129_v5 = vpop.f32.mrf.mxu0 }
 0x818   : > { %18117 = vst [vmem:[#allocation24_spill] sm:$0xff] %v15334_v37  ;;  %18119 = vst [vmem:[#allocation10_spill] sm:$0xff] %v15337_v19  ;;  %v18130_v21 = vld [vmem:[#allocation6_spill] sm:$0xff] }
 0x831   : > { %v5240_v26 = vpop.f32.mrf.mxu1  ;;  %v5383_v29 = vpop.f32.mrf.mxu0 }
 0x832   : > { %v15340_v1 = vadd.f32 %v5240_v26, %v18120_v17  ;;  %v15343_v10 = vadd.f32 %v5383_v29, %v18122_v36 }
 0x833   : > { %v5242_v54 = vpop.f32.mrf.mxu1  ;;  %v5385_v6 = vpop.f32.mrf.mxu0 }
 0x834   : > { %18121 = vst [vmem:[#allocation5_spill] sm:$0xff] %v15340_v1  ;;  %18123 = vst [vmem:[#allocation11_spill] sm:$0xff] %v15343_v10  ;;  %v9394_v54 = vld [vmem:[%s17895_s3 + $0x8c8] sm:$0xff]  ;;  %v9416_v6 = vld [vmem:[%s17895_s3 + $0x938] sm:$0xff] }
 0x835   : > { %v5245_v52 = vpop.f32.mrf.mxu1  ;;  %v5388_v8 = vpop.f32.mrf.mxu0  ;;  %9408 = vmatprep.mubr.msk.f32.mxu0 %vm2093_vm4, %v9394_v54  ;;  %9430 = vmatprep.mubr.msk.f32.mxu1 %vm2093_vm4, %v9416_v6 }
 0x836   : > { %v15346_v35 = vadd.f32 %v5245_v52, %v18124_v39  ;;  %v15349_v9 = vadd.f32 %v5388_v8, %v18126_v16  ;;  %v18132_v52 = vld [vmem:[#allocation16_spill] sm:$0xff]  ;;  %v18134_v39 = vld [vmem:[#allocation3_spill] sm:$0xff] }
 0x837   : > { %v5247_v34 = vpop.f32.mrf.mxu1  ;;  %v5390_v40 = vpop.f32.mrf.mxu0 }
 0x838   : > { %18125 = vst [vmem:[#allocation19_spill] sm:$0xff] %v15346_v35  ;;  %18127 = vst [vmem:[#allocation12_spill] sm:$0xff] %v15349_v9 }
 0x839   : > { %v5250_v13 = vpop.f32.mrf.mxu1  ;;  %v5393_v33 = vpop.f32.mrf.mxu0 }
 0x83a   : > { %v15352_v3 = vadd.f32 %v5250_v13, %v18128_v51  ;;  %v15355_v5 = vadd.f32 %v5393_v33, %v18130_v21  ;;  %v18136_v51 = vld [vmem:[#allocation17_spill] sm:$0xff] }
 0x83b   : > { %v5252_v26 = vpop.f32.mrf.mxu1  ;;  %v5395_v29 = vpop.f32.mrf.mxu0 }
 0x83c   : > { %18129 = vst [vmem:[#allocation20_spill] sm:$0xff] %v15352_v3  ;;  %18131 = vst [vmem:[#allocation13_spill] sm:$0xff] %v15355_v5  ;;  %v18138_v26 = vld [vmem:[#allocation7_spill] sm:$0xff]  ;;  %v18143_v3 = vld [vmem:[#allocation2_spill] sm:$0xff] }
 0x83d   : > { %v5255_v17 = vpop.f32.mrf.mxu1  ;;  %v5398_v36 = vpop.f32.mrf.mxu0 }
 0x83e   : > { %v15364_v8 = vadd.f32 %v5255_v17, %v18132_v52  ;;  %v15367_v16 = vadd.f32 %v5398_v36, %v18134_v39  ;;  %v18140_v36 = vld [vmem:[#allocation18_spill] sm:$0xff] }
 0x83f   : > { %v5257_v34 = vpop.f32.mrf.mxu1  ;;  %v5400_v40 = vpop.f32.mrf.mxu0 }
 0x840   : > { %18133 = vst [vmem:[#allocation21_spill] sm:$0xff] %v15364_v8  ;;  %18135 = vst [vmem:[#allocation14_spill] sm:$0xff] %v15367_v16 }
 0x841   : > { %v5260_v13 = vpop.f32.mrf.mxu1  ;;  %v5403_v33 = vpop.f32.mrf.mxu0 }
 0x842   : > { %v15372_v21 = vadd.f32 %v5260_v13, %v18136_v51  ;;  %v15375_v29 = vadd.f32 %v5403_v33, %v18138_v26 }
 0x843   : > { %v5262_v5 = vpop.f32.mrf.mxu1  ;;  %v5405_v17 = vpop.f32.mrf.mxu0 }
 0x844   : > { %18137 = vst [vmem:[#allocation22_spill] sm:$0xff] %v15372_v21  ;;  %18139 = vst [vmem:[#allocation15_spill] sm:$0xff] %v15375_v29 }
 0x845   : > { %v5265_v52 = vpop.f32.mrf.mxu1  ;;  %v5408_v8 = vpop.f32.mrf.mxu0 }
 0x846   : > { %v15378_v39 = vadd.f32 %v5265_v52, %v18140_v36  ;;  %v15381_v54 = vadd.f32 %v5408_v8, %v14842_v46 }
 0x847   : > { %v5267_v6 = vpop.f32.mrf.mxu1  ;;  %v5410_v34 = vpop.f32.mrf.mxu0 }
 0x848   : > { %18141 = vst [vmem:[#allocation23_spill] sm:$0xff] %v15378_v39  ;;  %18142 = vst [vmem:[#allocation6_spill] sm:$0xff] %v15381_v54 }
 0x849   : > { %v5270_v40 = vpop.f32.mrf.mxu1  ;;  %v5413_v16 = vpop.f32.mrf.mxu0 }
 0x84a   : > { %v15384_v13 = vadd.f32 %v5270_v40, %v18143_v3  ;;  %v15387_v33 = vadd.f32 %v5413_v16, %v14849_v31 }
 0x84b   : > { %v5272_v5 = vpop.f32.mrf.mxu1  ;;  %v5415_v51 = vpop.f32.mrf.mxu0 }
 0x84c   : > { %18144 = vst [vmem:[#allocation16_spill] sm:$0xff] %v15384_v13  ;;  %18145 = vst [vmem:[#allocation3_spill] sm:$0xff] %v15387_v33 }
 0x84d   : > { %v15389_v26 = vpop.f32.mrf.mxu1 }
 0x84f   : > { %v10945_v17 = vpop.f32.mrf.mxu1 }
 0x851   : > { %v15391_v52 = vpop.f32.mrf.mxu1 }
 0x853   : > { %v10948_v36 = vpop.f32.mrf.mxu1 }
 0x855   : > { %v15393_v46 = vpop.f32.mrf.mxu1 }
 0x857   : > { %v10951_v8 = vpop.f32.mrf.mxu1 }
 0x859   : > { %v15395_v6 = vpop.f32.mrf.mxu1 }
 0x85b   : > { %v10954_v34 = vpop.f32.mrf.mxu1 }
 0x85d   : > { %v15397_v54 = vpop.f32.mrf.mxu1 }
 0x85f   : > { %v10957_v3 = vpop.f32.mrf.mxu1 }
 0x861   : > { %v15399_v40 = vpop.f32.mrf.mxu1 }
 0x863   : > { %v10960_v31 = vpop.f32.mrf.mxu1 }
 0x865   : > { %v15401_v16 = vpop.f32.mrf.mxu1 }
 0x867   : > { %v10963_v5 = vpop.f32.mrf.mxu1 }
 0x869   : > { %v15403_v51 = vpop.f32.mrf.mxu1 }
 0x86b   : > { %v10966_v17 = vpop.f32.mrf.mxu1 }
 0x86d   : > { %v15405_v33 = vpop.f32.mrf.mxu1 }
 0x86f   : > { %v10969_v36 = vpop.f32.mrf.mxu1 }
 0x871   : > { %v15407_v13 = vpop.f32.mrf.mxu1 }
 0x873   : > { %v10972_v8 = vpop.f32.mrf.mxu1 }
 0x875   : > { %v15409_v39 = vpop.f32.mrf.mxu1 }
 0x877   : > { %v10975_v34 = vpop.f32.mrf.mxu1 }
 0x879   : > { %v15411_v29 = vpop.f32.mrf.mxu1 }
 0x87b   : > { %v10978_v3 = vpop.f32.mrf.mxu1 }
 0x87d   : > { %v15413_v21 = vpop.f32.mrf.mxu1 }
 0x87f   : > { %v10981_v31 = vpop.f32.mrf.mxu1 }
 0x881   : > { %v15415_v9 = vpop.f32.mrf.mxu1 }
 0x883   : > { %v10984_v5 = vpop.f32.mrf.mxu1 }
 0x885   : > { %v15417_v35 = vpop.f32.mrf.mxu1 }
 0x887   : > { %v10987_v17 = vpop.f32.mrf.mxu1 }
 0x889   : > { %v15419_v10 = vpop.f32.mrf.mxu1 }
 0x88a   : > { %5659 = vmatpush1.msra.mxu0 %v15419_v10  ;;  %5802 = vmatpush1.msra.mxu1 %v15419_v10 }
 0x88b   : > { %v10990_v36 = vpop.f32.mrf.mxu1  ;;  %5660 = vmatprep.subr.mxu0 %v17943_v14  ;;  %5803 = vmatprep.subr.mxu1 %v17943_v14 }
 0x88c   : > { %5661 = vmatpush1.msra.mxu0 %v15417_v35  ;;  %5804 = vmatpush1.msra.mxu1 %v15417_v35 }
 0x88d   : > { %v15427_v8 = vpop.f32.mrf.mxu1  ;;  %5662 = vmatprep.subr.mxu0 %v17943_v14  ;;  %5805 = vmatprep.subr.mxu1 %v17943_v14 }
 0x88e   : > { %5663 = vmatpush1.msra.mxu0 %v15415_v9  ;;  %5806 = vmatpush1.msra.mxu1 %v15415_v9 }
 0x88f   : > { %v10993_v34 = vpop.f32.mrf.mxu1  ;;  %5664 = vmatprep.subr.mxu0 %v17943_v14  ;;  %5807 = vmatprep.subr.mxu1 %v17943_v14 }
 0x890   : > { %5665 = vmatpush1.msra.mxu0 %v15413_v21  ;;  %5808 = vmatpush1.msra.mxu1 %v15413_v21 }
 0x891   : > { %v15437_v3 = vpop.f32.mrf.mxu1  ;;  %5666 = vmatprep.subr.mxu0 %v17943_v14  ;;  %5809 = vmatprep.subr.mxu1 %v17943_v14 }
 0x892   : > { %5667 = vmatpush1.msra.mxu0 %v15411_v29  ;;  %5810 = vmatpush1.msra.mxu1 %v15411_v29 }
 0x893   : > { %v10996_v31 = vpop.f32.mrf.mxu1  ;;  %5668 = vmatprep.subr.mxu0 %v17943_v14  ;;  %5811 = vmatprep.subr.mxu1 %v17943_v14 }
 0x894   : > { %5669 = vmatpush1.msra.mxu0 %v15409_v39  ;;  %5812 = vmatpush1.msra.mxu1 %v15409_v39 }
 0x895   : > { %v15447_v5 = vpop.f32.mrf.mxu1  ;;  %5670 = vmatprep.subr.mxu0 %v17943_v14  ;;  %5813 = vmatprep.subr.mxu1 %v17943_v14 }
 0x896   : > { %5671 = vmatpush1.msra.mxu0 %v15407_v13  ;;  %5814 = vmatpush1.msra.mxu1 %v15407_v13 }
 0x897   : > { %v10999_v17 = vpop.f32.mrf.mxu1  ;;  %5672 = vmatprep.subr.mxu0 %v17943_v14  ;;  %5815 = vmatprep.subr.mxu1 %v17943_v14 }
 0x898   : > { %5673 = vmatpush1.msra.mxu0 %v15405_v33  ;;  %5816 = vmatpush1.msra.mxu1 %v15405_v33 }
 0x899   : > { %v15457_v36 = vpop.f32.mrf.mxu1  ;;  %5674 = vmatprep.subr.mxu0 %v17943_v14  ;;  %5817 = vmatprep.subr.mxu1 %v17943_v14 }
 0x89a   : > { %5675 = vmatpush1.msra.mxu0 %v15403_v51  ;;  %5818 = vmatpush1.msra.mxu1 %v15403_v51 }
 0x89b   : > { %v11002_v34 = vpop.f32.mrf.mxu1  ;;  %5676 = vmatprep.subr.mxu0 %v17943_v14  ;;  %5819 = vmatprep.subr.mxu1 %v17943_v14 }
 0x89c   : > { %5677 = vmatpush1.msra.mxu0 %v15401_v16  ;;  %5820 = vmatpush1.msra.mxu1 %v15401_v16 }
 0x89d   : > { %v15467_v31 = vpop.f32.mrf.mxu1  ;;  %5678 = vmatprep.subr.mxu0 %v17943_v14  ;;  %5821 = vmatprep.subr.mxu1 %v17943_v14 }
 0x89e   : > { %5679 = vmatpush1.msra.mxu0 %v15399_v40  ;;  %5822 = vmatpush1.msra.mxu1 %v15399_v40 }
 0x89f   : > { %v11005_v17 = vpop.f32.mrf.mxu1  ;;  %5680 = vmatprep.subr.mxu0 %v17943_v14  ;;  %5823 = vmatprep.subr.mxu1 %v17943_v14 }
 0x8a0   : > { %5681 = vmatpush1.msra.mxu0 %v15397_v54  ;;  %5824 = vmatpush1.msra.mxu1 %v15397_v54 }
 0x8a1   : > { %v15477_v34 = vpop.f32.mrf.mxu1  ;;  %5682 = vmatprep.subr.mxu0 %v17943_v14  ;;  %5825 = vmatprep.subr.mxu1 %v17943_v14 }
 0x8a2   : > { %5683 = vmatpush1.msra.mxu0 %v15395_v6  ;;  %5826 = vmatpush1.msra.mxu1 %v15395_v6 }
 0x8a3   : > { %v11008_v1 = vpop.f32.mrf.mxu1  ;;  %5684 = vmatprep.subr.mxu0 %v17943_v14  ;;  %5827 = vmatprep.subr.mxu1 %v17943_v14 }
 0x8a4   : > { %5685 = vmatpush1.msra.mxu0 %v15393_v46  ;;  %5828 = vmatpush1.msra.mxu1 %v15393_v46 }
 0x8a5   : > { %v15487_v17 = vpop.f32.mrf.mxu1  ;;  %5686 = vmatprep.subr.mxu0 %v17943_v14  ;;  %5829 = vmatprep.subr.mxu1 %v17943_v14 }
 0x8a6   : > { %5687 = vmatpush1.msra.mxu0 %v15391_v52  ;;  %5830 = vmatpush1.msra.mxu1 %v15391_v52 }
 0x8a7   : > { %v11011_v19 = vpop.f32.mrf.mxu1  ;;  %5688 = vmatprep.subr.mxu0 %v17943_v14  ;;  %5831 = vmatprep.subr.mxu1 %v17943_v14 }
 0x8a8   : > { %5689 = vmatpush1.msra.mxu0 %v15389_v26  ;;  %5832 = vmatpush1.msra.mxu1 %v15389_v26 }
 0x8a9   : > { %v15497_v1 = vpop.f32.mrf.mxu1  ;;  %5704 = vmatprep.subr.mxu0 %v17943_v14  ;;  %5847 = vmatprep.subr.mxu1 %v17943_v14 }
 0x8ab   : > { %v11014_v37 = vpop.f32.mrf.mxu1 }
 0x8ac   : > { %v9393_v37 = vld [vmem:[%s17895_s3 + $0x8c0] sm:$0xff] }
 0x8ad   : > { %v15501_v15 = vpop.f32.mrf.mxu1 }
 0x8ae   : > { %9407 = vmatpush2.msk.msra.mxu0 %vm2115_vm5, %v15501_v15  ;;  %9429 = vmatpush2.msk.msra.mxu1 %vm2115_vm5, %v15501_v15 }
 0x8af   : > { %v11017_v19 = vpop.f32.mrf.mxu1  ;;  %5706 = vmatprep.subr.mxu0 %v17943_v14  ;;  %5849 = vmatprep.subr.mxu1 %v17943_v14 }
 0x8b0   : > { %5707 = vmatpush2.msra.mxu0 %v15497_v1  ;;  %5850 = vmatpush2.msra.mxu1 %v15497_v1  ;;  %v9415_v19 = vld [vmem:[%s17895_s3 + $0x930] sm:$0xff] }
 0x8b1   : > { %5708 = vmatprep.subr.mxu0 %v17943_v14  ;;  %5851 = vmatprep.subr.mxu1 %v17943_v14 }
 0x8b2   : > { %5709 = vmatpush2.msra.mxu0 %v15487_v17  ;;  %5852 = vmatpush2.msra.mxu1 %v15487_v17 }
 0x8b3   : > { %5710 = vmatprep.subr.mxu0 %v17943_v14  ;;  %5853 = vmatprep.subr.mxu1 %v17943_v14 }
 0x8b4   : > { %5711 = vmatpush2.msra.mxu0 %v15477_v34  ;;  %5854 = vmatpush2.msra.mxu1 %v15477_v34 }
 0x8b5   : > { %5712 = vmatprep.subr.mxu0 %v17943_v14  ;;  %5855 = vmatprep.subr.mxu1 %v17943_v14 }
 0x8b6   : > { %5713 = vmatpush2.msra.mxu0 %v15467_v31  ;;  %5856 = vmatpush2.msra.mxu1 %v15467_v31 }
 0x8b7   : > { %5714 = vmatprep.subr.mxu0 %v17943_v14  ;;  %5857 = vmatprep.subr.mxu1 %v17943_v14 }
 0x8b8   : > { %5715 = vmatpush2.msra.mxu0 %v15457_v36  ;;  %5858 = vmatpush2.msra.mxu1 %v15457_v36 }
 0x8b9   : > { %5716 = vmatprep.subr.mxu0 %v17943_v14  ;;  %5859 = vmatprep.subr.mxu1 %v17943_v14 }
 0x8ba   : > { %5717 = vmatpush2.msra.mxu0 %v15447_v5  ;;  %5860 = vmatpush2.msra.mxu1 %v15447_v5 }
 0x8bb   : > { %5718 = vmatprep.subr.mxu0 %v17943_v14  ;;  %5861 = vmatprep.subr.mxu1 %v17943_v14 }
 0x8bc   : > { %5719 = vmatpush2.msra.mxu0 %v15437_v3  ;;  %5862 = vmatpush2.msra.mxu1 %v15437_v3 }
 0x8bd   : > { %5720 = vmatprep.subr.mxu0 %v17943_v14  ;;  %5863 = vmatprep.subr.mxu1 %v17943_v14 }
 0x8be   : > { %5721 = vmatpush2.msra.mxu0 %v15427_v8  ;;  %5864 = vmatpush2.msra.mxu1 %v15427_v8 }
 0x8bf   : > { %5723 = vmatmul.mubr.f32.vlgmr.msra.gmra.mxu0 %v9393_v37  ;;  %5866 = vmatmul.mubr.f32.vlgmr.msra.gmra.mxu1 %v9415_v19  ;;  %v9395_v37 = vld [vmem:[%s17895_s3 + $0x8d0] sm:$0xff]  ;;  %v9417_v19 = vld [vmem:[%s17895_s3 + $0x940] sm:$0xff] }
 0x8c0   : > { %5944 = vmatprep.subr.mxu0 %v17943_v14  ;;  %6087 = vmatprep.subr.mxu1 %v17943_v14 }
 0x8c1   : > { %5945 = vmatpush1.msra.mxu0 %v15419_v10  ;;  %6088 = vmatpush1.msra.mxu1 %v15419_v10  ;;  %v9398_v10 = vld [vmem:[%s17895_s3 + $0x8e8] sm:$0xff] }
 0x8c2   : > { %5946 = vmatprep.subr.mxu0 %v17943_v14  ;;  %6089 = vmatprep.subr.mxu1 %v17943_v14 }
 0x8c3   : > { %9409 = vmatprep.mubr.msk.f32.mxu0 %vm2093_vm4, %v9396_v41  ;;  %9431 = vmatprep.mubr.msk.f32.mxu1 %vm2093_vm4, %v9418_v23  ;;  %v9420_v41 = vld [vmem:[%s17895_s3 + $0x958] sm:$0xff]  ;;  %v9397_v23 = vld [vmem:[%s17895_s3 + $0x8e0] sm:$0xff] }
 0x8c4   : > { %5947 = vmatpush1.msra.mxu0 %v15417_v35  ;;  %6090 = vmatpush1.msra.mxu1 %v15417_v35  ;;  %v9419_v35 = vld [vmem:[%s17895_s3 + $0x950] sm:$0xff] }
 0x8c5   : > { %5728 = vmatmul.mubr.f32.gmra.mxu0 %v9395_v37  ;;  %5871 = vmatmul.mubr.f32.gmra.mxu1 %v9417_v19  ;;  %v9422_v37 = vld [vmem:[%s17895_s3 + $0x968] sm:$0xff]  ;;  %v9421_v19 = vld [vmem:[%s17895_s3 + $0x960] sm:$0xff] }
 0x8c6   : > { %5948 = vmatprep.subr.mxu0 %v17943_v14  ;;  %6091 = vmatprep.subr.mxu1 %v17943_v14 }
 0x8c7   : > { %5949 = vmatpush1.msra.mxu0 %v15415_v9  ;;  %6092 = vmatpush1.msra.mxu1 %v15415_v9  ;;  %v9400_v9 = vld [vmem:[%s17895_s3 + $0x8f8] sm:$0xff] }
 0x8c8   : > { %5950 = vmatprep.subr.mxu0 %v17943_v14  ;;  %6093 = vmatprep.subr.mxu1 %v17943_v14 }
 0x8c9   : > { %9410 = vmatprep.mubr.msk.f32.mxu0 %vm2093_vm4, %v9398_v10  ;;  %9432 = vmatprep.mubr.msk.f32.mxu1 %vm2093_vm4, %v9420_v41  ;;  %v9424_v10 = vld [vmem:[%s17895_s3 + $0x978] sm:$0xff]  ;;  %v9423_v41 = vld [vmem:[%s17895_s3 + $0x970] sm:$0xff] }
 0x8ca   : > { %5951 = vmatpush1.msra.mxu0 %v15413_v21  ;;  %6094 = vmatpush1.msra.mxu1 %v15413_v21  ;;  %v9399_v21 = vld [vmem:[%s17895_s3 + $0x8f0] sm:$0xff] }
 0x8cb   : > { %5733 = vmatmul.mubr.f32.gmra.mxu0 %v9397_v23  ;;  %5876 = vmatmul.mubr.f32.gmra.mxu1 %v9419_v35  ;;  %v9426_v23 = vld [vmem:[%s17895_s3 + $0x988] sm:$0xff]  ;;  %v9425_v35 = vld [vmem:[%s17895_s3 + $0x980] sm:$0xff] }
 0x8cc   : > { %5952 = vmatprep.subr.mxu0 %v17943_v14  ;;  %6095 = vmatprep.subr.mxu1 %v17943_v14 }
 0x8cd   : > { %5953 = vmatpush1.msra.mxu0 %v15411_v29  ;;  %6096 = vmatpush1.msra.mxu1 %v15411_v29  ;;  %v9402_v29 = vld [vmem:[%s17895_s3 + $0x908] sm:$0xff] }
 0x8ce   : > { %5954 = vmatprep.subr.mxu0 %v17943_v14  ;;  %6097 = vmatprep.subr.mxu1 %v17943_v14 }
 0x8cf   : > { %9411 = vmatprep.mubr.msk.f32.mxu0 %vm2093_vm4, %v9400_v9  ;;  %9433 = vmatprep.mubr.msk.f32.mxu1 %vm2093_vm4, %v9422_v37  ;;  %v9428_v9 = vld [vmem:[%s17895_s3 + $0x998] sm:$0x1]  ;;  %v9427_v37 = vld [vmem:[%s17895_s3 + $0x990] sm:$0x1] }
 0x8d0   : > { %5955 = vmatpush1.msra.mxu0 %v15409_v39  ;;  %6098 = vmatpush1.msra.mxu1 %v15409_v39  ;;  %v9401_v39 = vld [vmem:[%s17895_s3 + $0x900] sm:$0xff] }
 0x8d1   : > { %5738 = vmatmul.mubr.f32.gmra.mxu0 %v9399_v21  ;;  %5881 = vmatmul.mubr.f32.gmra.mxu1 %v9421_v19  ;;  %v9466_v21 = vld [vmem:[%s17895_s3 + $0xa48] sm:$0xff] }
 0x8d2   : > { %5956 = vmatprep.subr.mxu0 %v17943_v14  ;;  %6099 = vmatprep.subr.mxu1 %v17943_v14  ;;  %v9482_v19 = vld [vmem:[%s17896_s4 + $0xc8] sm:$0xff] }
 0x8d3   : > { %5957 = vmatpush1.msra.mxu0 %v15407_v13  ;;  %6100 = vmatpush1.msra.mxu1 %v15407_v13  ;;  %v9404_v13 = vld [vmem:[%s17895_s3 + $0x918] sm:$0xff] }
 0x8d4   : > { %5958 = vmatprep.subr.mxu0 %v17943_v14  ;;  %6101 = vmatprep.subr.mxu1 %v17943_v14 }
 0x8d5   : > { %9412 = vmatprep.mubr.msk.f32.mxu0 %vm2093_vm4, %v9402_v29  ;;  %9434 = vmatprep.mubr.msk.f32.mxu1 %vm2093_vm4, %v9424_v10  ;;  %v9443_v29 = vld [vmem:[%s17895_s3 + $0x9d0] sm:$0xff]  ;;  %v9465_v10 = vld [vmem:[%s17895_s3 + $0xa40] sm:$0xff] }
 0x8d6   : > { %5959 = vmatpush1.msra.mxu0 %v15405_v33  ;;  %6102 = vmatpush1.msra.mxu1 %v15405_v33  ;;  %v9403_v33 = vld [vmem:[%s17895_s3 + $0x910] sm:$0xff] }
 0x8d7   : > { %5743 = vmatmul.mubr.f32.gmra.mxu0 %v9401_v39  ;;  %5886 = vmatmul.mubr.f32.gmra.mxu1 %v9423_v41  ;;  %v9446_v39 = vld [vmem:[%s17895_s3 + $0x9e8] sm:$0xff]  ;;  %v9468_v41 = vld [vmem:[%s17895_s3 + $0xa58] sm:$0xff] }
 0x8d8   : > { %5960 = vmatprep.subr.mxu0 %v17943_v14  ;;  %6103 = vmatprep.subr.mxu1 %v17943_v14 }
 0x8d9   : > { %5961 = vmatpush1.msra.mxu0 %v15403_v51  ;;  %6104 = vmatpush1.msra.mxu1 %v15403_v51  ;;  %v9406_v51 = vld [vmem:[%s17895_s3 + $0x928] sm:$0x1] }
 0x8da   : > { %5962 = vmatprep.subr.mxu0 %v17943_v14  ;;  %6105 = vmatprep.subr.mxu1 %v17943_v14 }
 0x8db   : > { %9413 = vmatprep.mubr.msk.f32.mxu0 %vm2093_vm4, %v9404_v13  ;;  %9435 = vmatprep.mubr.msk.f32.mxu1 %vm2093_vm4, %v9426_v23  ;;  %v9481_v13 = vld [vmem:[%s17896_s4 + $0xc0] sm:$0xff] }
 0x8dc   : > { %5963 = vmatpush1.msra.mxu0 %v15401_v16  ;;  %6106 = vmatpush1.msra.mxu1 %v15401_v16  ;;  %v9405_v16 = vld [vmem:[%s17895_s3 + $0x920] sm:$0x1] }
 0x8dd   : > { %5748 = vmatmul.mubr.f32.gmra.mxu0 %v9403_v33  ;;  %5891 = vmatmul.mubr.f32.gmra.mxu1 %v9425_v35  ;;  %v9445_v23 = vld [vmem:[%s17895_s3 + $0x9e0] sm:$0xff]  ;;  %v9467_v33 = vld [vmem:[%s17895_s3 + $0xa50] sm:$0xff]  ;;  %v9448_v35 = vld [vmem:[%s17895_s3 + $0x9f8] sm:$0xff] }
 0x8de   : > { %5964 = vmatprep.subr.mxu0 %v17943_v14  ;;  %6107 = vmatprep.subr.mxu1 %v17943_v14 }
 0x8df   : > { %5965 = vmatpush1.msra.mxu0 %v15399_v40  ;;  %6108 = vmatpush1.msra.mxu1 %v15399_v40  ;;  %v9484_v40 = vld [vmem:[%s17896_s4 + $0xd8] sm:$0xff] }
 0x8e0   : > { %5966 = vmatprep.subr.mxu0 %v17943_v14  ;;  %6109 = vmatprep.subr.mxu1 %v17943_v14 }
 0x8e1   : > { %9414 = vmatprep.mubr.msk.f32.mxu0 %vm2093_vm4, %v9406_v51  ;;  %9436 = vmatprep.mubr.msk.f32.mxu1 %vm2093_vm4, %v9428_v9  ;;  %v9470_v51 = vld [vmem:[%s17895_s3 + $0xa68] sm:$0xff]  ;;  %v9447_v9 = vld [vmem:[%s17895_s3 + $0x9f0] sm:$0xff] }
 0x8e2   : > { %5967 = vmatpush1.msra.mxu0 %v15397_v54  ;;  %6110 = vmatpush1.msra.mxu1 %v15397_v54  ;;  %v9460_v54 = vld [vmem:[%s17895_s3 + $0xa18] sm:$0xff] }
 0x8e3   : > { %5753 = vmatmul.mubr.f32.gmra.mxu0 %v9405_v16  ;;  %5896 = vmatmul.mubr.f32.gmra.mxu1 %v9427_v37  ;;  %v9469_v16 = vld [vmem:[%s17895_s3 + $0xa60] sm:$0xff]  ;;  %v9450_v37 = vld [vmem:[%s17895_s3 + $0xa08] sm:$0x1] }
 0x8e4   : > { %5968 = vmatprep.subr.mxu0 %v17943_v14  ;;  %6111 = vmatprep.subr.mxu1 %v17943_v14 }
 0x8e5   : > { %5969 = vmatpush1.msra.mxu0 %v15395_v6  ;;  %6112 = vmatpush1.msra.mxu1 %v15395_v6  ;;  %v9462_v6 = vld [vmem:[%s17895_s3 + $0xa28] sm:$0xff] }
 0x8e6   : > { %5970 = vmatprep.subr.mxu0 %v17943_v14  ;;  %6113 = vmatprep.subr.mxu1 %v17943_v14 }
 0x8e7   : > { %5971 = vmatpush1.msra.mxu0 %v15393_v46  ;;  %6114 = vmatpush1.msra.mxu1 %v15393_v46  ;;  %v9440_v46 = vld [vmem:[%s17895_s3 + $0x9b8] sm:$0xff] }
 0x8e8   : > { %5972 = vmatprep.subr.mxu0 %v17943_v14  ;;  %6115 = vmatprep.subr.mxu1 %v17943_v14 }
 0x8e9   : > { %5973 = vmatpush1.msra.mxu0 %v15391_v52  ;;  %6116 = vmatpush1.msra.mxu1 %v15391_v52  ;;  %v9459_v52 = vld [vmem:[%s17895_s3 + $0xa10] sm:$0xff] }
 0x8ea   : > { %5974 = vmatprep.subr.mxu0 %v17943_v14  ;;  %6117 = vmatprep.subr.mxu1 %v17943_v14 }
 0x8eb   : > { %5975 = vmatpush1.msra.mxu0 %v15389_v26  ;;  %6118 = vmatpush1.msra.mxu1 %v15389_v26  ;;  %v9437_v26 = vld [vmem:[%s17895_s3 + $0x9a0] sm:$0xff] }
 0x8ec   : > { %5990 = vmatprep.subr.mxu0 %v17943_v14  ;;  %6133 = vmatprep.subr.mxu1 %v17943_v14 }
 0x8ed   : > { %9451 = vmatpush2.msk.msra.mxu0 %vm2115_vm5, %v15501_v15  ;;  %9473 = vmatpush2.msk.msra.mxu1 %vm2115_vm5, %v15501_v15  ;;  %v9438_v15 = vld [vmem:[%s17895_s3 + $0x9a8] sm:$0xff] }
 0x8ee   : > { %5992 = vmatprep.subr.mxu0 %v17943_v14  ;;  %6135 = vmatprep.subr.mxu1 %v17943_v14 }
 0x8ef   : > { %5993 = vmatpush2.msra.mxu0 %v15497_v1  ;;  %6136 = vmatpush2.msra.mxu1 %v15497_v1  ;;  %v9444_v1 = vld [vmem:[%s17895_s3 + $0x9d8] sm:$0xff] }
 0x8f0   : > { %5994 = vmatprep.subr.mxu0 %v17943_v14  ;;  %6137 = vmatprep.subr.mxu1 %v17943_v14 }
 0x8f1   : > { %5995 = vmatpush2.msra.mxu0 %v15487_v17  ;;  %6138 = vmatpush2.msra.mxu1 %v15487_v17  ;;  %v9463_v17 = vld [vmem:[%s17895_s3 + $0xa30] sm:$0xff] }
 0x8f2   : > { %5996 = vmatprep.subr.mxu0 %v17943_v14  ;;  %6139 = vmatprep.subr.mxu1 %v17943_v14 }
 0x8f3   : > { %5997 = vmatpush2.msra.mxu0 %v15477_v34  ;;  %6140 = vmatpush2.msra.mxu1 %v15477_v34  ;;  %v9441_v34 = vld [vmem:[%s17895_s3 + $0x9c0] sm:$0xff] }
 0x8f4   : > { %5998 = vmatprep.subr.mxu0 %v17943_v14  ;;  %6141 = vmatprep.subr.mxu1 %v17943_v14 }
 0x8f5   : > { %5999 = vmatpush2.msra.mxu0 %v15467_v31  ;;  %6142 = vmatpush2.msra.mxu1 %v15467_v31  ;;  %v9483_v31 = vld [vmem:[%s17896_s4 + $0xd0] sm:$0xff] }
 0x8f6   : > { %6000 = vmatprep.subr.mxu0 %v17943_v14  ;;  %6143 = vmatprep.subr.mxu1 %v17943_v14 }
 0x8f7   : > { %6001 = vmatpush2.msra.mxu0 %v15457_v36  ;;  %6144 = vmatpush2.msra.mxu1 %v15457_v36  ;;  %v9464_v36 = vld [vmem:[%s17895_s3 + $0xa38] sm:$0xff] }
 0x8f8   : > { %6002 = vmatprep.subr.mxu0 %v17943_v14  ;;  %6145 = vmatprep.subr.mxu1 %v17943_v14 }
 0x8f9   : > { %6003 = vmatpush2.msra.mxu0 %v15447_v5  ;;  %6146 = vmatpush2.msra.mxu1 %v15447_v5  ;;  %v9442_v5 = vld [vmem:[%s17895_s3 + $0x9c8] sm:$0xff] }
 0x8fa   : > { %6004 = vmatprep.subr.mxu0 %v17943_v14  ;;  %6147 = vmatprep.subr.mxu1 %v17943_v14 }
 0x8fb   : > { %6005 = vmatpush2.msra.mxu0 %v15437_v3  ;;  %6148 = vmatpush2.msra.mxu1 %v15437_v3  ;;  %v9439_v3 = vld [vmem:[%s17895_s3 + $0x9b0] sm:$0xff] }
 0x8fc   : > { %6006 = vmatprep.subr.mxu0 %v17943_v14  ;;  %6149 = vmatprep.subr.mxu1 %v17943_v14 }
 0x8fd   : > { %6007 = vmatpush2.msra.mxu0 %v15427_v8  ;;  %9452 = vmatprep.mubr.msk.f32.mxu0 %vm2093_vm4, %v9438_v15  ;;  %v9472_v15 = vld [vmem:[%s17895_s3 + $0xa78] sm:$0x1] }
 0x8fe   : > { %6150 = vmatpush2.msra.mxu1 %v15427_v8  ;;  %9474 = vmatprep.mubr.msk.f32.mxu1 %vm2093_vm4, %v9460_v54  ;;  %v9461_v8 = vld [vmem:[%s17895_s3 + $0xa20] sm:$0xff] }
 0x8ff   : > { %6009 = vmatmul.mubr.f32.vlgmr.msra.gmra.mxu0 %v9437_v26  ;;  %6152 = vmatmul.mubr.f32.vlgmr.msra.gmra.mxu1 %v9459_v52  ;;  %v9449_v54 = vld [vmem:[%s17895_s3 + $0xa00] sm:$0x1]  ;;  %v9471_v26 = vld [vmem:[%s17895_s3 + $0xa70] sm:$0x1] }
 0x900   : > { %9453 = vmatprep.mubr.msk.f32.mxu0 %vm2093_vm4, %v9440_v46  ;;  %9475 = vmatprep.mubr.msk.f32.mxu1 %vm2093_vm4, %v9462_v6 }
 0x901   : > { %11018 = vmatprep.subr.mxu0 %v17943_v14  ;;  %6428 = vmatprep.subr.mxu1 %v17943_v14 }
 0x902   : > { %11019 = vmatpush3.msra.mxu0 %v9484_v40 }
 0x903   : > { %6014 = vmatmul.mubr.f32.gmra.mxu0 %v9439_v3  ;;  %6157 = vmatmul.mubr.f32.gmra.mxu1 %v9461_v8 }
 0x904   : > { %9454 = vmatprep.mubr.msk.f32.mxu0 %vm2093_vm4, %v9442_v5  ;;  %9476 = vmatprep.mubr.msk.f32.mxu1 %vm2093_vm4, %v9464_v36 }
 0x905   : > { %11020 = vmatprep.subr.mxu0 %v17943_v14 }
 0x906   : > { %11021 = vmatpush3.msra.mxu0 %v9483_v31 }
 0x907   : > { %6019 = vmatmul.mubr.f32.gmra.mxu0 %v9441_v34  ;;  %6162 = vmatmul.mubr.f32.gmra.mxu1 %v9463_v17 }
 0x908   : > { %9455 = vmatprep.mubr.msk.f32.mxu0 %vm2093_vm4, %v9444_v1  ;;  %9477 = vmatprep.mubr.msk.f32.mxu1 %vm2093_vm4, %v9466_v21 }
 0x909   : > { %11022 = vmatprep.subr.mxu0 %v17943_v14 }
 0x90a   : > { %11023 = vmatpush3.msra.mxu0 %v9482_v19 }
 0x90b   : > { %6024 = vmatmul.mubr.f32.gmra.mxu0 %v9443_v29  ;;  %6167 = vmatmul.mubr.f32.gmra.mxu1 %v9465_v10 }
 0x90c   : > { %9456 = vmatprep.mubr.msk.f32.mxu0 %vm2093_vm4, %v9446_v39  ;;  %9478 = vmatprep.mubr.msk.f32.mxu1 %vm2093_vm4, %v9468_v41 }
 0x90d   : > { %11024 = vmatprep.subr.mxu0 %v17943_v14 }
 0x90e   : > { %11025 = vmatpush3.msra.mxu0 %v9481_v13 }
 0x90f   : > { %6029 = vmatmul.mubr.f32.gmra.mxu0 %v9445_v23  ;;  %6172 = vmatmul.mubr.f32.gmra.mxu1 %v9467_v33 }
 0x910   : > { %9457 = vmatprep.mubr.msk.f32.mxu0 %vm2093_vm4, %v9448_v35  ;;  %9479 = vmatprep.mubr.msk.f32.mxu1 %vm2093_vm4, %v9470_v51  ;;  %v18146_v51 = vld [vmem:[#allocation4_spill] sm:$0xff] }
 0x911   : > { %6571 = vmatprep.subr.mxu0 %v17943_v14 }
 0x913   : > { %6034 = vmatmul.mubr.f32.gmra.mxu0 %v9447_v9  ;;  %6177 = vmatmul.mubr.f32.gmra.mxu1 %v9469_v16 }
 0x914   : > { %9458 = vmatprep.mubr.msk.f32.mxu0 %vm2093_vm4, %v9450_v37  ;;  %9480 = vmatprep.mubr.msk.f32.mxu1 %vm2093_vm4, %v9472_v15 }
 0x917   : > { %6039 = vmatmul.mubr.f32.gmra.mxu0 %v9449_v54  ;;  %6182 = vmatmul.mubr.f32.gmra.mxu1 %v9471_v26  ;;  %v18148_v54 = vld [vmem:[#allocation8_spill] sm:$0xff]  ;;  %v18150_v26 = vld [vmem:[#allocation9_spill] sm:$0xff] }
 0x918   : > { %11026 = vmatprep.mubr.msk.f32.mxu0 %vm11292_vm1, %v17943_v14 }
 0x91b   : > { %11027 = vmatmul.mubr.msk.f32.vlgmr.msra.gmra.mxu0 %vm1558_vm3, %v11974_v0 }
 0x91c   : > { %11029 = vmatprep.mubr.msk.f32.mxu0 %vm11292_vm1, %v17943_v14 }
 0x91f   : > { %11030 = vmatmul.mubr.msk.f32.gmra.mxu0 %vm1558_vm3, %v11990_v44 }
 0x920   : > { %11032 = vmatprep.mubr.msk.f32.mxu0 %vm11292_vm1, %v17943_v14 }
 0x923   : > { %11033 = vmatmul.mubr.msk.f32.gmra.mxu0 %vm1558_vm3, %v12006_v43 }
 0x924   : > { %11035 = vmatprep.mubr.msk.f32.mxu0 %vm11292_vm1, %v17943_v14 }
 0x927   : > { %11036 = vmatmul.mubr.msk.f32.gmra.mxu0 %vm1558_vm3, %v12022_v7 }
 0x928   : > { %11038 = vmatprep.mubr.msk.f32.mxu0 %vm11292_vm1, %v17943_v14 }
 0x92b   : > { %11039 = vmatmul.mubr.msk.f32.gmra.mxu0 %vm1558_vm3, %v12039_v59 }
 0x92c   : > { %11041 = vmatprep.mubr.msk.f32.mxu0 %vm11292_vm1, %v17943_v14 }
 0x92f   : > { %11042 = vmatmul.mubr.msk.f32.gmra.mxu0 %vm1558_vm3, %v12056_v24 }
 0x930   : > { %11044 = vmatprep.mubr.msk.f32.mxu0 %vm11292_vm1, %v17943_v14 }
 0x933   : > { %11045 = vmatmul.mubr.msk.f32.gmra.mxu0 %vm1558_vm3, %v12073_v53 }
 0x934   : > { %11047 = vmatprep.mubr.msk.f32.mxu0 %vm11292_vm1, %v17943_v14 }
 0x937   : > { %11048 = vmatmul.mubr.msk.f32.gmra.mxu0 %vm1558_vm3, %v12090_v27 }
 0x938   : > { %11050 = vmatprep.mubr.msk.f32.mxu0 %vm11292_vm1, %v17943_v14 }
 0x93b   : > { %11051 = vmatmul.mubr.msk.f32.gmra.mxu0 %vm1558_vm3, %v12107_v11 }
 0x93c   : > { %11053 = vmatprep.mubr.msk.f32.mxu0 %vm11292_vm1, %v17943_v14 }
 0x93f   : > { %11054 = vmatmul.mubr.msk.f32.gmra.mxu0 %vm1558_vm3, %v17988_v63 }
 0x940   : > { %11056 = vmatprep.mubr.msk.f32.mxu0 %vm11292_vm1, %v17943_v14 }
 0x943   : > { %11057 = vmatmul.mubr.msk.f32.gmra.mxu0 %vm1558_vm3, %v17990_v38 }
 0x944   : > { %11059 = vmatprep.mubr.msk.f32.mxu0 %vm11292_vm1, %v17943_v14 }
 0x947   : > { %11060 = vmatmul.mubr.msk.f32.gmra.mxu0 %vm1558_vm3, %v17991_v58 }
 0x948   : > { %11062 = vmatprep.mubr.msk.f32.mxu0 %vm11292_vm1, %v17943_v14 }
 0x94b   : > { %11063 = vmatmul.mubr.msk.f32.gmra.mxu0 %vm1558_vm3, %v17992_v30 }
 0x94c   : > { %11065 = vmatprep.mubr.msk.f32.mxu0 %vm11292_vm1, %v17943_v14 }
 0x94f   : > { %11066 = vmatmul.mubr.msk.f32.gmra.mxu0 %vm1558_vm3, %v17993_v61 }
 0x950   : > { %11068 = vmatprep.mubr.msk.f32.mxu0 %vm11292_vm1, %v17943_v14 }
 0x953   : > { %11069 = vmatmul.mubr.msk.f32.gmra.mxu0 %vm1558_vm3, %v17994_v22 }
 0x954   : > { %11071 = vmatprep.mubr.msk.f32.mxu0 %vm11292_vm1, %v17943_v14 }
 0x957   : > { %11072 = vmatmul.mubr.msk.f32.gmra.mxu0 %vm1558_vm3, %v17995_v49 }
 0x958   : > { %11074 = vmatprep.mubr.msk.f32.mxu0 %vm11292_vm1, %v17943_v14 }
 0x95b   : > { %11075 = vmatmul.mubr.msk.f32.gmra.mxu0 %vm1558_vm3, %v17996_v45 }
 0x95c   : > { %11077 = vmatprep.mubr.msk.f32.mxu0 %vm11292_vm1, %v17943_v14 }
 0x95f   : > { %11078 = vmatmul.mubr.msk.f32.gmra.mxu0 %vm1558_vm3, %v17998_v55 }
 0x960   : > { %11080 = vmatprep.mubr.msk.f32.mxu0 %vm11292_vm1, %v17943_v14 }
 0x963   : > { %11081 = vmatmul.mubr.msk.f32.gmra.mxu0 %vm1558_vm3, %v17999_v42 }
 0x964   : > { %11083 = vmatprep.mubr.msk.f32.mxu0 %vm11292_vm1, %v17943_v14 }
 0x967   : > { %11084 = vmatmul.mubr.msk.f32.gmra.mxu0 %vm1558_vm3, %v18001_v25 }
 0x968   : > { %11086 = vmatprep.mubr.msk.f32.mxu0 %vm11292_vm1, %v17943_v14 }
 0x96b   : > { %11087 = vmatmul.mubr.msk.f32.gmra.mxu0 %vm1558_vm3, %v18003_v20 }
 0x96c   : > { %11089 = vmatprep.mubr.msk.f32.mxu0 %vm11292_vm1, %v17943_v14 }
 0x96f   : > { %11090 = vmatmul.mubr.msk.f32.gmra.mxu0 %vm1558_vm3, %v18004_v28 }
 0x970   : > { %11092 = vmatprep.mubr.msk.f32.mxu0 %vm11292_vm1, %v17943_v14 }
 0x973   : > { %11093 = vmatmul.mubr.msk.f32.gmra.mxu0 %vm1558_vm3, %v18006_v62 }
 0x974   : > { %11095 = vmatprep.mubr.msk.f32.mxu0 %vm11292_vm1, %v17943_v14 }
 0x977   : > { %11096 = vmatmul.mubr.msk.f32.gmra.mxu0 %vm1558_vm3, %v18008_v4 }
 0x978   : > { %11098 = vmatprep.mubr.msk.f32.mxu0 %vm11292_vm1, %v17943_v14 }
 0x97b   : > { %11099 = vmatmul.mubr.msk.f32.gmra.mxu0 %vm1558_vm3, %v18009_v12 }
 0x97f   : > { %v5724_v52 = vpop.f32.mrf.mxu0  ;;  %v5867_v46 = vpop.f32.mrf.mxu1 }
 0x980   : > { %v15948_v6 = vadd.f32 %v5724_v52, %v15298_v32  ;;  %v15951_v40 = vadd.f32 %v5867_v46, %v15301_v60 }
 0x981   : > { %v5726_v3 = vpop.f32.mrf.mxu0  ;;  %v5869_v8 = vpop.f32.mrf.mxu1 }
 0x985   : > { %v5729_v5 = vpop.f32.mrf.mxu0  ;;  %v5872_v36 = vpop.f32.mrf.mxu1 }
 0x986   : > { %v15954_v31 = vadd.f32 %v5729_v5, %v15304_v57  ;;  %v15957_v34 = vadd.f32 %v5872_v36, %v15307_v18  ;;  %v18152_v5 = vld [vmem:[#allocation24_spill] sm:$0xff]  ;;  %v18154_v36 = vld [vmem:[#allocation10_spill] sm:$0xff] }
 0x987   : > { %v5731_v17 = vpop.f32.mrf.mxu0  ;;  %v5874_v1 = vpop.f32.mrf.mxu1 }
 0x98b   : > { %v5734_v21 = vpop.f32.mrf.mxu0  ;;  %v5877_v19 = vpop.f32.mrf.mxu1 }
 0x98c   : > { %v15960_v32 = vadd.f32 %v5734_v21, %v15310_v2  ;;  %v15963_v60 = vadd.f32 %v5877_v19, %v15313_v50 }
 0x98d   : > { %v5736_v29 = vpop.f32.mrf.mxu0  ;;  %v5879_v10 = vpop.f32.mrf.mxu1 }
 0x98e   : > { %v18156_v10 = vld [vmem:[#allocation5_spill] sm:$0xff] }
 0x991   : > { %v5739_v39 = vpop.f32.mrf.mxu0  ;;  %v5882_v41 = vpop.f32.mrf.mxu1 }
 0x992   : > { %v15966_v57 = vadd.f32 %v5739_v39, %v15316_v56  ;;  %v15969_v18 = vadd.f32 %v5882_v41, %v15319_v48  ;;  %v18158_v41 = vld [vmem:[#allocation11_spill] sm:$0xff] }
 0x993   : > { %v5741_v13 = vpop.f32.mrf.mxu0  ;;  %v5884_v23 = vpop.f32.mrf.mxu1 }
 0x997   : > { %v5744_v33 = vpop.f32.mrf.mxu0  ;;  %v5887_v35 = vpop.f32.mrf.mxu1 }
 0x998   : > { %v15972_v2 = vadd.f32 %v5744_v33, %v15322_v47  ;;  %v15975_v50 = vadd.f32 %v5887_v35, %v18146_v51 }
 0x999   : > { %v5746_v9 = vpop.f32.mrf.mxu0  ;;  %v5889_v16 = vpop.f32.mrf.mxu1 }
 0x99a   : > { %18147 = vst [vmem:[#allocation17_spill] sm:$0xff] %v15975_v50  ;;  %v18160_v9 = vld [vmem:[#allocation19_spill] sm:$0xff] }
 0x99b   : > { %v9535_v50 = vld [vmem:[%s17895_s3 + $0xb08] sm:$0xff] }
 0x99d   : > { %v5749_v37 = vpop.f32.mrf.mxu0  ;;  %v5892_v15 = vpop.f32.mrf.mxu1 }
 0x99e   : > { %v15978_v56 = vadd.f32 %v5749_v37, %v18148_v54  ;;  %v15981_v48 = vadd.f32 %v5892_v15, %v18150_v26  ;;  %v18162_v37 = vld [vmem:[#allocation12_spill] sm:$0xff] }
 0x99f   : > { %v5751_v52 = vpop.f32.mrf.mxu0  ;;  %v5894_v46 = vpop.f32.mrf.mxu1 }
 0x9a0   : > { %18149 = vst [vmem:[#allocation7_spill] sm:$0xff] %v15978_v56  ;;  %18151 = vst [vmem:[#allocation18_spill] sm:$0xff] %v15981_v48  ;;  %v9513_v56 = vld [vmem:[%s17895_s3 + $0xa98] sm:$0xff] }
 0x9a3   : > { %v5754_v3 = vpop.f32.mrf.mxu0  ;;  %v5897_v8 = vpop.f32.mrf.mxu1 }
 0x9a4   : > { %v15984_v47 = vadd.f32 %v5754_v3, %v18152_v5  ;;  %v15987_v17 = vadd.f32 %v5897_v8, %v18154_v36  ;;  %v18164_v3 = vld [vmem:[#allocation20_spill] sm:$0xff]  ;;  %v18166_v5 = vld [vmem:[#allocation13_spill] sm:$0xff] }
 0x9a5   : > { %v5756_v1 = vpop.f32.mrf.mxu0  ;;  %v5899_v21 = vpop.f32.mrf.mxu1 }
 0x9a6   : > { %18153 = vst [vmem:[#allocation2_spill] sm:$0xff] %v15984_v47  ;;  %18155 = vst [vmem:[#allocation4_spill] sm:$0xff] %v15987_v17 }
 0x9bf   : > { %v6010_v19 = vpop.f32.mrf.mxu0  ;;  %v6153_v29 = vpop.f32.mrf.mxu1 }
 0x9c0   : > { %v15990_v39 = vadd.f32 %v6010_v19, %v18156_v10  ;;  %v15993_v13 = vadd.f32 %v6153_v29, %v18158_v41  ;;  %v9511_v10 = vld [vmem:[%s17895_s3 + $0xa88] sm:$0xff]  ;;  %v9533_v41 = vld [vmem:[%s17895_s3 + $0xaf8] sm:$0xff] }
 0x9c1   : > { %v6012_v23 = vpop.f32.mrf.mxu0  ;;  %v6155_v33 = vpop.f32.mrf.mxu1  ;;  %9525 = vmatprep.mubr.msk.f32.mxu1 %vm2093_vm4, %v9511_v10  ;;  %9547 = vmatprep.mubr.msk.f32.mxu0 %vm2093_vm4, %v9533_v41  ;;  %v18178_v10 = vld [vmem:[#allocation6_spill] sm:$0xff] }
 0x9c2   : > { %18157 = vst [vmem:[#allocation8_spill] sm:$0xff] %v15990_v39  ;;  %18159 = vst [vmem:[#allocation9_spill] sm:$0xff] %v15993_v13  ;;  %v18168_v23 = vld [vmem:[#allocation21_spill] sm:$0xff] }
 0x9c3   : > { %v6015_v35 = vpop.f32.mrf.mxu0  ;;  %v6158_v51 = vpop.f32.mrf.mxu1 }
 0x9c4   : > { %v15996_v16 = vadd.f32 %v6015_v35, %v18160_v9  ;;  %v15999_v15 = vadd.f32 %v6158_v51, %v18162_v37  ;;  %v18170_v35 = vld [vmem:[#allocation14_spill] sm:$0xff] }
 0x9c5   : > { %v6017_v54 = vpop.f32.mrf.mxu0  ;;  %v6160_v26 = vpop.f32.mrf.mxu1 }
 0x9c6   : > { %18161 = vst [vmem:[#allocation24_spill] sm:$0xff] %v15996_v16  ;;  %18163 = vst [vmem:[#allocation10_spill] sm:$0xff] %v15999_v15 }
 0x9c7   : > { %v6020_v52 = vpop.f32.mrf.mxu0  ;;  %v6163_v46 = vpop.f32.mrf.mxu1 }
 0x9c8   : > { %v16002_v8 = vadd.f32 %v6020_v52, %v18164_v3  ;;  %v16005_v36 = vadd.f32 %v6163_v46, %v18166_v5  ;;  %v18172_v52 = vld [vmem:[#allocation22_spill] sm:$0xff]  ;;  %v18174_v3 = vld [vmem:[#allocation15_spill] sm:$0xff] }
 0x9c9   : > { %v6022_v1 = vpop.f32.mrf.mxu0  ;;  %v6165_v21 = vpop.f32.mrf.mxu1 }
 0x9ca   : > { %18165 = vst [vmem:[#allocation5_spill] sm:$0xff] %v16002_v8  ;;  %18167 = vst [vmem:[#allocation11_spill] sm:$0xff] %v16005_v36  ;;  %v18180_v36 = vld [vmem:[#allocation16_spill] sm:$0xff] }
 0x9cb   : > { %v6025_v19 = vpop.f32.mrf.mxu0  ;;  %v6168_v29 = vpop.f32.mrf.mxu1 }
 0x9cc   : > { %v16014_v33 = vadd.f32 %v6025_v19, %v18168_v23  ;;  %v16017_v51 = vadd.f32 %v6168_v29, %v18170_v35  ;;  %v18176_v29 = vld [vmem:[#allocation23_spill] sm:$0xff] }
 0x9cd   : > { %v6027_v9 = vpop.f32.mrf.mxu0  ;;  %v6170_v37 = vpop.f32.mrf.mxu1 }
 0x9ce   : > { %18169 = vst [vmem:[#allocation19_spill] sm:$0xff] %v16014_v33  ;;  %18171 = vst [vmem:[#allocation12_spill] sm:$0xff] %v16017_v51 }
 0x9cf   : > { %v6030_v54 = vpop.f32.mrf.mxu0  ;;  %v6173_v26 = vpop.f32.mrf.mxu1 }
 0x9d0   : > { %v16022_v46 = vadd.f32 %v6030_v54, %v18172_v52  ;;  %v16025_v5 = vadd.f32 %v6173_v26, %v18174_v3  ;;  %v18182_v52 = vld [vmem:[#allocation3_spill] sm:$0xff] }
 0x9d1   : > { %v6032_v1 = vpop.f32.mrf.mxu0  ;;  %v6175_v21 = vpop.f32.mrf.mxu1 }
 0x9d2   : > { %18173 = vst [vmem:[#allocation20_spill] sm:$0xff] %v16022_v46  ;;  %18175 = vst [vmem:[#allocation13_spill] sm:$0xff] %v16025_v5 }
 0x9d3   : > { %v6035_v19 = vpop.f32.mrf.mxu0  ;;  %v6178_v23 = vpop.f32.mrf.mxu1 }
 0x9d4   : > { %v16028_v35 = vadd.f32 %v6035_v19, %v18176_v29  ;;  %v16031_v51 = vadd.f32 %v6178_v23, %v18178_v10 }
 0x9d5   : > { %v6037_v41 = vpop.f32.mrf.mxu0  ;;  %v6180_v9 = vpop.f32.mrf.mxu1 }
 0x9d6   : > { %18177 = vst [vmem:[#allocation21_spill] sm:$0xff] %v16028_v35  ;;  %18179 = vst [vmem:[#allocation14_spill] sm:$0xff] %v16031_v51 }
 0x9d7   : > { %v6040_v37 = vpop.f32.mrf.mxu0  ;;  %v6183_v33 = vpop.f32.mrf.mxu1 }
 0x9d8   : > { %v16034_v54 = vadd.f32 %v6040_v37, %v18180_v36  ;;  %v16037_v26 = vadd.f32 %v6183_v33, %v18182_v52 }
 0x9d9   : > { %v6042_v3 = vpop.f32.mrf.mxu0  ;;  %v6185_v1 = vpop.f32.mrf.mxu1 }
 0x9da   : > { %18181 = vst [vmem:[#allocation22_spill] sm:$0xff] %v16034_v54  ;;  %18183 = vst [vmem:[#allocation15_spill] sm:$0xff] %v16037_v26 }
 0x9db   : > { %v16039_v21 = vpop.f32.mrf.mxu0 }
 0x9dd   : > { %v11028_v5 = vpop.f32.mrf.mxu0 }
 0x9df   : > { %v16041_v19 = vpop.f32.mrf.mxu0 }
 0x9e1   : > { %v11031_v29 = vpop.f32.mrf.mxu0 }
 0x9e3   : > { %v16043_v23 = vpop.f32.mrf.mxu0 }
 0x9e5   : > { %v11034_v10 = vpop.f32.mrf.mxu0 }
 0x9e7   : > { %v16045_v41 = vpop.f32.mrf.mxu0 }
 0x9e9   : > { %v11037_v9 = vpop.f32.mrf.mxu0 }
 0x9eb   : > { %v16047_v51 = vpop.f32.mrf.mxu0 }
 0x9ed   : > { %v11040_v36 = vpop.f32.mrf.mxu0 }
 0x9ef   : > { %v16049_v37 = vpop.f32.mrf.mxu0 }
 0x9f1   : > { %v11043_v33 = vpop.f32.mrf.mxu0 }
 0x9f3   : > { %v16051_v52 = vpop.f32.mrf.mxu0 }
 0x9f5   : > { %v11046_v3 = vpop.f32.mrf.mxu0 }
 0x9f7   : > { %v16053_v1 = vpop.f32.mrf.mxu0 }
 0x9f9   : > { %v11049_v5 = vpop.f32.mrf.mxu0 }
 0x9fb   : > { %v16055_v26 = vpop.f32.mrf.mxu0 }
 0x9fd   : > { %v11052_v29 = vpop.f32.mrf.mxu0 }
 0x9ff   : > { %v16057_v54 = vpop.f32.mrf.mxu0 }
 0xa01   : > { %v11055_v10 = vpop.f32.mrf.mxu0 }
 0xa03   : > { %v16059_v35 = vpop.f32.mrf.mxu0 }
 0xa05   : > { %v11058_v9 = vpop.f32.mrf.mxu0 }
 0xa07   : > { %v16061_v46 = vpop.f32.mrf.mxu0 }
 0xa09   : > { %v11061_v36 = vpop.f32.mrf.mxu0 }
 0xa0b   : > { %v16063_v8 = vpop.f32.mrf.mxu0 }
 0xa0d   : > { %v11064_v33 = vpop.f32.mrf.mxu0 }
 0xa0f   : > { %v16065_v15 = vpop.f32.mrf.mxu0 }
 0xa11   : > { %v11067_v3 = vpop.f32.mrf.mxu0 }
 0xa13   : > { %v16067_v16 = vpop.f32.mrf.mxu0 }
 0xa15   : > { %v11070_v5 = vpop.f32.mrf.mxu0 }
 0xa17   : > { %v16069_v13 = vpop.f32.mrf.mxu0 }
 0xa18   : > { %6429 = vmatpush1.msra.mxu1 %v16069_v13  ;;  %6572 = vmatpush1.msra.mxu0 %v16069_v13 }
 0xa19   : > { %v11073_v29 = vpop.f32.mrf.mxu0  ;;  %6430 = vmatprep.subr.mxu1 %v17943_v14  ;;  %6573 = vmatprep.subr.mxu0 %v17943_v14 }
 0xa1a   : > { %6431 = vmatpush1.msra.mxu1 %v16067_v16  ;;  %6574 = vmatpush1.msra.mxu0 %v16067_v16 }
 0xa1b   : > { %v16077_v10 = vpop.f32.mrf.mxu0  ;;  %6432 = vmatprep.subr.mxu1 %v17943_v14  ;;  %6575 = vmatprep.subr.mxu0 %v17943_v14 }
 0xa1c   : > { %6433 = vmatpush1.msra.mxu1 %v16065_v15  ;;  %6576 = vmatpush1.msra.mxu0 %v16065_v15 }
 0xa1d   : > { %v11076_v9 = vpop.f32.mrf.mxu0  ;;  %6434 = vmatprep.subr.mxu1 %v17943_v14  ;;  %6577 = vmatprep.subr.mxu0 %v17943_v14 }
 0xa1e   : > { %6435 = vmatpush1.msra.mxu1 %v16063_v8  ;;  %6578 = vmatpush1.msra.mxu0 %v16063_v8 }
 0xa1f   : > { %v16087_v36 = vpop.f32.mrf.mxu0  ;;  %6436 = vmatprep.subr.mxu1 %v17943_v14  ;;  %6579 = vmatprep.subr.mxu0 %v17943_v14 }
 0xa20   : > { %6437 = vmatpush1.msra.mxu1 %v16061_v46  ;;  %6580 = vmatpush1.msra.mxu0 %v16061_v46 }
 0xa21   : > { %v11079_v33 = vpop.f32.mrf.mxu0  ;;  %6438 = vmatprep.subr.mxu1 %v17943_v14  ;;  %6581 = vmatprep.subr.mxu0 %v17943_v14 }
 0xa22   : > { %6439 = vmatpush1.msra.mxu1 %v16059_v35  ;;  %6582 = vmatpush1.msra.mxu0 %v16059_v35 }
 0xa23   : > { %v16097_v3 = vpop.f32.mrf.mxu0  ;;  %6440 = vmatprep.subr.mxu1 %v17943_v14  ;;  %6583 = vmatprep.subr.mxu0 %v17943_v14 }
 0xa24   : > { %6441 = vmatpush1.msra.mxu1 %v16057_v54  ;;  %6584 = vmatpush1.msra.mxu0 %v16057_v54 }
 0xa25   : > { %v11082_v5 = vpop.f32.mrf.mxu0  ;;  %6442 = vmatprep.subr.mxu1 %v17943_v14  ;;  %6585 = vmatprep.subr.mxu0 %v17943_v14 }
 0xa26   : > { %6443 = vmatpush1.msra.mxu1 %v16055_v26  ;;  %6586 = vmatpush1.msra.mxu0 %v16055_v26 }
 0xa27   : > { %v16107_v29 = vpop.f32.mrf.mxu0  ;;  %6444 = vmatprep.subr.mxu1 %v17943_v14  ;;  %6587 = vmatprep.subr.mxu0 %v17943_v14 }
 0xa28   : > { %6445 = vmatpush1.msra.mxu1 %v16053_v1  ;;  %6588 = vmatpush1.msra.mxu0 %v16053_v1 }
 0xa29   : > { %v11085_v9 = vpop.f32.mrf.mxu0  ;;  %6446 = vmatprep.subr.mxu1 %v17943_v14  ;;  %6589 = vmatprep.subr.mxu0 %v17943_v14 }
 0xa2a   : > { %6447 = vmatpush1.msra.mxu1 %v16051_v52  ;;  %6590 = vmatpush1.msra.mxu0 %v16051_v52 }
 0xa2b   : > { %v16117_v33 = vpop.f32.mrf.mxu0  ;;  %6448 = vmatprep.subr.mxu1 %v17943_v14  ;;  %6591 = vmatprep.subr.mxu0 %v17943_v14 }
 0xa2c   : > { %6449 = vmatpush1.msra.mxu1 %v16049_v37  ;;  %6592 = vmatpush1.msra.mxu0 %v16049_v37 }
 0xa2d   : > { %v11088_v5 = vpop.f32.mrf.mxu0  ;;  %6450 = vmatprep.subr.mxu1 %v17943_v14  ;;  %6593 = vmatprep.subr.mxu0 %v17943_v14 }
 0xa2e   : > { %6451 = vmatpush1.msra.mxu1 %v16047_v51  ;;  %6594 = vmatpush1.msra.mxu0 %v16047_v51 }
 0xa2f   : > { %v16127_v9 = vpop.f32.mrf.mxu0  ;;  %6452 = vmatprep.subr.mxu1 %v17943_v14  ;;  %6595 = vmatprep.subr.mxu0 %v17943_v14 }
 0xa30   : > { %6453 = vmatpush1.msra.mxu1 %v16045_v41  ;;  %6596 = vmatpush1.msra.mxu0 %v16045_v41 }
 0xa31   : > { %v11091_v39 = vpop.f32.mrf.mxu0  ;;  %6454 = vmatprep.subr.mxu1 %v17943_v14  ;;  %6597 = vmatprep.subr.mxu0 %v17943_v14 }
 0xa32   : > { %6455 = vmatpush1.msra.mxu1 %v16043_v23  ;;  %6598 = vmatpush1.msra.mxu0 %v16043_v23 }
 0xa33   : > { %v16137_v5 = vpop.f32.mrf.mxu0  ;;  %6456 = vmatprep.subr.mxu1 %v17943_v14  ;;  %6599 = vmatprep.subr.mxu0 %v17943_v14 }
 0xa34   : > { %6457 = vmatpush1.msra.mxu1 %v16041_v19  ;;  %6600 = vmatpush1.msra.mxu0 %v16041_v19 }
 0xa35   : > { %v11094_v17 = vpop.f32.mrf.mxu0  ;;  %6458 = vmatprep.subr.mxu1 %v17943_v14  ;;  %6601 = vmatprep.subr.mxu0 %v17943_v14 }
 0xa36   : > { %6459 = vmatpush1.msra.mxu1 %v16039_v21  ;;  %6602 = vmatpush1.msra.mxu0 %v16039_v21 }
 0xa37   : > { %v16147_v39 = vpop.f32.mrf.mxu0  ;;  %6474 = vmatprep.subr.mxu1 %v17943_v14  ;;  %6617 = vmatprep.subr.mxu0 %v17943_v14 }
 0xa39   : > { %v11097_v47 = vpop.f32.mrf.mxu0 }
 0xa3a   : > { %v9510_v47 = vld [vmem:[%s17895_s3 + $0xa80] sm:$0xff] }
 0xa3b   : > { %v16151_v48 = vpop.f32.mrf.mxu0 }
 0xa3c   : > { %9524 = vmatpush2.msk.msra.mxu1 %vm2115_vm5, %v16151_v48  ;;  %9546 = vmatpush2.msk.msra.mxu0 %vm2115_vm5, %v16151_v48 }
 0xa3d   : > { %v11100_v17 = vpop.f32.mrf.mxu0  ;;  %6476 = vmatprep.subr.mxu1 %v17943_v14  ;;  %6619 = vmatprep.subr.mxu0 %v17943_v14 }
 0xa3e   : > { %6477 = vmatpush2.msra.mxu1 %v16147_v39  ;;  %6620 = vmatpush2.msra.mxu0 %v16147_v39  ;;  %v9532_v17 = vld [vmem:[%s17895_s3 + $0xaf0] sm:$0xff] }
 0xa3f   : > { %6478 = vmatprep.subr.mxu1 %v17943_v14  ;;  %6621 = vmatprep.subr.mxu0 %v17943_v14 }
 0xa40   : > { %6479 = vmatpush2.msra.mxu1 %v16137_v5  ;;  %6622 = vmatpush2.msra.mxu0 %v16137_v5 }
 0xa41   : > { %6480 = vmatprep.subr.mxu1 %v17943_v14  ;;  %6623 = vmatprep.subr.mxu0 %v17943_v14 }
 0xa42   : > { %6481 = vmatpush2.msra.mxu1 %v16127_v9  ;;  %6624 = vmatpush2.msra.mxu0 %v16127_v9 }
 0xa43   : > { %6482 = vmatprep.subr.mxu1 %v17943_v14  ;;  %6625 = vmatprep.subr.mxu0 %v17943_v14 }
 0xa44   : > { %6483 = vmatpush2.msra.mxu1 %v16117_v33  ;;  %6626 = vmatpush2.msra.mxu0 %v16117_v33 }
 0xa45   : > { %6484 = vmatprep.subr.mxu1 %v17943_v14  ;;  %6627 = vmatprep.subr.mxu0 %v17943_v14 }
 0xa46   : > { %6485 = vmatpush2.msra.mxu1 %v16107_v29  ;;  %6628 = vmatpush2.msra.mxu0 %v16107_v29 }
 0xa47   : > { %6486 = vmatprep.subr.mxu1 %v17943_v14  ;;  %6629 = vmatprep.subr.mxu0 %v17943_v14 }
 0xa48   : > { %6487 = vmatpush2.msra.mxu1 %v16097_v3  ;;  %6630 = vmatpush2.msra.mxu0 %v16097_v3 }
 0xa49   : > { %6488 = vmatprep.subr.mxu1 %v17943_v14  ;;  %6631 = vmatprep.subr.mxu0 %v17943_v14 }
 0xa4a   : > { %6489 = vmatpush2.msra.mxu1 %v16087_v36  ;;  %6632 = vmatpush2.msra.mxu0 %v16087_v36 }
 0xa4b   : > { %6490 = vmatprep.subr.mxu1 %v17943_v14  ;;  %6633 = vmatprep.subr.mxu0 %v17943_v14 }
 0xa4c   : > { %6491 = vmatpush2.msra.mxu1 %v16077_v10  ;;  %6634 = vmatpush2.msra.mxu0 %v16077_v10 }
 0xa4d   : > { %6493 = vmatmul.mubr.f32.vlgmr.msra.gmra.mxu1 %v9510_v47  ;;  %6636 = vmatmul.mubr.f32.vlgmr.msra.gmra.mxu0 %v9532_v17  ;;  %v9512_v47 = vld [vmem:[%s17895_s3 + $0xa90] sm:$0xff]  ;;  %v9534_v17 = vld [vmem:[%s17895_s3 + $0xb00] sm:$0xff] }
 0xa4e   : > { %6714 = vmatprep.subr.mxu1 %v17943_v14  ;;  %6857 = vmatprep.subr.mxu0 %v17943_v14 }
 0xa4f   : > { %6715 = vmatpush1.msra.mxu1 %v16069_v13  ;;  %6858 = vmatpush1.msra.mxu0 %v16069_v13  ;;  %v9515_v13 = vld [vmem:[%s17895_s3 + $0xaa8] sm:$0xff] }
 0xa50   : > { %6716 = vmatprep.subr.mxu1 %v17943_v14  ;;  %6859 = vmatprep.subr.mxu0 %v17943_v14 }
 0xa51   : > { %9526 = vmatprep.mubr.msk.f32.mxu1 %vm2093_vm4, %v9513_v56  ;;  %9548 = vmatprep.mubr.msk.f32.mxu0 %vm2093_vm4, %v9535_v50  ;;  %v9537_v56 = vld [vmem:[%s17895_s3 + $0xb18] sm:$0xff]  ;;  %v9514_v50 = vld [vmem:[%s17895_s3 + $0xaa0] sm:$0xff] }
 0xa52   : > { %6717 = vmatpush1.msra.mxu1 %v16067_v16  ;;  %6860 = vmatpush1.msra.mxu0 %v16067_v16  ;;  %v9536_v16 = vld [vmem:[%s17895_s3 + $0xb10] sm:$0xff] }
 0xa53   : > { %6498 = vmatmul.mubr.f32.gmra.mxu1 %v9512_v47  ;;  %6641 = vmatmul.mubr.f32.gmra.mxu0 %v9534_v17  ;;  %v9539_v47 = vld [vmem:[%s17895_s3 + $0xb28] sm:$0xff]  ;;  %v9538_v17 = vld [vmem:[%s17895_s3 + $0xb20] sm:$0xff] }
 0xa54   : > { %6718 = vmatprep.subr.mxu1 %v17943_v14  ;;  %6861 = vmatprep.subr.mxu0 %v17943_v14 }
 0xa55   : > { %6719 = vmatpush1.msra.mxu1 %v16065_v15  ;;  %6862 = vmatpush1.msra.mxu0 %v16065_v15  ;;  %v9517_v15 = vld [vmem:[%s17895_s3 + $0xab8] sm:$0xff] }
 0xa56   : > { %6720 = vmatprep.subr.mxu1 %v17943_v14  ;;  %6863 = vmatprep.subr.mxu0 %v17943_v14 }
 0xa57   : > { %9527 = vmatprep.mubr.msk.f32.mxu1 %vm2093_vm4, %v9515_v13  ;;  %9549 = vmatprep.mubr.msk.f32.mxu0 %vm2093_vm4, %v9537_v56  ;;  %v9541_v13 = vld [vmem:[%s17895_s3 + $0xb38] sm:$0xff]  ;;  %v9540_v56 = vld [vmem:[%s17895_s3 + $0xb30] sm:$0xff] }
 0xa58   : > { %6721 = vmatpush1.msra.mxu1 %v16063_v8  ;;  %6864 = vmatpush1.msra.mxu0 %v16063_v8  ;;  %v9516_v8 = vld [vmem:[%s17895_s3 + $0xab0] sm:$0xff] }
 0xa59   : > { %6503 = vmatmul.mubr.f32.gmra.mxu1 %v9514_v50  ;;  %6646 = vmatmul.mubr.f32.gmra.mxu0 %v9536_v16  ;;  %v9543_v50 = vld [vmem:[%s17895_s3 + $0xb48] sm:$0xff]  ;;  %v9542_v16 = vld [vmem:[%s17895_s3 + $0xb40] sm:$0xff] }
 0xa5a   : > { %6722 = vmatprep.subr.mxu1 %v17943_v14  ;;  %6865 = vmatprep.subr.mxu0 %v17943_v14 }
 0xa5b   : > { %6723 = vmatpush1.msra.mxu1 %v16061_v46  ;;  %6866 = vmatpush1.msra.mxu0 %v16061_v46  ;;  %v9519_v46 = vld [vmem:[%s17895_s3 + $0xac8] sm:$0xff] }
 0xa5c   : > { %6724 = vmatprep.subr.mxu1 %v17943_v14  ;;  %6867 = vmatprep.subr.mxu0 %v17943_v14 }
 0xa5d   : > { %9528 = vmatprep.mubr.msk.f32.mxu1 %vm2093_vm4, %v9517_v15  ;;  %9550 = vmatprep.mubr.msk.f32.mxu0 %vm2093_vm4, %v9539_v47  ;;  %v9545_v15 = vld [vmem:[%s17895_s3 + $0xb58] sm:$0x1]  ;;  %v9544_v47 = vld [vmem:[%s17895_s3 + $0xb50] sm:$0x1] }
 0xa5e   : > { %6725 = vmatpush1.msra.mxu1 %v16059_v35  ;;  %6868 = vmatpush1.msra.mxu0 %v16059_v35  ;;  %v9518_v35 = vld [vmem:[%s17895_s3 + $0xac0] sm:$0xff] }
 0xa5f   : > { %6508 = vmatmul.mubr.f32.gmra.mxu1 %v9516_v8  ;;  %6651 = vmatmul.mubr.f32.gmra.mxu0 %v9538_v17  ;;  %v9583_v8 = vld [vmem:[%s17895_s3 + $0xc08] sm:$0xff] }
 0xa60   : > { %6726 = vmatprep.subr.mxu1 %v17943_v14  ;;  %6869 = vmatprep.subr.mxu0 %v17943_v14  ;;  %v9599_v17 = vld [vmem:[%s17896_s4 + $0xe8] sm:$0xff] }
 0xa61   : > { %6727 = vmatpush1.msra.mxu1 %v16057_v54  ;;  %6870 = vmatpush1.msra.mxu0 %v16057_v54  ;;  %v9521_v54 = vld [vmem:[%s17895_s3 + $0xad8] sm:$0xff] }
 0xa62   : > { %6728 = vmatprep.subr.mxu1 %v17943_v14  ;;  %6871 = vmatprep.subr.mxu0 %v17943_v14 }
 0xa63   : > { %9529 = vmatprep.mubr.msk.f32.mxu1 %vm2093_vm4, %v9519_v46  ;;  %9551 = vmatprep.mubr.msk.f32.mxu0 %vm2093_vm4, %v9541_v13  ;;  %v9560_v46 = vld [vmem:[%s17895_s3 + $0xb90] sm:$0xff]  ;;  %v9582_v13 = vld [vmem:[%s17895_s3 + $0xc00] sm:$0xff] }
 0xa64   : > { %6729 = vmatpush1.msra.mxu1 %v16055_v26  ;;  %6872 = vmatpush1.msra.mxu0 %v16055_v26  ;;  %v9520_v26 = vld [vmem:[%s17895_s3 + $0xad0] sm:$0xff] }
 0xa65   : > { %6513 = vmatmul.mubr.f32.gmra.mxu1 %v9518_v35  ;;  %6656 = vmatmul.mubr.f32.gmra.mxu0 %v9540_v56  ;;  %v9563_v35 = vld [vmem:[%s17895_s3 + $0xba8] sm:$0xff]  ;;  %v9585_v56 = vld [vmem:[%s17895_s3 + $0xc18] sm:$0xff] }
 0xa66   : > { %6730 = vmatprep.subr.mxu1 %v17943_v14  ;;  %6873 = vmatprep.subr.mxu0 %v17943_v14 }
 0xa67   : > { %6731 = vmatpush1.msra.mxu1 %v16053_v1  ;;  %6874 = vmatpush1.msra.mxu0 %v16053_v1  ;;  %v9523_v1 = vld [vmem:[%s17895_s3 + $0xae8] sm:$0x1] }
 0xa68   : > { %6732 = vmatprep.subr.mxu1 %v17943_v14  ;;  %6875 = vmatprep.subr.mxu0 %v17943_v14 }
 0xa69   : > { %9530 = vmatprep.mubr.msk.f32.mxu1 %vm2093_vm4, %v9521_v54  ;;  %9552 = vmatprep.mubr.msk.f32.mxu0 %vm2093_vm4, %v9543_v50  ;;  %v9598_v54 = vld [vmem:[%s17896_s4 + $0xe0] sm:$0xff] }
 0xa6a   : > { %6733 = vmatpush1.msra.mxu1 %v16051_v52  ;;  %6876 = vmatpush1.msra.mxu0 %v16051_v52  ;;  %v9522_v52 = vld [vmem:[%s17895_s3 + $0xae0] sm:$0x1] }
 0xa6b   : > { %6518 = vmatmul.mubr.f32.gmra.mxu1 %v9520_v26  ;;  %6661 = vmatmul.mubr.f32.gmra.mxu0 %v9542_v16  ;;  %v9562_v50 = vld [vmem:[%s17895_s3 + $0xba0] sm:$0xff]  ;;  %v9584_v26 = vld [vmem:[%s17895_s3 + $0xc10] sm:$0xff]  ;;  %v9565_v16 = vld [vmem:[%s17895_s3 + $0xbb8] sm:$0xff] }
 0xa6c   : > { %6734 = vmatprep.subr.mxu1 %v17943_v14  ;;  %6877 = vmatprep.subr.mxu0 %v17943_v14 }
 0xa6d   : > { %6735 = vmatpush1.msra.mxu1 %v16049_v37  ;;  %6878 = vmatpush1.msra.mxu0 %v16049_v37  ;;  %v9601_v37 = vld [vmem:[%s17896_s4 + $0xf8] sm:$0xff] }
 0xa6e   : > { %6736 = vmatprep.subr.mxu1 %v17943_v14  ;;  %6879 = vmatprep.subr.mxu0 %v17943_v14 }
 0xa6f   : > { %9531 = vmatprep.mubr.msk.f32.mxu1 %vm2093_vm4, %v9523_v1  ;;  %9553 = vmatprep.mubr.msk.f32.mxu0 %vm2093_vm4, %v9545_v15  ;;  %v9587_v1 = vld [vmem:[%s17895_s3 + $0xc28] sm:$0xff]  ;;  %v9564_v15 = vld [vmem:[%s17895_s3 + $0xbb0] sm:$0xff] }
 0xa70   : > { %6737 = vmatpush1.msra.mxu1 %v16047_v51  ;;  %6880 = vmatpush1.msra.mxu0 %v16047_v51  ;;  %v9577_v51 = vld [vmem:[%s17895_s3 + $0xbd8] sm:$0xff] }
 0xa71   : > { %6523 = vmatmul.mubr.f32.gmra.mxu1 %v9522_v52  ;;  %6666 = vmatmul.mubr.f32.gmra.mxu0 %v9544_v47  ;;  %v9586_v52 = vld [vmem:[%s17895_s3 + $0xc20] sm:$0xff]  ;;  %v9567_v47 = vld [vmem:[%s17895_s3 + $0xbc8] sm:$0x1] }
 0xa72   : > { %6738 = vmatprep.subr.mxu1 %v17943_v14  ;;  %6881 = vmatprep.subr.mxu0 %v17943_v14 }
 0xa73   : > { %6739 = vmatpush1.msra.mxu1 %v16045_v41  ;;  %6882 = vmatpush1.msra.mxu0 %v16045_v41  ;;  %v9579_v41 = vld [vmem:[%s17895_s3 + $0xbe8] sm:$0xff] }
 0xa74   : > { %6740 = vmatprep.subr.mxu1 %v17943_v14  ;;  %6883 = vmatprep.subr.mxu0 %v17943_v14 }
 0xa75   : > { %6741 = vmatpush1.msra.mxu1 %v16043_v23  ;;  %6884 = vmatpush1.msra.mxu0 %v16043_v23  ;;  %v9557_v23 = vld [vmem:[%s17895_s3 + $0xb78] sm:$0xff] }
 0xa76   : > { %6742 = vmatprep.subr.mxu1 %v17943_v14  ;;  %6885 = vmatprep.subr.mxu0 %v17943_v14 }
 0xa77   : > { %6743 = vmatpush1.msra.mxu1 %v16041_v19  ;;  %6886 = vmatpush1.msra.mxu0 %v16041_v19  ;;  %v9576_v19 = vld [vmem:[%s17895_s3 + $0xbd0] sm:$0xff] }
 0xa78   : > { %6744 = vmatprep.subr.mxu1 %v17943_v14  ;;  %6887 = vmatprep.subr.mxu0 %v17943_v14 }
 0xa79   : > { %6745 = vmatpush1.msra.mxu1 %v16039_v21  ;;  %6888 = vmatpush1.msra.mxu0 %v16039_v21  ;;  %v9554_v21 = vld [vmem:[%s17895_s3 + $0xb60] sm:$0xff] }
 0xa7a   : > { %6760 = vmatprep.subr.mxu1 %v17943_v14  ;;  %6903 = vmatprep.subr.mxu0 %v17943_v14 }
 0xa7b   : > { %9568 = vmatpush2.msk.msra.mxu1 %vm2115_vm5, %v16151_v48  ;;  %9590 = vmatpush2.msk.msra.mxu0 %vm2115_vm5, %v16151_v48  ;;  %v9555_v48 = vld [vmem:[%s17895_s3 + $0xb68] sm:$0xff] }
 0xa7c   : > { %6762 = vmatprep.subr.mxu1 %v17943_v14  ;;  %6905 = vmatprep.subr.mxu0 %v17943_v14 }
 0xa7d   : > { %6763 = vmatpush2.msra.mxu1 %v16147_v39  ;;  %6906 = vmatpush2.msra.mxu0 %v16147_v39  ;;  %v9561_v39 = vld [vmem:[%s17895_s3 + $0xb98] sm:$0xff] }
 0xa7e   : > { %6764 = vmatprep.subr.mxu1 %v17943_v14  ;;  %6907 = vmatprep.subr.mxu0 %v17943_v14 }
 0xa7f   : > { %6765 = vmatpush2.msra.mxu1 %v16137_v5  ;;  %6908 = vmatpush2.msra.mxu0 %v16137_v5  ;;  %v9580_v5 = vld [vmem:[%s17895_s3 + $0xbf0] sm:$0xff] }
 0xa80   : > { %6766 = vmatprep.subr.mxu1 %v17943_v14  ;;  %6909 = vmatprep.subr.mxu0 %v17943_v14 }
 0xa81   : > { %6767 = vmatpush2.msra.mxu1 %v16127_v9  ;;  %6910 = vmatpush2.msra.mxu0 %v16127_v9  ;;  %v9558_v9 = vld [vmem:[%s17895_s3 + $0xb80] sm:$0xff] }
 0xa82   : > { %6768 = vmatprep.subr.mxu1 %v17943_v14  ;;  %6911 = vmatprep.subr.mxu0 %v17943_v14 }
 0xa83   : > { %6769 = vmatpush2.msra.mxu1 %v16117_v33  ;;  %6912 = vmatpush2.msra.mxu0 %v16117_v33  ;;  %v9600_v33 = vld [vmem:[%s17896_s4 + $0xf0] sm:$0xff] }
 0xa84   : > { %6770 = vmatprep.subr.mxu1 %v17943_v14  ;;  %6913 = vmatprep.subr.mxu0 %v17943_v14 }
 0xa85   : > { %6771 = vmatpush2.msra.mxu1 %v16107_v29  ;;  %6914 = vmatpush2.msra.mxu0 %v16107_v29  ;;  %v9581_v29 = vld [vmem:[%s17895_s3 + $0xbf8] sm:$0xff] }
 0xa86   : > { %6772 = vmatprep.subr.mxu1 %v17943_v14  ;;  %6915 = vmatprep.subr.mxu0 %v17943_v14 }
 0xa87   : > { %6773 = vmatpush2.msra.mxu1 %v16097_v3  ;;  %6916 = vmatpush2.msra.mxu0 %v16097_v3  ;;  %v9559_v3 = vld [vmem:[%s17895_s3 + $0xb88] sm:$0xff] }
 0xa88   : > { %6774 = vmatprep.subr.mxu1 %v17943_v14  ;;  %6917 = vmatprep.subr.mxu0 %v17943_v14 }
 0xa89   : > { %6775 = vmatpush2.msra.mxu1 %v16087_v36  ;;  %6918 = vmatpush2.msra.mxu0 %v16087_v36  ;;  %v9556_v36 = vld [vmem:[%s17895_s3 + $0xb70] sm:$0xff] }
 0xa8a   : > { %6776 = vmatprep.subr.mxu1 %v17943_v14  ;;  %6919 = vmatprep.subr.mxu0 %v17943_v14 }
 0xa8b   : > { %6777 = vmatpush2.msra.mxu1 %v16077_v10  ;;  %9569 = vmatprep.mubr.msk.f32.mxu1 %vm2093_vm4, %v9555_v48  ;;  %v9589_v48 = vld [vmem:[%s17895_s3 + $0xc38] sm:$0x1] }
 0xa8c   : > { %6920 = vmatpush2.msra.mxu0 %v16077_v10  ;;  %9591 = vmatprep.mubr.msk.f32.mxu0 %vm2093_vm4, %v9577_v51  ;;  %v9578_v10 = vld [vmem:[%s17895_s3 + $0xbe0] sm:$0xff] }
 0xa8d   : > { %6779 = vmatmul.mubr.f32.vlgmr.msra.gmra.mxu1 %v9554_v21  ;;  %6922 = vmatmul.mubr.f32.vlgmr.msra.gmra.mxu0 %v9576_v19  ;;  %v9566_v51 = vld [vmem:[%s17895_s3 + $0xbc0] sm:$0x1]  ;;  %v9588_v21 = vld [vmem:[%s17895_s3 + $0xc30] sm:$0x1] }
 0xa8e   : > { %9570 = vmatprep.mubr.msk.f32.mxu1 %vm2093_vm4, %v9557_v23  ;;  %9592 = vmatprep.mubr.msk.f32.mxu0 %vm2093_vm4, %v9579_v41 }
 0xa8f   : > { %11101 = vmatprep.subr.mxu1 %v17943_v14  ;;  %7198 = vmatprep.subr.mxu0 %v17943_v14 }
 0xa90   : > { %11102 = vmatpush3.msra.mxu1 %v9601_v37 }
 0xa91   : > { %6784 = vmatmul.mubr.f32.gmra.mxu1 %v9556_v36  ;;  %6927 = vmatmul.mubr.f32.gmra.mxu0 %v9578_v10 }
 0xa92   : > { %9571 = vmatprep.mubr.msk.f32.mxu1 %vm2093_vm4, %v9559_v3  ;;  %9593 = vmatprep.mubr.msk.f32.mxu0 %vm2093_vm4, %v9581_v29 }
 0xa93   : > { %11103 = vmatprep.subr.mxu1 %v17943_v14 }
 0xa94   : > { %11104 = vmatpush3.msra.mxu1 %v9600_v33 }
 0xa95   : > { %6789 = vmatmul.mubr.f32.gmra.mxu1 %v9558_v9  ;;  %6932 = vmatmul.mubr.f32.gmra.mxu0 %v9580_v5 }
 0xa96   : > { %9572 = vmatprep.mubr.msk.f32.mxu1 %vm2093_vm4, %v9561_v39  ;;  %9594 = vmatprep.mubr.msk.f32.mxu0 %vm2093_vm4, %v9583_v8 }
 0xa97   : > { %11105 = vmatprep.subr.mxu1 %v17943_v14 }
 0xa98   : > { %11106 = vmatpush3.msra.mxu1 %v9599_v17 }
 0xa99   : > { %6794 = vmatmul.mubr.f32.gmra.mxu1 %v9560_v46  ;;  %6937 = vmatmul.mubr.f32.gmra.mxu0 %v9582_v13 }
 0xa9a   : > { %9573 = vmatprep.mubr.msk.f32.mxu1 %vm2093_vm4, %v9563_v35  ;;  %9595 = vmatprep.mubr.msk.f32.mxu0 %vm2093_vm4, %v9585_v56 }
 0xa9b   : > { %11107 = vmatprep.subr.mxu1 %v17943_v14 }
 0xa9c   : > { %11108 = vmatpush3.msra.mxu1 %v9598_v54 }
 0xa9d   : > { %6799 = vmatmul.mubr.f32.gmra.mxu1 %v9562_v50  ;;  %6942 = vmatmul.mubr.f32.gmra.mxu0 %v9584_v26 }
 0xa9e   : > { %9574 = vmatprep.mubr.msk.f32.mxu1 %vm2093_vm4, %v9565_v16  ;;  %9596 = vmatprep.mubr.msk.f32.mxu0 %vm2093_vm4, %v9587_v1  ;;  %v18184_v1 = vld [vmem:[#allocation17_spill] sm:$0xff] }
 0xa9f   : > { %7341 = vmatprep.subr.mxu1 %v17943_v14 }
 0xaa1   : > { %6804 = vmatmul.mubr.f32.gmra.mxu1 %v9564_v15  ;;  %6947 = vmatmul.mubr.f32.gmra.mxu0 %v9586_v52 }
 0xaa2   : > { %9575 = vmatprep.mubr.msk.f32.mxu1 %vm2093_vm4, %v9567_v47  ;;  %9597 = vmatprep.mubr.msk.f32.mxu0 %vm2093_vm4, %v9589_v48 }
 0xaa5   : > { %6809 = vmatmul.mubr.f32.gmra.mxu1 %v9566_v51  ;;  %6952 = vmatmul.mubr.f32.gmra.mxu0 %v9588_v21  ;;  %v18186_v51 = vld [vmem:[#allocation7_spill] sm:$0xff]  ;;  %v18188_v21 = vld [vmem:[#allocation18_spill] sm:$0xff] }
 0xaa6   : > { %11109 = vmatprep.mubr.msk.f32.mxu1 %vm11292_vm1, %v17943_v14 }
 0xaa9   : > { %11110 = vmatmul.mubr.msk.f32.vlgmr.msra.gmra.mxu1 %vm1558_vm3, %v11974_v0 }
 0xaaa   : > { %11112 = vmatprep.mubr.msk.f32.mxu1 %vm11292_vm1, %v17943_v14 }
 0xaad   : > { %11113 = vmatmul.mubr.msk.f32.gmra.mxu1 %vm1558_vm3, %v11990_v44 }
 0xaae   : > { %11115 = vmatprep.mubr.msk.f32.mxu1 %vm11292_vm1, %v17943_v14 }
 0xab1   : > { %11116 = vmatmul.mubr.msk.f32.gmra.mxu1 %vm1558_vm3, %v12006_v43 }
 0xab2   : > { %11118 = vmatprep.mubr.msk.f32.mxu1 %vm11292_vm1, %v17943_v14 }
 0xab5   : > { %11119 = vmatmul.mubr.msk.f32.gmra.mxu1 %vm1558_vm3, %v12022_v7 }
 0xab6   : > { %11121 = vmatprep.mubr.msk.f32.mxu1 %vm11292_vm1, %v17943_v14 }
 0xab9   : > { %11122 = vmatmul.mubr.msk.f32.gmra.mxu1 %vm1558_vm3, %v12039_v59 }
 0xaba   : > { %11124 = vmatprep.mubr.msk.f32.mxu1 %vm11292_vm1, %v17943_v14 }
 0xabd   : > { %11125 = vmatmul.mubr.msk.f32.gmra.mxu1 %vm1558_vm3, %v12056_v24 }
 0xabe   : > { %11127 = vmatprep.mubr.msk.f32.mxu1 %vm11292_vm1, %v17943_v14 }
 0xac1   : > { %11128 = vmatmul.mubr.msk.f32.gmra.mxu1 %vm1558_vm3, %v12073_v53 }
 0xac2   : > { %11130 = vmatprep.mubr.msk.f32.mxu1 %vm11292_vm1, %v17943_v14 }
 0xac5   : > { %11131 = vmatmul.mubr.msk.f32.gmra.mxu1 %vm1558_vm3, %v12090_v27 }
 0xac6   : > { %11133 = vmatprep.mubr.msk.f32.mxu1 %vm11292_vm1, %v17943_v14 }
 0xac9   : > { %11134 = vmatmul.mubr.msk.f32.gmra.mxu1 %vm1558_vm3, %v12107_v11 }
 0xaca   : > { %11136 = vmatprep.mubr.msk.f32.mxu1 %vm11292_vm1, %v17943_v14 }
 0xacd   : > { %11137 = vmatmul.mubr.msk.f32.gmra.mxu1 %vm1558_vm3, %v17988_v63 }
 0xace   : > { %11139 = vmatprep.mubr.msk.f32.mxu1 %vm11292_vm1, %v17943_v14 }
 0xad1   : > { %11140 = vmatmul.mubr.msk.f32.gmra.mxu1 %vm1558_vm3, %v17990_v38 }
 0xad2   : > { %11142 = vmatprep.mubr.msk.f32.mxu1 %vm11292_vm1, %v17943_v14 }
 0xad5   : > { %11143 = vmatmul.mubr.msk.f32.gmra.mxu1 %vm1558_vm3, %v17991_v58 }
 0xad6   : > { %11145 = vmatprep.mubr.msk.f32.mxu1 %vm11292_vm1, %v17943_v14 }
 0xad9   : > { %11146 = vmatmul.mubr.msk.f32.gmra.mxu1 %vm1558_vm3, %v17992_v30 }
 0xada   : > { %11148 = vmatprep.mubr.msk.f32.mxu1 %vm11292_vm1, %v17943_v14 }
 0xadd   : > { %11149 = vmatmul.mubr.msk.f32.gmra.mxu1 %vm1558_vm3, %v17993_v61 }
 0xade   : > { %11151 = vmatprep.mubr.msk.f32.mxu1 %vm11292_vm1, %v17943_v14 }
 0xae1   : > { %11152 = vmatmul.mubr.msk.f32.gmra.mxu1 %vm1558_vm3, %v17994_v22 }
 0xae2   : > { %11154 = vmatprep.mubr.msk.f32.mxu1 %vm11292_vm1, %v17943_v14 }
 0xae5   : > { %11155 = vmatmul.mubr.msk.f32.gmra.mxu1 %vm1558_vm3, %v17995_v49 }
 0xae6   : > { %11157 = vmatprep.mubr.msk.f32.mxu1 %vm11292_vm1, %v17943_v14 }
 0xae9   : > { %11158 = vmatmul.mubr.msk.f32.gmra.mxu1 %vm1558_vm3, %v17996_v45 }
 0xaea   : > { %11160 = vmatprep.mubr.msk.f32.mxu1 %vm11292_vm1, %v17943_v14 }
 0xaed   : > { %11161 = vmatmul.mubr.msk.f32.gmra.mxu1 %vm1558_vm3, %v17998_v55 }
 0xaee   : > { %11163 = vmatprep.mubr.msk.f32.mxu1 %vm11292_vm1, %v17943_v14 }
 0xaf1   : > { %11164 = vmatmul.mubr.msk.f32.gmra.mxu1 %vm1558_vm3, %v17999_v42 }
 0xaf2   : > { %11166 = vmatprep.mubr.msk.f32.mxu1 %vm11292_vm1, %v17943_v14 }
 0xaf5   : > { %11167 = vmatmul.mubr.msk.f32.gmra.mxu1 %vm1558_vm3, %v18001_v25 }
 0xaf6   : > { %11169 = vmatprep.mubr.msk.f32.mxu1 %vm11292_vm1, %v17943_v14 }
 0xaf9   : > { %11170 = vmatmul.mubr.msk.f32.gmra.mxu1 %vm1558_vm3, %v18003_v20 }
 0xafa   : > { %11172 = vmatprep.mubr.msk.f32.mxu1 %vm11292_vm1, %v17943_v14 }
 0xafd   : > { %11173 = vmatmul.mubr.msk.f32.gmra.mxu1 %vm1558_vm3, %v18004_v28 }
 0xafe   : > { %11175 = vmatprep.mubr.msk.f32.mxu1 %vm11292_vm1, %v17943_v14 }
 0xb01   : > { %11176 = vmatmul.mubr.msk.f32.gmra.mxu1 %vm1558_vm3, %v18006_v62 }
 0xb02   : > { %11178 = vmatprep.mubr.msk.f32.mxu1 %vm11292_vm1, %v17943_v14 }
 0xb05   : > { %11179 = vmatmul.mubr.msk.f32.gmra.mxu1 %vm1558_vm3, %v18008_v4 }
 0xb06   : > { %11181 = vmatprep.mubr.msk.f32.mxu1 %vm11292_vm1, %v17943_v14 }
 0xb09   : > { %11182 = vmatmul.mubr.msk.f32.gmra.mxu1 %vm1558_vm3, %v18009_v12 }
 0xb0d   : > { %v6494_v19 = vpop.f32.mrf.mxu1  ;;  %v6637_v23 = vpop.f32.mrf.mxu0 }
 0xb0e   : > { %v16598_v41 = vadd.f32 %v6494_v19, %v15948_v6  ;;  %v16601_v37 = vadd.f32 %v6637_v23, %v15951_v40 }
 0xb0f   : > { %v6496_v36 = vpop.f32.mrf.mxu1  ;;  %v6639_v10 = vpop.f32.mrf.mxu0 }
 0xb13   : > { %v6499_v3 = vpop.f32.mrf.mxu1  ;;  %v6642_v29 = vpop.f32.mrf.mxu0 }
 0xb14   : > { %v16604_v33 = vadd.f32 %v6499_v3, %v15954_v31  ;;  %v16607_v9 = vadd.f32 %v6642_v29, %v15957_v34  ;;  %v18190_v3 = vld [vmem:[#allocation2_spill] sm:$0xff]  ;;  %v18192_v29 = vld [vmem:[#allocation4_spill] sm:$0xff] }
 0xb15   : > { %v6501_v5 = vpop.f32.mrf.mxu1  ;;  %v6644_v39 = vpop.f32.mrf.mxu0 }
 0xb19   : > { %v6504_v8 = vpop.f32.mrf.mxu1  ;;  %v6647_v17 = vpop.f32.mrf.mxu0 }
 0xb1a   : > { %v16610_v6 = vadd.f32 %v6504_v8, %v15960_v32  ;;  %v16613_v40 = vadd.f32 %v6647_v17, %v15963_v60 }
 0xb1b   : > { %v6506_v46 = vpop.f32.mrf.mxu1  ;;  %v6649_v13 = vpop.f32.mrf.mxu0 }
 0xb1c   : > { %v18194_v13 = vld [vmem:[#allocation8_spill] sm:$0xff] }
 0xb1f   : > { %v6509_v35 = vpop.f32.mrf.mxu1  ;;  %v6652_v56 = vpop.f32.mrf.mxu0 }
 0xb20   : > { %v16616_v31 = vadd.f32 %v6509_v35, %v15966_v57  ;;  %v16619_v34 = vadd.f32 %v6652_v56, %v15969_v18  ;;  %v18196_v56 = vld [vmem:[#allocation9_spill] sm:$0xff] }
 0xb21   : > { %v6511_v54 = vpop.f32.mrf.mxu1  ;;  %v6654_v50 = vpop.f32.mrf.mxu0 }
 0xb25   : > { %v6514_v26 = vpop.f32.mrf.mxu1  ;;  %v6657_v16 = vpop.f32.mrf.mxu0 }
 0xb26   : > { %v16622_v32 = vadd.f32 %v6514_v26, %v15972_v2  ;;  %v16625_v60 = vadd.f32 %v6657_v16, %v18184_v1 }
 0xb27   : > { %v6516_v15 = vpop.f32.mrf.mxu1  ;;  %v6659_v52 = vpop.f32.mrf.mxu0 }
 0xb28   : > { %18185 = vst [vmem:[#allocation23_spill] sm:$0xff] %v16625_v60  ;;  %v18198_v15 = vld [vmem:[#allocation24_spill] sm:$0xff]  ;;  %v9652_v60 = vld [vmem:[%s17895_s3 + $0xcc8] sm:$0xff] }
 0xb2b   : > { %v6519_v47 = vpop.f32.mrf.mxu1  ;;  %v6662_v48 = vpop.f32.mrf.mxu0 }
 0xb2c   : > { %v16628_v57 = vadd.f32 %v6519_v47, %v18186_v51  ;;  %v16631_v18 = vadd.f32 %v6662_v48, %v18188_v21  ;;  %v18200_v47 = vld [vmem:[#allocation10_spill] sm:$0xff] }
 0xb2d   : > { %v6521_v19 = vpop.f32.mrf.mxu1  ;;  %v6664_v23 = vpop.f32.mrf.mxu0 }
 0xb2e   : > { %18187 = vst [vmem:[#allocation6_spill] sm:$0xff] %v16628_v57  ;;  %18189 = vst [vmem:[#allocation16_spill] sm:$0xff] %v16631_v18  ;;  %v9630_v57 = vld [vmem:[%s17895_s3 + $0xc58] sm:$0xff] }
 0xb31   : > { %v6524_v36 = vpop.f32.mrf.mxu1  ;;  %v6667_v10 = vpop.f32.mrf.mxu0 }
 0xb32   : > { %v16634_v2 = vadd.f32 %v6524_v36, %v18190_v3  ;;  %v16637_v5 = vadd.f32 %v6667_v10, %v18192_v29  ;;  %v18202_v36 = vld [vmem:[#allocation5_spill] sm:$0xff]  ;;  %v18204_v3 = vld [vmem:[#allocation11_spill] sm:$0xff] }
 0xb33   : > { %v6526_v39 = vpop.f32.mrf.mxu1  ;;  %v6669_v8 = vpop.f32.mrf.mxu0 }
 0xb34   : > { %18191 = vst [vmem:[#allocation3_spill] sm:$0xff] %v16634_v2  ;;  %18193 = vst [vmem:[#allocation17_spill] sm:$0xff] %v16637_v5 }
 0xb4d   : > { %v6780_v17 = vpop.f32.mrf.mxu1  ;;  %v6923_v46 = vpop.f32.mrf.mxu0 }
 0xb4e   : > { %v16640_v35 = vadd.f32 %v6780_v17, %v18194_v13  ;;  %v16643_v54 = vadd.f32 %v6923_v46, %v18196_v56  ;;  %v9628_v13 = vld [vmem:[%s17895_s3 + $0xc48] sm:$0xff]  ;;  %v9650_v56 = vld [vmem:[%s17895_s3 + $0xcb8] sm:$0xff] }
 0xb4f   : > { %v6782_v50 = vpop.f32.mrf.mxu1  ;;  %v6925_v26 = vpop.f32.mrf.mxu0  ;;  %9642 = vmatprep.mubr.msk.f32.mxu0 %vm2093_vm4, %v9628_v13  ;;  %9664 = vmatprep.mubr.msk.f32.mxu1 %vm2093_vm4, %v9650_v56  ;;  %v18216_v13 = vld [vmem:[#allocation14_spill] sm:$0xff] }
 0xb50   : > { %18195 = vst [vmem:[#allocation7_spill] sm:$0xff] %v16640_v35  ;;  %18197 = vst [vmem:[#allocation18_spill] sm:$0xff] %v16643_v54  ;;  %v18206_v50 = vld [vmem:[#allocation19_spill] sm:$0xff] }
 0xb51   : > { %v6785_v16 = vpop.f32.mrf.mxu1  ;;  %v6928_v1 = vpop.f32.mrf.mxu0 }
 0xb52   : > { %v16646_v52 = vadd.f32 %v6785_v16, %v18198_v15  ;;  %v16649_v48 = vadd.f32 %v6928_v1, %v18200_v47  ;;  %v18208_v16 = vld [vmem:[#allocation12_spill] sm:$0xff] }
 0xb53   : > { %v6787_v51 = vpop.f32.mrf.mxu1  ;;  %v6930_v21 = vpop.f32.mrf.mxu0 }
 0xb54   : > { %18199 = vst [vmem:[#allocation2_spill] sm:$0xff] %v16646_v52  ;;  %18201 = vst [vmem:[#allocation4_spill] sm:$0xff] %v16649_v48 }
 0xb55   : > { %v6790_v19 = vpop.f32.mrf.mxu1  ;;  %v6933_v23 = vpop.f32.mrf.mxu0 }
 0xb56   : > { %v16652_v10 = vadd.f32 %v6790_v19, %v18202_v36  ;;  %v16655_v29 = vadd.f32 %v6933_v23, %v18204_v3  ;;  %v18210_v19 = vld [vmem:[#allocation20_spill] sm:$0xff]  ;;  %v18212_v36 = vld [vmem:[#allocation13_spill] sm:$0xff] }
 0xb57   : > { %v6792_v39 = vpop.f32.mrf.mxu1  ;;  %v6935_v8 = vpop.f32.mrf.mxu0 }
 0xb58   : > { %18203 = vst [vmem:[#allocation8_spill] sm:$0xff] %v16652_v10  ;;  %18205 = vst [vmem:[#allocation9_spill] sm:$0xff] %v16655_v29  ;;  %v18218_v29 = vld [vmem:[#allocation22_spill] sm:$0xff] }
 0xb59   : > { %v6795_v17 = vpop.f32.mrf.mxu1  ;;  %v6938_v46 = vpop.f32.mrf.mxu0 }
 0xb5a   : > { %v16664_v26 = vadd.f32 %v6795_v17, %v18206_v50  ;;  %v16667_v1 = vadd.f32 %v6938_v46, %v18208_v16  ;;  %v18214_v46 = vld [vmem:[#allocation21_spill] sm:$0xff] }
 0xb5b   : > { %v6797_v15 = vpop.f32.mrf.mxu1  ;;  %v6940_v47 = vpop.f32.mrf.mxu0 }
 0xb5c   : > { %18207 = vst [vmem:[#allocation24_spill] sm:$0xff] %v16664_v26  ;;  %18209 = vst [vmem:[#allocation10_spill] sm:$0xff] %v16667_v1 }
 0xb5d   : > { %v6800_v51 = vpop.f32.mrf.mxu1  ;;  %v6943_v21 = vpop.f32.mrf.mxu0 }
 0xb5e   : > { %v16672_v23 = vadd.f32 %v6800_v51, %v18210_v19  ;;  %v16675_v3 = vadd.f32 %v6943_v21, %v18212_v36  ;;  %v18220_v19 = vld [vmem:[#allocation15_spill] sm:$0xff] }
 0xb5f   : > { %v6802_v39 = vpop.f32.mrf.mxu1  ;;  %v6945_v8 = vpop.f32.mrf.mxu0 }
 0xb60   : > { %18211 = vst [vmem:[#allocation5_spill] sm:$0xff] %v16672_v23  ;;  %18213 = vst [vmem:[#allocation11_spill] sm:$0xff] %v16675_v3 }
 0xb61   : > { %v6805_v17 = vpop.f32.mrf.mxu1  ;;  %v6948_v50 = vpop.f32.mrf.mxu0 }
 0xb62   : > { %v16678_v16 = vadd.f32 %v6805_v17, %v18214_v46  ;;  %v16681_v1 = vadd.f32 %v6948_v50, %v18216_v13 }
 0xb63   : > { %v6807_v56 = vpop.f32.mrf.mxu1  ;;  %v6950_v15 = vpop.f32.mrf.mxu0 }
 0xb64   : > { %18215 = vst [vmem:[#allocation19_spill] sm:$0xff] %v16678_v16  ;;  %18217 = vst [vmem:[#allocation12_spill] sm:$0xff] %v16681_v1 }
 0xb65   : > { %v6810_v47 = vpop.f32.mrf.mxu1  ;;  %v6953_v26 = vpop.f32.mrf.mxu0 }
 0xb66   : > { %v16684_v51 = vadd.f32 %v6810_v47, %v18218_v29  ;;  %v16687_v21 = vadd.f32 %v6953_v26, %v18220_v19 }
 0xb67   : > { %v6812_v36 = vpop.f32.mrf.mxu1  ;;  %v6955_v39 = vpop.f32.mrf.mxu0 }
 0xb68   : > { %18219 = vst [vmem:[#allocation20_spill] sm:$0xff] %v16684_v51  ;;  %18221 = vst [vmem:[#allocation13_spill] sm:$0xff] %v16687_v21 }
 0xb69   : > { %v16689_v8 = vpop.f32.mrf.mxu1 }
 0xb6b   : > { %v11111_v3 = vpop.f32.mrf.mxu1 }
 0xb6d   : > { %v16691_v17 = vpop.f32.mrf.mxu1 }
 0xb6f   : > { %v11114_v46 = vpop.f32.mrf.mxu1 }
 0xb71   : > { %v16693_v50 = vpop.f32.mrf.mxu1 }
 0xb73   : > { %v11117_v13 = vpop.f32.mrf.mxu1 }
 0xb75   : > { %v16695_v56 = vpop.f32.mrf.mxu1 }
 0xb77   : > { %v11120_v15 = vpop.f32.mrf.mxu1 }
 0xb79   : > { %v16697_v1 = vpop.f32.mrf.mxu1 }
 0xb7b   : > { %v11123_v29 = vpop.f32.mrf.mxu1 }
 0xb7d   : > { %v16699_v47 = vpop.f32.mrf.mxu1 }
 0xb7f   : > { %v11126_v26 = vpop.f32.mrf.mxu1 }
 0xb81   : > { %v16701_v19 = vpop.f32.mrf.mxu1 }
 0xb83   : > { %v11129_v36 = vpop.f32.mrf.mxu1 }
 0xb85   : > { %v16703_v39 = vpop.f32.mrf.mxu1 }
 0xb87   : > { %v11132_v3 = vpop.f32.mrf.mxu1 }
 0xb89   : > { %v16705_v21 = vpop.f32.mrf.mxu1 }
 0xb8b   : > { %v11135_v46 = vpop.f32.mrf.mxu1 }
 0xb8d   : > { %v16707_v51 = vpop.f32.mrf.mxu1 }
 0xb8f   : > { %v11138_v13 = vpop.f32.mrf.mxu1 }
 0xb91   : > { %v16709_v16 = vpop.f32.mrf.mxu1 }
 0xb93   : > { %v11141_v15 = vpop.f32.mrf.mxu1 }
 0xb95   : > { %v16711_v23 = vpop.f32.mrf.mxu1 }
 0xb97   : > { %v11144_v29 = vpop.f32.mrf.mxu1 }
 0xb99   : > { %v16713_v10 = vpop.f32.mrf.mxu1 }
 0xb9b   : > { %v11147_v26 = vpop.f32.mrf.mxu1 }
 0xb9d   : > { %v16715_v48 = vpop.f32.mrf.mxu1 }
 0xb9f   : > { %v11150_v36 = vpop.f32.mrf.mxu1 }
 0xba1   : > { %v16717_v52 = vpop.f32.mrf.mxu1 }
 0xba3   : > { %v11153_v3 = vpop.f32.mrf.mxu1 }
 0xba5   : > { %v16719_v54 = vpop.f32.mrf.mxu1 }
 0xba6   : > { %7199 = vmatpush1.msra.mxu0 %v16719_v54  ;;  %7342 = vmatpush1.msra.mxu1 %v16719_v54 }
 0xba7   : > { %v11156_v46 = vpop.f32.mrf.mxu1  ;;  %7200 = vmatprep.subr.mxu0 %v17943_v14  ;;  %7343 = vmatprep.subr.mxu1 %v17943_v14 }
 0xba8   : > { %7201 = vmatpush1.msra.mxu0 %v16717_v52  ;;  %7344 = vmatpush1.msra.mxu1 %v16717_v52 }
 0xba9   : > { %v16727_v13 = vpop.f32.mrf.mxu1  ;;  %7202 = vmatprep.subr.mxu0 %v17943_v14  ;;  %7345 = vmatprep.subr.mxu1 %v17943_v14 }
 0xbaa   : > { %7203 = vmatpush1.msra.mxu0 %v16715_v48  ;;  %7346 = vmatpush1.msra.mxu1 %v16715_v48 }
 0xbab   : > { %v11159_v15 = vpop.f32.mrf.mxu1  ;;  %7204 = vmatprep.subr.mxu0 %v17943_v14  ;;  %7347 = vmatprep.subr.mxu1 %v17943_v14 }
 0xbac   : > { %7205 = vmatpush1.msra.mxu0 %v16713_v10  ;;  %7348 = vmatpush1.msra.mxu1 %v16713_v10 }
 0xbad   : > { %v16737_v29 = vpop.f32.mrf.mxu1  ;;  %7206 = vmatprep.subr.mxu0 %v17943_v14  ;;  %7349 = vmatprep.subr.mxu1 %v17943_v14 }
 0xbae   : > { %7207 = vmatpush1.msra.mxu0 %v16711_v23  ;;  %7350 = vmatpush1.msra.mxu1 %v16711_v23 }
 0xbaf   : > { %v11162_v26 = vpop.f32.mrf.mxu1  ;;  %7208 = vmatprep.subr.mxu0 %v17943_v14  ;;  %7351 = vmatprep.subr.mxu1 %v17943_v14 }
 0xbb0   : > { %7209 = vmatpush1.msra.mxu0 %v16709_v16  ;;  %7352 = vmatpush1.msra.mxu1 %v16709_v16 }
 0xbb1   : > { %v16747_v36 = vpop.f32.mrf.mxu1  ;;  %7210 = vmatprep.subr.mxu0 %v17943_v14  ;;  %7353 = vmatprep.subr.mxu1 %v17943_v14 }
 0xbb2   : > { %7211 = vmatpush1.msra.mxu0 %v16707_v51  ;;  %7354 = vmatpush1.msra.mxu1 %v16707_v51 }
 0xbb3   : > { %v11165_v3 = vpop.f32.mrf.mxu1  ;;  %7212 = vmatprep.subr.mxu0 %v17943_v14  ;;  %7355 = vmatprep.subr.mxu1 %v17943_v14 }
 0xbb4   : > { %7213 = vmatpush1.msra.mxu0 %v16705_v21  ;;  %7356 = vmatpush1.msra.mxu1 %v16705_v21 }
 0xbb5   : > { %v16757_v46 = vpop.f32.mrf.mxu1  ;;  %7214 = vmatprep.subr.mxu0 %v17943_v14  ;;  %7357 = vmatprep.subr.mxu1 %v17943_v14 }
 0xbb6   : > { %7215 = vmatpush1.msra.mxu0 %v16703_v39  ;;  %7358 = vmatpush1.msra.mxu1 %v16703_v39 }
 0xbb7   : > { %v11168_v15 = vpop.f32.mrf.mxu1  ;;  %7216 = vmatprep.subr.mxu0 %v17943_v14  ;;  %7359 = vmatprep.subr.mxu1 %v17943_v14 }
 0xbb8   : > { %7217 = vmatpush1.msra.mxu0 %v16701_v19  ;;  %7360 = vmatpush1.msra.mxu1 %v16701_v19 }
 0xbb9   : > { %v16767_v26 = vpop.f32.mrf.mxu1  ;;  %7218 = vmatprep.subr.mxu0 %v17943_v14  ;;  %7361 = vmatprep.subr.mxu1 %v17943_v14 }
 0xbba   : > { %7219 = vmatpush1.msra.mxu0 %v16699_v47  ;;  %7362 = vmatpush1.msra.mxu1 %v16699_v47 }
 0xbbb   : > { %v11171_v3 = vpop.f32.mrf.mxu1  ;;  %7220 = vmatprep.subr.mxu0 %v17943_v14  ;;  %7363 = vmatprep.subr.mxu1 %v17943_v14 }
 0xbbc   : > { %7221 = vmatpush1.msra.mxu0 %v16697_v1  ;;  %7364 = vmatpush1.msra.mxu1 %v16697_v1 }
 0xbbd   : > { %v16777_v15 = vpop.f32.mrf.mxu1  ;;  %7222 = vmatprep.subr.mxu0 %v17943_v14  ;;  %7365 = vmatprep.subr.mxu1 %v17943_v14 }
 0xbbe   : > { %7223 = vmatpush1.msra.mxu0 %v16695_v56  ;;  %7366 = vmatpush1.msra.mxu1 %v16695_v56 }
 0xbbf   : > { %v11174_v35 = vpop.f32.mrf.mxu1  ;;  %7224 = vmatprep.subr.mxu0 %v17943_v14  ;;  %7367 = vmatprep.subr.mxu1 %v17943_v14 }
 0xbc0   : > { %7225 = vmatpush1.msra.mxu0 %v16693_v50  ;;  %7368 = vmatpush1.msra.mxu1 %v16693_v50 }
 0xbc1   : > { %v16787_v3 = vpop.f32.mrf.mxu1  ;;  %7226 = vmatprep.subr.mxu0 %v17943_v14  ;;  %7369 = vmatprep.subr.mxu1 %v17943_v14 }
 0xbc2   : > { %7227 = vmatpush1.msra.mxu0 %v16691_v17  ;;  %7370 = vmatpush1.msra.mxu1 %v16691_v17 }
 0xbc3   : > { %v11177_v5 = vpop.f32.mrf.mxu1  ;;  %7228 = vmatprep.subr.mxu0 %v17943_v14  ;;  %7371 = vmatprep.subr.mxu1 %v17943_v14 }
 0xbc4   : > { %7229 = vmatpush1.msra.mxu0 %v16689_v8  ;;  %7372 = vmatpush1.msra.mxu1 %v16689_v8 }
 0xbc5   : > { %v16797_v35 = vpop.f32.mrf.mxu1  ;;  %7244 = vmatprep.subr.mxu0 %v17943_v14  ;;  %7387 = vmatprep.subr.mxu1 %v17943_v14 }
 0xbc7   : > { %v11180_v2 = vpop.f32.mrf.mxu1 }
 0xbc8   : > { %v9627_v2 = vld [vmem:[%s17895_s3 + $0xc40] sm:$0xff] }
 0xbc9   : > { %v16801_v18 = vpop.f32.mrf.mxu1 }
 0xbca   : > { %9641 = vmatpush2.msk.msra.mxu0 %vm2115_vm5, %v16801_v18  ;;  %9663 = vmatpush2.msk.msra.mxu1 %vm2115_vm5, %v16801_v18 }
 0xbcb   : > { %v11183_v5 = vpop.f32.mrf.mxu1  ;;  %7246 = vmatprep.subr.mxu0 %v17943_v14  ;;  %7389 = vmatprep.subr.mxu1 %v17943_v14 }
 0xbcc   : > { %7247 = vmatpush2.msra.mxu0 %v16797_v35  ;;  %7390 = vmatpush2.msra.mxu1 %v16797_v35  ;;  %v9649_v5 = vld [vmem:[%s17895_s3 + $0xcb0] sm:$0xff] }
 0xbcd   : > { %7248 = vmatprep.subr.mxu0 %v17943_v14  ;;  %7391 = vmatprep.subr.mxu1 %v17943_v14 }
 0xbce   : > { %7249 = vmatpush2.msra.mxu0 %v16787_v3  ;;  %7392 = vmatpush2.msra.mxu1 %v16787_v3 }
 0xbcf   : > { %7250 = vmatprep.subr.mxu0 %v17943_v14  ;;  %7393 = vmatprep.subr.mxu1 %v17943_v14 }
 0xbd0   : > { %7251 = vmatpush2.msra.mxu0 %v16777_v15  ;;  %7394 = vmatpush2.msra.mxu1 %v16777_v15 }
 0xbd1   : > { %7252 = vmatprep.subr.mxu0 %v17943_v14  ;;  %7395 = vmatprep.subr.mxu1 %v17943_v14 }
 0xbd2   : > { %7253 = vmatpush2.msra.mxu0 %v16767_v26  ;;  %7396 = vmatpush2.msra.mxu1 %v16767_v26 }
 0xbd3   : > { %7254 = vmatprep.subr.mxu0 %v17943_v14  ;;  %7397 = vmatprep.subr.mxu1 %v17943_v14 }
 0xbd4   : > { %7255 = vmatpush2.msra.mxu0 %v16757_v46  ;;  %7398 = vmatpush2.msra.mxu1 %v16757_v46 }
 0xbd5   : > { %7256 = vmatprep.subr.mxu0 %v17943_v14  ;;  %7399 = vmatprep.subr.mxu1 %v17943_v14 }
 0xbd6   : > { %7257 = vmatpush2.msra.mxu0 %v16747_v36  ;;  %7400 = vmatpush2.msra.mxu1 %v16747_v36 }
 0xbd7   : > { %7258 = vmatprep.subr.mxu0 %v17943_v14  ;;  %7401 = vmatprep.subr.mxu1 %v17943_v14 }
 0xbd8   : > { %7259 = vmatpush2.msra.mxu0 %v16737_v29  ;;  %7402 = vmatpush2.msra.mxu1 %v16737_v29 }
 0xbd9   : > { %7260 = vmatprep.subr.mxu0 %v17943_v14  ;;  %7403 = vmatprep.subr.mxu1 %v17943_v14 }
 0xbda   : > { %7261 = vmatpush2.msra.mxu0 %v16727_v13  ;;  %7404 = vmatpush2.msra.mxu1 %v16727_v13 }
 0xbdb   : > { %7263 = vmatmul.mubr.f32.vlgmr.msra.gmra.mxu0 %v9627_v2  ;;  %7406 = vmatmul.mubr.f32.vlgmr.msra.gmra.mxu1 %v9649_v5  ;;  %v9629_v2 = vld [vmem:[%s17895_s3 + $0xc50] sm:$0xff]  ;;  %v9651_v5 = vld [vmem:[%s17895_s3 + $0xcc0] sm:$0xff] }
 0xbdc   : > { %7484 = vmatprep.subr.mxu0 %v17943_v14  ;;  %7627 = vmatprep.subr.mxu1 %v17943_v14 }
 0xbdd   : > { %7485 = vmatpush1.msra.mxu0 %v16719_v54  ;;  %7628 = vmatpush1.msra.mxu1 %v16719_v54  ;;  %v9632_v54 = vld [vmem:[%s17895_s3 + $0xc68] sm:$0xff] }
 0xbde   : > { %7486 = vmatprep.subr.mxu0 %v17943_v14  ;;  %7629 = vmatprep.subr.mxu1 %v17943_v14 }
 0xbdf   : > { %9643 = vmatprep.mubr.msk.f32.mxu0 %vm2093_vm4, %v9630_v57  ;;  %9665 = vmatprep.mubr.msk.f32.mxu1 %vm2093_vm4, %v9652_v60  ;;  %v9654_v57 = vld [vmem:[%s17895_s3 + $0xcd8] sm:$0xff]  ;;  %v9631_v60 = vld [vmem:[%s17895_s3 + $0xc60] sm:$0xff] }
 0xbe0   : > { %7487 = vmatpush1.msra.mxu0 %v16717_v52  ;;  %7630 = vmatpush1.msra.mxu1 %v16717_v52  ;;  %v9653_v52 = vld [vmem:[%s17895_s3 + $0xcd0] sm:$0xff] }
 0xbe1   : > { %7268 = vmatmul.mubr.f32.gmra.mxu0 %v9629_v2  ;;  %7411 = vmatmul.mubr.f32.gmra.mxu1 %v9651_v5  ;;  %v9656_v2 = vld [vmem:[%s17895_s3 + $0xce8] sm:$0xff]  ;;  %v9655_v5 = vld [vmem:[%s17895_s3 + $0xce0] sm:$0xff] }
 0xbe2   : > { %7488 = vmatprep.subr.mxu0 %v17943_v14  ;;  %7631 = vmatprep.subr.mxu1 %v17943_v14 }
 0xbe3   : > { %7489 = vmatpush1.msra.mxu0 %v16715_v48  ;;  %7632 = vmatpush1.msra.mxu1 %v16715_v48  ;;  %v9634_v48 = vld [vmem:[%s17895_s3 + $0xc78] sm:$0xff] }
 0xbe4   : > { %7490 = vmatprep.subr.mxu0 %v17943_v14  ;;  %7633 = vmatprep.subr.mxu1 %v17943_v14 }
 0xbe5   : > { %9644 = vmatprep.mubr.msk.f32.mxu0 %vm2093_vm4, %v9632_v54  ;;  %9666 = vmatprep.mubr.msk.f32.mxu1 %vm2093_vm4, %v9654_v57  ;;  %v9658_v54 = vld [vmem:[%s17895_s3 + $0xcf8] sm:$0xff]  ;;  %v9657_v57 = vld [vmem:[%s17895_s3 + $0xcf0] sm:$0xff] }
 0xbe6   : > { %7491 = vmatpush1.msra.mxu0 %v16713_v10  ;;  %7634 = vmatpush1.msra.mxu1 %v16713_v10  ;;  %v9633_v10 = vld [vmem:[%s17895_s3 + $0xc70] sm:$0xff] }
 0xbe7   : > { %7273 = vmatmul.mubr.f32.gmra.mxu0 %v9631_v60  ;;  %7416 = vmatmul.mubr.f32.gmra.mxu1 %v9653_v52  ;;  %v9660_v60 = vld [vmem:[%s17895_s3 + $0xd08] sm:$0xff]  ;;  %v9659_v52 = vld [vmem:[%s17895_s3 + $0xd00] sm:$0xff] }
 0xbe8   : > { %7492 = vmatprep.subr.mxu0 %v17943_v14  ;;  %7635 = vmatprep.subr.mxu1 %v17943_v14 }
 0xbe9   : > { %7493 = vmatpush1.msra.mxu0 %v16711_v23  ;;  %7636 = vmatpush1.msra.mxu1 %v16711_v23  ;;  %v9636_v23 = vld [vmem:[%s17895_s3 + $0xc88] sm:$0xff] }
 0xbea   : > { %7494 = vmatprep.subr.mxu0 %v17943_v14  ;;  %7637 = vmatprep.subr.mxu1 %v17943_v14 }
 0xbeb   : > { %9645 = vmatprep.mubr.msk.f32.mxu0 %vm2093_vm4, %v9634_v48  ;;  %9667 = vmatprep.mubr.msk.f32.mxu1 %vm2093_vm4, %v9656_v2  ;;  %v9662_v48 = vld [vmem:[%s17895_s3 + $0xd18] sm:$0x1]  ;;  %v9661_v2 = vld [vmem:[%s17895_s3 + $0xd10] sm:$0x1] }
 0xbec   : > { %7495 = vmatpush1.msra.mxu0 %v16709_v16  ;;  %7638 = vmatpush1.msra.mxu1 %v16709_v16  ;;  %v9635_v16 = vld [vmem:[%s17895_s3 + $0xc80] sm:$0xff] }
 0xbed   : > { %7278 = vmatmul.mubr.f32.gmra.mxu0 %v9633_v10  ;;  %7421 = vmatmul.mubr.f32.gmra.mxu1 %v9655_v5  ;;  %v9700_v10 = vld [vmem:[%s17895_s3 + $0xdc8] sm:$0xff] }
 0xbee   : > { %7496 = vmatprep.subr.mxu0 %v17943_v14  ;;  %7639 = vmatprep.subr.mxu1 %v17943_v14  ;;  %v9716_v5 = vld [vmem:[%s17896_s4 + $0x108] sm:$0xff] }
 0xbef   : > { %7497 = vmatpush1.msra.mxu0 %v16707_v51  ;;  %7640 = vmatpush1.msra.mxu1 %v16707_v51  ;;  %v9638_v51 = vld [vmem:[%s17895_s3 + $0xc98] sm:$0xff] }
 0xbf0   : > { %7498 = vmatprep.subr.mxu0 %v17943_v14  ;;  %7641 = vmatprep.subr.mxu1 %v17943_v14 }
 0xbf1   : > { %9646 = vmatprep.mubr.msk.f32.mxu0 %vm2093_vm4, %v9636_v23  ;;  %9668 = vmatprep.mubr.msk.f32.mxu1 %vm2093_vm4, %v9658_v54  ;;  %v9677_v23 = vld [vmem:[%s17895_s3 + $0xd50] sm:$0xff]  ;;  %v9699_v54 = vld [vmem:[%s17895_s3 + $0xdc0] sm:$0xff] }
 0xbf2   : > { %7499 = vmatpush1.msra.mxu0 %v16705_v21  ;;  %7642 = vmatpush1.msra.mxu1 %v16705_v21  ;;  %v9637_v21 = vld [vmem:[%s17895_s3 + $0xc90] sm:$0xff] }
 0xbf3   : > { %7283 = vmatmul.mubr.f32.gmra.mxu0 %v9635_v16  ;;  %7426 = vmatmul.mubr.f32.gmra.mxu1 %v9657_v57  ;;  %v9680_v16 = vld [vmem:[%s17895_s3 + $0xd68] sm:$0xff]  ;;  %v9702_v57 = vld [vmem:[%s17895_s3 + $0xdd8] sm:$0xff] }
 0xbf4   : > { %7500 = vmatprep.subr.mxu0 %v17943_v14  ;;  %7643 = vmatprep.subr.mxu1 %v17943_v14 }
 0xbf5   : > { %7501 = vmatpush1.msra.mxu0 %v16703_v39  ;;  %7644 = vmatpush1.msra.mxu1 %v16703_v39  ;;  %v9640_v39 = vld [vmem:[%s17895_s3 + $0xca8] sm:$0x1] }
 0xbf6   : > { %7502 = vmatprep.subr.mxu0 %v17943_v14  ;;  %7645 = vmatprep.subr.mxu1 %v17943_v14 }
 0xbf7   : > { %9647 = vmatprep.mubr.msk.f32.mxu0 %vm2093_vm4, %v9638_v51  ;;  %9669 = vmatprep.mubr.msk.f32.mxu1 %vm2093_vm4, %v9660_v60  ;;  %v9715_v51 = vld [vmem:[%s17896_s4 + $0x100] sm:$0xff] }
 0xbf8   : > { %7503 = vmatpush1.msra.mxu0 %v16701_v19  ;;  %7646 = vmatpush1.msra.mxu1 %v16701_v19  ;;  %v9639_v19 = vld [vmem:[%s17895_s3 + $0xca0] sm:$0x1] }
 0xbf9   : > { %7288 = vmatmul.mubr.f32.gmra.mxu0 %v9637_v21  ;;  %7431 = vmatmul.mubr.f32.gmra.mxu1 %v9659_v52  ;;  %v9679_v60 = vld [vmem:[%s17895_s3 + $0xd60] sm:$0xff]  ;;  %v9701_v21 = vld [vmem:[%s17895_s3 + $0xdd0] sm:$0xff]  ;;  %v9682_v52 = vld [vmem:[%s17895_s3 + $0xd78] sm:$0xff] }
 0xbfa   : > { %7504 = vmatprep.subr.mxu0 %v17943_v14  ;;  %7647 = vmatprep.subr.mxu1 %v17943_v14 }
 0xbfb   : > { %7505 = vmatpush1.msra.mxu0 %v16699_v47  ;;  %7648 = vmatpush1.msra.mxu1 %v16699_v47  ;;  %v9718_v47 = vld [vmem:[%s17896_s4 + $0x118] sm:$0xff] }
 0xbfc   : > { %7506 = vmatprep.subr.mxu0 %v17943_v14  ;;  %7649 = vmatprep.subr.mxu1 %v17943_v14 }
 0xbfd   : > { %9648 = vmatprep.mubr.msk.f32.mxu0 %vm2093_vm4, %v9640_v39  ;;  %9670 = vmatprep.mubr.msk.f32.mxu1 %vm2093_vm4, %v9662_v48  ;;  %v9704_v39 = vld [vmem:[%s17895_s3 + $0xde8] sm:$0xff]  ;;  %v9681_v48 = vld [vmem:[%s17895_s3 + $0xd70] sm:$0xff] }
 0xbfe   : > { %7507 = vmatpush1.msra.mxu0 %v16697_v1  ;;  %7650 = vmatpush1.msra.mxu1 %v16697_v1  ;;  %v9694_v1 = vld [vmem:[%s17895_s3 + $0xd98] sm:$0xff] }
 0xbff   : > { %7293 = vmatmul.mubr.f32.gmra.mxu0 %v9639_v19  ;;  %7436 = vmatmul.mubr.f32.gmra.mxu1 %v9661_v2  ;;  %v9703_v19 = vld [vmem:[%s17895_s3 + $0xde0] sm:$0xff]  ;;  %v9684_v2 = vld [vmem:[%s17895_s3 + $0xd88] sm:$0x1] }
 0xc00   : > { %7508 = vmatprep.subr.mxu0 %v17943_v14  ;;  %7651 = vmatprep.subr.mxu1 %v17943_v14 }
 0xc01   : > { %7509 = vmatpush1.msra.mxu0 %v16695_v56  ;;  %7652 = vmatpush1.msra.mxu1 %v16695_v56  ;;  %v9696_v56 = vld [vmem:[%s17895_s3 + $0xda8] sm:$0xff] }
 0xc02   : > { %7510 = vmatprep.subr.mxu0 %v17943_v14  ;;  %7653 = vmatprep.subr.mxu1 %v17943_v14 }
 0xc03   : > { %7511 = vmatpush1.msra.mxu0 %v16693_v50  ;;  %7654 = vmatpush1.msra.mxu1 %v16693_v50  ;;  %v9674_v50 = vld [vmem:[%s17895_s3 + $0xd38] sm:$0xff] }
 0xc04   : > { %7512 = vmatprep.subr.mxu0 %v17943_v14  ;;  %7655 = vmatprep.subr.mxu1 %v17943_v14 }
 0xc05   : > { %7513 = vmatpush1.msra.mxu0 %v16691_v17  ;;  %7656 = vmatpush1.msra.mxu1 %v16691_v17  ;;  %v9693_v17 = vld [vmem:[%s17895_s3 + $0xd90] sm:$0xff] }
 0xc06   : > { %7514 = vmatprep.subr.mxu0 %v17943_v14  ;;  %7657 = vmatprep.subr.mxu1 %v17943_v14 }
 0xc07   : > { %7515 = vmatpush1.msra.mxu0 %v16689_v8  ;;  %7658 = vmatpush1.msra.mxu1 %v16689_v8  ;;  %v9671_v8 = vld [vmem:[%s17895_s3 + $0xd20] sm:$0xff] }
 0xc08   : > { %7530 = vmatprep.subr.mxu0 %v17943_v14  ;;  %7673 = vmatprep.subr.mxu1 %v17943_v14 }
 0xc09   : > { %9685 = vmatpush2.msk.msra.mxu0 %vm2115_vm5, %v16801_v18  ;;  %9707 = vmatpush2.msk.msra.mxu1 %vm2115_vm5, %v16801_v18  ;;  %v9672_v18 = vld [vmem:[%s17895_s3 + $0xd28] sm:$0xff] }
 0xc0a   : > { %7532 = vmatprep.subr.mxu0 %v17943_v14  ;;  %7675 = vmatprep.subr.mxu1 %v17943_v14 }
 0xc0b   : > { %7533 = vmatpush2.msra.mxu0 %v16797_v35  ;;  %7676 = vmatpush2.msra.mxu1 %v16797_v35  ;;  %v9678_v35 = vld [vmem:[%s17895_s3 + $0xd58] sm:$0xff] }
 0xc0c   : > { %7534 = vmatprep.subr.mxu0 %v17943_v14  ;;  %7677 = vmatprep.subr.mxu1 %v17943_v14 }
 0xc0d   : > { %7535 = vmatpush2.msra.mxu0 %v16787_v3  ;;  %7678 = vmatpush2.msra.mxu1 %v16787_v3  ;;  %v9697_v3 = vld [vmem:[%s17895_s3 + $0xdb0] sm:$0xff] }
 0xc0e   : > { %7536 = vmatprep.subr.mxu0 %v17943_v14  ;;  %7679 = vmatprep.subr.mxu1 %v17943_v14 }
 0xc0f   : > { %7537 = vmatpush2.msra.mxu0 %v16777_v15  ;;  %7680 = vmatpush2.msra.mxu1 %v16777_v15  ;;  %v9675_v15 = vld [vmem:[%s17895_s3 + $0xd40] sm:$0xff] }
 0xc10   : > { %7538 = vmatprep.subr.mxu0 %v17943_v14  ;;  %7681 = vmatprep.subr.mxu1 %v17943_v14 }
 0xc11   : > { %7539 = vmatpush2.msra.mxu0 %v16767_v26  ;;  %7682 = vmatpush2.msra.mxu1 %v16767_v26  ;;  %v9717_v26 = vld [vmem:[%s17896_s4 + $0x110] sm:$0xff] }
 0xc12   : > { %7540 = vmatprep.subr.mxu0 %v17943_v14  ;;  %7683 = vmatprep.subr.mxu1 %v17943_v14 }
 0xc13   : > { %7541 = vmatpush2.msra.mxu0 %v16757_v46  ;;  %7684 = vmatpush2.msra.mxu1 %v16757_v46  ;;  %v9698_v46 = vld [vmem:[%s17895_s3 + $0xdb8] sm:$0xff] }
 0xc14   : > { %7542 = vmatprep.subr.mxu0 %v17943_v14  ;;  %7685 = vmatprep.subr.mxu1 %v17943_v14 }
 0xc15   : > { %7543 = vmatpush2.msra.mxu0 %v16747_v36  ;;  %7686 = vmatpush2.msra.mxu1 %v16747_v36  ;;  %v9676_v36 = vld [vmem:[%s17895_s3 + $0xd48] sm:$0xff] }
 0xc16   : > { %7544 = vmatprep.subr.mxu0 %v17943_v14  ;;  %7687 = vmatprep.subr.mxu1 %v17943_v14 }
 0xc17   : > { %7545 = vmatpush2.msra.mxu0 %v16737_v29  ;;  %7688 = vmatpush2.msra.mxu1 %v16737_v29  ;;  %v9673_v29 = vld [vmem:[%s17895_s3 + $0xd30] sm:$0xff] }
 0xc18   : > { %7546 = vmatprep.subr.mxu0 %v17943_v14  ;;  %7689 = vmatprep.subr.mxu1 %v17943_v14 }
 0xc19   : > { %7547 = vmatpush2.msra.mxu0 %v16727_v13  ;;  %9686 = vmatprep.mubr.msk.f32.mxu0 %vm2093_vm4, %v9672_v18  ;;  %v9706_v18 = vld [vmem:[%s17895_s3 + $0xdf8] sm:$0x1] }
 0xc1a   : > { %7690 = vmatpush2.msra.mxu1 %v16727_v13  ;;  %9708 = vmatprep.mubr.msk.f32.mxu1 %vm2093_vm4, %v9694_v1  ;;  %v9695_v13 = vld [vmem:[%s17895_s3 + $0xda0] sm:$0xff] }
 0xc1b   : > { %7549 = vmatmul.mubr.f32.vlgmr.msra.gmra.mxu0 %v9671_v8  ;;  %7692 = vmatmul.mubr.f32.vlgmr.msra.gmra.mxu1 %v9693_v17  ;;  %v9683_v1 = vld [vmem:[%s17895_s3 + $0xd80] sm:$0x1]  ;;  %v9705_v8 = vld [vmem:[%s17895_s3 + $0xdf0] sm:$0x1] }
 0xc1c   : > { %9687 = vmatprep.mubr.msk.f32.mxu0 %vm2093_vm4, %v9674_v50  ;;  %9709 = vmatprep.mubr.msk.f32.mxu1 %vm2093_vm4, %v9696_v56  ;;  %v18223_v56 = vld [vmem:[#allocation6_spill] sm:$0xff] }
 0xc1d   : > { %11184 = vmatprep.subr.mxu0 %v17943_v14  ;;  %7968 = vmatprep.subr.mxu1 %v17943_v14 }
 0xc1e   : > { %11185 = vmatpush3.msra.mxu0 %v9718_v47  ;;  %v18224_v47 = vld [vmem:[#allocation16_spill] sm:$0xff] }
 0xc1f   : > { %7554 = vmatmul.mubr.f32.gmra.mxu0 %v9673_v29  ;;  %7697 = vmatmul.mubr.f32.gmra.mxu1 %v9695_v13 }
 0xc20   : > { %9688 = vmatprep.mubr.msk.f32.mxu0 %vm2093_vm4, %v9676_v36  ;;  %9710 = vmatprep.mubr.msk.f32.mxu1 %vm2093_vm4, %v9698_v46 }
 0xc21   : > { %11186 = vmatprep.subr.mxu0 %v17943_v14 }
 0xc22   : > { %11187 = vmatpush3.msra.mxu0 %v9717_v26  ;;  %v18225_v26 = vld [vmem:[#allocation3_spill] sm:$0xff] }
 0xc23   : > { %7559 = vmatmul.mubr.f32.gmra.mxu0 %v9675_v15  ;;  %7702 = vmatmul.mubr.f32.gmra.mxu1 %v9697_v3  ;;  %v18226_v15 = vld [vmem:[#allocation17_spill] sm:$0xff] }
 0xc24   : > { %9689 = vmatprep.mubr.msk.f32.mxu0 %vm2093_vm4, %v9678_v35  ;;  %9711 = vmatprep.mubr.msk.f32.mxu1 %vm2093_vm4, %v9700_v10 }
 0xc25   : > { %11188 = vmatprep.subr.mxu0 %v17943_v14 }
 0xc26   : > { %11189 = vmatpush3.msra.mxu0 %v9716_v5 }
 0xc27   : > { %7564 = vmatmul.mubr.f32.gmra.mxu0 %v9677_v23  ;;  %7707 = vmatmul.mubr.f32.gmra.mxu1 %v9699_v54  ;;  %v18227_v54 = vld [vmem:[#allocation7_spill] sm:$0xff] }
 0xc28   : > { %9690 = vmatprep.mubr.msk.f32.mxu0 %vm2093_vm4, %v9680_v16  ;;  %9712 = vmatprep.mubr.msk.f32.mxu1 %vm2093_vm4, %v9702_v57  ;;  %v18228_v57 = vld [vmem:[#allocation18_spill] sm:$0xff] }
 0xc29   : > { %11190 = vmatprep.subr.mxu0 %v17943_v14 }
 0xc2a   : > { %11191 = vmatpush3.msra.mxu0 %v9715_v51 }
 0xc2b   : > { %7569 = vmatmul.mubr.f32.gmra.mxu0 %v9679_v60  ;;  %7712 = vmatmul.mubr.f32.gmra.mxu1 %v9701_v21 }
 0xc2c   : > { %9691 = vmatprep.mubr.msk.f32.mxu0 %vm2093_vm4, %v9682_v52  ;;  %9713 = vmatprep.mubr.msk.f32.mxu1 %vm2093_vm4, %v9704_v39 }
 0xc2d   : > { %8111 = vmatprep.subr.mxu0 %v17943_v14 }
 0xc2f   : > { %7574 = vmatmul.mubr.f32.gmra.mxu0 %v9681_v48  ;;  %7717 = vmatmul.mubr.f32.gmra.mxu1 %v9703_v19  ;;  %v18229_v48 = vld [vmem:[#allocation2_spill] sm:$0xff] }
 0xc30   : > { %9692 = vmatprep.mubr.msk.f32.mxu0 %vm2093_vm4, %v9684_v2  ;;  %9714 = vmatprep.mubr.msk.f32.mxu1 %vm2093_vm4, %v9706_v18  ;;  %v18230_v2 = vld [vmem:[#allocation4_spill] sm:$0xff] }
 0xc33   : > { %7579 = vmatmul.mubr.f32.gmra.mxu0 %v9683_v1  ;;  %7722 = vmatmul.mubr.f32.gmra.mxu1 %v9705_v8 }
 0xc34   : > { %11192 = vmatprep.mubr.msk.f32.mxu0 %vm11292_vm1, %v17943_v14 }
 0xc37   : > { %11193 = vmatmul.mubr.msk.f32.vlgmr.msra.gmra.mxu0 %vm1558_vm3, %v11974_v0 }
 0xc38   : > { %11195 = vmatprep.mubr.msk.f32.mxu0 %vm11292_vm1, %v17943_v14 }
 0xc3b   : > { %11196 = vmatmul.mubr.msk.f32.gmra.mxu0 %vm1558_vm3, %v11990_v44 }
 0xc3c   : > { %11198 = vmatprep.mubr.msk.f32.mxu0 %vm11292_vm1, %v17943_v14 }
 0xc3f   : > { %11199 = vmatmul.mubr.msk.f32.gmra.mxu0 %vm1558_vm3, %v12006_v43 }
 0xc40   : > { %11201 = vmatprep.mubr.msk.f32.mxu0 %vm11292_vm1, %v17943_v14 }
 0xc43   : > { %11202 = vmatmul.mubr.msk.f32.gmra.mxu0 %vm1558_vm3, %v12022_v7 }
 0xc44   : > { %11204 = vmatprep.mubr.msk.f32.mxu0 %vm11292_vm1, %v17943_v14 }
 0xc47   : > { %11205 = vmatmul.mubr.msk.f32.gmra.mxu0 %vm1558_vm3, %v12039_v59 }
 0xc48   : > { %11207 = vmatprep.mubr.msk.f32.mxu0 %vm11292_vm1, %v17943_v14 }
 0xc4b   : > { %11208 = vmatmul.mubr.msk.f32.gmra.mxu0 %vm1558_vm3, %v12056_v24 }
 0xc4c   : > { %11210 = vmatprep.mubr.msk.f32.mxu0 %vm11292_vm1, %v17943_v14 }
 0xc4f   : > { %11211 = vmatmul.mubr.msk.f32.gmra.mxu0 %vm1558_vm3, %v12073_v53 }
 0xc50   : > { %11213 = vmatprep.mubr.msk.f32.mxu0 %vm11292_vm1, %v17943_v14 }
 0xc53   : > { %11214 = vmatmul.mubr.msk.f32.gmra.mxu0 %vm1558_vm3, %v12090_v27 }
 0xc54   : > { %11216 = vmatprep.mubr.msk.f32.mxu0 %vm11292_vm1, %v17943_v14 }
 0xc57   : > { %11217 = vmatmul.mubr.msk.f32.gmra.mxu0 %vm1558_vm3, %v12107_v11 }
 0xc58   : > { %11219 = vmatprep.mubr.msk.f32.mxu0 %vm11292_vm1, %v17943_v14 }
 0xc5b   : > { %11220 = vmatmul.mubr.msk.f32.gmra.mxu0 %vm1558_vm3, %v17988_v63 }
 0xc5c   : > { %11222 = vmatprep.mubr.msk.f32.mxu0 %vm11292_vm1, %v17943_v14 }
 0xc5f   : > { %11223 = vmatmul.mubr.msk.f32.gmra.mxu0 %vm1558_vm3, %v17990_v38 }
 0xc60   : > { %11225 = vmatprep.mubr.msk.f32.mxu0 %vm11292_vm1, %v17943_v14 }
 0xc63   : > { %11226 = vmatmul.mubr.msk.f32.gmra.mxu0 %vm1558_vm3, %v17991_v58 }
 0xc64   : > { %11228 = vmatprep.mubr.msk.f32.mxu0 %vm11292_vm1, %v17943_v14 }
 0xc67   : > { %11229 = vmatmul.mubr.msk.f32.gmra.mxu0 %vm1558_vm3, %v17992_v30 }
 0xc68   : > { %11231 = vmatprep.mubr.msk.f32.mxu0 %vm11292_vm1, %v17943_v14 }
 0xc6b   : > { %11232 = vmatmul.mubr.msk.f32.gmra.mxu0 %vm1558_vm3, %v17993_v61 }
 0xc6c   : > { %11234 = vmatprep.mubr.msk.f32.mxu0 %vm11292_vm1, %v17943_v14 }
 0xc6f   : > { %11235 = vmatmul.mubr.msk.f32.gmra.mxu0 %vm1558_vm3, %v17994_v22 }
 0xc70   : > { %11237 = vmatprep.mubr.msk.f32.mxu0 %vm11292_vm1, %v17943_v14 }
 0xc73   : > { %11238 = vmatmul.mubr.msk.f32.gmra.mxu0 %vm1558_vm3, %v17995_v49 }
 0xc74   : > { %11240 = vmatprep.mubr.msk.f32.mxu0 %vm11292_vm1, %v17943_v14 }
 0xc77   : > { %11241 = vmatmul.mubr.msk.f32.gmra.mxu0 %vm1558_vm3, %v17996_v45 }
 0xc78   : > { %11243 = vmatprep.mubr.msk.f32.mxu0 %vm11292_vm1, %v17943_v14 }
 0xc7b   : > { %11244 = vmatmul.mubr.msk.f32.gmra.mxu0 %vm1558_vm3, %v17998_v55 }
 0xc7c   : > { %11246 = vmatprep.mubr.msk.f32.mxu0 %vm11292_vm1, %v17943_v14 }
 0xc7f   : > { %11247 = vmatmul.mubr.msk.f32.gmra.mxu0 %vm1558_vm3, %v17999_v42 }
 0xc80   : > { %11249 = vmatprep.mubr.msk.f32.mxu0 %vm11292_vm1, %v17943_v14 }
 0xc83   : > { %11250 = vmatmul.mubr.msk.f32.gmra.mxu0 %vm1558_vm3, %v18001_v25 }
 0xc84   : > { %11252 = vmatprep.mubr.msk.f32.mxu0 %vm11292_vm1, %v17943_v14 }
 0xc87   : > { %11253 = vmatmul.mubr.msk.f32.gmra.mxu0 %vm1558_vm3, %v18003_v20 }
 0xc88   : > { %11255 = vmatprep.mubr.msk.f32.mxu0 %vm11292_vm1, %v17943_v14 }
 0xc8b   : > { %11256 = vmatmul.mubr.msk.f32.gmra.mxu0 %vm1558_vm3, %v18004_v28 }
 0xc8c   : > { %11258 = vmatprep.mubr.msk.f32.mxu0 %vm11292_vm1, %v17943_v14 }
 0xc8f   : > { %11259 = vmatmul.mubr.msk.f32.gmra.mxu0 %vm1558_vm3, %v18006_v62 }
 0xc90   : > { %11261 = vmatprep.mubr.msk.f32.mxu0 %vm11292_vm1, %v17943_v14 }
 0xc93   : > { %11262 = vmatmul.mubr.msk.f32.gmra.mxu0 %vm1558_vm3, %v18008_v4 }
 0xc94   : > { %11264 = vmatprep.mubr.msk.f32.mxu0 %vm11292_vm1, %v17943_v14 }
 0xc97   : > { %11265 = vmatmul.mubr.msk.f32.gmra.mxu0 %vm1558_vm3, %v18009_v12 }
 0xc9b   : > { %v7264_v0 = vpop.f32.mrf.mxu0  ;;  %v7407_v44 = vpop.f32.mrf.mxu1 }
 0xc9c   : > { %v17248_v43 = vadd.f32 %v7264_v0, %v16598_v41  ;;  %v17251_v7 = vadd.f32 %v7407_v44, %v16601_v37 }
 0xc9d   : > { %v7266_v59 = vpop.f32.mrf.mxu0  ;;  %v7409_v24 = vpop.f32.mrf.mxu1 }
 0xc9e   : > { %v18231_v59 = vld [vmem:[#allocation8_spill] sm:$0xff] }
 0xca1   : > { %v7269_v53 = vpop.f32.mrf.mxu0  ;;  %v7412_v27 = vpop.f32.mrf.mxu1 }
 0xca2   : > { %v17254_v11 = vadd.f32 %v7269_v53, %v16604_v33  ;;  %v17257_v63 = vadd.f32 %v7412_v27, %v16607_v9  ;;  %v18222_v33 = vld [vmem:[#allocation23_spill] sm:$0xff]  ;;  %v18232_v53 = vld [vmem:[#allocation9_spill] sm:$0xff] }
 0xca3   : > { %v7271_v38 = vpop.f32.mrf.mxu0  ;;  %v7414_v58 = vpop.f32.mrf.mxu1 }
 0xca7   : > { %v7274_v30 = vpop.f32.mrf.mxu0  ;;  %v7417_v61 = vpop.f32.mrf.mxu1 }
 0xca8   : > { %v17260_v22 = vadd.f32 %v7274_v30, %v16610_v6  ;;  %v17263_v49 = vadd.f32 %v7417_v61, %v16613_v40 }
 0xca9   : > { %v7276_v45 = vpop.f32.mrf.mxu0  ;;  %v7419_v55 = vpop.f32.mrf.mxu1 }
 0xcaa   : > { %v9745_v45 = vld [vmem:[%s17895_s3 + $0xe08] sm:$0xff]  ;;  %v9767_v55 = vld [vmem:[%s17895_s3 + $0xe78] sm:$0xff] }
 0xcab   : > { %9759 = vmatprep.mubr.msk.f32.mxu1 %vm2093_vm4, %v9745_v45  ;;  %9781 = vmatprep.mubr.msk.f32.mxu0 %vm2093_vm4, %v9767_v55 }
 0xcad   : > { %v7279_v42 = vpop.f32.mrf.mxu0  ;;  %v7422_v25 = vpop.f32.mrf.mxu1 }
 0xcae   : > { %v17266_v20 = vadd.f32 %v7279_v42, %v16616_v31  ;;  %v17269_v28 = vadd.f32 %v7422_v25, %v16619_v34  ;;  %v18233_v42 = vld [vmem:[#allocation24_spill] sm:$0xff] }
 0xcaf   : > { %v7281_v62 = vpop.f32.mrf.mxu0  ;;  %v7424_v4 = vpop.f32.mrf.mxu1 }
 0xcb0   : > { %v18234_v62 = vld [vmem:[#allocation10_spill] sm:$0xff] }
 0xcb3   : > { %v7284_v12 = vpop.f32.mrf.mxu0  ;;  %v7427_v41 = vpop.f32.mrf.mxu1 }
 0xcb4   : > { %v17272_v37 = vadd.f32 %v7284_v12, %v16622_v32  ;;  %v17275_v9 = vadd.f32 %v7427_v41, %v18222_v33 }
 0xcb5   : > { %v7286_v6 = vpop.f32.mrf.mxu0  ;;  %v7429_v40 = vpop.f32.mrf.mxu1 }
 0xcb6   : > { %v18235_v40 = vld [vmem:[#allocation5_spill] sm:$0xff] }
 0xcb9   : > { %v7289_v17 = vpop.f32.mrf.mxu0  ;;  %v7432_v50 = vpop.f32.mrf.mxu1 }
 0xcba   : > { %v17278_v31 = vadd.f32 %v7289_v17, %v18223_v56  ;;  %v17281_v34 = vadd.f32 %v7432_v50, %v18224_v47  ;;  %v18236_v50 = vld [vmem:[#allocation11_spill] sm:$0xff] }
 0xcbb   : > { %v7291_v29 = vpop.f32.mrf.mxu0  ;;  %v7434_v13 = vpop.f32.mrf.mxu1 }
 0xcbf   : > { %v7294_v36 = vpop.f32.mrf.mxu0  ;;  %v7437_v46 = vpop.f32.mrf.mxu1 }
 0xcc0   : > { %v17284_v32 = vadd.f32 %v7294_v36, %v18225_v26  ;;  %v17287_v3 = vadd.f32 %v7437_v46, %v18226_v15  ;;  %v18237_v46 = vld [vmem:[#allocation19_spill] sm:$0xff]  ;;  %v18238_v15 = vld [vmem:[#allocation12_spill] sm:$0xff] }
 0xcc1   : > { %v7296_v35 = vpop.f32.mrf.mxu0  ;;  %v7439_v10 = vpop.f32.mrf.mxu1 }
 0xcdb   : > { %v7550_v5 = vpop.f32.mrf.mxu0  ;;  %v7693_v23 = vpop.f32.mrf.mxu1 }
 0xcdc   : > { %v17290_v16 = vadd.f32 %v7550_v5, %v18227_v54  ;;  %v17293_v51 = vadd.f32 %v7693_v23, %v18228_v57  ;;  %v18239_v57 = vld [vmem:[#allocation20_spill] sm:$0xff] }
 0xcdd   : > { %v7552_v60 = vpop.f32.mrf.mxu0  ;;  %v7695_v21 = vpop.f32.mrf.mxu1 }
 0xcde   : > { %v18240_v21 = vld [vmem:[#allocation13_spill] sm:$0xff] }
 0xcdf   : > { %v7555_v52 = vpop.f32.mrf.mxu0  ;;  %v7698_v39 = vpop.f32.mrf.mxu1 }
 0xce0   : > { %v17296_v19 = vadd.f32 %v7555_v52, %v18229_v48  ;;  %v17299_v18 = vadd.f32 %v7698_v39, %v18230_v2 }
 0xce1   : > { %v7557_v1 = vpop.f32.mrf.mxu0  ;;  %v7700_v8 = vpop.f32.mrf.mxu1 }
 0xce3   : > { %v7560_v0 = vpop.f32.mrf.mxu0  ;;  %v7703_v44 = vpop.f32.mrf.mxu1 }
 0xce4   : > { %v17302_v24 = vadd.f32 %v7560_v0, %v18231_v59  ;;  %v17305_v27 = vadd.f32 %v7703_v44, %v18232_v53 }
 0xce5   : > { %v7562_v38 = vpop.f32.mrf.mxu0  ;;  %v7705_v58 = vpop.f32.mrf.mxu1 }
 0xce7   : > { %v7565_v30 = vpop.f32.mrf.mxu0  ;;  %v7708_v61 = vpop.f32.mrf.mxu1 }
 0xce8   : > { %v17314_v25 = vadd.f32 %v7565_v30, %v18233_v42  ;;  %v17317_v4 = vadd.f32 %v7708_v61, %v18234_v62 }
 0xce9   : > { %v7567_v12 = vpop.f32.mrf.mxu0  ;;  %v7710_v41 = vpop.f32.mrf.mxu1 }
 0xceb   : > { %v7570_v33 = vpop.f32.mrf.mxu0  ;;  %v7713_v6 = vpop.f32.mrf.mxu1 }
 0xcec   : > { %v17322_v17 = vadd.f32 %v7570_v33, %v18235_v40  ;;  %v17325_v56 = vadd.f32 %v7713_v6, %v18236_v50 }
 0xced   : > { %v7572_v47 = vpop.f32.mrf.mxu0  ;;  %v7715_v29 = vpop.f32.mrf.mxu1 }
 0xcef   : > { %v7575_v13 = vpop.f32.mrf.mxu0  ;;  %v7718_v36 = vpop.f32.mrf.mxu1 }
 0xcf0   : > { %v17328_v26 = vadd.f32 %v7575_v13, %v18237_v46  ;;  %v17331_v35 = vadd.f32 %v7718_v36, %v18238_v15 }
 0xcf1   : > { %v7577_v10 = vpop.f32.mrf.mxu0  ;;  %v7720_v5 = vpop.f32.mrf.mxu1 }
 0xcf3   : > { %v7580_v23 = vpop.f32.mrf.mxu0  ;;  %v7723_v54 = vpop.f32.mrf.mxu1 }
 0xcf4   : > { %v17334_v60 = vadd.f32 %v7580_v23, %v18239_v57  ;;  %v17337_v52 = vadd.f32 %v7723_v54, %v18240_v21 }
 0xcf5   : > { %v7582_v39 = vpop.f32.mrf.mxu0  ;;  %v7725_v48 = vpop.f32.mrf.mxu1 }
 0xcf7   : > { %v17339_v2 = vpop.f32.mrf.mxu0 }
 0xcf9   : > { %v11194_v1 = vpop.f32.mrf.mxu0 }
 0xcfb   : > { %v17341_v8 = vpop.f32.mrf.mxu0 }
 0xcfd   : > { %v11197_v0 = vpop.f32.mrf.mxu0 }
 0xcff   : > { %v17343_v44 = vpop.f32.mrf.mxu0 }
 0xd01   : > { %v11200_v59 = vpop.f32.mrf.mxu0 }
 0xd03   : > { %v17345_v53 = vpop.f32.mrf.mxu0 }
 0xd05   : > { %v11203_v38 = vpop.f32.mrf.mxu0 }
 0xd07   : > { %v17347_v58 = vpop.f32.mrf.mxu0 }
 0xd09   : > { %v11206_v30 = vpop.f32.mrf.mxu0 }
 0xd0b   : > { %v17349_v61 = vpop.f32.mrf.mxu0 }
 0xd0d   : > { %v11209_v45 = vpop.f32.mrf.mxu0 }
 0xd0f   : > { %v17351_v55 = vpop.f32.mrf.mxu0 }
 0xd11   : > { %v11212_v42 = vpop.f32.mrf.mxu0 }
 0xd13   : > { %v17353_v62 = vpop.f32.mrf.mxu0 }
 0xd15   : > { %v11215_v12 = vpop.f32.mrf.mxu0 }
 0xd17   : > { %v17355_v41 = vpop.f32.mrf.mxu0 }
 0xd19   : > { %v11218_v33 = vpop.f32.mrf.mxu0 }
 0xd1b   : > { %v17357_v6 = vpop.f32.mrf.mxu0 }
 0xd1d   : > { %v11221_v40 = vpop.f32.mrf.mxu0 }
 0xd1f   : > { %v17359_v50 = vpop.f32.mrf.mxu0 }
 0xd21   : > { %v11224_v47 = vpop.f32.mrf.mxu0 }
 0xd23   : > { %v17361_v29 = vpop.f32.mrf.mxu0 }
 0xd25   : > { %v11227_v13 = vpop.f32.mrf.mxu0 }
 0xd27   : > { %v17363_v36 = vpop.f32.mrf.mxu0 }
 0xd29   : > { %v11230_v46 = vpop.f32.mrf.mxu0 }
 0xd2b   : > { %v17365_v15 = vpop.f32.mrf.mxu0 }
 0xd2d   : > { %v11233_v10 = vpop.f32.mrf.mxu0 }
 0xd2f   : > { %v17367_v5 = vpop.f32.mrf.mxu0 }
 0xd31   : > { %v11236_v23 = vpop.f32.mrf.mxu0 }
 0xd33   : > { %v17369_v54 = vpop.f32.mrf.mxu0 }
 0xd34   : > { %7969 = vmatpush1.msra.mxu1 %v17369_v54  ;;  %8112 = vmatpush1.msra.mxu0 %v17369_v54 }
 0xd35   : > { %v11239_v57 = vpop.f32.mrf.mxu0  ;;  %7970 = vmatprep.subr.mxu1 %v17943_v14  ;;  %8113 = vmatprep.subr.mxu0 %v17943_v14 }
 0xd36   : > { %7971 = vmatpush1.msra.mxu1 %v17367_v5  ;;  %8114 = vmatpush1.msra.mxu0 %v17367_v5  ;;  %v9744_v57 = vld [vmem:[%s17895_s3 + $0xe00] sm:$0xff] }
 0xd37   : > { %v17377_v21 = vpop.f32.mrf.mxu0  ;;  %7972 = vmatprep.subr.mxu1 %v17943_v14  ;;  %8115 = vmatprep.subr.mxu0 %v17943_v14 }
 0xd38   : > { %7973 = vmatpush1.msra.mxu1 %v17365_v15  ;;  %8116 = vmatpush1.msra.mxu0 %v17365_v15 }
 0xd39   : > { %v11242_v39 = vpop.f32.mrf.mxu0  ;;  %7974 = vmatprep.subr.mxu1 %v17943_v14  ;;  %8117 = vmatprep.subr.mxu0 %v17943_v14 }
 0xd3a   : > { %7975 = vmatpush1.msra.mxu1 %v17363_v36  ;;  %8118 = vmatpush1.msra.mxu0 %v17363_v36  ;;  %v9766_v39 = vld [vmem:[%s17895_s3 + $0xe70] sm:$0xff] }
 0xd3b   : > { %v17387_v48 = vpop.f32.mrf.mxu0  ;;  %7976 = vmatprep.subr.mxu1 %v17943_v14  ;;  %8119 = vmatprep.subr.mxu0 %v17943_v14 }
 0xd3c   : > { %7977 = vmatpush1.msra.mxu1 %v17361_v29  ;;  %8120 = vmatpush1.msra.mxu0 %v17361_v29 }
 0xd3d   : > { %v11245_v1 = vpop.f32.mrf.mxu0  ;;  %7978 = vmatprep.subr.mxu1 %v17943_v14  ;;  %8121 = vmatprep.subr.mxu0 %v17943_v14 }
 0xd3e   : > { %7979 = vmatpush1.msra.mxu1 %v17359_v50  ;;  %8122 = vmatpush1.msra.mxu0 %v17359_v50  ;;  %v9747_v1 = vld [vmem:[%s17895_s3 + $0xe18] sm:$0xff] }
 0xd3f   : > { %v17397_v0 = vpop.f32.mrf.mxu0  ;;  %7980 = vmatprep.subr.mxu1 %v17943_v14  ;;  %8123 = vmatprep.subr.mxu0 %v17943_v14 }
 0xd40   : > { %7981 = vmatpush1.msra.mxu1 %v17357_v6  ;;  %8124 = vmatpush1.msra.mxu0 %v17357_v6 }
 0xd41   : > { %v11248_v59 = vpop.f32.mrf.mxu0  ;;  %7982 = vmatprep.subr.mxu1 %v17943_v14  ;;  %8125 = vmatprep.subr.mxu0 %v17943_v14 }
 0xd42   : > { %7983 = vmatpush1.msra.mxu1 %v17355_v41  ;;  %8126 = vmatpush1.msra.mxu0 %v17355_v41  ;;  %v9769_v59 = vld [vmem:[%s17895_s3 + $0xe88] sm:$0xff] }
 0xd43   : > { %v17407_v38 = vpop.f32.mrf.mxu0  ;;  %7984 = vmatprep.subr.mxu1 %v17943_v14  ;;  %8127 = vmatprep.subr.mxu0 %v17943_v14 }
 0xd44   : > { %7985 = vmatpush1.msra.mxu1 %v17353_v62  ;;  %8128 = vmatpush1.msra.mxu0 %v17353_v62 }
 0xd45   : > { %v11251_v30 = vpop.f32.mrf.mxu0  ;;  %7986 = vmatprep.subr.mxu1 %v17943_v14  ;;  %8129 = vmatprep.subr.mxu0 %v17943_v14 }
 0xd46   : > { %7987 = vmatpush1.msra.mxu1 %v17351_v55  ;;  %8130 = vmatpush1.msra.mxu0 %v17351_v55  ;;  %v9746_v30 = vld [vmem:[%s17895_s3 + $0xe10] sm:$0xff] }
 0xd47   : > { %v17417_v45 = vpop.f32.mrf.mxu0  ;;  %7988 = vmatprep.subr.mxu1 %v17943_v14  ;;  %8131 = vmatprep.subr.mxu0 %v17943_v14 }
 0xd48   : > { %7989 = vmatpush1.msra.mxu1 %v17349_v61  ;;  %8132 = vmatpush1.msra.mxu0 %v17349_v61 }
 0xd49   : > { %v11254_v42 = vpop.f32.mrf.mxu0  ;;  %7990 = vmatprep.subr.mxu1 %v17943_v14  ;;  %8133 = vmatprep.subr.mxu0 %v17943_v14 }
 0xd4a   : > { %7991 = vmatpush1.msra.mxu1 %v17347_v58  ;;  %8134 = vmatpush1.msra.mxu0 %v17347_v58  ;;  %v9768_v42 = vld [vmem:[%s17895_s3 + $0xe80] sm:$0xff] }
 0xd4b   : > { %v17427_v12 = vpop.f32.mrf.mxu0  ;;  %7992 = vmatprep.subr.mxu1 %v17943_v14  ;;  %8135 = vmatprep.subr.mxu0 %v17943_v14 }
 0xd4c   : > { %7993 = vmatpush1.msra.mxu1 %v17345_v53  ;;  %8136 = vmatpush1.msra.mxu0 %v17345_v53 }
 0xd4d   : > { %v11257_v33 = vpop.f32.mrf.mxu0  ;;  %7994 = vmatprep.subr.mxu1 %v17943_v14  ;;  %8137 = vmatprep.subr.mxu0 %v17943_v14 }
 0xd4e   : > { %7995 = vmatpush1.msra.mxu1 %v17343_v44  ;;  %8138 = vmatpush1.msra.mxu0 %v17343_v44  ;;  %v9771_v33 = vld [vmem:[%s17895_s3 + $0xe98] sm:$0xff] }
 0xd4f   : > { %v17437_v40 = vpop.f32.mrf.mxu0  ;;  %7996 = vmatprep.subr.mxu1 %v17943_v14  ;;  %8139 = vmatprep.subr.mxu0 %v17943_v14 }
 0xd50   : > { %7997 = vmatpush1.msra.mxu1 %v17341_v8  ;;  %8140 = vmatpush1.msra.mxu0 %v17341_v8 }
 0xd51   : > { %v11260_v47 = vpop.f32.mrf.mxu0  ;;  %7998 = vmatprep.subr.mxu1 %v17943_v14  ;;  %8141 = vmatprep.subr.mxu0 %v17943_v14 }
 0xd52   : > { %7999 = vmatpush1.msra.mxu1 %v17339_v2  ;;  %8142 = vmatpush1.msra.mxu0 %v17339_v2  ;;  %v9770_v47 = vld [vmem:[%s17895_s3 + $0xe90] sm:$0xff] }
 0xd53   : > { %v17447_v13 = vpop.f32.mrf.mxu0  ;;  %8014 = vmatprep.subr.mxu1 %v17943_v14  ;;  %8157 = vmatprep.subr.mxu0 %v17943_v14 }
 0xd55   : > { %v11263_v46 = vpop.f32.mrf.mxu0 }
 0xd56   : > { %v9773_v46 = vld [vmem:[%s17895_s3 + $0xea8] sm:$0xff] }
 0xd57   : > { %v17451_v10 = vpop.f32.mrf.mxu0 }
 0xd58   : > { %9758 = vmatpush2.msk.msra.mxu1 %vm2115_vm5, %v17451_v10  ;;  %9780 = vmatpush2.msk.msra.mxu0 %vm2115_vm5, %v17451_v10 }
 0xd59   : > { %v11266_v23 = vpop.f32.mrf.mxu0  ;;  %8016 = vmatprep.subr.mxu1 %v17943_v14  ;;  %8159 = vmatprep.subr.mxu0 %v17943_v14 }
 0xd5a   : > { %8017 = vmatpush2.msra.mxu1 %v17447_v13  ;;  %8160 = vmatpush2.msra.mxu0 %v17447_v13  ;;  %v9772_v23 = vld [vmem:[%s17895_s3 + $0xea0] sm:$0xff] }
 0xd5b   : > { %8018 = vmatprep.subr.mxu1 %v17943_v14  ;;  %8161 = vmatprep.subr.mxu0 %v17943_v14 }
 0xd5c   : > { %8019 = vmatpush2.msra.mxu1 %v17437_v40  ;;  %8162 = vmatpush2.msra.mxu0 %v17437_v40 }
 0xd5d   : > { %8020 = vmatprep.subr.mxu1 %v17943_v14  ;;  %8163 = vmatprep.subr.mxu0 %v17943_v14 }
 0xd5e   : > { %8021 = vmatpush2.msra.mxu1 %v17427_v12  ;;  %8164 = vmatpush2.msra.mxu0 %v17427_v12 }
 0xd5f   : > { %8022 = vmatprep.subr.mxu1 %v17943_v14  ;;  %8165 = vmatprep.subr.mxu0 %v17943_v14 }
 0xd60   : > { %8023 = vmatpush2.msra.mxu1 %v17417_v45  ;;  %8166 = vmatpush2.msra.mxu0 %v17417_v45 }
 0xd61   : > { %8024 = vmatprep.subr.mxu1 %v17943_v14  ;;  %8167 = vmatprep.subr.mxu0 %v17943_v14 }
 0xd62   : > { %8025 = vmatpush2.msra.mxu1 %v17407_v38  ;;  %8168 = vmatpush2.msra.mxu0 %v17407_v38 }
 0xd63   : > { %8026 = vmatprep.subr.mxu1 %v17943_v14  ;;  %8169 = vmatprep.subr.mxu0 %v17943_v14 }
 0xd64   : > { %8027 = vmatpush2.msra.mxu1 %v17397_v0  ;;  %8170 = vmatpush2.msra.mxu0 %v17397_v0 }
 0xd65   : > { %8028 = vmatprep.subr.mxu1 %v17943_v14  ;;  %8171 = vmatprep.subr.mxu0 %v17943_v14 }
 0xd66   : > { %8029 = vmatpush2.msra.mxu1 %v17387_v48  ;;  %8172 = vmatpush2.msra.mxu0 %v17387_v48 }
 0xd67   : > { %8030 = vmatprep.subr.mxu1 %v17943_v14  ;;  %8173 = vmatprep.subr.mxu0 %v17943_v14 }
 0xd68   : > { %8031 = vmatpush2.msra.mxu1 %v17377_v21  ;;  %8174 = vmatpush2.msra.mxu0 %v17377_v21 }
 0xd69   : > { %8033 = vmatmul.mubr.f32.vlgmr.msra.gmra.mxu1 %v9744_v57  ;;  %8176 = vmatmul.mubr.f32.vlgmr.msra.gmra.mxu0 %v9766_v39  ;;  %v9775_v57 = vld [vmem:[%s17895_s3 + $0xeb8] sm:$0xff]  ;;  %v9774_v39 = vld [vmem:[%s17895_s3 + $0xeb0] sm:$0xff] }
 0xd6a   : > { %8254 = vmatprep.subr.mxu1 %v17943_v14  ;;  %8397 = vmatprep.subr.mxu0 %v17943_v14 }
 0xd6b   : > { %8255 = vmatpush1.msra.mxu1 %v17369_v54  ;;  %8398 = vmatpush1.msra.mxu0 %v17369_v54  ;;  %v9749_v54 = vld [vmem:[%s17895_s3 + $0xe28] sm:$0xff] }
 0xd6c   : > { %8256 = vmatprep.subr.mxu1 %v17943_v14  ;;  %8399 = vmatprep.subr.mxu0 %v17943_v14 }
 0xd6d   : > { %9760 = vmatprep.mubr.msk.f32.mxu1 %vm2093_vm4, %v9747_v1  ;;  %9782 = vmatprep.mubr.msk.f32.mxu0 %vm2093_vm4, %v9769_v59  ;;  %v9777_v1 = vld [vmem:[%s17895_s3 + $0xec8] sm:$0xff]  ;;  %v9776_v59 = vld [vmem:[%s17895_s3 + $0xec0] sm:$0xff] }
 0xd6e   : > { %8257 = vmatpush1.msra.mxu1 %v17367_v5  ;;  %8400 = vmatpush1.msra.mxu0 %v17367_v5  ;;  %v9748_v5 = vld [vmem:[%s17895_s3 + $0xe20] sm:$0xff] }
 0xd6f   : > { %8038 = vmatmul.mubr.f32.gmra.mxu1 %v9746_v30  ;;  %8181 = vmatmul.mubr.f32.gmra.mxu0 %v9768_v42  ;;  %v9779_v30 = vld [vmem:[%s17895_s3 + $0xed8] sm:$0x1]  ;;  %v9778_v42 = vld [vmem:[%s17895_s3 + $0xed0] sm:$0x1] }
 0xd70   : > { %8258 = vmatprep.subr.mxu1 %v17943_v14  ;;  %8401 = vmatprep.subr.mxu0 %v17943_v14 }
 0xd71   : > { %8259 = vmatpush1.msra.mxu1 %v17365_v15  ;;  %8402 = vmatpush1.msra.mxu0 %v17365_v15  ;;  %v9751_v15 = vld [vmem:[%s17895_s3 + $0xe38] sm:$0xff] }
 0xd72   : > { %8260 = vmatprep.subr.mxu1 %v17943_v14  ;;  %8403 = vmatprep.subr.mxu0 %v17943_v14 }
 0xd73   : > { %9761 = vmatprep.mubr.msk.f32.mxu1 %vm2093_vm4, %v9749_v54  ;;  %9783 = vmatprep.mubr.msk.f32.mxu0 %vm2093_vm4, %v9771_v33  ;;  %v9797_v54 = vld [vmem:[%s17895_s3 + $0xf28] sm:$0xff]  ;;  %v9819_v33 = vld [vmem:[%s17895_s3 + $0xf98] sm:$0xff] }
 0xd74   : > { %8261 = vmatpush1.msra.mxu1 %v17363_v36  ;;  %8404 = vmatpush1.msra.mxu0 %v17363_v36  ;;  %v9750_v36 = vld [vmem:[%s17895_s3 + $0xe30] sm:$0xff] }
 0xd75   : > { %8043 = vmatmul.mubr.f32.gmra.mxu1 %v9748_v5  ;;  %8186 = vmatmul.mubr.f32.gmra.mxu0 %v9770_v47  ;;  %v9796_v5 = vld [vmem:[%s17895_s3 + $0xf20] sm:$0xff]  ;;  %v9818_v47 = vld [vmem:[%s17895_s3 + $0xf90] sm:$0xff] }
 0xd76   : > { %8262 = vmatprep.subr.mxu1 %v17943_v14  ;;  %8405 = vmatprep.subr.mxu0 %v17943_v14 }
 0xd77   : > { %8263 = vmatpush1.msra.mxu1 %v17361_v29  ;;  %8406 = vmatpush1.msra.mxu0 %v17361_v29  ;;  %v9753_v29 = vld [vmem:[%s17895_s3 + $0xe48] sm:$0xff] }
 0xd78   : > { %8264 = vmatprep.subr.mxu1 %v17943_v14  ;;  %8407 = vmatprep.subr.mxu0 %v17943_v14 }
 0xd79   : > { %9762 = vmatprep.mubr.msk.f32.mxu1 %vm2093_vm4, %v9751_v15  ;;  %9784 = vmatprep.mubr.msk.f32.mxu0 %vm2093_vm4, %v9773_v46  ;;  %v9799_v15 = vld [vmem:[%s17895_s3 + $0xf38] sm:$0xff]  ;;  %v9821_v46 = vld [vmem:[%s17895_s3 + $0xfa8] sm:$0xff] }
 0xd7a   : > { %8265 = vmatpush1.msra.mxu1 %v17359_v50  ;;  %8408 = vmatpush1.msra.mxu0 %v17359_v50  ;;  %v9752_v50 = vld [vmem:[%s17895_s3 + $0xe40] sm:$0xff] }
 0xd7b   : > { %8048 = vmatmul.mubr.f32.gmra.mxu1 %v9750_v36  ;;  %8191 = vmatmul.mubr.f32.gmra.mxu0 %v9772_v23  ;;  %v9798_v36 = vld [vmem:[%s17895_s3 + $0xf30] sm:$0xff]  ;;  %v9820_v23 = vld [vmem:[%s17895_s3 + $0xfa0] sm:$0xff] }
 0xd7c   : > { %8266 = vmatprep.subr.mxu1 %v17943_v14  ;;  %8409 = vmatprep.subr.mxu0 %v17943_v14 }
 0xd7d   : > { %8267 = vmatpush1.msra.mxu1 %v17357_v6  ;;  %8410 = vmatpush1.msra.mxu0 %v17357_v6  ;;  %v9755_v6 = vld [vmem:[%s17895_s3 + $0xe58] sm:$0xff] }
 0xd7e   : > { %8268 = vmatprep.subr.mxu1 %v17943_v14  ;;  %8411 = vmatprep.subr.mxu0 %v17943_v14 }
 0xd7f   : > { %9763 = vmatprep.mubr.msk.f32.mxu1 %vm2093_vm4, %v9753_v29  ;;  %9785 = vmatprep.mubr.msk.f32.mxu0 %vm2093_vm4, %v9775_v57  ;;  %v9801_v29 = vld [vmem:[%s17895_s3 + $0xf48] sm:$0x1]  ;;  %v9823_v57 = vld [vmem:[%s17895_s3 + $0xfb8] sm:$0x1] }
 0xd80   : > { %8269 = vmatpush1.msra.mxu1 %v17355_v41  ;;  %8412 = vmatpush1.msra.mxu0 %v17355_v41  ;;  %v9754_v41 = vld [vmem:[%s17895_s3 + $0xe50] sm:$0xff] }
 0xd81   : > { %8053 = vmatmul.mubr.f32.gmra.mxu1 %v9752_v50  ;;  %8196 = vmatmul.mubr.f32.gmra.mxu0 %v9774_v39  ;;  %v9800_v50 = vld [vmem:[%s17895_s3 + $0xf40] sm:$0x1]  ;;  %v9822_v39 = vld [vmem:[%s17895_s3 + $0xfb0] sm:$0x1] }
 0xd82   : > { %8270 = vmatprep.subr.mxu1 %v17943_v14  ;;  %8413 = vmatprep.subr.mxu0 %v17943_v14 }
 0xd83   : > { %8271 = vmatpush1.msra.mxu1 %v17353_v62  ;;  %8414 = vmatpush1.msra.mxu0 %v17353_v62  ;;  %v9757_v62 = vld [vmem:[%s17895_s3 + $0xe68] sm:$0x1] }
 0xd84   : > { %8272 = vmatprep.subr.mxu1 %v17943_v14  ;;  %8415 = vmatprep.subr.mxu0 %v17943_v14 }
 0xd85   : > { %9764 = vmatprep.mubr.msk.f32.mxu1 %vm2093_vm4, %v9755_v6  ;;  %9786 = vmatprep.mubr.msk.f32.mxu0 %vm2093_vm4, %v9777_v1 }
 0xd86   : > { %8273 = vmatpush1.msra.mxu1 %v17351_v55  ;;  %8416 = vmatpush1.msra.mxu0 %v17351_v55  ;;  %v9756_v55 = vld [vmem:[%s17895_s3 + $0xe60] sm:$0x1] }
 0xd87   : > { %8058 = vmatmul.mubr.f32.gmra.mxu1 %v9754_v41  ;;  %8201 = vmatmul.mubr.f32.gmra.mxu0 %v9776_v59 }
 0xd88   : > { %8274 = vmatprep.subr.mxu1 %v17943_v14  ;;  %8417 = vmatprep.subr.mxu0 %v17943_v14 }
 0xd89   : > { %8275 = vmatpush1.msra.mxu1 %v17349_v61  ;;  %8418 = vmatpush1.msra.mxu0 %v17349_v61  ;;  %v9790_v61 = vld [vmem:[%s17895_s3 + $0xef0] sm:$0xff] }
 0xd8a   : > { %8276 = vmatprep.subr.mxu1 %v17943_v14  ;;  %8419 = vmatprep.subr.mxu0 %v17943_v14 }
 0xd8b   : > { %9765 = vmatprep.mubr.msk.f32.mxu1 %vm2093_vm4, %v9757_v62  ;;  %9787 = vmatprep.mubr.msk.f32.mxu0 %vm2093_vm4, %v9779_v30 }
 0xd8c   : > { %8277 = vmatpush1.msra.mxu1 %v17347_v58  ;;  %8420 = vmatpush1.msra.mxu0 %v17347_v58  ;;  %v9791_v58 = vld [vmem:[%s17895_s3 + $0xef8] sm:$0xff] }
 0xd8d   : > { %8063 = vmatmul.mubr.f32.gmra.mxu1 %v9756_v55  ;;  %8206 = vmatmul.mubr.f32.gmra.mxu0 %v9778_v42 }
 0xd8e   : > { %8278 = vmatprep.subr.mxu1 %v17943_v14  ;;  %8421 = vmatprep.subr.mxu0 %v17943_v14 }
 0xd8f   : > { %8279 = vmatpush1.msra.mxu1 %v17345_v53  ;;  %8422 = vmatpush1.msra.mxu0 %v17345_v53  ;;  %v9810_v53 = vld [vmem:[%s17895_s3 + $0xf50] sm:$0xff] }
 0xd90   : > { %8280 = vmatprep.subr.mxu1 %v17943_v14  ;;  %8423 = vmatprep.subr.mxu0 %v17943_v14 }
 0xd91   : > { %8281 = vmatpush1.msra.mxu1 %v17343_v44  ;;  %8424 = vmatpush1.msra.mxu0 %v17343_v44  ;;  %v9788_v44 = vld [vmem:[%s17895_s3 + $0xee0] sm:$0xff] }
 0xd92   : > { %8282 = vmatprep.subr.mxu1 %v17943_v14  ;;  %8425 = vmatprep.subr.mxu0 %v17943_v14 }
 0xd93   : > { %8283 = vmatpush1.msra.mxu1 %v17341_v8  ;;  %8426 = vmatpush1.msra.mxu0 %v17341_v8  ;;  %v9811_v8 = vld [vmem:[%s17895_s3 + $0xf58] sm:$0xff] }
 0xd94   : > { %8284 = vmatprep.subr.mxu1 %v17943_v14  ;;  %8427 = vmatprep.subr.mxu0 %v17943_v14 }
 0xd95   : > { %8285 = vmatpush1.msra.mxu1 %v17339_v2  ;;  %8428 = vmatpush1.msra.mxu0 %v17339_v2  ;;  %v9789_v2 = vld [vmem:[%s17895_s3 + $0xee8] sm:$0xff] }
 0xd96   : > { %8300 = vmatprep.subr.mxu1 %v17943_v14  ;;  %8443 = vmatprep.subr.mxu0 %v17943_v14 }
 0xd97   : > { %9802 = vmatpush2.msk.msra.mxu1 %vm2115_vm5, %v17451_v10  ;;  %9824 = vmatpush2.msk.msra.mxu0 %vm2115_vm5, %v17451_v10  ;;  %v9816_v10 = vld [vmem:[%s17895_s3 + $0xf80] sm:$0xff] }
 0xd98   : > { %8302 = vmatprep.subr.mxu1 %v17943_v14  ;;  %8445 = vmatprep.subr.mxu0 %v17943_v14 }
 0xd99   : > { %8303 = vmatpush2.msra.mxu1 %v17447_v13  ;;  %8446 = vmatpush2.msra.mxu0 %v17447_v13  ;;  %v9794_v13 = vld [vmem:[%s17895_s3 + $0xf10] sm:$0xff] }
 0xd9a   : > { %8304 = vmatprep.subr.mxu1 %v17943_v14  ;;  %8447 = vmatprep.subr.mxu0 %v17943_v14 }
 0xd9b   : > { %8305 = vmatpush2.msra.mxu1 %v17437_v40  ;;  %8448 = vmatpush2.msra.mxu0 %v17437_v40  ;;  %v9817_v40 = vld [vmem:[%s17895_s3 + $0xf88] sm:$0xff] }
 0xd9c   : > { %8306 = vmatprep.subr.mxu1 %v17943_v14  ;;  %8449 = vmatprep.subr.mxu0 %v17943_v14 }
 0xd9d   : > { %8307 = vmatpush2.msra.mxu1 %v17427_v12  ;;  %8450 = vmatpush2.msra.mxu0 %v17427_v12  ;;  %v9795_v12 = vld [vmem:[%s17895_s3 + $0xf18] sm:$0xff] }
 0xd9e   : > { %8308 = vmatprep.subr.mxu1 %v17943_v14  ;;  %8451 = vmatprep.subr.mxu0 %v17943_v14 }
 0xd9f   : > { %8309 = vmatpush2.msra.mxu1 %v17417_v45  ;;  %8452 = vmatpush2.msra.mxu0 %v17417_v45  ;;  %v9814_v45 = vld [vmem:[%s17895_s3 + $0xf70] sm:$0xff] }
 0xda0   : > { %8310 = vmatprep.subr.mxu1 %v17943_v14  ;;  %8453 = vmatprep.subr.mxu0 %v17943_v14 }
 0xda1   : > { %8311 = vmatpush2.msra.mxu1 %v17407_v38  ;;  %8454 = vmatpush2.msra.mxu0 %v17407_v38  ;;  %v9792_v38 = vld [vmem:[%s17895_s3 + $0xf00] sm:$0xff] }
 0xda2   : > { %8312 = vmatprep.subr.mxu1 %v17943_v14  ;;  %8455 = vmatprep.subr.mxu0 %v17943_v14 }
 0xda3   : > { %8313 = vmatpush2.msra.mxu1 %v17397_v0  ;;  %8456 = vmatpush2.msra.mxu0 %v17397_v0  ;;  %v9815_v0 = vld [vmem:[%s17895_s3 + $0xf78] sm:$0xff] }
 0xda4   : > { %8314 = vmatprep.subr.mxu1 %v17943_v14  ;;  %8457 = vmatprep.subr.mxu0 %v17943_v14 }
 0xda5   : > { %8315 = vmatpush2.msra.mxu1 %v17387_v48  ;;  %8458 = vmatpush2.msra.mxu0 %v17387_v48  ;;  %v9812_v48 = vld [vmem:[%s17895_s3 + $0xf60] sm:$0xff] }
 0xda6   : > { %8316 = vmatprep.subr.mxu1 %v17943_v14  ;;  %8459 = vmatprep.subr.mxu0 %v17943_v14  ;;  %v9813_v14 = vld [vmem:[%s17895_s3 + $0xf68] sm:$0xff] }
 0xda7   : > { %8317 = vmatpush2.msra.mxu1 %v17377_v21  ;;  %9803 = vmatprep.mubr.msk.f32.mxu1 %vm2093_vm4, %v9789_v2 }
 0xda8   : > { %8460 = vmatpush2.msra.mxu0 %v17377_v21  ;;  %9825 = vmatprep.mubr.msk.f32.mxu0 %vm2093_vm4, %v9811_v8  ;;  %v9793_v21 = vld [vmem:[%s17895_s3 + $0xf08] sm:$0xff] }
 0xda9   : > { %8319 = vmatmul.mubr.f32.vlgmr.msra.gmra.mxu1 %v9788_v44  ;;  %8462 = vmatmul.mubr.f32.vlgmr.msra.gmra.mxu0 %v9810_v53 }
 0xdaa   : > { %9804 = vmatprep.mubr.msk.f32.mxu1 %vm2093_vm4, %v9791_v58  ;;  %9826 = vmatprep.mubr.msk.f32.mxu0 %vm2093_vm4, %v9813_v14 }
 0xdad   : > { %8324 = vmatmul.mubr.f32.gmra.mxu1 %v9790_v61  ;;  %8467 = vmatmul.mubr.f32.gmra.mxu0 %v9812_v48 }
 0xdae   : > { %9805 = vmatprep.mubr.msk.f32.mxu1 %vm2093_vm4, %v9793_v21  ;;  %9827 = vmatprep.mubr.msk.f32.mxu0 %vm2093_vm4, %v9815_v0 }
 0xdb1   : > { %8329 = vmatmul.mubr.f32.gmra.mxu1 %v9792_v38  ;;  %8472 = vmatmul.mubr.f32.gmra.mxu0 %v9814_v45 }
 0xdb2   : > { %9806 = vmatprep.mubr.msk.f32.mxu1 %vm2093_vm4, %v9795_v12  ;;  %9828 = vmatprep.mubr.msk.f32.mxu0 %vm2093_vm4, %v9817_v40 }
 0xdb5   : > { %8334 = vmatmul.mubr.f32.gmra.mxu1 %v9794_v13  ;;  %8477 = vmatmul.mubr.f32.gmra.mxu0 %v9816_v10 }
 0xdb6   : > { %9807 = vmatprep.mubr.msk.f32.mxu1 %vm2093_vm4, %v9797_v54  ;;  %9829 = vmatprep.mubr.msk.f32.mxu0 %vm2093_vm4, %v9819_v33 }
 0xdb9   : > { %8339 = vmatmul.mubr.f32.gmra.mxu1 %v9796_v5  ;;  %8482 = vmatmul.mubr.f32.gmra.mxu0 %v9818_v47 }
 0xdba   : > { %9808 = vmatprep.mubr.msk.f32.mxu1 %vm2093_vm4, %v9799_v15  ;;  %9830 = vmatprep.mubr.msk.f32.mxu0 %vm2093_vm4, %v9821_v46 }
 0xdbd   : > { %8344 = vmatmul.mubr.f32.gmra.mxu1 %v9798_v36  ;;  %8487 = vmatmul.mubr.f32.gmra.mxu0 %v9820_v23 }
 0xdbe   : > { %9809 = vmatprep.mubr.msk.f32.mxu1 %vm2093_vm4, %v9801_v29  ;;  %9831 = vmatprep.mubr.msk.f32.mxu0 %vm2093_vm4, %v9823_v57 }
 0xdc1   : > { %8349 = vmatmul.mubr.f32.gmra.mxu1 %v9800_v50  ;;  %8492 = vmatmul.mubr.f32.gmra.mxu0 %v9822_v39 }
 0xe29   : > { %v8034_v6 = vpop.f32.mrf.mxu1  ;;  %v8177_v1 = vpop.f32.mrf.mxu0 }
 0xe2a   : > { %v8068_v41 = vadd.f32 %v8034_v6, %v17248_v43  ;;  %v8211_v59 = vadd.f32 %v8177_v1, %v17251_v7 }
 0xe2b   : > { %v8036_v62 = vpop.f32.mrf.mxu1  ;;  %v8179_v30 = vpop.f32.mrf.mxu0 }
 0xe2c   : > { %v8504_v55 = vmax.f32 %v8068_v41, %v8211_v59 }
 0xe2f   : > { %v8039_v42 = vpop.f32.mrf.mxu1  ;;  %v8182_v2 = vpop.f32.mrf.mxu0 }
 0xe30   : > { %v17782_v8 = vadd.f32 %v8039_v42, %v17254_v11  ;;  %v17785_v44 = vadd.f32 %v8182_v2, %v17257_v63 }
 0xe31   : > { %v8041_v53 = vpop.f32.mrf.mxu1  ;;  %v8184_v58 = vpop.f32.mrf.mxu0 }
 0xe32   : > { %v8505_v14 = vmax.f32 %v17782_v8, %v17785_v44 }
 0xe35   : > { %v8044_v61 = vpop.f32.mrf.mxu1  ;;  %v8187_v43 = vpop.f32.mrf.mxu0 }
 0xe36   : > { %v17790_v7 = vadd.f32 %v8044_v61, %v17260_v22  ;;  %v17793_v48 = vadd.f32 %v8187_v43, %v17263_v49 }
 0xe37   : > { %v8046_v21 = vpop.f32.mrf.mxu1  ;;  %v8189_v0 = vpop.f32.mrf.mxu0 }
 0xe38   : > { %v8506_v11 = vmax.f32 %v17790_v7, %v17793_v48 }
 0xe3b   : > { %v8049_v63 = vpop.f32.mrf.mxu1  ;;  %v8192_v38 = vpop.f32.mrf.mxu0 }
 0xe3c   : > { %v17798_v45 = vadd.f32 %v8049_v63, %v17266_v20  ;;  %v17801_v12 = vadd.f32 %v8192_v38, %v17269_v28 }
 0xe3d   : > { %v8051_v40 = vpop.f32.mrf.mxu1  ;;  %v8194_v13 = vpop.f32.mrf.mxu0 }
 0xe3e   : > { %v8507_v22 = vmax.f32 %v17798_v45, %v17801_v12 }
 0xe41   : > { %v8054_v49 = vpop.f32.mrf.mxu1  ;;  %v8197_v10 = vpop.f32.mrf.mxu0 }
 0xe42   : > { %v17806_v54 = vadd.f32 %v8054_v49, %v17272_v37  ;;  %v17809_v33 = vadd.f32 %v8197_v10, %v17275_v9 }
 0xe43   : > { %v8056_v5 = vpop.f32.mrf.mxu1  ;;  %v8199_v47 = vpop.f32.mrf.mxu0 }
 0xe44   : > { %v8508_v20 = vmax.f32 %v17806_v54, %v17809_v33 }
 0xe47   : > { %v8059_v28 = vpop.f32.mrf.mxu1  ;;  %v8202_v15 = vpop.f32.mrf.mxu0 }
 0xe48   : > { %v17814_v46 = vadd.f32 %v8059_v28, %v17278_v31  ;;  %v17817_v36 = vadd.f32 %v8202_v15, %v17281_v34 }
 0xe49   : > { %v8061_v23 = vpop.f32.mrf.mxu1  ;;  %v8204_v29 = vpop.f32.mrf.mxu0 }
 0xe4a   : > { %v8509_v37 = vmax.f32 %v17814_v46, %v17817_v36 }
 0xe4d   : > { %v8064_v9 = vpop.f32.mrf.mxu1  ;;  %v8207_v57 = vpop.f32.mrf.mxu0 }
 0xe4e   : > { %v17822_v50 = vadd.f32 %v8064_v9, %v17284_v32  ;;  %v17825_v39 = vadd.f32 %v8207_v57, %v17287_v3  ;;  %v17835_v32 = vld [vmem:[%s17897_s5] ss:$0 sm:$0xff] }
 0xe4f   : > { %v8066_v6 = vpop.f32.mrf.mxu1  ;;  %v8209_v31 = vpop.f32.mrf.mxu0 }
 0xe50   : > { %v8510_v34 = vmax.f32 %v17822_v50, %v17825_v39 }
 0xe69   : > { %v8320_v1 = vpop.f32.mrf.mxu1  ;;  %v8463_v41 = vpop.f32.mrf.mxu0 }
 0xe6a   : > { %v8354_v59 = vadd.f32 %v8320_v1, %v17290_v16  ;;  %v8497_v62 = vadd.f32 %v8463_v41, %v17293_v51 }
 0xe6b   : > { %v8322_v30 = vpop.f32.mrf.mxu1  ;;  %v8465_v42 = vpop.f32.mrf.mxu0 }
 0xe6c   : > { %v8511_v2 = vmax.f32 %v8354_v59, %v8497_v62 }
 0xe6d   : > { %v8325_v3 = vpop.f32.mrf.mxu1  ;;  %v8468_v8 = vpop.f32.mrf.mxu0 }
 0xe6e   : > { %v8518_v44 = vmax.f32 %v8504_v55, %v8511_v2  ;;  %v8355_v53 = vadd.f32 %v8325_v3, %v17296_v19  ;;  %v8498_v58 = vadd.f32 %v8468_v8, %v17299_v18 }
 0xe6f   : > { %v8327_v61 = vpop.f32.mrf.mxu1  ;;  %v8470_v16 = vpop.f32.mrf.mxu0 }
 0xe70   : > { %v8532_v51 = vadd.f32 %v17835_v32, %v8518_v44  ;;  %v8512_v43 = vmax.f32 %v8355_v53, %v8498_v58 }
 0xe71   : > { %v8330_v21 = vpop.f32.mrf.mxu1  ;;  %v8473_v0 = vpop.f32.mrf.mxu0 }
 0xe72   : > { %v8539_v63 = vmax.f32 %v8532_v51, 0.0  ;;  %v8519_v55 = vmax.f32 %v8505_v14, %v8512_v43  ;;  %v8356_v19 = vadd.f32 %v8330_v21, %v17302_v24  ;;  %v8499_v18 = vadd.f32 %v8473_v0, %v17305_v27 }
 0xe73   : > { %v8332_v38 = vpop.f32.mrf.mxu1  ;;  %v8475_v40 = vpop.f32.mrf.mxu0 }
 0xe74   : > { %8547 = vst.msk [vmem:[%s17843_s22] sm:$0xff] %vm8546_vm6, %v8539_v63  ;;  %v8533_v13 = vadd.f32 %v17835_v32, %v8519_v55  ;;  %v8513_v49 = vmax.f32 %v8356_v19, %v8499_v18 }
 0xe75   : > { %v8335_v10 = vpop.f32.mrf.mxu1  ;;  %v8478_v5 = vpop.f32.mrf.mxu0 }
 0xe76   : > { %v8540_v47 = vmax.f32 %v8533_v13, 0.0  ;;  %v8520_v28 = vmax.f32 %v8506_v11, %v8513_v49  ;;  %v8357_v14 = vadd.f32 %v8335_v10, %v17314_v25  ;;  %v8500_v24 = vadd.f32 %v8478_v5, %v17317_v4 }
 0xe77   : > { %v8337_v27 = vpop.f32.mrf.mxu1  ;;  %v8480_v15 = vpop.f32.mrf.mxu0 }
 0xe78   : > { %8548 = vst.msk [vmem:[%s17843_s22 + $0x8] sm:$0xff] %vm8546_vm6, %v8540_v47  ;;  %v8534_v23 = vadd.f32 %v17835_v32, %v8520_v28  ;;  %v8514_v29 = vmax.f32 %v8357_v14, %v8500_v24 }
 0xe79   : > { %v8340_v9 = vpop.f32.mrf.mxu1  ;;  %v8483_v57 = vpop.f32.mrf.mxu0 }
 0xe7a   : > { %v8541_v6 = vmax.f32 %v8534_v23, 0.0  ;;  %v8521_v7 = vmax.f32 %v8507_v22, %v8514_v29  ;;  %v8358_v48 = vadd.f32 %v8340_v9, %v17322_v17  ;;  %v8501_v25 = vadd.f32 %v8483_v57, %v17325_v56 }
 0xe7b   : > { %v8342_v4 = vpop.f32.mrf.mxu1  ;;  %v8485_v11 = vpop.f32.mrf.mxu0 }
 0xe7c   : > { %8549 = vst.msk [vmem:[%s17843_s22 + $0x10] sm:$0xff] %vm8546_vm6, %v8541_v6  ;;  %v8535_v31 = vadd.f32 %v17835_v32, %v8521_v7  ;;  %v8515_v1 = vmax.f32 %v8358_v48, %v8501_v25 }
 0xe7d   : > { %v8345_v41 = vpop.f32.mrf.mxu1  ;;  %v8488_v59 = vpop.f32.mrf.mxu0 }
 0xe7e   : > { %v8542_v62 = vmax.f32 %v8535_v31, 0.0  ;;  %v8522_v45 = vmax.f32 %v8508_v20, %v8515_v1  ;;  %v8359_v12 = vadd.f32 %v8345_v41, %v17328_v26  ;;  %v8502_v17 = vadd.f32 %v8488_v59, %v17331_v35 }
 0xe7f   : > { %v8347_v56 = vpop.f32.mrf.mxu1  ;;  %v8490_v22 = vpop.f32.mrf.mxu0 }
 0xe80   : > { %8550 = vst.msk [vmem:[%s17843_s22 + $0x18] sm:$0xff] %vm8546_vm6, %v8542_v62  ;;  %v8536_v30 = vadd.f32 %v17835_v32, %v8522_v45  ;;  %v8516_v42 = vmax.f32 %v8359_v12, %v8502_v17 }
 0xe81   : > { %v8350_v2 = vpop.f32.mrf.mxu1  ;;  %v8493_v3 = vpop.f32.mrf.mxu0 }
 0xe82   : > { %v8543_v8 = vmax.f32 %v8536_v30, 0.0  ;;  %v8523_v54 = vmax.f32 %v8509_v37, %v8516_v42  ;;  %v8360_v26 = vadd.f32 %v8350_v2, %v17334_v60  ;;  %v8503_v35 = vadd.f32 %v8493_v3, %v17337_v52 }
 0xe83   : > { %v8352_v33 = vpop.f32.mrf.mxu1  ;;  %v8495_v20 = vpop.f32.mrf.mxu0 }
 0xe84   : > { %8551 = vst.msk [vmem:[%s17843_s22 + $0x20] sm:$0xff] %vm8546_vm6, %v8543_v8  ;;  %v8537_v44 = vadd.f32 %v17835_v32, %v8523_v54  ;;  %v8517_v53 = vmax.f32 %v8360_v26, %v8503_v35 }
 0xe86   : > { %v8544_v58 = vmax.f32 %v8537_v44, 0.0  ;;  %v8524_v61 = vmax.f32 %v8510_v34, %v8517_v53 }
 0xe88   : > { %8552 = vst.msk [vmem:[%s17843_s22 + $0x28] sm:$0xff] %vm8546_vm6, %v8544_v58  ;;  %v8538_v46 = vadd.f32 %v17835_v32, %v8524_v61 }
 0xe8a   : > { %v8545_v60 = vmax.f32 %v8538_v46, 0.0 }
 0xe8c   : > { %8554 = vst.msk [vmem:[%s17843_s22 + $0x30] sm:$0x1] %vm8553_vm7, %v8545_v60 }
 0xe8d PF: > { %s16_s21 = sadd.s32 1, %s11289_s21  }
 0xe8e   : > { %p13_p4 = scmp.ge.s32.totalorder %s16_s21, 4  }
 0xe90   :  { %15 = sbr.rel (!%p13_p4) target bundleno = 1 (0x1), region = 120 }

</bundles_post_ra>
